<compile_context>
chip_gen: v5e
topology: v5e:2x2
jax: 0.10.0
libtpu: 0.0.40
codegen_flags: <defaults>
</compile_context>

<pallas_src>
import jax
import jax.numpy as jnp
from jax.experimental import pallas as pl
from jax.experimental.pallas import tpu as pltpu


def _embedding_kernel(ids_ref, mask_ref, pos_ref, item_hbm, out_ref, sem):
    # ids_ref:  SMEM (B_pad*L,) int32   -- flattened item ids (scalar prefetch)
    # mask_ref: VMEM (K, L, 1) int32    -- keep flag (0 => zero the output row)
    # pos_ref:  VMEM (L, H) float32     -- positional rows 0..L-1 (resident block)
    # item_hbm: HBM  (V, H) float32     -- full item embedding table (never in VMEM)
    # out_ref:  VMEM (K, L, H) float32  -- output tile; gathered rows land here directly
    # sem:      DMA semaphore pair (one slot per in-flight chunk)
    K, L, H = out_ref.shape
    base = pl.program_id(0) * (K * L)
    scale = float(H) ** 0.5

    def issue_chunk(k):
        # One small DMA per token of batch-row k: item_table[ids[...]] -> out_ref[k, l].
        # Fully static issue (k, l are Python ints); all L copies signal sem[k % 2].
        for l in range(L):
            row = ids_ref[base + k * L + l]
            pltpu.make_async_copy(item_hbm.at[row], out_ref.at[k, l],
                                  sem.at[k % 2]).start()

    def drain_chunk(k):
        # Single wait per chunk: DMA semaphores count bytes, so one (L, H)
        # descriptor (same dtype as the issued row copies) covers all L copies.
        pltpu.make_async_copy(item_hbm.at[pl.ds(0, L)], out_ref.at[k],
                              sem.at[k % 2]).wait()

    def compute_chunk(k):
        keep = (mask_ref[k] != 0).astype(jnp.float32)             # (L, 1)
        # In-place: scale gathered rows, add positional rows, zero masked tokens.
        out_ref[k] = (out_ref[k] * scale + pos_ref[...]) * keep   # lane-dense (L, H) store

    # Software pipeline over chunks: prime chunk 0, then overlap chunk k+1's
    # gathers with chunk k's drain + compute.
    issue_chunk(0)
    for k in range(K):              # K is a small static Python int
        if k + 1 < K:
            issue_chunk(k + 1)
        drain_chunk(k)
        compute_chunk(k)


def embedding_layer_forward(seq, mask, item_table, posi_table, *, target_tile_tokens=512):
    """seq, mask: (B, L) int; item_table: (V, H); posi_table: (max_len, H)."""
    B, L = seq.shape
    V, H = item_table.shape
    assert L <= posi_table.shape[0]
    # The per-chunk drain descriptor slices the first L table rows (byte count only).
    assert V >= L, "item_num must be >= seq_len for the aggregate drain descriptor"

    # Batch rows per grid step: aim for ~target_tile_tokens tokens per step to
    # amortize per-step overhead, but keep the grid length >= 2 so both v7x
    # TensorCores get work under dimension_semantics=("parallel",).
    K = max(1, -(-target_tile_tokens // L))
    K = min(K, B)
    if B >= 2:
        K = max(1, min(K, B // 2))

    Bp = -(-B // K) * K                      # pad batch to a multiple of K
    if Bp != B:
        pad = Bp - B
        seq = jnp.concatenate([seq, jnp.zeros((pad, L), seq.dtype)], axis=0)
        mask = jnp.concatenate([mask, jnp.zeros((pad, L), mask.dtype)], axis=0)

    ids_flat = seq.reshape(-1).astype(jnp.int32)            # -> SMEM via scalar prefetch
    mask3 = mask.astype(jnp.int32).reshape(Bp, L, 1)
    posi_sl = posi_table[:L]                                 # only the L needed rows

    grid = (Bp // K,)

    out = pl.pallas_call(
        _embedding_kernel,
        out_shape=jax.ShapeDtypeStruct((Bp, L, H), jnp.float32),
        grid_spec=pltpu.PrefetchScalarGridSpec(
            num_scalar_prefetch=1,
            grid=grid,
            in_specs=[
                pl.BlockSpec((K, L, 1), lambda g, ids: (g, 0, 0)),   # mask tile
                pl.BlockSpec((L, H), lambda g, ids: (0, 0)),         # positional rows (resident)
                pl.BlockSpec(memory_space=pl.ANY),                   # item table stays in HBM
            ],
            out_specs=pl.BlockSpec((K, L, H), lambda g, ids: (g, 0, 0)),
            scratch_shapes=[
                pltpu.SemaphoreType.DMA((2,)),                       # double-buffered chunk sems
            ],
        ),
        compiler_params=pltpu.CompilerParams(
            dimension_semantics=("parallel",)),
    )(ids_flat, mask3, posi_sl, item_table)

    return out if Bp == B else out[:B]


if __name__ == "__main__":
    # Small but representative shapes: H = 128 keeps stores lane-dense.
    # With B=4, L=64 the wrapper picks K=2 rows/step -> grid of 2 parallel steps,
    # each step pipelining 2 chunks of 64 row-gather DMAs against compute.
    batch, seq_len, hidden_dim = 4, 64, 128
    item_num, max_len = 512, 64

    key = jax.random.PRNGKey(0)
    k_item, k_posi, k_seq, k_mask = jax.random.split(key, 4)

    # nn.Embedding default init ~ N(0, 1), deterministic here.
    item_table = jax.random.normal(k_item, (item_num, hidden_dim), dtype=jnp.float32)
    posi_table = jax.random.normal(k_posi, (max_len, hidden_dim), dtype=jnp.float32)

    seq = jax.random.randint(k_seq, (batch, seq_len), 0, item_num, dtype=jnp.int32)
    mask = jax.random.bernoulli(k_mask, 0.7, (batch, seq_len)).astype(jnp.int32)

    out = embedding_layer_forward(seq, mask, item_table, posi_table)
    out = jax.block_until_ready(out)

    # Pure-JAX reference (dropout = identity in eval mode).
    ref = item_table[seq] * (hidden_dim ** 0.5) + posi_table[jnp.arange(seq_len)][None, :, :]
    ref = jnp.where(mask[:, :, None] == 0, 0.0, ref)
    assert out.shape == (batch, seq_len, hidden_dim)
    assert jnp.allclose(out, ref, atol=1e-5, rtol=1e-5)

    print("KERNEL_OK")
</pallas_src>

<mosaic_0001>
module attributes {stable_mosaic.version = 11 : i64} {
  func.func @_embedding_kernel(%arg0: i32, %arg1: memref<256xi32, #tpu.memory_space<smem>>, %arg2: memref<2x64x1xi32, #tpu.memory_space<vmem>>, %arg3: memref<64x128xf32, #tpu.memory_space<vmem>>, %arg4: memref<512x128xf32, #tpu.memory_space<any>>, %arg5: memref<2x64x128xf32, #tpu.memory_space<vmem>>, %arg6: memref<2x!tpu.dma_semaphore, #tpu.memory_space<semaphore_mem>>) attributes {dimension_semantics = [#tpu.dimension_semantics<parallel>], iteration_bounds = array<i64: 2>, scalar_prefetch = 1 : i64, scratch_operands = 1 : i64, tpu.core_type = #tpu.core_type<tc>, window_params = [{transform_indices = @transform_0, window_bounds = array<i64: 2, 64, 1>}, {pipeline_mode = #tpu.pipeline_mode<synchronous>, transform_indices = @transform_1, window_bounds = array<i64: 64, 128>}, {}, {transform_indices = @transform_3, window_bounds = array<i64: 2, 64, 128>}]} {
    %c128_i32 = arith.constant 128 : i32
    %0 = arith.muli %arg0, %c128_i32 : i32
    %c0_i32 = arith.constant 0 : i32
    %1 = arith.addi %0, %c0_i32 : i32
    %c0_i32_0 = arith.constant 0 : i32
    %2 = arith.addi %1, %c0_i32_0 : i32
    %3 = arith.index_cast %2 : i32 to index
    %4 = memref.load %arg1[%3] : memref<256xi32, #tpu.memory_space<smem>>
    %c0_i32_1 = arith.constant 0 : i32
    %c0_i32_2 = arith.constant 0 : i32
    %c0_i32_3 = arith.constant 0 : i32
    %c0_i32_4 = arith.constant 0 : i32
    %5 = tpu.memref_slice %arg4[%4, %c0_i32_4] : memref<512x128xf32, #tpu.memory_space<any>> -> memref<1x128xf32, #tpu.memory_space<any>>
    %6 = tpu.memref_squeeze %5 : memref<1x128xf32, #tpu.memory_space<any>> -> memref<128xf32, #tpu.memory_space<any>>
    %c0_i32_5 = arith.constant 0 : i32
    %7 = tpu.memref_slice %arg5[%c0_i32_1, %c0_i32_2, %c0_i32_5] : memref<2x64x128xf32, #tpu.memory_space<vmem>> -> memref<1x1x128xf32, #tpu.memory_space<vmem>>
    %8 = tpu.memref_squeeze %7 : memref<1x1x128xf32, #tpu.memory_space<vmem>> -> memref<128xf32, #tpu.memory_space<vmem>>
    %9 = tpu.memref_slice %arg6[%c0_i32_3] : memref<2x!tpu.dma_semaphore, #tpu.memory_space<semaphore_mem>> -> memref<1x!tpu.dma_semaphore, #tpu.memory_space<semaphore_mem>>
    %10 = tpu.memref_squeeze %9 : memref<1x!tpu.dma_semaphore, #tpu.memory_space<semaphore_mem>> -> memref<!tpu.dma_semaphore, #tpu.memory_space<semaphore_mem>>
    tpu.enqueue_dma source(%6 : memref<128xf32, #tpu.memory_space<any>>) target(%8 : memref<128xf32, #tpu.memory_space<vmem>>) target_semaphore(%10 : memref<!tpu.dma_semaphore, #tpu.memory_space<semaphore_mem>>)
    %c0_i32_6 = arith.constant 0 : i32
    %11 = arith.addi %0, %c0_i32_6 : i32
    %c1_i32 = arith.constant 1 : i32
    %12 = arith.addi %11, %c1_i32 : i32
    %13 = arith.index_cast %12 : i32 to index
    %14 = memref.load %arg1[%13] : memref<256xi32, #tpu.memory_space<smem>>
    %c0_i32_7 = arith.constant 0 : i32
    %c1_i32_8 = arith.constant 1 : i32
    %c0_i32_9 = arith.constant 0 : i32
    %c0_i32_10 = arith.constant 0 : i32
    %15 = tpu.memref_slice %arg4[%14, %c0_i32_10] : memref<512x128xf32, #tpu.memory_space<any>> -> memref<1x128xf32, #tpu.memory_space<any>>
    %16 = tpu.memref_squeeze %15 : memref<1x128xf32, #tpu.memory_space<any>> -> memref<128xf32, #tpu.memory_space<any>>
    %c0_i32_11 = arith.constant 0 : i32
    %17 = tpu.memref_slice %arg5[%c0_i32_7, %c1_i32_8, %c0_i32_11] : memref<2x64x128xf32, #tpu.memory_space<vmem>> -> memref<1x1x128xf32, #tpu.memory_space<vmem>>
    %18 = tpu.memref_squeeze %17 : memref<1x1x128xf32, #tpu.memory_space<vmem>> -> memref<128xf32, #tpu.memory_space<vmem>>
    %19 = tpu.memref_slice %arg6[%c0_i32_9] : memref<2x!tpu.dma_semaphore, #tpu.memory_space<semaphore_mem>> -> memref<1x!tpu.dma_semaphore, #tpu.memory_space<semaphore_mem>>
    %20 = tpu.memref_squeeze %19 : memref<1x!tpu.dma_semaphore, #tpu.memory_space<semaphore_mem>> -> memref<!tpu.dma_semaphore, #tpu.memory_space<semaphore_mem>>
    tpu.enqueue_dma source(%16 : memref<128xf32, #tpu.memory_space<any>>) target(%18 : memref<128xf32, #tpu.memory_space<vmem>>) target_semaphore(%20 : memref<!tpu.dma_semaphore, #tpu.memory_space<semaphore_mem>>)
    %c0_i32_12 = arith.constant 0 : i32
    %21 = arith.addi %0, %c0_i32_12 : i32
    %c2_i32 = arith.constant 2 : i32
    %22 = arith.addi %21, %c2_i32 : i32
    %23 = arith.index_cast %22 : i32 to index
    %24 = memref.load %arg1[%23] : memref<256xi32, #tpu.memory_space<smem>>
    %c0_i32_13 = arith.constant 0 : i32
    %c2_i32_14 = arith.constant 2 : i32
    %c0_i32_15 = arith.constant 0 : i32
    %c0_i32_16 = arith.constant 0 : i32
    %25 = tpu.memref_slice %arg4[%24, %c0_i32_16] : memref<512x128xf32, #tpu.memory_space<any>> -> memref<1x128xf32, #tpu.memory_space<any>>
    %26 = tpu.memref_squeeze %25 : memref<1x128xf32, #tpu.memory_space<any>> -> memref<128xf32, #tpu.memory_space<any>>
    %c0_i32_17 = arith.constant 0 : i32
    %27 = tpu.memref_slice %arg5[%c0_i32_13, %c2_i32_14, %c0_i32_17] : memref<2x64x128xf32, #tpu.memory_space<vmem>> -> memref<1x1x128xf32, #tpu.memory_space<vmem>>
    %28 = tpu.memref_squeeze %27 : memref<1x1x128xf32, #tpu.memory_space<vmem>> -> memref<128xf32, #tpu.memory_space<vmem>>
    %29 = tpu.memref_slice %arg6[%c0_i32_15] : memref<2x!tpu.dma_semaphore, #tpu.memory_space<semaphore_mem>> -> memref<1x!tpu.dma_semaphore, #tpu.memory_space<semaphore_mem>>
    %30 = tpu.memref_squeeze %29 : memref<1x!tpu.dma_semaphore, #tpu.memory_space<semaphore_mem>> -> memref<!tpu.dma_semaphore, #tpu.memory_space<semaphore_mem>>
    tpu.enqueue_dma source(%26 : memref<128xf32, #tpu.memory_space<any>>) target(%28 : memref<128xf32, #tpu.memory_space<vmem>>) target_semaphore(%30 : memref<!tpu.dma_semaphore, #tpu.memory_space<semaphore_mem>>)
    %c0_i32_18 = arith.constant 0 : i32
    %31 = arith.addi %0, %c0_i32_18 : i32
    %c3_i32 = arith.constant 3 : i32
    %32 = arith.addi %31, %c3_i32 : i32
    %33 = arith.index_cast %32 : i32 to index
    %34 = memref.load %arg1[%33] : memref<256xi32, #tpu.memory_space<smem>>
    %c0_i32_19 = arith.constant 0 : i32
    %c3_i32_20 = arith.constant 3 : i32
    %c0_i32_21 = arith.constant 0 : i32
    %c0_i32_22 = arith.constant 0 : i32
    %35 = tpu.memref_slice %arg4[%34, %c0_i32_22] : memref<512x128xf32, #tpu.memory_space<any>> -> memref<1x128xf32, #tpu.memory_space<any>>
    %36 = tpu.memref_squeeze %35 : memref<1x128xf32, #tpu.memory_space<any>> -> memref<128xf32, #tpu.memory_space<any>>
    %c0_i32_23 = arith.constant 0 : i32
    %37 = tpu.memref_slice %arg5[%c0_i32_19, %c3_i32_20, %c0_i32_23] : memref<2x64x128xf32, #tpu.memory_space<vmem>> -> memref<1x1x128xf32, #tpu.memory_space<vmem>>
    %38 = tpu.memref_squeeze %37 : memref<1x1x128xf32, #tpu.memory_space<vmem>> -> memref<128xf32, #tpu.memory_space<vmem>>
    %39 = tpu.memref_slice %arg6[%c0_i32_21] : memref<2x!tpu.dma_semaphore, #tpu.memory_space<semaphore_mem>> -> memref<1x!tpu.dma_semaphore, #tpu.memory_space<semaphore_mem>>
    %40 = tpu.memref_squeeze %39 : memref<1x!tpu.dma_semaphore, #tpu.memory_space<semaphore_mem>> -> memref<!tpu.dma_semaphore, #tpu.memory_space<semaphore_mem>>
    tpu.enqueue_dma source(%36 : memref<128xf32, #tpu.memory_space<any>>) target(%38 : memref<128xf32, #tpu.memory_space<vmem>>) target_semaphore(%40 : memref<!tpu.dma_semaphore, #tpu.memory_space<semaphore_mem>>)
    %c0_i32_24 = arith.constant 0 : i32
    %41 = arith.addi %0, %c0_i32_24 : i32
    %c4_i32 = arith.constant 4 : i32
    %42 = arith.addi %41, %c4_i32 : i32
    %43 = arith.index_cast %42 : i32 to index
    %44 = memref.load %arg1[%43] : memref<256xi32, #tpu.memory_space<smem>>
    %c0_i32_25 = arith.constant 0 : i32
    %c4_i32_26 = arith.constant 4 : i32
    %c0_i32_27 = arith.constant 0 : i32
    %c0_i32_28 = arith.constant 0 : i32
    %45 = tpu.memref_slice %arg4[%44, %c0_i32_28] : memref<512x128xf32, #tpu.memory_space<any>> -> memref<1x128xf32, #tpu.memory_space<any>>
    %46 = tpu.memref_squeeze %45 : memref<1x128xf32, #tpu.memory_space<any>> -> memref<128xf32, #tpu.memory_space<any>>
    %c0_i32_29 = arith.constant 0 : i32
    %47 = tpu.memref_slice %arg5[%c0_i32_25, %c4_i32_26, %c0_i32_29] : memref<2x64x128xf32, #tpu.memory_space<vmem>> -> memref<1x1x128xf32, #tpu.memory_space<vmem>>
    %48 = tpu.memref_squeeze %47 : memref<1x1x128xf32, #tpu.memory_space<vmem>> -> memref<128xf32, #tpu.memory_space<vmem>>
    %49 = tpu.memref_slice %arg6[%c0_i32_27] : memref<2x!tpu.dma_semaphore, #tpu.memory_space<semaphore_mem>> -> memref<1x!tpu.dma_semaphore, #tpu.memory_space<semaphore_mem>>
    %50 = tpu.memref_squeeze %49 : memref<1x!tpu.dma_semaphore, #tpu.memory_space<semaphore_mem>> -> memref<!tpu.dma_semaphore, #tpu.memory_space<semaphore_mem>>
    tpu.enqueue_dma source(%46 : memref<128xf32, #tpu.memory_space<any>>) target(%48 : memref<128xf32, #tpu.memory_space<vmem>>) target_semaphore(%50 : memref<!tpu.dma_semaphore, #tpu.memory_space<semaphore_mem>>)
    %c0_i32_30 = arith.constant 0 : i32
    %51 = arith.addi %0, %c0_i32_30 : i32
    %c5_i32 = arith.constant 5 : i32
    %52 = arith.addi %51, %c5_i32 : i32
    %53 = arith.index_cast %52 : i32 to index
    %54 = memref.load %arg1[%53] : memref<256xi32, #tpu.memory_space<smem>>
    %c0_i32_31 = arith.constant 0 : i32
    %c5_i32_32 = arith.constant 5 : i32
    %c0_i32_33 = arith.constant 0 : i32
    %c0_i32_34 = arith.constant 0 : i32
    %55 = tpu.memref_slice %arg4[%54, %c0_i32_34] : memref<512x128xf32, #tpu.memory_space<any>> -> memref<1x128xf32, #tpu.memory_space<any>>
    %56 = tpu.memref_squeeze %55 : memref<1x128xf32, #tpu.memory_space<any>> -> memref<128xf32, #tpu.memory_space<any>>
    %c0_i32_35 = arith.constant 0 : i32
    %57 = tpu.memref_slice %arg5[%c0_i32_31, %c5_i32_32, %c0_i32_35] : memref<2x64x128xf32, #tpu.memory_space<vmem>> -> memref<1x1x128xf32, #tpu.memory_space<vmem>>
    %58 = tpu.memref_squeeze %57 : memref<1x1x128xf32, #tpu.memory_space<vmem>> -> memref<128xf32, #tpu.memory_space<vmem>>
    %59 = tpu.memref_slice %arg6[%c0_i32_33] : memref<2x!tpu.dma_semaphore, #tpu.memory_space<semaphore_mem>> -> memref<1x!tpu.dma_semaphore, #tpu.memory_space<semaphore_mem>>
    %60 = tpu.memref_squeeze %59 : memref<1x!tpu.dma_semaphore, #tpu.memory_space<semaphore_mem>> -> memref<!tpu.dma_semaphore, #tpu.memory_space<semaphore_mem>>
    tpu.enqueue_dma source(%56 : memref<128xf32, #tpu.memory_space<any>>) target(%58 : memref<128xf32, #tpu.memory_space<vmem>>) target_semaphore(%60 : memref<!tpu.dma_semaphore, #tpu.memory_space<semaphore_mem>>)
    %c0_i32_36 = arith.constant 0 : i32
    %61 = arith.addi %0, %c0_i32_36 : i32
    %c6_i32 = arith.constant 6 : i32
    %62 = arith.addi %61, %c6_i32 : i32
    %63 = arith.index_cast %62 : i32 to index
    %64 = memref.load %arg1[%63] : memref<256xi32, #tpu.memory_space<smem>>
    %c0_i32_37 = arith.constant 0 : i32
    %c6_i32_38 = arith.constant 6 : i32
    %c0_i32_39 = arith.constant 0 : i32
    %c0_i32_40 = arith.constant 0 : i32
    %65 = tpu.memref_slice %arg4[%64, %c0_i32_40] : memref<512x128xf32, #tpu.memory_space<any>> -> memref<1x128xf32, #tpu.memory_space<any>>
    %66 = tpu.memref_squeeze %65 : memref<1x128xf32, #tpu.memory_space<any>> -> memref<128xf32, #tpu.memory_space<any>>
    %c0_i32_41 = arith.constant 0 : i32
    %67 = tpu.memref_slice %arg5[%c0_i32_37, %c6_i32_38, %c0_i32_41] : memref<2x64x128xf32, #tpu.memory_space<vmem>> -> memref<1x1x128xf32, #tpu.memory_space<vmem>>
    %68 = tpu.memref_squeeze %67 : memref<1x1x128xf32, #tpu.memory_space<vmem>> -> memref<128xf32, #tpu.memory_space<vmem>>
    %69 = tpu.memref_slice %arg6[%c0_i32_39] : memref<2x!tpu.dma_semaphore, #tpu.memory_space<semaphore_mem>> -> memref<1x!tpu.dma_semaphore, #tpu.memory_space<semaphore_mem>>
    %70 = tpu.memref_squeeze %69 : memref<1x!tpu.dma_semaphore, #tpu.memory_space<semaphore_mem>> -> memref<!tpu.dma_semaphore, #tpu.memory_space<semaphore_mem>>
    tpu.enqueue_dma source(%66 : memref<128xf32, #tpu.memory_space<any>>) target(%68 : memref<128xf32, #tpu.memory_space<vmem>>) target_semaphore(%70 : memref<!tpu.dma_semaphore, #tpu.memory_space<semaphore_mem>>)
    %c0_i32_42 = arith.constant 0 : i32
    %71 = arith.addi %0, %c0_i32_42 : i32
    %c7_i32 = arith.constant 7 : i32
    %72 = arith.addi %71, %c7_i32 : i32
    %73 = arith.index_cast %72 : i32 to index
    %74 = memref.load %arg1[%73] : memref<256xi32, #tpu.memory_space<smem>>
    %c0_i32_43 = arith.constant 0 : i32
    %c7_i32_44 = arith.constant 7 : i32
    %c0_i32_45 = arith.constant 0 : i32
    %c0_i32_46 = arith.constant 0 : i32
    %75 = tpu.memref_slice %arg4[%74, %c0_i32_46] : memref<512x128xf32, #tpu.memory_space<any>> -> memref<1x128xf32, #tpu.memory_space<any>>
    %76 = tpu.memref_squeeze %75 : memref<1x128xf32, #tpu.memory_space<any>> -> memref<128xf32, #tpu.memory_space<any>>
    %c0_i32_47 = arith.constant 0 : i32
    %77 = tpu.memref_slice %arg5[%c0_i32_43, %c7_i32_44, %c0_i32_47] : memref<2x64x128xf32, #tpu.memory_space<vmem>> -> memref<1x1x128xf32, #tpu.memory_space<vmem>>
    %78 = tpu.memref_squeeze %77 : memref<1x1x128xf32, #tpu.memory_space<vmem>> -> memref<128xf32, #tpu.memory_space<vmem>>
    %79 = tpu.memref_slice %arg6[%c0_i32_45] : memref<2x!tpu.dma_semaphore, #tpu.memory_space<semaphore_mem>> -> memref<1x!tpu.dma_semaphore, #tpu.memory_space<semaphore_mem>>
    %80 = tpu.memref_squeeze %79 : memref<1x!tpu.dma_semaphore, #tpu.memory_space<semaphore_mem>> -> memref<!tpu.dma_semaphore, #tpu.memory_space<semaphore_mem>>
    tpu.enqueue_dma source(%76 : memref<128xf32, #tpu.memory_space<any>>) target(%78 : memref<128xf32, #tpu.memory_space<vmem>>) target_semaphore(%80 : memref<!tpu.dma_semaphore, #tpu.memory_space<semaphore_mem>>)
    %c0_i32_48 = arith.constant 0 : i32
    %81 = arith.addi %0, %c0_i32_48 : i32
    %c8_i32 = arith.constant 8 : i32
    %82 = arith.addi %81, %c8_i32 : i32
    %83 = arith.index_cast %82 : i32 to index
    %84 = memref.load %arg1[%83] : memref<256xi32, #tpu.memory_space<smem>>
    %c0_i32_49 = arith.constant 0 : i32
    %c8_i32_50 = arith.constant 8 : i32
    %c0_i32_51 = arith.constant 0 : i32
    %c0_i32_52 = arith.constant 0 : i32
    %85 = tpu.memref_slice %arg4[%84, %c0_i32_52] : memref<512x128xf32, #tpu.memory_space<any>> -> memref<1x128xf32, #tpu.memory_space<any>>
    %86 = tpu.memref_squeeze %85 : memref<1x128xf32, #tpu.memory_space<any>> -> memref<128xf32, #tpu.memory_space<any>>
    %c0_i32_53 = arith.constant 0 : i32
    %87 = tpu.memref_slice %arg5[%c0_i32_49, %c8_i32_50, %c0_i32_53] : memref<2x64x128xf32, #tpu.memory_space<vmem>> -> memref<1x1x128xf32, #tpu.memory_space<vmem>>
    %88 = tpu.memref_squeeze %87 : memref<1x1x128xf32, #tpu.memory_space<vmem>> -> memref<128xf32, #tpu.memory_space<vmem>>
    %89 = tpu.memref_slice %arg6[%c0_i32_51] : memref<2x!tpu.dma_semaphore, #tpu.memory_space<semaphore_mem>> -> memref<1x!tpu.dma_semaphore, #tpu.memory_space<semaphore_mem>>
    %90 = tpu.memref_squeeze %89 : memref<1x!tpu.dma_semaphore, #tpu.memory_space<semaphore_mem>> -> memref<!tpu.dma_semaphore, #tpu.memory_space<semaphore_mem>>
    tpu.enqueue_dma source(%86 : memref<128xf32, #tpu.memory_space<any>>) target(%88 : memref<128xf32, #tpu.memory_space<vmem>>) target_semaphore(%90 : memref<!tpu.dma_semaphore, #tpu.memory_space<semaphore_mem>>)
    %c0_i32_54 = arith.constant 0 : i32
    %91 = arith.addi %0, %c0_i32_54 : i32
    %c9_i32 = arith.constant 9 : i32
    %92 = arith.addi %91, %c9_i32 : i32
    %93 = arith.index_cast %92 : i32 to index
    %94 = memref.load %arg1[%93] : memref<256xi32, #tpu.memory_space<smem>>
    %c0_i32_55 = arith.constant 0 : i32
    %c9_i32_56 = arith.constant 9 : i32
    %c0_i32_57 = arith.constant 0 : i32
    %c0_i32_58 = arith.constant 0 : i32
    %95 = tpu.memref_slice %arg4[%94, %c0_i32_58] : memref<512x128xf32, #tpu.memory_space<any>> -> memref<1x128xf32, #tpu.memory_space<any>>
    %96 = tpu.memref_squeeze %95 : memref<1x128xf32, #tpu.memory_space<any>> -> memref<128xf32, #tpu.memory_space<any>>
    %c0_i32_59 = arith.constant 0 : i32
    %97 = tpu.memref_slice %arg5[%c0_i32_55, %c9_i32_56, %c0_i32_59] : memref<2x64x128xf32, #tpu.memory_space<vmem>> -> memref<1x1x128xf32, #tpu.memory_space<vmem>>
    %98 = tpu.memref_squeeze %97 : memref<1x1x128xf32, #tpu.memory_space<vmem>> -> memref<128xf32, #tpu.memory_space<vmem>>
    %99 = tpu.memref_slice %arg6[%c0_i32_57] : memref<2x!tpu.dma_semaphore, #tpu.memory_space<semaphore_mem>> -> memref<1x!tpu.dma_semaphore, #tpu.memory_space<semaphore_mem>>
    %100 = tpu.memref_squeeze %99 : memref<1x!tpu.dma_semaphore, #tpu.memory_space<semaphore_mem>> -> memref<!tpu.dma_semaphore, #tpu.memory_space<semaphore_mem>>
    tpu.enqueue_dma source(%96 : memref<128xf32, #tpu.memory_space<any>>) target(%98 : memref<128xf32, #tpu.memory_space<vmem>>) target_semaphore(%100 : memref<!tpu.dma_semaphore, #tpu.memory_space<semaphore_mem>>)
    %c0_i32_60 = arith.constant 0 : i32
    %101 = arith.addi %0, %c0_i32_60 : i32
    %c10_i32 = arith.constant 10 : i32
    %102 = arith.addi %101, %c10_i32 : i32
    %103 = arith.index_cast %102 : i32 to index
    %104 = memref.load %arg1[%103] : memref<256xi32, #tpu.memory_space<smem>>
    %c0_i32_61 = arith.constant 0 : i32
    %c10_i32_62 = arith.constant 10 : i32
    %c0_i32_63 = arith.constant 0 : i32
    %c0_i32_64 = arith.constant 0 : i32
    %105 = tpu.memref_slice %arg4[%104, %c0_i32_64] : memref<512x128xf32, #tpu.memory_space<any>> -> memref<1x128xf32, #tpu.memory_space<any>>
    %106 = tpu.memref_squeeze %105 : memref<1x128xf32, #tpu.memory_space<any>> -> memref<128xf32, #tpu.memory_space<any>>
    %c0_i32_65 = arith.constant 0 : i32
    %107 = tpu.memref_slice %arg5[%c0_i32_61, %c10_i32_62, %c0_i32_65] : memref<2x64x128xf32, #tpu.memory_space<vmem>> -> memref<1x1x128xf32, #tpu.memory_space<vmem>>
    %108 = tpu.memref_squeeze %107 : memref<1x1x128xf32, #tpu.memory_space<vmem>> -> memref<128xf32, #tpu.memory_space<vmem>>
    %109 = tpu.memref_slice %arg6[%c0_i32_63] : memref<2x!tpu.dma_semaphore, #tpu.memory_space<semaphore_mem>> -> memref<1x!tpu.dma_semaphore, #tpu.memory_space<semaphore_mem>>
    %110 = tpu.memref_squeeze %109 : memref<1x!tpu.dma_semaphore, #tpu.memory_space<semaphore_mem>> -> memref<!tpu.dma_semaphore, #tpu.memory_space<semaphore_mem>>
    tpu.enqueue_dma source(%106 : memref<128xf32, #tpu.memory_space<any>>) target(%108 : memref<128xf32, #tpu.memory_space<vmem>>) target_semaphore(%110 : memref<!tpu.dma_semaphore, #tpu.memory_space<semaphore_mem>>)
    %c0_i32_66 = arith.constant 0 : i32
    %111 = arith.addi %0, %c0_i32_66 : i32
    %c11_i32 = arith.constant 11 : i32
    %112 = arith.addi %111, %c11_i32 : i32
    %113 = arith.index_cast %112 : i32 to index
    %114 = memref.load %arg1[%113] : memref<256xi32, #tpu.memory_space<smem>>
    %c0_i32_67 = arith.constant 0 : i32
    %c11_i32_68 = arith.constant 11 : i32
    %c0_i32_69 = arith.constant 0 : i32
    %c0_i32_70 = arith.constant 0 : i32
    %115 = tpu.memref_slice %arg4[%114, %c0_i32_70] : memref<512x128xf32, #tpu.memory_space<any>> -> memref<1x128xf32, #tpu.memory_space<any>>
    %116 = tpu.memref_squeeze %115 : memref<1x128xf32, #tpu.memory_space<any>> -> memref<128xf32, #tpu.memory_space<any>>
    %c0_i32_71 = arith.constant 0 : i32
    %117 = tpu.memref_slice %arg5[%c0_i32_67, %c11_i32_68, %c0_i32_71] : memref<2x64x128xf32, #tpu.memory_space<vmem>> -> memref<1x1x128xf32, #tpu.memory_space<vmem>>
    %118 = tpu.memref_squeeze %117 : memref<1x1x128xf32, #tpu.memory_space<vmem>> -> memref<128xf32, #tpu.memory_space<vmem>>
    %119 = tpu.memref_slice %arg6[%c0_i32_69] : memref<2x!tpu.dma_semaphore, #tpu.memory_space<semaphore_mem>> -> memref<1x!tpu.dma_semaphore, #tpu.memory_space<semaphore_mem>>
    %120 = tpu.memref_squeeze %119 : memref<1x!tpu.dma_semaphore, #tpu.memory_space<semaphore_mem>> -> memref<!tpu.dma_semaphore, #tpu.memory_space<semaphore_mem>>
    tpu.enqueue_dma source(%116 : memref<128xf32, #tpu.memory_space<any>>) target(%118 : memref<128xf32, #tpu.memory_space<vmem>>) target_semaphore(%120 : memref<!tpu.dma_semaphore, #tpu.memory_space<semaphore_mem>>)
    %c0_i32_72 = arith.constant 0 : i32
    %121 = arith.addi %0, %c0_i32_72 : i32
    %c12_i32 = arith.constant 12 : i32
    %122 = arith.addi %121, %c12_i32 : i32
    %123 = arith.index_cast %122 : i32 to index
    %124 = memref.load %arg1[%123] : memref<256xi32, #tpu.memory_space<smem>>
    %c0_i32_73 = arith.constant 0 : i32
    %c12_i32_74 = arith.constant 12 : i32
    %c0_i32_75 = arith.constant 0 : i32
    %c0_i32_76 = arith.constant 0 : i32
    %125 = tpu.memref_slice %arg4[%124, %c0_i32_76] : memref<512x128xf32, #tpu.memory_space<any>> -> memref<1x128xf32, #tpu.memory_space<any>>
    %126 = tpu.memref_squeeze %125 : memref<1x128xf32, #tpu.memory_space<any>> -> memref<128xf32, #tpu.memory_space<any>>
    %c0_i32_77 = arith.constant 0 : i32
    %127 = tpu.memref_slice %arg5[%c0_i32_73, %c12_i32_74, %c0_i32_77] : memref<2x64x128xf32, #tpu.memory_space<vmem>> -> memref<1x1x128xf32, #tpu.memory_space<vmem>>
    %128 = tpu.memref_squeeze %127 : memref<1x1x128xf32, #tpu.memory_space<vmem>> -> memref<128xf32, #tpu.memory_space<vmem>>
    %129 = tpu.memref_slice %arg6[%c0_i32_75] : memref<2x!tpu.dma_semaphore, #tpu.memory_space<semaphore_mem>> -> memref<1x!tpu.dma_semaphore, #tpu.memory_space<semaphore_mem>>
    %130 = tpu.memref_squeeze %129 : memref<1x!tpu.dma_semaphore, #tpu.memory_space<semaphore_mem>> -> memref<!tpu.dma_semaphore, #tpu.memory_space<semaphore_mem>>
    tpu.enqueue_dma source(%126 : memref<128xf32, #tpu.memory_space<any>>) target(%128 : memref<128xf32, #tpu.memory_space<vmem>>) target_semaphore(%130 : memref<!tpu.dma_semaphore, #tpu.memory_space<semaphore_mem>>)
    %c0_i32_78 = arith.constant 0 : i32
    %131 = arith.addi %0, %c0_i32_78 : i32
    %c13_i32 = arith.constant 13 : i32
    %132 = arith.addi %131, %c13_i32 : i32
    %133 = arith.index_cast %132 : i32 to index
    %134 = memref.load %arg1[%133] : memref<256xi32, #tpu.memory_space<smem>>
    %c0_i32_79 = arith.constant 0 : i32
    %c13_i32_80 = arith.constant 13 : i32
    %c0_i32_81 = arith.constant 0 : i32
    %c0_i32_82 = arith.constant 0 : i32
    %135 = tpu.memref_slice %arg4[%134, %c0_i32_82] : memref<512x128xf32, #tpu.memory_space<any>> -> memref<1x128xf32, #tpu.memory_space<any>>
    %136 = tpu.memref_squeeze %135 : memref<1x128xf32, #tpu.memory_space<any>> -> memref<128xf32, #tpu.memory_space<any>>
    %c0_i32_83 = arith.constant 0 : i32
    %137 = tpu.memref_slice %arg5[%c0_i32_79, %c13_i32_80, %c0_i32_83] : memref<2x64x128xf32, #tpu.memory_space<vmem>> -> memref<1x1x128xf32, #tpu.memory_space<vmem>>
    %138 = tpu.memref_squeeze %137 : memref<1x1x128xf32, #tpu.memory_space<vmem>> -> memref<128xf32, #tpu.memory_space<vmem>>
    %139 = tpu.memref_slice %arg6[%c0_i32_81] : memref<2x!tpu.dma_semaphore, #tpu.memory_space<semaphore_mem>> -> memref<1x!tpu.dma_semaphore, #tpu.memory_space<semaphore_mem>>
    %140 = tpu.memref_squeeze %139 : memref<1x!tpu.dma_semaphore, #tpu.memory_space<semaphore_mem>> -> memref<!tpu.dma_semaphore, #tpu.memory_space<semaphore_mem>>
    tpu.enqueue_dma source(%136 : memref<128xf32, #tpu.memory_space<any>>) target(%138 : memref<128xf32, #tpu.memory_space<vmem>>) target_semaphore(%140 : memref<!tpu.dma_semaphore, #tpu.memory_space<semaphore_mem>>)
    %c0_i32_84 = arith.constant 0 : i32
    %141 = arith.addi %0, %c0_i32_84 : i32
    %c14_i32 = arith.constant 14 : i32
    %142 = arith.addi %141, %c14_i32 : i32
    %143 = arith.index_cast %142 : i32 to index
    %144 = memref.load %arg1[%143] : memref<256xi32, #tpu.memory_space<smem>>
    %c0_i32_85 = arith.constant 0 : i32
    %c14_i32_86 = arith.constant 14 : i32
    %c0_i32_87 = arith.constant 0 : i32
    %c0_i32_88 = arith.constant 0 : i32
    %145 = tpu.memref_slice %arg4[%144, %c0_i32_88] : memref<512x128xf32, #tpu.memory_space<any>> -> memref<1x128xf32, #tpu.memory_space<any>>
    %146 = tpu.memref_squeeze %145 : memref<1x128xf32, #tpu.memory_space<any>> -> memref<128xf32, #tpu.memory_space<any>>
    %c0_i32_89 = arith.constant 0 : i32
    %147 = tpu.memref_slice %arg5[%c0_i32_85, %c14_i32_86, %c0_i32_89] : memref<2x64x128xf32, #tpu.memory_space<vmem>> -> memref<1x1x128xf32, #tpu.memory_space<vmem>>
    %148 = tpu.memref_squeeze %147 : memref<1x1x128xf32, #tpu.memory_space<vmem>> -> memref<128xf32, #tpu.memory_space<vmem>>
    %149 = tpu.memref_slice %arg6[%c0_i32_87] : memref<2x!tpu.dma_semaphore, #tpu.memory_space<semaphore_mem>> -> memref<1x!tpu.dma_semaphore, #tpu.memory_space<semaphore_mem>>
    %150 = tpu.memref_squeeze %149 : memref<1x!tpu.dma_semaphore, #tpu.memory_space<semaphore_mem>> -> memref<!tpu.dma_semaphore, #tpu.memory_space<semaphore_mem>>
    tpu.enqueue_dma source(%146 : memref<128xf32, #tpu.memory_space<any>>) target(%148 : memref<128xf32, #tpu.memory_space<vmem>>) target_semaphore(%150 : memref<!tpu.dma_semaphore, #tpu.memory_space<semaphore_mem>>)
    %c0_i32_90 = arith.constant 0 : i32
    %151 = arith.addi %0, %c0_i32_90 : i32
    %c15_i32 = arith.constant 15 : i32
    %152 = arith.addi %151, %c15_i32 : i32
    %153 = arith.index_cast %152 : i32 to index
    %154 = memref.load %arg1[%153] : memref<256xi32, #tpu.memory_space<smem>>
    %c0_i32_91 = arith.constant 0 : i32
    %c15_i32_92 = arith.constant 15 : i32
    %c0_i32_93 = arith.constant 0 : i32
    %c0_i32_94 = arith.constant 0 : i32
    %155 = tpu.memref_slice %arg4[%154, %c0_i32_94] : memref<512x128xf32, #tpu.memory_space<any>> -> memref<1x128xf32, #tpu.memory_space<any>>
    %156 = tpu.memref_squeeze %155 : memref<1x128xf32, #tpu.memory_space<any>> -> memref<128xf32, #tpu.memory_space<any>>
    %c0_i32_95 = arith.constant 0 : i32
    %157 = tpu.memref_slice %arg5[%c0_i32_91, %c15_i32_92, %c0_i32_95] : memref<2x64x128xf32, #tpu.memory_space<vmem>> -> memref<1x1x128xf32, #tpu.memory_space<vmem>>
    %158 = tpu.memref_squeeze %157 : memref<1x1x128xf32, #tpu.memory_space<vmem>> -> memref<128xf32, #tpu.memory_space<vmem>>
    %159 = tpu.memref_slice %arg6[%c0_i32_93] : memref<2x!tpu.dma_semaphore, #tpu.memory_space<semaphore_mem>> -> memref<1x!tpu.dma_semaphore, #tpu.memory_space<semaphore_mem>>
    %160 = tpu.memref_squeeze %159 : memref<1x!tpu.dma_semaphore, #tpu.memory_space<semaphore_mem>> -> memref<!tpu.dma_semaphore, #tpu.memory_space<semaphore_mem>>
    tpu.enqueue_dma source(%156 : memref<128xf32, #tpu.memory_space<any>>) target(%158 : memref<128xf32, #tpu.memory_space<vmem>>) target_semaphore(%160 : memref<!tpu.dma_semaphore, #tpu.memory_space<semaphore_mem>>)
    %c0_i32_96 = arith.constant 0 : i32
    %161 = arith.addi %0, %c0_i32_96 : i32
    %c16_i32 = arith.constant 16 : i32
    %162 = arith.addi %161, %c16_i32 : i32
    %163 = arith.index_cast %162 : i32 to index
    %164 = memref.load %arg1[%163] : memref<256xi32, #tpu.memory_space<smem>>
    %c0_i32_97 = arith.constant 0 : i32
    %c16_i32_98 = arith.constant 16 : i32
    %c0_i32_99 = arith.constant 0 : i32
    %c0_i32_100 = arith.constant 0 : i32
    %165 = tpu.memref_slice %arg4[%164, %c0_i32_100] : memref<512x128xf32, #tpu.memory_space<any>> -> memref<1x128xf32, #tpu.memory_space<any>>
    %166 = tpu.memref_squeeze %165 : memref<1x128xf32, #tpu.memory_space<any>> -> memref<128xf32, #tpu.memory_space<any>>
    %c0_i32_101 = arith.constant 0 : i32
    %167 = tpu.memref_slice %arg5[%c0_i32_97, %c16_i32_98, %c0_i32_101] : memref<2x64x128xf32, #tpu.memory_space<vmem>> -> memref<1x1x128xf32, #tpu.memory_space<vmem>>
    %168 = tpu.memref_squeeze %167 : memref<1x1x128xf32, #tpu.memory_space<vmem>> -> memref<128xf32, #tpu.memory_space<vmem>>
    %169 = tpu.memref_slice %arg6[%c0_i32_99] : memref<2x!tpu.dma_semaphore, #tpu.memory_space<semaphore_mem>> -> memref<1x!tpu.dma_semaphore, #tpu.memory_space<semaphore_mem>>
    %170 = tpu.memref_squeeze %169 : memref<1x!tpu.dma_semaphore, #tpu.memory_space<semaphore_mem>> -> memref<!tpu.dma_semaphore, #tpu.memory_space<semaphore_mem>>
    tpu.enqueue_dma source(%166 : memref<128xf32, #tpu.memory_space<any>>) target(%168 : memref<128xf32, #tpu.memory_space<vmem>>) target_semaphore(%170 : memref<!tpu.dma_semaphore, #tpu.memory_space<semaphore_mem>>)
    %c0_i32_102 = arith.constant 0 : i32
    %171 = arith.addi %0, %c0_i32_102 : i32
    %c17_i32 = arith.constant 17 : i32
    %172 = arith.addi %171, %c17_i32 : i32
    %173 = arith.index_cast %172 : i32 to index
    %174 = memref.load %arg1[%173] : memref<256xi32, #tpu.memory_space<smem>>
    %c0_i32_103 = arith.constant 0 : i32
    %c17_i32_104 = arith.constant 17 : i32
    %c0_i32_105 = arith.constant 0 : i32
    %c0_i32_106 = arith.constant 0 : i32
    %175 = tpu.memref_slice %arg4[%174, %c0_i32_106] : memref<512x128xf32, #tpu.memory_space<any>> -> memref<1x128xf32, #tpu.memory_space<any>>
    %176 = tpu.memref_squeeze %175 : memref<1x128xf32, #tpu.memory_space<any>> -> memref<128xf32, #tpu.memory_space<any>>
    %c0_i32_107 = arith.constant 0 : i32
    %177 = tpu.memref_slice %arg5[%c0_i32_103, %c17_i32_104, %c0_i32_107] : memref<2x64x128xf32, #tpu.memory_space<vmem>> -> memref<1x1x128xf32, #tpu.memory_space<vmem>>
    %178 = tpu.memref_squeeze %177 : memref<1x1x128xf32, #tpu.memory_space<vmem>> -> memref<128xf32, #tpu.memory_space<vmem>>
    %179 = tpu.memref_slice %arg6[%c0_i32_105] : memref<2x!tpu.dma_semaphore, #tpu.memory_space<semaphore_mem>> -> memref<1x!tpu.dma_semaphore, #tpu.memory_space<semaphore_mem>>
    %180 = tpu.memref_squeeze %179 : memref<1x!tpu.dma_semaphore, #tpu.memory_space<semaphore_mem>> -> memref<!tpu.dma_semaphore, #tpu.memory_space<semaphore_mem>>
    tpu.enqueue_dma source(%176 : memref<128xf32, #tpu.memory_space<any>>) target(%178 : memref<128xf32, #tpu.memory_space<vmem>>) target_semaphore(%180 : memref<!tpu.dma_semaphore, #tpu.memory_space<semaphore_mem>>)
    %c0_i32_108 = arith.constant 0 : i32
    %181 = arith.addi %0, %c0_i32_108 : i32
    %c18_i32 = arith.constant 18 : i32
    %182 = arith.addi %181, %c18_i32 : i32
    %183 = arith.index_cast %182 : i32 to index
    %184 = memref.load %arg1[%183] : memref<256xi32, #tpu.memory_space<smem>>
    %c0_i32_109 = arith.constant 0 : i32
    %c18_i32_110 = arith.constant 18 : i32
    %c0_i32_111 = arith.constant 0 : i32
    %c0_i32_112 = arith.constant 0 : i32
    %185 = tpu.memref_slice %arg4[%184, %c0_i32_112] : memref<512x128xf32, #tpu.memory_space<any>> -> memref<1x128xf32, #tpu.memory_space<any>>
    %186 = tpu.memref_squeeze %185 : memref<1x128xf32, #tpu.memory_space<any>> -> memref<128xf32, #tpu.memory_space<any>>
    %c0_i32_113 = arith.constant 0 : i32
    %187 = tpu.memref_slice %arg5[%c0_i32_109, %c18_i32_110, %c0_i32_113] : memref<2x64x128xf32, #tpu.memory_space<vmem>> -> memref<1x1x128xf32, #tpu.memory_space<vmem>>
    %188 = tpu.memref_squeeze %187 : memref<1x1x128xf32, #tpu.memory_space<vmem>> -> memref<128xf32, #tpu.memory_space<vmem>>
    %189 = tpu.memref_slice %arg6[%c0_i32_111] : memref<2x!tpu.dma_semaphore, #tpu.memory_space<semaphore_mem>> -> memref<1x!tpu.dma_semaphore, #tpu.memory_space<semaphore_mem>>
    %190 = tpu.memref_squeeze %189 : memref<1x!tpu.dma_semaphore, #tpu.memory_space<semaphore_mem>> -> memref<!tpu.dma_semaphore, #tpu.memory_space<semaphore_mem>>
    tpu.enqueue_dma source(%186 : memref<128xf32, #tpu.memory_space<any>>) target(%188 : memref<128xf32, #tpu.memory_space<vmem>>) target_semaphore(%190 : memref<!tpu.dma_semaphore, #tpu.memory_space<semaphore_mem>>)
    %c0_i32_114 = arith.constant 0 : i32
    %191 = arith.addi %0, %c0_i32_114 : i32
    %c19_i32 = arith.constant 19 : i32
    %192 = arith.addi %191, %c19_i32 : i32
    %193 = arith.index_cast %192 : i32 to index
    %194 = memref.load %arg1[%193] : memref<256xi32, #tpu.memory_space<smem>>
    %c0_i32_115 = arith.constant 0 : i32
    %c19_i32_116 = arith.constant 19 : i32
    %c0_i32_117 = arith.constant 0 : i32
    %c0_i32_118 = arith.constant 0 : i32
    %195 = tpu.memref_slice %arg4[%194, %c0_i32_118] : memref<512x128xf32, #tpu.memory_space<any>> -> memref<1x128xf32, #tpu.memory_space<any>>
    %196 = tpu.memref_squeeze %195 : memref<1x128xf32, #tpu.memory_space<any>> -> memref<128xf32, #tpu.memory_space<any>>
    %c0_i32_119 = arith.constant 0 : i32
    %197 = tpu.memref_slice %arg5[%c0_i32_115, %c19_i32_116, %c0_i32_119] : memref<2x64x128xf32, #tpu.memory_space<vmem>> -> memref<1x1x128xf32, #tpu.memory_space<vmem>>
    %198 = tpu.memref_squeeze %197 : memref<1x1x128xf32, #tpu.memory_space<vmem>> -> memref<128xf32, #tpu.memory_space<vmem>>
    %199 = tpu.memref_slice %arg6[%c0_i32_117] : memref<2x!tpu.dma_semaphore, #tpu.memory_space<semaphore_mem>> -> memref<1x!tpu.dma_semaphore, #tpu.memory_space<semaphore_mem>>
    %200 = tpu.memref_squeeze %199 : memref<1x!tpu.dma_semaphore, #tpu.memory_space<semaphore_mem>> -> memref<!tpu.dma_semaphore, #tpu.memory_space<semaphore_mem>>
    tpu.enqueue_dma source(%196 : memref<128xf32, #tpu.memory_space<any>>) target(%198 : memref<128xf32, #tpu.memory_space<vmem>>) target_semaphore(%200 : memref<!tpu.dma_semaphore, #tpu.memory_space<semaphore_mem>>)
    %c0_i32_120 = arith.constant 0 : i32
    %201 = arith.addi %0, %c0_i32_120 : i32
    %c20_i32 = arith.constant 20 : i32
    %202 = arith.addi %201, %c20_i32 : i32
    %203 = arith.index_cast %202 : i32 to index
    %204 = memref.load %arg1[%203] : memref<256xi32, #tpu.memory_space<smem>>
    %c0_i32_121 = arith.constant 0 : i32
    %c20_i32_122 = arith.constant 20 : i32
    %c0_i32_123 = arith.constant 0 : i32
    %c0_i32_124 = arith.constant 0 : i32
    %205 = tpu.memref_slice %arg4[%204, %c0_i32_124] : memref<512x128xf32, #tpu.memory_space<any>> -> memref<1x128xf32, #tpu.memory_space<any>>
    %206 = tpu.memref_squeeze %205 : memref<1x128xf32, #tpu.memory_space<any>> -> memref<128xf32, #tpu.memory_space<any>>
    %c0_i32_125 = arith.constant 0 : i32
    %207 = tpu.memref_slice %arg5[%c0_i32_121, %c20_i32_122, %c0_i32_125] : memref<2x64x128xf32, #tpu.memory_space<vmem>> -> memref<1x1x128xf32, #tpu.memory_space<vmem>>
    %208 = tpu.memref_squeeze %207 : memref<1x1x128xf32, #tpu.memory_space<vmem>> -> memref<128xf32, #tpu.memory_space<vmem>>
    %209 = tpu.memref_slice %arg6[%c0_i32_123] : memref<2x!tpu.dma_semaphore, #tpu.memory_space<semaphore_mem>> -> memref<1x!tpu.dma_semaphore, #tpu.memory_space<semaphore_mem>>
    %210 = tpu.memref_squeeze %209 : memref<1x!tpu.dma_semaphore, #tpu.memory_space<semaphore_mem>> -> memref<!tpu.dma_semaphore, #tpu.memory_space<semaphore_mem>>
    tpu.enqueue_dma source(%206 : memref<128xf32, #tpu.memory_space<any>>) target(%208 : memref<128xf32, #tpu.memory_space<vmem>>) target_semaphore(%210 : memref<!tpu.dma_semaphore, #tpu.memory_space<semaphore_mem>>)
    %c0_i32_126 = arith.constant 0 : i32
    %211 = arith.addi %0, %c0_i32_126 : i32
    %c21_i32 = arith.constant 21 : i32
    %212 = arith.addi %211, %c21_i32 : i32
    %213 = arith.index_cast %212 : i32 to index
    %214 = memref.load %arg1[%213] : memref<256xi32, #tpu.memory_space<smem>>
    %c0_i32_127 = arith.constant 0 : i32
    %c21_i32_128 = arith.constant 21 : i32
    %c0_i32_129 = arith.constant 0 : i32
    %c0_i32_130 = arith.constant 0 : i32
    %215 = tpu.memref_slice %arg4[%214, %c0_i32_130] : memref<512x128xf32, #tpu.memory_space<any>> -> memref<1x128xf32, #tpu.memory_space<any>>
    %216 = tpu.memref_squeeze %215 : memref<1x128xf32, #tpu.memory_space<any>> -> memref<128xf32, #tpu.memory_space<any>>
    %c0_i32_131 = arith.constant 0 : i32
    %217 = tpu.memref_slice %arg5[%c0_i32_127, %c21_i32_128, %c0_i32_131] : memref<2x64x128xf32, #tpu.memory_space<vmem>> -> memref<1x1x128xf32, #tpu.memory_space<vmem>>
    %218 = tpu.memref_squeeze %217 : memref<1x1x128xf32, #tpu.memory_space<vmem>> -> memref<128xf32, #tpu.memory_space<vmem>>
    %219 = tpu.memref_slice %arg6[%c0_i32_129] : memref<2x!tpu.dma_semaphore, #tpu.memory_space<semaphore_mem>> -> memref<1x!tpu.dma_semaphore, #tpu.memory_space<semaphore_mem>>
    %220 = tpu.memref_squeeze %219 : memref<1x!tpu.dma_semaphore, #tpu.memory_space<semaphore_mem>> -> memref<!tpu.dma_semaphore, #tpu.memory_space<semaphore_mem>>
    tpu.enqueue_dma source(%216 : memref<128xf32, #tpu.memory_space<any>>) target(%218 : memref<128xf32, #tpu.memory_space<vmem>>) target_semaphore(%220 : memref<!tpu.dma_semaphore, #tpu.memory_space<semaphore_mem>>)
    %c0_i32_132 = arith.constant 0 : i32
    %221 = arith.addi %0, %c0_i32_132 : i32
    %c22_i32 = arith.constant 22 : i32
    %222 = arith.addi %221, %c22_i32 : i32
    %223 = arith.index_cast %222 : i32 to index
    %224 = memref.load %arg1[%223] : memref<256xi32, #tpu.memory_space<smem>>
    %c0_i32_133 = arith.constant 0 : i32
    %c22_i32_134 = arith.constant 22 : i32
    %c0_i32_135 = arith.constant 0 : i32
    %c0_i32_136 = arith.constant 0 : i32
    %225 = tpu.memref_slice %arg4[%224, %c0_i32_136] : memref<512x128xf32, #tpu.memory_space<any>> -> memref<1x128xf32, #tpu.memory_space<any>>
    %226 = tpu.memref_squeeze %225 : memref<1x128xf32, #tpu.memory_space<any>> -> memref<128xf32, #tpu.memory_space<any>>
    %c0_i32_137 = arith.constant 0 : i32
    %227 = tpu.memref_slice %arg5[%c0_i32_133, %c22_i32_134, %c0_i32_137] : memref<2x64x128xf32, #tpu.memory_space<vmem>> -> memref<1x1x128xf32, #tpu.memory_space<vmem>>
    %228 = tpu.memref_squeeze %227 : memref<1x1x128xf32, #tpu.memory_space<vmem>> -> memref<128xf32, #tpu.memory_space<vmem>>
    %229 = tpu.memref_slice %arg6[%c0_i32_135] : memref<2x!tpu.dma_semaphore, #tpu.memory_space<semaphore_mem>> -> memref<1x!tpu.dma_semaphore, #tpu.memory_space<semaphore_mem>>
    %230 = tpu.memref_squeeze %229 : memref<1x!tpu.dma_semaphore, #tpu.memory_space<semaphore_mem>> -> memref<!tpu.dma_semaphore, #tpu.memory_space<semaphore_mem>>
    tpu.enqueue_dma source(%226 : memref<128xf32, #tpu.memory_space<any>>) target(%228 : memref<128xf32, #tpu.memory_space<vmem>>) target_semaphore(%230 : memref<!tpu.dma_semaphore, #tpu.memory_space<semaphore_mem>>)
    %c0_i32_138 = arith.constant 0 : i32
    %231 = arith.addi %0, %c0_i32_138 : i32
    %c23_i32 = arith.constant 23 : i32
    %232 = arith.addi %231, %c23_i32 : i32
    %233 = arith.index_cast %232 : i32 to index
    %234 = memref.load %arg1[%233] : memref<256xi32, #tpu.memory_space<smem>>
    %c0_i32_139 = arith.constant 0 : i32
    %c23_i32_140 = arith.constant 23 : i32
    %c0_i32_141 = arith.constant 0 : i32
    %c0_i32_142 = arith.constant 0 : i32
    %235 = tpu.memref_slice %arg4[%234, %c0_i32_142] : memref<512x128xf32, #tpu.memory_space<any>> -> memref<1x128xf32, #tpu.memory_space<any>>
    %236 = tpu.memref_squeeze %235 : memref<1x128xf32, #tpu.memory_space<any>> -> memref<128xf32, #tpu.memory_space<any>>
    %c0_i32_143 = arith.constant 0 : i32
    %237 = tpu.memref_slice %arg5[%c0_i32_139, %c23_i32_140, %c0_i32_143] : memref<2x64x128xf32, #tpu.memory_space<vmem>> -> memref<1x1x128xf32, #tpu.memory_space<vmem>>
    %238 = tpu.memref_squeeze %237 : memref<1x1x128xf32, #tpu.memory_space<vmem>> -> memref<128xf32, #tpu.memory_space<vmem>>
    %239 = tpu.memref_slice %arg6[%c0_i32_141] : memref<2x!tpu.dma_semaphore, #tpu.memory_space<semaphore_mem>> -> memref<1x!tpu.dma_semaphore, #tpu.memory_space<semaphore_mem>>
    %240 = tpu.memref_squeeze %239 : memref<1x!tpu.dma_semaphore, #tpu.memory_space<semaphore_mem>> -> memref<!tpu.dma_semaphore, #tpu.memory_space<semaphore_mem>>
    tpu.enqueue_dma source(%236 : memref<128xf32, #tpu.memory_space<any>>) target(%238 : memref<128xf32, #tpu.memory_space<vmem>>) target_semaphore(%240 : memref<!tpu.dma_semaphore, #tpu.memory_space<semaphore_mem>>)
    %c0_i32_144 = arith.constant 0 : i32
    %241 = arith.addi %0, %c0_i32_144 : i32
    %c24_i32 = arith.constant 24 : i32
    %242 = arith.addi %241, %c24_i32 : i32
    %243 = arith.index_cast %242 : i32 to index
    %244 = memref.load %arg1[%243] : memref<256xi32, #tpu.memory_space<smem>>
    %c0_i32_145 = arith.constant 0 : i32
    %c24_i32_146 = arith.constant 24 : i32
    %c0_i32_147 = arith.constant 0 : i32
    %c0_i32_148 = arith.constant 0 : i32
    %245 = tpu.memref_slice %arg4[%244, %c0_i32_148] : memref<512x128xf32, #tpu.memory_space<any>> -> memref<1x128xf32, #tpu.memory_space<any>>
    %246 = tpu.memref_squeeze %245 : memref<1x128xf32, #tpu.memory_space<any>> -> memref<128xf32, #tpu.memory_space<any>>
    %c0_i32_149 = arith.constant 0 : i32
    %247 = tpu.memref_slice %arg5[%c0_i32_145, %c24_i32_146, %c0_i32_149] : memref<2x64x128xf32, #tpu.memory_space<vmem>> -> memref<1x1x128xf32, #tpu.memory_space<vmem>>
    %248 = tpu.memref_squeeze %247 : memref<1x1x128xf32, #tpu.memory_space<vmem>> -> memref<128xf32, #tpu.memory_space<vmem>>
    %249 = tpu.memref_slice %arg6[%c0_i32_147] : memref<2x!tpu.dma_semaphore, #tpu.memory_space<semaphore_mem>> -> memref<1x!tpu.dma_semaphore, #tpu.memory_space<semaphore_mem>>
    %250 = tpu.memref_squeeze %249 : memref<1x!tpu.dma_semaphore, #tpu.memory_space<semaphore_mem>> -> memref<!tpu.dma_semaphore, #tpu.memory_space<semaphore_mem>>
    tpu.enqueue_dma source(%246 : memref<128xf32, #tpu.memory_space<any>>) target(%248 : memref<128xf32, #tpu.memory_space<vmem>>) target_semaphore(%250 : memref<!tpu.dma_semaphore, #tpu.memory_space<semaphore_mem>>)
    %c0_i32_150 = arith.constant 0 : i32
    %251 = arith.addi %0, %c0_i32_150 : i32
    %c25_i32 = arith.constant 25 : i32
    %252 = arith.addi %251, %c25_i32 : i32
    %253 = arith.index_cast %252 : i32 to index
    %254 = memref.load %arg1[%253] : memref<256xi32, #tpu.memory_space<smem>>
    %c0_i32_151 = arith.constant 0 : i32
    %c25_i32_152 = arith.constant 25 : i32
    %c0_i32_153 = arith.constant 0 : i32
    %c0_i32_154 = arith.constant 0 : i32
    %255 = tpu.memref_slice %arg4[%254, %c0_i32_154] : memref<512x128xf32, #tpu.memory_space<any>> -> memref<1x128xf32, #tpu.memory_space<any>>
    %256 = tpu.memref_squeeze %255 : memref<1x128xf32, #tpu.memory_space<any>> -> memref<128xf32, #tpu.memory_space<any>>
    %c0_i32_155 = arith.constant 0 : i32
    %257 = tpu.memref_slice %arg5[%c0_i32_151, %c25_i32_152, %c0_i32_155] : memref<2x64x128xf32, #tpu.memory_space<vmem>> -> memref<1x1x128xf32, #tpu.memory_space<vmem>>
    %258 = tpu.memref_squeeze %257 : memref<1x1x128xf32, #tpu.memory_space<vmem>> -> memref<128xf32, #tpu.memory_space<vmem>>
    %259 = tpu.memref_slice %arg6[%c0_i32_153] : memref<2x!tpu.dma_semaphore, #tpu.memory_space<semaphore_mem>> -> memref<1x!tpu.dma_semaphore, #tpu.memory_space<semaphore_mem>>
    %260 = tpu.memref_squeeze %259 : memref<1x!tpu.dma_semaphore, #tpu.memory_space<semaphore_mem>> -> memref<!tpu.dma_semaphore, #tpu.memory_space<semaphore_mem>>
    tpu.enqueue_dma source(%256 : memref<128xf32, #tpu.memory_space<any>>) target(%258 : memref<128xf32, #tpu.memory_space<vmem>>) target_semaphore(%260 : memref<!tpu.dma_semaphore, #tpu.memory_space<semaphore_mem>>)
    %c0_i32_156 = arith.constant 0 : i32
    %261 = arith.addi %0, %c0_i32_156 : i32
    %c26_i32 = arith.constant 26 : i32
    %262 = arith.addi %261, %c26_i32 : i32
    %263 = arith.index_cast %262 : i32 to index
    %264 = memref.load %arg1[%263] : memref<256xi32, #tpu.memory_space<smem>>
    %c0_i32_157 = arith.constant 0 : i32
    %c26_i32_158 = arith.constant 26 : i32
    %c0_i32_159 = arith.constant 0 : i32
    %c0_i32_160 = arith.constant 0 : i32
    %265 = tpu.memref_slice %arg4[%264, %c0_i32_160] : memref<512x128xf32, #tpu.memory_space<any>> -> memref<1x128xf32, #tpu.memory_space<any>>
    %266 = tpu.memref_squeeze %265 : memref<1x128xf32, #tpu.memory_space<any>> -> memref<128xf32, #tpu.memory_space<any>>
    %c0_i32_161 = arith.constant 0 : i32
    %267 = tpu.memref_slice %arg5[%c0_i32_157, %c26_i32_158, %c0_i32_161] : memref<2x64x128xf32, #tpu.memory_space<vmem>> -> memref<1x1x128xf32, #tpu.memory_space<vmem>>
    %268 = tpu.memref_squeeze %267 : memref<1x1x128xf32, #tpu.memory_space<vmem>> -> memref<128xf32, #tpu.memory_space<vmem>>
    %269 = tpu.memref_slice %arg6[%c0_i32_159] : memref<2x!tpu.dma_semaphore, #tpu.memory_space<semaphore_mem>> -> memref<1x!tpu.dma_semaphore, #tpu.memory_space<semaphore_mem>>
    %270 = tpu.memref_squeeze %269 : memref<1x!tpu.dma_semaphore, #tpu.memory_space<semaphore_mem>> -> memref<!tpu.dma_semaphore, #tpu.memory_space<semaphore_mem>>
    tpu.enqueue_dma source(%266 : memref<128xf32, #tpu.memory_space<any>>) target(%268 : memref<128xf32, #tpu.memory_space<vmem>>) target_semaphore(%270 : memref<!tpu.dma_semaphore, #tpu.memory_space<semaphore_mem>>)
    %c0_i32_162 = arith.constant 0 : i32
    %271 = arith.addi %0, %c0_i32_162 : i32
    %c27_i32 = arith.constant 27 : i32
    %272 = arith.addi %271, %c27_i32 : i32
    %273 = arith.index_cast %272 : i32 to index
    %274 = memref.load %arg1[%273] : memref<256xi32, #tpu.memory_space<smem>>
    %c0_i32_163 = arith.constant 0 : i32
    %c27_i32_164 = arith.constant 27 : i32
    %c0_i32_165 = arith.constant 0 : i32
    %c0_i32_166 = arith.constant 0 : i32
    %275 = tpu.memref_slice %arg4[%274, %c0_i32_166] : memref<512x128xf32, #tpu.memory_space<any>> -> memref<1x128xf32, #tpu.memory_space<any>>
    %276 = tpu.memref_squeeze %275 : memref<1x128xf32, #tpu.memory_space<any>> -> memref<128xf32, #tpu.memory_space<any>>
    %c0_i32_167 = arith.constant 0 : i32
    %277 = tpu.memref_slice %arg5[%c0_i32_163, %c27_i32_164, %c0_i32_167] : memref<2x64x128xf32, #tpu.memory_space<vmem>> -> memref<1x1x128xf32, #tpu.memory_space<vmem>>
    %278 = tpu.memref_squeeze %277 : memref<1x1x128xf32, #tpu.memory_space<vmem>> -> memref<128xf32, #tpu.memory_space<vmem>>
    %279 = tpu.memref_slice %arg6[%c0_i32_165] : memref<2x!tpu.dma_semaphore, #tpu.memory_space<semaphore_mem>> -> memref<1x!tpu.dma_semaphore, #tpu.memory_space<semaphore_mem>>
    %280 = tpu.memref_squeeze %279 : memref<1x!tpu.dma_semaphore, #tpu.memory_space<semaphore_mem>> -> memref<!tpu.dma_semaphore, #tpu.memory_space<semaphore_mem>>
    tpu.enqueue_dma source(%276 : memref<128xf32, #tpu.memory_space<any>>) target(%278 : memref<128xf32, #tpu.memory_space<vmem>>) target_semaphore(%280 : memref<!tpu.dma_semaphore, #tpu.memory_space<semaphore_mem>>)
    %c0_i32_168 = arith.constant 0 : i32
    %281 = arith.addi %0, %c0_i32_168 : i32
    %c28_i32 = arith.constant 28 : i32
    %282 = arith.addi %281, %c28_i32 : i32
    %283 = arith.index_cast %282 : i32 to index
    %284 = memref.load %arg1[%283] : memref<256xi32, #tpu.memory_space<smem>>
    %c0_i32_169 = arith.constant 0 : i32
    %c28_i32_170 = arith.constant 28 : i32
    %c0_i32_171 = arith.constant 0 : i32
    %c0_i32_172 = arith.constant 0 : i32
    %285 = tpu.memref_slice %arg4[%284, %c0_i32_172] : memref<512x128xf32, #tpu.memory_space<any>> -> memref<1x128xf32, #tpu.memory_space<any>>
    %286 = tpu.memref_squeeze %285 : memref<1x128xf32, #tpu.memory_space<any>> -> memref<128xf32, #tpu.memory_space<any>>
    %c0_i32_173 = arith.constant 0 : i32
    %287 = tpu.memref_slice %arg5[%c0_i32_169, %c28_i32_170, %c0_i32_173] : memref<2x64x128xf32, #tpu.memory_space<vmem>> -> memref<1x1x128xf32, #tpu.memory_space<vmem>>
    %288 = tpu.memref_squeeze %287 : memref<1x1x128xf32, #tpu.memory_space<vmem>> -> memref<128xf32, #tpu.memory_space<vmem>>
    %289 = tpu.memref_slice %arg6[%c0_i32_171] : memref<2x!tpu.dma_semaphore, #tpu.memory_space<semaphore_mem>> -> memref<1x!tpu.dma_semaphore, #tpu.memory_space<semaphore_mem>>
    %290 = tpu.memref_squeeze %289 : memref<1x!tpu.dma_semaphore, #tpu.memory_space<semaphore_mem>> -> memref<!tpu.dma_semaphore, #tpu.memory_space<semaphore_mem>>
    tpu.enqueue_dma source(%286 : memref<128xf32, #tpu.memory_space<any>>) target(%288 : memref<128xf32, #tpu.memory_space<vmem>>) target_semaphore(%290 : memref<!tpu.dma_semaphore, #tpu.memory_space<semaphore_mem>>)
    %c0_i32_174 = arith.constant 0 : i32
    %291 = arith.addi %0, %c0_i32_174 : i32
    %c29_i32 = arith.constant 29 : i32
    %292 = arith.addi %291, %c29_i32 : i32
    %293 = arith.index_cast %292 : i32 to index
    %294 = memref.load %arg1[%293] : memref<256xi32, #tpu.memory_space<smem>>
    %c0_i32_175 = arith.constant 0 : i32
    %c29_i32_176 = arith.constant 29 : i32
    %c0_i32_177 = arith.constant 0 : i32
    %c0_i32_178 = arith.constant 0 : i32
    %295 = tpu.memref_slice %arg4[%294, %c0_i32_178] : memref<512x128xf32, #tpu.memory_space<any>> -> memref<1x128xf32, #tpu.memory_space<any>>
    %296 = tpu.memref_squeeze %295 : memref<1x128xf32, #tpu.memory_space<any>> -> memref<128xf32, #tpu.memory_space<any>>
    %c0_i32_179 = arith.constant 0 : i32
    %297 = tpu.memref_slice %arg5[%c0_i32_175, %c29_i32_176, %c0_i32_179] : memref<2x64x128xf32, #tpu.memory_space<vmem>> -> memref<1x1x128xf32, #tpu.memory_space<vmem>>
    %298 = tpu.memref_squeeze %297 : memref<1x1x128xf32, #tpu.memory_space<vmem>> -> memref<128xf32, #tpu.memory_space<vmem>>
    %299 = tpu.memref_slice %arg6[%c0_i32_177] : memref<2x!tpu.dma_semaphore, #tpu.memory_space<semaphore_mem>> -> memref<1x!tpu.dma_semaphore, #tpu.memory_space<semaphore_mem>>
    %300 = tpu.memref_squeeze %299 : memref<1x!tpu.dma_semaphore, #tpu.memory_space<semaphore_mem>> -> memref<!tpu.dma_semaphore, #tpu.memory_space<semaphore_mem>>
    tpu.enqueue_dma source(%296 : memref<128xf32, #tpu.memory_space<any>>) target(%298 : memref<128xf32, #tpu.memory_space<vmem>>) target_semaphore(%300 : memref<!tpu.dma_semaphore, #tpu.memory_space<semaphore_mem>>)
    %c0_i32_180 = arith.constant 0 : i32
    %301 = arith.addi %0, %c0_i32_180 : i32
    %c30_i32 = arith.constant 30 : i32
    %302 = arith.addi %301, %c30_i32 : i32
    %303 = arith.index_cast %302 : i32 to index
    %304 = memref.load %arg1[%303] : memref<256xi32, #tpu.memory_space<smem>>
    %c0_i32_181 = arith.constant 0 : i32
    %c30_i32_182 = arith.constant 30 : i32
    %c0_i32_183 = arith.constant 0 : i32
    %c0_i32_184 = arith.constant 0 : i32
    %305 = tpu.memref_slice %arg4[%304, %c0_i32_184] : memref<512x128xf32, #tpu.memory_space<any>> -> memref<1x128xf32, #tpu.memory_space<any>>
    %306 = tpu.memref_squeeze %305 : memref<1x128xf32, #tpu.memory_space<any>> -> memref<128xf32, #tpu.memory_space<any>>
    %c0_i32_185 = arith.constant 0 : i32
    %307 = tpu.memref_slice %arg5[%c0_i32_181, %c30_i32_182, %c0_i32_185] : memref<2x64x128xf32, #tpu.memory_space<vmem>> -> memref<1x1x128xf32, #tpu.memory_space<vmem>>
    %308 = tpu.memref_squeeze %307 : memref<1x1x128xf32, #tpu.memory_space<vmem>> -> memref<128xf32, #tpu.memory_space<vmem>>
    %309 = tpu.memref_slice %arg6[%c0_i32_183] : memref<2x!tpu.dma_semaphore, #tpu.memory_space<semaphore_mem>> -> memref<1x!tpu.dma_semaphore, #tpu.memory_space<semaphore_mem>>
    %310 = tpu.memref_squeeze %309 : memref<1x!tpu.dma_semaphore, #tpu.memory_space<semaphore_mem>> -> memref<!tpu.dma_semaphore, #tpu.memory_space<semaphore_mem>>
    tpu.enqueue_dma source(%306 : memref<128xf32, #tpu.memory_space<any>>) target(%308 : memref<128xf32, #tpu.memory_space<vmem>>) target_semaphore(%310 : memref<!tpu.dma_semaphore, #tpu.memory_space<semaphore_mem>>)
    %c0_i32_186 = arith.constant 0 : i32
    %311 = arith.addi %0, %c0_i32_186 : i32
    %c31_i32 = arith.constant 31 : i32
    %312 = arith.addi %311, %c31_i32 : i32
    %313 = arith.index_cast %312 : i32 to index
    %314 = memref.load %arg1[%313] : memref<256xi32, #tpu.memory_space<smem>>
    %c0_i32_187 = arith.constant 0 : i32
    %c31_i32_188 = arith.constant 31 : i32
    %c0_i32_189 = arith.constant 0 : i32
    %c0_i32_190 = arith.constant 0 : i32
    %315 = tpu.memref_slice %arg4[%314, %c0_i32_190] : memref<512x128xf32, #tpu.memory_space<any>> -> memref<1x128xf32, #tpu.memory_space<any>>
    %316 = tpu.memref_squeeze %315 : memref<1x128xf32, #tpu.memory_space<any>> -> memref<128xf32, #tpu.memory_space<any>>
    %c0_i32_191 = arith.constant 0 : i32
    %317 = tpu.memref_slice %arg5[%c0_i32_187, %c31_i32_188, %c0_i32_191] : memref<2x64x128xf32, #tpu.memory_space<vmem>> -> memref<1x1x128xf32, #tpu.memory_space<vmem>>
    %318 = tpu.memref_squeeze %317 : memref<1x1x128xf32, #tpu.memory_space<vmem>> -> memref<128xf32, #tpu.memory_space<vmem>>
    %319 = tpu.memref_slice %arg6[%c0_i32_189] : memref<2x!tpu.dma_semaphore, #tpu.memory_space<semaphore_mem>> -> memref<1x!tpu.dma_semaphore, #tpu.memory_space<semaphore_mem>>
    %320 = tpu.memref_squeeze %319 : memref<1x!tpu.dma_semaphore, #tpu.memory_space<semaphore_mem>> -> memref<!tpu.dma_semaphore, #tpu.memory_space<semaphore_mem>>
    tpu.enqueue_dma source(%316 : memref<128xf32, #tpu.memory_space<any>>) target(%318 : memref<128xf32, #tpu.memory_space<vmem>>) target_semaphore(%320 : memref<!tpu.dma_semaphore, #tpu.memory_space<semaphore_mem>>)
    %c0_i32_192 = arith.constant 0 : i32
    %321 = arith.addi %0, %c0_i32_192 : i32
    %c32_i32 = arith.constant 32 : i32
    %322 = arith.addi %321, %c32_i32 : i32
    %323 = arith.index_cast %322 : i32 to index
    %324 = memref.load %arg1[%323] : memref<256xi32, #tpu.memory_space<smem>>
    %c0_i32_193 = arith.constant 0 : i32
    %c32_i32_194 = arith.constant 32 : i32
    %c0_i32_195 = arith.constant 0 : i32
    %c0_i32_196 = arith.constant 0 : i32
    %325 = tpu.memref_slice %arg4[%324, %c0_i32_196] : memref<512x128xf32, #tpu.memory_space<any>> -> memref<1x128xf32, #tpu.memory_space<any>>
    %326 = tpu.memref_squeeze %325 : memref<1x128xf32, #tpu.memory_space<any>> -> memref<128xf32, #tpu.memory_space<any>>
    %c0_i32_197 = arith.constant 0 : i32
    %327 = tpu.memref_slice %arg5[%c0_i32_193, %c32_i32_194, %c0_i32_197] : memref<2x64x128xf32, #tpu.memory_space<vmem>> -> memref<1x1x128xf32, #tpu.memory_space<vmem>>
    %328 = tpu.memref_squeeze %327 : memref<1x1x128xf32, #tpu.memory_space<vmem>> -> memref<128xf32, #tpu.memory_space<vmem>>
    %329 = tpu.memref_slice %arg6[%c0_i32_195] : memref<2x!tpu.dma_semaphore, #tpu.memory_space<semaphore_mem>> -> memref<1x!tpu.dma_semaphore, #tpu.memory_space<semaphore_mem>>
    %330 = tpu.memref_squeeze %329 : memref<1x!tpu.dma_semaphore, #tpu.memory_space<semaphore_mem>> -> memref<!tpu.dma_semaphore, #tpu.memory_space<semaphore_mem>>
    tpu.enqueue_dma source(%326 : memref<128xf32, #tpu.memory_space<any>>) target(%328 : memref<128xf32, #tpu.memory_space<vmem>>) target_semaphore(%330 : memref<!tpu.dma_semaphore, #tpu.memory_space<semaphore_mem>>)
    %c0_i32_198 = arith.constant 0 : i32
    %331 = arith.addi %0, %c0_i32_198 : i32
    %c33_i32 = arith.constant 33 : i32
    %332 = arith.addi %331, %c33_i32 : i32
    %333 = arith.index_cast %332 : i32 to index
    %334 = memref.load %arg1[%333] : memref<256xi32, #tpu.memory_space<smem>>
    %c0_i32_199 = arith.constant 0 : i32
    %c33_i32_200 = arith.constant 33 : i32
    %c0_i32_201 = arith.constant 0 : i32
    %c0_i32_202 = arith.constant 0 : i32
    %335 = tpu.memref_slice %arg4[%334, %c0_i32_202] : memref<512x128xf32, #tpu.memory_space<any>> -> memref<1x128xf32, #tpu.memory_space<any>>
    %336 = tpu.memref_squeeze %335 : memref<1x128xf32, #tpu.memory_space<any>> -> memref<128xf32, #tpu.memory_space<any>>
    %c0_i32_203 = arith.constant 0 : i32
    %337 = tpu.memref_slice %arg5[%c0_i32_199, %c33_i32_200, %c0_i32_203] : memref<2x64x128xf32, #tpu.memory_space<vmem>> -> memref<1x1x128xf32, #tpu.memory_space<vmem>>
    %338 = tpu.memref_squeeze %337 : memref<1x1x128xf32, #tpu.memory_space<vmem>> -> memref<128xf32, #tpu.memory_space<vmem>>
    %339 = tpu.memref_slice %arg6[%c0_i32_201] : memref<2x!tpu.dma_semaphore, #tpu.memory_space<semaphore_mem>> -> memref<1x!tpu.dma_semaphore, #tpu.memory_space<semaphore_mem>>
    %340 = tpu.memref_squeeze %339 : memref<1x!tpu.dma_semaphore, #tpu.memory_space<semaphore_mem>> -> memref<!tpu.dma_semaphore, #tpu.memory_space<semaphore_mem>>
    tpu.enqueue_dma source(%336 : memref<128xf32, #tpu.memory_space<any>>) target(%338 : memref<128xf32, #tpu.memory_space<vmem>>) target_semaphore(%340 : memref<!tpu.dma_semaphore, #tpu.memory_space<semaphore_mem>>)
    %c0_i32_204 = arith.constant 0 : i32
    %341 = arith.addi %0, %c0_i32_204 : i32
    %c34_i32 = arith.constant 34 : i32
    %342 = arith.addi %341, %c34_i32 : i32
    %343 = arith.index_cast %342 : i32 to index
    %344 = memref.load %arg1[%343] : memref<256xi32, #tpu.memory_space<smem>>
    %c0_i32_205 = arith.constant 0 : i32
    %c34_i32_206 = arith.constant 34 : i32
    %c0_i32_207 = arith.constant 0 : i32
    %c0_i32_208 = arith.constant 0 : i32
    %345 = tpu.memref_slice %arg4[%344, %c0_i32_208] : memref<512x128xf32, #tpu.memory_space<any>> -> memref<1x128xf32, #tpu.memory_space<any>>
    %346 = tpu.memref_squeeze %345 : memref<1x128xf32, #tpu.memory_space<any>> -> memref<128xf32, #tpu.memory_space<any>>
    %c0_i32_209 = arith.constant 0 : i32
    %347 = tpu.memref_slice %arg5[%c0_i32_205, %c34_i32_206, %c0_i32_209] : memref<2x64x128xf32, #tpu.memory_space<vmem>> -> memref<1x1x128xf32, #tpu.memory_space<vmem>>
    %348 = tpu.memref_squeeze %347 : memref<1x1x128xf32, #tpu.memory_space<vmem>> -> memref<128xf32, #tpu.memory_space<vmem>>
    %349 = tpu.memref_slice %arg6[%c0_i32_207] : memref<2x!tpu.dma_semaphore, #tpu.memory_space<semaphore_mem>> -> memref<1x!tpu.dma_semaphore, #tpu.memory_space<semaphore_mem>>
    %350 = tpu.memref_squeeze %349 : memref<1x!tpu.dma_semaphore, #tpu.memory_space<semaphore_mem>> -> memref<!tpu.dma_semaphore, #tpu.memory_space<semaphore_mem>>
    tpu.enqueue_dma source(%346 : memref<128xf32, #tpu.memory_space<any>>) target(%348 : memref<128xf32, #tpu.memory_space<vmem>>) target_semaphore(%350 : memref<!tpu.dma_semaphore, #tpu.memory_space<semaphore_mem>>)
    %c0_i32_210 = arith.constant 0 : i32
    %351 = arith.addi %0, %c0_i32_210 : i32
    %c35_i32 = arith.constant 35 : i32
    %352 = arith.addi %351, %c35_i32 : i32
    %353 = arith.index_cast %352 : i32 to index
    %354 = memref.load %arg1[%353] : memref<256xi32, #tpu.memory_space<smem>>
    %c0_i32_211 = arith.constant 0 : i32
    %c35_i32_212 = arith.constant 35 : i32
    %c0_i32_213 = arith.constant 0 : i32
    %c0_i32_214 = arith.constant 0 : i32
    %355 = tpu.memref_slice %arg4[%354, %c0_i32_214] : memref<512x128xf32, #tpu.memory_space<any>> -> memref<1x128xf32, #tpu.memory_space<any>>
    %356 = tpu.memref_squeeze %355 : memref<1x128xf32, #tpu.memory_space<any>> -> memref<128xf32, #tpu.memory_space<any>>
    %c0_i32_215 = arith.constant 0 : i32
    %357 = tpu.memref_slice %arg5[%c0_i32_211, %c35_i32_212, %c0_i32_215] : memref<2x64x128xf32, #tpu.memory_space<vmem>> -> memref<1x1x128xf32, #tpu.memory_space<vmem>>
    %358 = tpu.memref_squeeze %357 : memref<1x1x128xf32, #tpu.memory_space<vmem>> -> memref<128xf32, #tpu.memory_space<vmem>>
    %359 = tpu.memref_slice %arg6[%c0_i32_213] : memref<2x!tpu.dma_semaphore, #tpu.memory_space<semaphore_mem>> -> memref<1x!tpu.dma_semaphore, #tpu.memory_space<semaphore_mem>>
    %360 = tpu.memref_squeeze %359 : memref<1x!tpu.dma_semaphore, #tpu.memory_space<semaphore_mem>> -> memref<!tpu.dma_semaphore, #tpu.memory_space<semaphore_mem>>
    tpu.enqueue_dma source(%356 : memref<128xf32, #tpu.memory_space<any>>) target(%358 : memref<128xf32, #tpu.memory_space<vmem>>) target_semaphore(%360 : memref<!tpu.dma_semaphore, #tpu.memory_space<semaphore_mem>>)
    %c0_i32_216 = arith.constant 0 : i32
    %361 = arith.addi %0, %c0_i32_216 : i32
    %c36_i32 = arith.constant 36 : i32
    %362 = arith.addi %361, %c36_i32 : i32
    %363 = arith.index_cast %362 : i32 to index
    %364 = memref.load %arg1[%363] : memref<256xi32, #tpu.memory_space<smem>>
    %c0_i32_217 = arith.constant 0 : i32
    %c36_i32_218 = arith.constant 36 : i32
    %c0_i32_219 = arith.constant 0 : i32
    %c0_i32_220 = arith.constant 0 : i32
    %365 = tpu.memref_slice %arg4[%364, %c0_i32_220] : memref<512x128xf32, #tpu.memory_space<any>> -> memref<1x128xf32, #tpu.memory_space<any>>
    %366 = tpu.memref_squeeze %365 : memref<1x128xf32, #tpu.memory_space<any>> -> memref<128xf32, #tpu.memory_space<any>>
    %c0_i32_221 = arith.constant 0 : i32
    %367 = tpu.memref_slice %arg5[%c0_i32_217, %c36_i32_218, %c0_i32_221] : memref<2x64x128xf32, #tpu.memory_space<vmem>> -> memref<1x1x128xf32, #tpu.memory_space<vmem>>
    %368 = tpu.memref_squeeze %367 : memref<1x1x128xf32, #tpu.memory_space<vmem>> -> memref<128xf32, #tpu.memory_space<vmem>>
    %369 = tpu.memref_slice %arg6[%c0_i32_219] : memref<2x!tpu.dma_semaphore, #tpu.memory_space<semaphore_mem>> -> memref<1x!tpu.dma_semaphore, #tpu.memory_space<semaphore_mem>>
    %370 = tpu.memref_squeeze %369 : memref<1x!tpu.dma_semaphore, #tpu.memory_space<semaphore_mem>> -> memref<!tpu.dma_semaphore, #tpu.memory_space<semaphore_mem>>
    tpu.enqueue_dma source(%366 : memref<128xf32, #tpu.memory_space<any>>) target(%368 : memref<128xf32, #tpu.memory_space<vmem>>) target_semaphore(%370 : memref<!tpu.dma_semaphore, #tpu.memory_space<semaphore_mem>>)
    %c0_i32_222 = arith.constant 0 : i32
    %371 = arith.addi %0, %c0_i32_222 : i32
    %c37_i32 = arith.constant 37 : i32
    %372 = arith.addi %371, %c37_i32 : i32
    %373 = arith.index_cast %372 : i32 to index
    %374 = memref.load %arg1[%373] : memref<256xi32, #tpu.memory_space<smem>>
    %c0_i32_223 = arith.constant 0 : i32
    %c37_i32_224 = arith.constant 37 : i32
    %c0_i32_225 = arith.constant 0 : i32
    %c0_i32_226 = arith.constant 0 : i32
    %375 = tpu.memref_slice %arg4[%374, %c0_i32_226] : memref<512x128xf32, #tpu.memory_space<any>> -> memref<1x128xf32, #tpu.memory_space<any>>
    %376 = tpu.memref_squeeze %375 : memref<1x128xf32, #tpu.memory_space<any>> -> memref<128xf32, #tpu.memory_space<any>>
    %c0_i32_227 = arith.constant 0 : i32
    %377 = tpu.memref_slice %arg5[%c0_i32_223, %c37_i32_224, %c0_i32_227] : memref<2x64x128xf32, #tpu.memory_space<vmem>> -> memref<1x1x128xf32, #tpu.memory_space<vmem>>
    %378 = tpu.memref_squeeze %377 : memref<1x1x128xf32, #tpu.memory_space<vmem>> -> memref<128xf32, #tpu.memory_space<vmem>>
    %379 = tpu.memref_slice %arg6[%c0_i32_225] : memref<2x!tpu.dma_semaphore, #tpu.memory_space<semaphore_mem>> -> memref<1x!tpu.dma_semaphore, #tpu.memory_space<semaphore_mem>>
    %380 = tpu.memref_squeeze %379 : memref<1x!tpu.dma_semaphore, #tpu.memory_space<semaphore_mem>> -> memref<!tpu.dma_semaphore, #tpu.memory_space<semaphore_mem>>
    tpu.enqueue_dma source(%376 : memref<128xf32, #tpu.memory_space<any>>) target(%378 : memref<128xf32, #tpu.memory_space<vmem>>) target_semaphore(%380 : memref<!tpu.dma_semaphore, #tpu.memory_space<semaphore_mem>>)
    %c0_i32_228 = arith.constant 0 : i32
    %381 = arith.addi %0, %c0_i32_228 : i32
    %c38_i32 = arith.constant 38 : i32
    %382 = arith.addi %381, %c38_i32 : i32
    %383 = arith.index_cast %382 : i32 to index
    %384 = memref.load %arg1[%383] : memref<256xi32, #tpu.memory_space<smem>>
    %c0_i32_229 = arith.constant 0 : i32
    %c38_i32_230 = arith.constant 38 : i32
    %c0_i32_231 = arith.constant 0 : i32
    %c0_i32_232 = arith.constant 0 : i32
    %385 = tpu.memref_slice %arg4[%384, %c0_i32_232] : memref<512x128xf32, #tpu.memory_space<any>> -> memref<1x128xf32, #tpu.memory_space<any>>
    %386 = tpu.memref_squeeze %385 : memref<1x128xf32, #tpu.memory_space<any>> -> memref<128xf32, #tpu.memory_space<any>>
    %c0_i32_233 = arith.constant 0 : i32
    %387 = tpu.memref_slice %arg5[%c0_i32_229, %c38_i32_230, %c0_i32_233] : memref<2x64x128xf32, #tpu.memory_space<vmem>> -> memref<1x1x128xf32, #tpu.memory_space<vmem>>
    %388 = tpu.memref_squeeze %387 : memref<1x1x128xf32, #tpu.memory_space<vmem>> -> memref<128xf32, #tpu.memory_space<vmem>>
    %389 = tpu.memref_slice %arg6[%c0_i32_231] : memref<2x!tpu.dma_semaphore, #tpu.memory_space<semaphore_mem>> -> memref<1x!tpu.dma_semaphore, #tpu.memory_space<semaphore_mem>>
    %390 = tpu.memref_squeeze %389 : memref<1x!tpu.dma_semaphore, #tpu.memory_space<semaphore_mem>> -> memref<!tpu.dma_semaphore, #tpu.memory_space<semaphore_mem>>
    tpu.enqueue_dma source(%386 : memref<128xf32, #tpu.memory_space<any>>) target(%388 : memref<128xf32, #tpu.memory_space<vmem>>) target_semaphore(%390 : memref<!tpu.dma_semaphore, #tpu.memory_space<semaphore_mem>>)
    %c0_i32_234 = arith.constant 0 : i32
    %391 = arith.addi %0, %c0_i32_234 : i32
    %c39_i32 = arith.constant 39 : i32
    %392 = arith.addi %391, %c39_i32 : i32
    %393 = arith.index_cast %392 : i32 to index
    %394 = memref.load %arg1[%393] : memref<256xi32, #tpu.memory_space<smem>>
    %c0_i32_235 = arith.constant 0 : i32
    %c39_i32_236 = arith.constant 39 : i32
    %c0_i32_237 = arith.constant 0 : i32
    %c0_i32_238 = arith.constant 0 : i32
    %395 = tpu.memref_slice %arg4[%394, %c0_i32_238] : memref<512x128xf32, #tpu.memory_space<any>> -> memref<1x128xf32, #tpu.memory_space<any>>
    %396 = tpu.memref_squeeze %395 : memref<1x128xf32, #tpu.memory_space<any>> -> memref<128xf32, #tpu.memory_space<any>>
    %c0_i32_239 = arith.constant 0 : i32
    %397 = tpu.memref_slice %arg5[%c0_i32_235, %c39_i32_236, %c0_i32_239] : memref<2x64x128xf32, #tpu.memory_space<vmem>> -> memref<1x1x128xf32, #tpu.memory_space<vmem>>
    %398 = tpu.memref_squeeze %397 : memref<1x1x128xf32, #tpu.memory_space<vmem>> -> memref<128xf32, #tpu.memory_space<vmem>>
    %399 = tpu.memref_slice %arg6[%c0_i32_237] : memref<2x!tpu.dma_semaphore, #tpu.memory_space<semaphore_mem>> -> memref<1x!tpu.dma_semaphore, #tpu.memory_space<semaphore_mem>>
    %400 = tpu.memref_squeeze %399 : memref<1x!tpu.dma_semaphore, #tpu.memory_space<semaphore_mem>> -> memref<!tpu.dma_semaphore, #tpu.memory_space<semaphore_mem>>
    tpu.enqueue_dma source(%396 : memref<128xf32, #tpu.memory_space<any>>) target(%398 : memref<128xf32, #tpu.memory_space<vmem>>) target_semaphore(%400 : memref<!tpu.dma_semaphore, #tpu.memory_space<semaphore_mem>>)
    %c0_i32_240 = arith.constant 0 : i32
    %401 = arith.addi %0, %c0_i32_240 : i32
    %c40_i32 = arith.constant 40 : i32
    %402 = arith.addi %401, %c40_i32 : i32
    %403 = arith.index_cast %402 : i32 to index
    %404 = memref.load %arg1[%403] : memref<256xi32, #tpu.memory_space<smem>>
    %c0_i32_241 = arith.constant 0 : i32
    %c40_i32_242 = arith.constant 40 : i32
    %c0_i32_243 = arith.constant 0 : i32
    %c0_i32_244 = arith.constant 0 : i32
    %405 = tpu.memref_slice %arg4[%404, %c0_i32_244] : memref<512x128xf32, #tpu.memory_space<any>> -> memref<1x128xf32, #tpu.memory_space<any>>
    %406 = tpu.memref_squeeze %405 : memref<1x128xf32, #tpu.memory_space<any>> -> memref<128xf32, #tpu.memory_space<any>>
    %c0_i32_245 = arith.constant 0 : i32
    %407 = tpu.memref_slice %arg5[%c0_i32_241, %c40_i32_242, %c0_i32_245] : memref<2x64x128xf32, #tpu.memory_space<vmem>> -> memref<1x1x128xf32, #tpu.memory_space<vmem>>
    %408 = tpu.memref_squeeze %407 : memref<1x1x128xf32, #tpu.memory_space<vmem>> -> memref<128xf32, #tpu.memory_space<vmem>>
    %409 = tpu.memref_slice %arg6[%c0_i32_243] : memref<2x!tpu.dma_semaphore, #tpu.memory_space<semaphore_mem>> -> memref<1x!tpu.dma_semaphore, #tpu.memory_space<semaphore_mem>>
    %410 = tpu.memref_squeeze %409 : memref<1x!tpu.dma_semaphore, #tpu.memory_space<semaphore_mem>> -> memref<!tpu.dma_semaphore, #tpu.memory_space<semaphore_mem>>
    tpu.enqueue_dma source(%406 : memref<128xf32, #tpu.memory_space<any>>) target(%408 : memref<128xf32, #tpu.memory_space<vmem>>) target_semaphore(%410 : memref<!tpu.dma_semaphore, #tpu.memory_space<semaphore_mem>>)
    %c0_i32_246 = arith.constant 0 : i32
    %411 = arith.addi %0, %c0_i32_246 : i32
    %c41_i32 = arith.constant 41 : i32
    %412 = arith.addi %411, %c41_i32 : i32
    %413 = arith.index_cast %412 : i32 to index
    %414 = memref.load %arg1[%413] : memref<256xi32, #tpu.memory_space<smem>>
    %c0_i32_247 = arith.constant 0 : i32
    %c41_i32_248 = arith.constant 41 : i32
    %c0_i32_249 = arith.constant 0 : i32
    %c0_i32_250 = arith.constant 0 : i32
    %415 = tpu.memref_slice %arg4[%414, %c0_i32_250] : memref<512x128xf32, #tpu.memory_space<any>> -> memref<1x128xf32, #tpu.memory_space<any>>
    %416 = tpu.memref_squeeze %415 : memref<1x128xf32, #tpu.memory_space<any>> -> memref<128xf32, #tpu.memory_space<any>>
    %c0_i32_251 = arith.constant 0 : i32
    %417 = tpu.memref_slice %arg5[%c0_i32_247, %c41_i32_248, %c0_i32_251] : memref<2x64x128xf32, #tpu.memory_space<vmem>> -> memref<1x1x128xf32, #tpu.memory_space<vmem>>
    %418 = tpu.memref_squeeze %417 : memref<1x1x128xf32, #tpu.memory_space<vmem>> -> memref<128xf32, #tpu.memory_space<vmem>>
    %419 = tpu.memref_slice %arg6[%c0_i32_249] : memref<2x!tpu.dma_semaphore, #tpu.memory_space<semaphore_mem>> -> memref<1x!tpu.dma_semaphore, #tpu.memory_space<semaphore_mem>>
    %420 = tpu.memref_squeeze %419 : memref<1x!tpu.dma_semaphore, #tpu.memory_space<semaphore_mem>> -> memref<!tpu.dma_semaphore, #tpu.memory_space<semaphore_mem>>
    tpu.enqueue_dma source(%416 : memref<128xf32, #tpu.memory_space<any>>) target(%418 : memref<128xf32, #tpu.memory_space<vmem>>) target_semaphore(%420 : memref<!tpu.dma_semaphore, #tpu.memory_space<semaphore_mem>>)
    %c0_i32_252 = arith.constant 0 : i32
    %421 = arith.addi %0, %c0_i32_252 : i32
    %c42_i32 = arith.constant 42 : i32
    %422 = arith.addi %421, %c42_i32 : i32
    %423 = arith.index_cast %422 : i32 to index
    %424 = memref.load %arg1[%423] : memref<256xi32, #tpu.memory_space<smem>>
    %c0_i32_253 = arith.constant 0 : i32
    %c42_i32_254 = arith.constant 42 : i32
    %c0_i32_255 = arith.constant 0 : i32
    %c0_i32_256 = arith.constant 0 : i32
    %425 = tpu.memref_slice %arg4[%424, %c0_i32_256] : memref<512x128xf32, #tpu.memory_space<any>> -> memref<1x128xf32, #tpu.memory_space<any>>
    %426 = tpu.memref_squeeze %425 : memref<1x128xf32, #tpu.memory_space<any>> -> memref<128xf32, #tpu.memory_space<any>>
    %c0_i32_257 = arith.constant 0 : i32
    %427 = tpu.memref_slice %arg5[%c0_i32_253, %c42_i32_254, %c0_i32_257] : memref<2x64x128xf32, #tpu.memory_space<vmem>> -> memref<1x1x128xf32, #tpu.memory_space<vmem>>
    %428 = tpu.memref_squeeze %427 : memref<1x1x128xf32, #tpu.memory_space<vmem>> -> memref<128xf32, #tpu.memory_space<vmem>>
    %429 = tpu.memref_slice %arg6[%c0_i32_255] : memref<2x!tpu.dma_semaphore, #tpu.memory_space<semaphore_mem>> -> memref<1x!tpu.dma_semaphore, #tpu.memory_space<semaphore_mem>>
    %430 = tpu.memref_squeeze %429 : memref<1x!tpu.dma_semaphore, #tpu.memory_space<semaphore_mem>> -> memref<!tpu.dma_semaphore, #tpu.memory_space<semaphore_mem>>
    tpu.enqueue_dma source(%426 : memref<128xf32, #tpu.memory_space<any>>) target(%428 : memref<128xf32, #tpu.memory_space<vmem>>) target_semaphore(%430 : memref<!tpu.dma_semaphore, #tpu.memory_space<semaphore_mem>>)
    %c0_i32_258 = arith.constant 0 : i32
    %431 = arith.addi %0, %c0_i32_258 : i32
    %c43_i32 = arith.constant 43 : i32
    %432 = arith.addi %431, %c43_i32 : i32
    %433 = arith.index_cast %432 : i32 to index
    %434 = memref.load %arg1[%433] : memref<256xi32, #tpu.memory_space<smem>>
    %c0_i32_259 = arith.constant 0 : i32
    %c43_i32_260 = arith.constant 43 : i32
    %c0_i32_261 = arith.constant 0 : i32
    %c0_i32_262 = arith.constant 0 : i32
    %435 = tpu.memref_slice %arg4[%434, %c0_i32_262] : memref<512x128xf32, #tpu.memory_space<any>> -> memref<1x128xf32, #tpu.memory_space<any>>
    %436 = tpu.memref_squeeze %435 : memref<1x128xf32, #tpu.memory_space<any>> -> memref<128xf32, #tpu.memory_space<any>>
    %c0_i32_263 = arith.constant 0 : i32
    %437 = tpu.memref_slice %arg5[%c0_i32_259, %c43_i32_260, %c0_i32_263] : memref<2x64x128xf32, #tpu.memory_space<vmem>> -> memref<1x1x128xf32, #tpu.memory_space<vmem>>
    %438 = tpu.memref_squeeze %437 : memref<1x1x128xf32, #tpu.memory_space<vmem>> -> memref<128xf32, #tpu.memory_space<vmem>>
    %439 = tpu.memref_slice %arg6[%c0_i32_261] : memref<2x!tpu.dma_semaphore, #tpu.memory_space<semaphore_mem>> -> memref<1x!tpu.dma_semaphore, #tpu.memory_space<semaphore_mem>>
    %440 = tpu.memref_squeeze %439 : memref<1x!tpu.dma_semaphore, #tpu.memory_space<semaphore_mem>> -> memref<!tpu.dma_semaphore, #tpu.memory_space<semaphore_mem>>
    tpu.enqueue_dma source(%436 : memref<128xf32, #tpu.memory_space<any>>) target(%438 : memref<128xf32, #tpu.memory_space<vmem>>) target_semaphore(%440 : memref<!tpu.dma_semaphore, #tpu.memory_space<semaphore_mem>>)
    %c0_i32_264 = arith.constant 0 : i32
    %441 = arith.addi %0, %c0_i32_264 : i32
    %c44_i32 = arith.constant 44 : i32
    %442 = arith.addi %441, %c44_i32 : i32
    %443 = arith.index_cast %442 : i32 to index
    %444 = memref.load %arg1[%443] : memref<256xi32, #tpu.memory_space<smem>>
    %c0_i32_265 = arith.constant 0 : i32
    %c44_i32_266 = arith.constant 44 : i32
    %c0_i32_267 = arith.constant 0 : i32
    %c0_i32_268 = arith.constant 0 : i32
    %445 = tpu.memref_slice %arg4[%444, %c0_i32_268] : memref<512x128xf32, #tpu.memory_space<any>> -> memref<1x128xf32, #tpu.memory_space<any>>
    %446 = tpu.memref_squeeze %445 : memref<1x128xf32, #tpu.memory_space<any>> -> memref<128xf32, #tpu.memory_space<any>>
    %c0_i32_269 = arith.constant 0 : i32
    %447 = tpu.memref_slice %arg5[%c0_i32_265, %c44_i32_266, %c0_i32_269] : memref<2x64x128xf32, #tpu.memory_space<vmem>> -> memref<1x1x128xf32, #tpu.memory_space<vmem>>
    %448 = tpu.memref_squeeze %447 : memref<1x1x128xf32, #tpu.memory_space<vmem>> -> memref<128xf32, #tpu.memory_space<vmem>>
    %449 = tpu.memref_slice %arg6[%c0_i32_267] : memref<2x!tpu.dma_semaphore, #tpu.memory_space<semaphore_mem>> -> memref<1x!tpu.dma_semaphore, #tpu.memory_space<semaphore_mem>>
    %450 = tpu.memref_squeeze %449 : memref<1x!tpu.dma_semaphore, #tpu.memory_space<semaphore_mem>> -> memref<!tpu.dma_semaphore, #tpu.memory_space<semaphore_mem>>
    tpu.enqueue_dma source(%446 : memref<128xf32, #tpu.memory_space<any>>) target(%448 : memref<128xf32, #tpu.memory_space<vmem>>) target_semaphore(%450 : memref<!tpu.dma_semaphore, #tpu.memory_space<semaphore_mem>>)
    %c0_i32_270 = arith.constant 0 : i32
    %451 = arith.addi %0, %c0_i32_270 : i32
    %c45_i32 = arith.constant 45 : i32
    %452 = arith.addi %451, %c45_i32 : i32
    %453 = arith.index_cast %452 : i32 to index
    %454 = memref.load %arg1[%453] : memref<256xi32, #tpu.memory_space<smem>>
    %c0_i32_271 = arith.constant 0 : i32
    %c45_i32_272 = arith.constant 45 : i32
    %c0_i32_273 = arith.constant 0 : i32
    %c0_i32_274 = arith.constant 0 : i32
    %455 = tpu.memref_slice %arg4[%454, %c0_i32_274] : memref<512x128xf32, #tpu.memory_space<any>> -> memref<1x128xf32, #tpu.memory_space<any>>
    %456 = tpu.memref_squeeze %455 : memref<1x128xf32, #tpu.memory_space<any>> -> memref<128xf32, #tpu.memory_space<any>>
    %c0_i32_275 = arith.constant 0 : i32
    %457 = tpu.memref_slice %arg5[%c0_i32_271, %c45_i32_272, %c0_i32_275] : memref<2x64x128xf32, #tpu.memory_space<vmem>> -> memref<1x1x128xf32, #tpu.memory_space<vmem>>
    %458 = tpu.memref_squeeze %457 : memref<1x1x128xf32, #tpu.memory_space<vmem>> -> memref<128xf32, #tpu.memory_space<vmem>>
    %459 = tpu.memref_slice %arg6[%c0_i32_273] : memref<2x!tpu.dma_semaphore, #tpu.memory_space<semaphore_mem>> -> memref<1x!tpu.dma_semaphore, #tpu.memory_space<semaphore_mem>>
    %460 = tpu.memref_squeeze %459 : memref<1x!tpu.dma_semaphore, #tpu.memory_space<semaphore_mem>> -> memref<!tpu.dma_semaphore, #tpu.memory_space<semaphore_mem>>
    tpu.enqueue_dma source(%456 : memref<128xf32, #tpu.memory_space<any>>) target(%458 : memref<128xf32, #tpu.memory_space<vmem>>) target_semaphore(%460 : memref<!tpu.dma_semaphore, #tpu.memory_space<semaphore_mem>>)
    %c0_i32_276 = arith.constant 0 : i32
    %461 = arith.addi %0, %c0_i32_276 : i32
    %c46_i32 = arith.constant 46 : i32
    %462 = arith.addi %461, %c46_i32 : i32
    %463 = arith.index_cast %462 : i32 to index
    %464 = memref.load %arg1[%463] : memref<256xi32, #tpu.memory_space<smem>>
    %c0_i32_277 = arith.constant 0 : i32
    %c46_i32_278 = arith.constant 46 : i32
    %c0_i32_279 = arith.constant 0 : i32
    %c0_i32_280 = arith.constant 0 : i32
    %465 = tpu.memref_slice %arg4[%464, %c0_i32_280] : memref<512x128xf32, #tpu.memory_space<any>> -> memref<1x128xf32, #tpu.memory_space<any>>
    %466 = tpu.memref_squeeze %465 : memref<1x128xf32, #tpu.memory_space<any>> -> memref<128xf32, #tpu.memory_space<any>>
    %c0_i32_281 = arith.constant 0 : i32
    %467 = tpu.memref_slice %arg5[%c0_i32_277, %c46_i32_278, %c0_i32_281] : memref<2x64x128xf32, #tpu.memory_space<vmem>> -> memref<1x1x128xf32, #tpu.memory_space<vmem>>
    %468 = tpu.memref_squeeze %467 : memref<1x1x128xf32, #tpu.memory_space<vmem>> -> memref<128xf32, #tpu.memory_space<vmem>>
    %469 = tpu.memref_slice %arg6[%c0_i32_279] : memref<2x!tpu.dma_semaphore, #tpu.memory_space<semaphore_mem>> -> memref<1x!tpu.dma_semaphore, #tpu.memory_space<semaphore_mem>>
    %470 = tpu.memref_squeeze %469 : memref<1x!tpu.dma_semaphore, #tpu.memory_space<semaphore_mem>> -> memref<!tpu.dma_semaphore, #tpu.memory_space<semaphore_mem>>
    tpu.enqueue_dma source(%466 : memref<128xf32, #tpu.memory_space<any>>) target(%468 : memref<128xf32, #tpu.memory_space<vmem>>) target_semaphore(%470 : memref<!tpu.dma_semaphore, #tpu.memory_space<semaphore_mem>>)
    %c0_i32_282 = arith.constant 0 : i32
    %471 = arith.addi %0, %c0_i32_282 : i32
    %c47_i32 = arith.constant 47 : i32
    %472 = arith.addi %471, %c47_i32 : i32
    %473 = arith.index_cast %472 : i32 to index
    %474 = memref.load %arg1[%473] : memref<256xi32, #tpu.memory_space<smem>>
    %c0_i32_283 = arith.constant 0 : i32
    %c47_i32_284 = arith.constant 47 : i32
    %c0_i32_285 = arith.constant 0 : i32
    %c0_i32_286 = arith.constant 0 : i32
    %475 = tpu.memref_slice %arg4[%474, %c0_i32_286] : memref<512x128xf32, #tpu.memory_space<any>> -> memref<1x128xf32, #tpu.memory_space<any>>
    %476 = tpu.memref_squeeze %475 : memref<1x128xf32, #tpu.memory_space<any>> -> memref<128xf32, #tpu.memory_space<any>>
    %c0_i32_287 = arith.constant 0 : i32
    %477 = tpu.memref_slice %arg5[%c0_i32_283, %c47_i32_284, %c0_i32_287] : memref<2x64x128xf32, #tpu.memory_space<vmem>> -> memref<1x1x128xf32, #tpu.memory_space<vmem>>
    %478 = tpu.memref_squeeze %477 : memref<1x1x128xf32, #tpu.memory_space<vmem>> -> memref<128xf32, #tpu.memory_space<vmem>>
    %479 = tpu.memref_slice %arg6[%c0_i32_285] : memref<2x!tpu.dma_semaphore, #tpu.memory_space<semaphore_mem>> -> memref<1x!tpu.dma_semaphore, #tpu.memory_space<semaphore_mem>>
    %480 = tpu.memref_squeeze %479 : memref<1x!tpu.dma_semaphore, #tpu.memory_space<semaphore_mem>> -> memref<!tpu.dma_semaphore, #tpu.memory_space<semaphore_mem>>
    tpu.enqueue_dma source(%476 : memref<128xf32, #tpu.memory_space<any>>) target(%478 : memref<128xf32, #tpu.memory_space<vmem>>) target_semaphore(%480 : memref<!tpu.dma_semaphore, #tpu.memory_space<semaphore_mem>>)
    %c0_i32_288 = arith.constant 0 : i32
    %481 = arith.addi %0, %c0_i32_288 : i32
    %c48_i32 = arith.constant 48 : i32
    %482 = arith.addi %481, %c48_i32 : i32
    %483 = arith.index_cast %482 : i32 to index
    %484 = memref.load %arg1[%483] : memref<256xi32, #tpu.memory_space<smem>>
    %c0_i32_289 = arith.constant 0 : i32
    %c48_i32_290 = arith.constant 48 : i32
    %c0_i32_291 = arith.constant 0 : i32
    %c0_i32_292 = arith.constant 0 : i32
    %485 = tpu.memref_slice %arg4[%484, %c0_i32_292] : memref<512x128xf32, #tpu.memory_space<any>> -> memref<1x128xf32, #tpu.memory_space<any>>
    %486 = tpu.memref_squeeze %485 : memref<1x128xf32, #tpu.memory_space<any>> -> memref<128xf32, #tpu.memory_space<any>>
    %c0_i32_293 = arith.constant 0 : i32
    %487 = tpu.memref_slice %arg5[%c0_i32_289, %c48_i32_290, %c0_i32_293] : memref<2x64x128xf32, #tpu.memory_space<vmem>> -> memref<1x1x128xf32, #tpu.memory_space<vmem>>
    %488 = tpu.memref_squeeze %487 : memref<1x1x128xf32, #tpu.memory_space<vmem>> -> memref<128xf32, #tpu.memory_space<vmem>>
    %489 = tpu.memref_slice %arg6[%c0_i32_291] : memref<2x!tpu.dma_semaphore, #tpu.memory_space<semaphore_mem>> -> memref<1x!tpu.dma_semaphore, #tpu.memory_space<semaphore_mem>>
    %490 = tpu.memref_squeeze %489 : memref<1x!tpu.dma_semaphore, #tpu.memory_space<semaphore_mem>> -> memref<!tpu.dma_semaphore, #tpu.memory_space<semaphore_mem>>
    tpu.enqueue_dma source(%486 : memref<128xf32, #tpu.memory_space<any>>) target(%488 : memref<128xf32, #tpu.memory_space<vmem>>) target_semaphore(%490 : memref<!tpu.dma_semaphore, #tpu.memory_space<semaphore_mem>>)
    %c0_i32_294 = arith.constant 0 : i32
    %491 = arith.addi %0, %c0_i32_294 : i32
    %c49_i32 = arith.constant 49 : i32
    %492 = arith.addi %491, %c49_i32 : i32
    %493 = arith.index_cast %492 : i32 to index
    %494 = memref.load %arg1[%493] : memref<256xi32, #tpu.memory_space<smem>>
    %c0_i32_295 = arith.constant 0 : i32
    %c49_i32_296 = arith.constant 49 : i32
    %c0_i32_297 = arith.constant 0 : i32
    %c0_i32_298 = arith.constant 0 : i32
    %495 = tpu.memref_slice %arg4[%494, %c0_i32_298] : memref<512x128xf32, #tpu.memory_space<any>> -> memref<1x128xf32, #tpu.memory_space<any>>
    %496 = tpu.memref_squeeze %495 : memref<1x128xf32, #tpu.memory_space<any>> -> memref<128xf32, #tpu.memory_space<any>>
    %c0_i32_299 = arith.constant 0 : i32
    %497 = tpu.memref_slice %arg5[%c0_i32_295, %c49_i32_296, %c0_i32_299] : memref<2x64x128xf32, #tpu.memory_space<vmem>> -> memref<1x1x128xf32, #tpu.memory_space<vmem>>
    %498 = tpu.memref_squeeze %497 : memref<1x1x128xf32, #tpu.memory_space<vmem>> -> memref<128xf32, #tpu.memory_space<vmem>>
    %499 = tpu.memref_slice %arg6[%c0_i32_297] : memref<2x!tpu.dma_semaphore, #tpu.memory_space<semaphore_mem>> -> memref<1x!tpu.dma_semaphore, #tpu.memory_space<semaphore_mem>>
    %500 = tpu.memref_squeeze %499 : memref<1x!tpu.dma_semaphore, #tpu.memory_space<semaphore_mem>> -> memref<!tpu.dma_semaphore, #tpu.memory_space<semaphore_mem>>
    tpu.enqueue_dma source(%496 : memref<128xf32, #tpu.memory_space<any>>) target(%498 : memref<128xf32, #tpu.memory_space<vmem>>) target_semaphore(%500 : memref<!tpu.dma_semaphore, #tpu.memory_space<semaphore_mem>>)
    %c0_i32_300 = arith.constant 0 : i32
    %501 = arith.addi %0, %c0_i32_300 : i32
    %c50_i32 = arith.constant 50 : i32
    %502 = arith.addi %501, %c50_i32 : i32
    %503 = arith.index_cast %502 : i32 to index
    %504 = memref.load %arg1[%503] : memref<256xi32, #tpu.memory_space<smem>>
    %c0_i32_301 = arith.constant 0 : i32
    %c50_i32_302 = arith.constant 50 : i32
    %c0_i32_303 = arith.constant 0 : i32
    %c0_i32_304 = arith.constant 0 : i32
    %505 = tpu.memref_slice %arg4[%504, %c0_i32_304] : memref<512x128xf32, #tpu.memory_space<any>> -> memref<1x128xf32, #tpu.memory_space<any>>
    %506 = tpu.memref_squeeze %505 : memref<1x128xf32, #tpu.memory_space<any>> -> memref<128xf32, #tpu.memory_space<any>>
    %c0_i32_305 = arith.constant 0 : i32
    %507 = tpu.memref_slice %arg5[%c0_i32_301, %c50_i32_302, %c0_i32_305] : memref<2x64x128xf32, #tpu.memory_space<vmem>> -> memref<1x1x128xf32, #tpu.memory_space<vmem>>
    %508 = tpu.memref_squeeze %507 : memref<1x1x128xf32, #tpu.memory_space<vmem>> -> memref<128xf32, #tpu.memory_space<vmem>>
    %509 = tpu.memref_slice %arg6[%c0_i32_303] : memref<2x!tpu.dma_semaphore, #tpu.memory_space<semaphore_mem>> -> memref<1x!tpu.dma_semaphore, #tpu.memory_space<semaphore_mem>>
    %510 = tpu.memref_squeeze %509 : memref<1x!tpu.dma_semaphore, #tpu.memory_space<semaphore_mem>> -> memref<!tpu.dma_semaphore, #tpu.memory_space<semaphore_mem>>
    tpu.enqueue_dma source(%506 : memref<128xf32, #tpu.memory_space<any>>) target(%508 : memref<128xf32, #tpu.memory_space<vmem>>) target_semaphore(%510 : memref<!tpu.dma_semaphore, #tpu.memory_space<semaphore_mem>>)
    %c0_i32_306 = arith.constant 0 : i32
    %511 = arith.addi %0, %c0_i32_306 : i32
    %c51_i32 = arith.constant 51 : i32
    %512 = arith.addi %511, %c51_i32 : i32
    %513 = arith.index_cast %512 : i32 to index
    %514 = memref.load %arg1[%513] : memref<256xi32, #tpu.memory_space<smem>>
    %c0_i32_307 = arith.constant 0 : i32
    %c51_i32_308 = arith.constant 51 : i32
    %c0_i32_309 = arith.constant 0 : i32
    %c0_i32_310 = arith.constant 0 : i32
    %515 = tpu.memref_slice %arg4[%514, %c0_i32_310] : memref<512x128xf32, #tpu.memory_space<any>> -> memref<1x128xf32, #tpu.memory_space<any>>
    %516 = tpu.memref_squeeze %515 : memref<1x128xf32, #tpu.memory_space<any>> -> memref<128xf32, #tpu.memory_space<any>>
    %c0_i32_311 = arith.constant 0 : i32
    %517 = tpu.memref_slice %arg5[%c0_i32_307, %c51_i32_308, %c0_i32_311] : memref<2x64x128xf32, #tpu.memory_space<vmem>> -> memref<1x1x128xf32, #tpu.memory_space<vmem>>
    %518 = tpu.memref_squeeze %517 : memref<1x1x128xf32, #tpu.memory_space<vmem>> -> memref<128xf32, #tpu.memory_space<vmem>>
    %519 = tpu.memref_slice %arg6[%c0_i32_309] : memref<2x!tpu.dma_semaphore, #tpu.memory_space<semaphore_mem>> -> memref<1x!tpu.dma_semaphore, #tpu.memory_space<semaphore_mem>>
    %520 = tpu.memref_squeeze %519 : memref<1x!tpu.dma_semaphore, #tpu.memory_space<semaphore_mem>> -> memref<!tpu.dma_semaphore, #tpu.memory_space<semaphore_mem>>
    tpu.enqueue_dma source(%516 : memref<128xf32, #tpu.memory_space<any>>) target(%518 : memref<128xf32, #tpu.memory_space<vmem>>) target_semaphore(%520 : memref<!tpu.dma_semaphore, #tpu.memory_space<semaphore_mem>>)
    %c0_i32_312 = arith.constant 0 : i32
    %521 = arith.addi %0, %c0_i32_312 : i32
    %c52_i32 = arith.constant 52 : i32
    %522 = arith.addi %521, %c52_i32 : i32
    %523 = arith.index_cast %522 : i32 to index
    %524 = memref.load %arg1[%523] : memref<256xi32, #tpu.memory_space<smem>>
    %c0_i32_313 = arith.constant 0 : i32
    %c52_i32_314 = arith.constant 52 : i32
    %c0_i32_315 = arith.constant 0 : i32
    %c0_i32_316 = arith.constant 0 : i32
    %525 = tpu.memref_slice %arg4[%524, %c0_i32_316] : memref<512x128xf32, #tpu.memory_space<any>> -> memref<1x128xf32, #tpu.memory_space<any>>
    %526 = tpu.memref_squeeze %525 : memref<1x128xf32, #tpu.memory_space<any>> -> memref<128xf32, #tpu.memory_space<any>>
    %c0_i32_317 = arith.constant 0 : i32
    %527 = tpu.memref_slice %arg5[%c0_i32_313, %c52_i32_314, %c0_i32_317] : memref<2x64x128xf32, #tpu.memory_space<vmem>> -> memref<1x1x128xf32, #tpu.memory_space<vmem>>
    %528 = tpu.memref_squeeze %527 : memref<1x1x128xf32, #tpu.memory_space<vmem>> -> memref<128xf32, #tpu.memory_space<vmem>>
    %529 = tpu.memref_slice %arg6[%c0_i32_315] : memref<2x!tpu.dma_semaphore, #tpu.memory_space<semaphore_mem>> -> memref<1x!tpu.dma_semaphore, #tpu.memory_space<semaphore_mem>>
    %530 = tpu.memref_squeeze %529 : memref<1x!tpu.dma_semaphore, #tpu.memory_space<semaphore_mem>> -> memref<!tpu.dma_semaphore, #tpu.memory_space<semaphore_mem>>
    tpu.enqueue_dma source(%526 : memref<128xf32, #tpu.memory_space<any>>) target(%528 : memref<128xf32, #tpu.memory_space<vmem>>) target_semaphore(%530 : memref<!tpu.dma_semaphore, #tpu.memory_space<semaphore_mem>>)
    %c0_i32_318 = arith.constant 0 : i32
    %531 = arith.addi %0, %c0_i32_318 : i32
    %c53_i32 = arith.constant 53 : i32
    %532 = arith.addi %531, %c53_i32 : i32
    %533 = arith.index_cast %532 : i32 to index
    %534 = memref.load %arg1[%533] : memref<256xi32, #tpu.memory_space<smem>>
    %c0_i32_319 = arith.constant 0 : i32
    %c53_i32_320 = arith.constant 53 : i32
    %c0_i32_321 = arith.constant 0 : i32
    %c0_i32_322 = arith.constant 0 : i32
    %535 = tpu.memref_slice %arg4[%534, %c0_i32_322] : memref<512x128xf32, #tpu.memory_space<any>> -> memref<1x128xf32, #tpu.memory_space<any>>
    %536 = tpu.memref_squeeze %535 : memref<1x128xf32, #tpu.memory_space<any>> -> memref<128xf32, #tpu.memory_space<any>>
    %c0_i32_323 = arith.constant 0 : i32
    %537 = tpu.memref_slice %arg5[%c0_i32_319, %c53_i32_320, %c0_i32_323] : memref<2x64x128xf32, #tpu.memory_space<vmem>> -> memref<1x1x128xf32, #tpu.memory_space<vmem>>
    %538 = tpu.memref_squeeze %537 : memref<1x1x128xf32, #tpu.memory_space<vmem>> -> memref<128xf32, #tpu.memory_space<vmem>>
    %539 = tpu.memref_slice %arg6[%c0_i32_321] : memref<2x!tpu.dma_semaphore, #tpu.memory_space<semaphore_mem>> -> memref<1x!tpu.dma_semaphore, #tpu.memory_space<semaphore_mem>>
    %540 = tpu.memref_squeeze %539 : memref<1x!tpu.dma_semaphore, #tpu.memory_space<semaphore_mem>> -> memref<!tpu.dma_semaphore, #tpu.memory_space<semaphore_mem>>
    tpu.enqueue_dma source(%536 : memref<128xf32, #tpu.memory_space<any>>) target(%538 : memref<128xf32, #tpu.memory_space<vmem>>) target_semaphore(%540 : memref<!tpu.dma_semaphore, #tpu.memory_space<semaphore_mem>>)
    %c0_i32_324 = arith.constant 0 : i32
    %541 = arith.addi %0, %c0_i32_324 : i32
    %c54_i32 = arith.constant 54 : i32
    %542 = arith.addi %541, %c54_i32 : i32
    %543 = arith.index_cast %542 : i32 to index
    %544 = memref.load %arg1[%543] : memref<256xi32, #tpu.memory_space<smem>>
    %c0_i32_325 = arith.constant 0 : i32
    %c54_i32_326 = arith.constant 54 : i32
    %c0_i32_327 = arith.constant 0 : i32
    %c0_i32_328 = arith.constant 0 : i32
    %545 = tpu.memref_slice %arg4[%544, %c0_i32_328] : memref<512x128xf32, #tpu.memory_space<any>> -> memref<1x128xf32, #tpu.memory_space<any>>
    %546 = tpu.memref_squeeze %545 : memref<1x128xf32, #tpu.memory_space<any>> -> memref<128xf32, #tpu.memory_space<any>>
    %c0_i32_329 = arith.constant 0 : i32
    %547 = tpu.memref_slice %arg5[%c0_i32_325, %c54_i32_326, %c0_i32_329] : memref<2x64x128xf32, #tpu.memory_space<vmem>> -> memref<1x1x128xf32, #tpu.memory_space<vmem>>
    %548 = tpu.memref_squeeze %547 : memref<1x1x128xf32, #tpu.memory_space<vmem>> -> memref<128xf32, #tpu.memory_space<vmem>>
    %549 = tpu.memref_slice %arg6[%c0_i32_327] : memref<2x!tpu.dma_semaphore, #tpu.memory_space<semaphore_mem>> -> memref<1x!tpu.dma_semaphore, #tpu.memory_space<semaphore_mem>>
    %550 = tpu.memref_squeeze %549 : memref<1x!tpu.dma_semaphore, #tpu.memory_space<semaphore_mem>> -> memref<!tpu.dma_semaphore, #tpu.memory_space<semaphore_mem>>
    tpu.enqueue_dma source(%546 : memref<128xf32, #tpu.memory_space<any>>) target(%548 : memref<128xf32, #tpu.memory_space<vmem>>) target_semaphore(%550 : memref<!tpu.dma_semaphore, #tpu.memory_space<semaphore_mem>>)
    %c0_i32_330 = arith.constant 0 : i32
    %551 = arith.addi %0, %c0_i32_330 : i32
    %c55_i32 = arith.constant 55 : i32
    %552 = arith.addi %551, %c55_i32 : i32
    %553 = arith.index_cast %552 : i32 to index
    %554 = memref.load %arg1[%553] : memref<256xi32, #tpu.memory_space<smem>>
    %c0_i32_331 = arith.constant 0 : i32
    %c55_i32_332 = arith.constant 55 : i32
    %c0_i32_333 = arith.constant 0 : i32
    %c0_i32_334 = arith.constant 0 : i32
    %555 = tpu.memref_slice %arg4[%554, %c0_i32_334] : memref<512x128xf32, #tpu.memory_space<any>> -> memref<1x128xf32, #tpu.memory_space<any>>
    %556 = tpu.memref_squeeze %555 : memref<1x128xf32, #tpu.memory_space<any>> -> memref<128xf32, #tpu.memory_space<any>>
    %c0_i32_335 = arith.constant 0 : i32
    %557 = tpu.memref_slice %arg5[%c0_i32_331, %c55_i32_332, %c0_i32_335] : memref<2x64x128xf32, #tpu.memory_space<vmem>> -> memref<1x1x128xf32, #tpu.memory_space<vmem>>
    %558 = tpu.memref_squeeze %557 : memref<1x1x128xf32, #tpu.memory_space<vmem>> -> memref<128xf32, #tpu.memory_space<vmem>>
    %559 = tpu.memref_slice %arg6[%c0_i32_333] : memref<2x!tpu.dma_semaphore, #tpu.memory_space<semaphore_mem>> -> memref<1x!tpu.dma_semaphore, #tpu.memory_space<semaphore_mem>>
    %560 = tpu.memref_squeeze %559 : memref<1x!tpu.dma_semaphore, #tpu.memory_space<semaphore_mem>> -> memref<!tpu.dma_semaphore, #tpu.memory_space<semaphore_mem>>
    tpu.enqueue_dma source(%556 : memref<128xf32, #tpu.memory_space<any>>) target(%558 : memref<128xf32, #tpu.memory_space<vmem>>) target_semaphore(%560 : memref<!tpu.dma_semaphore, #tpu.memory_space<semaphore_mem>>)
    %c0_i32_336 = arith.constant 0 : i32
    %561 = arith.addi %0, %c0_i32_336 : i32
    %c56_i32 = arith.constant 56 : i32
    %562 = arith.addi %561, %c56_i32 : i32
    %563 = arith.index_cast %562 : i32 to index
    %564 = memref.load %arg1[%563] : memref<256xi32, #tpu.memory_space<smem>>
    %c0_i32_337 = arith.constant 0 : i32
    %c56_i32_338 = arith.constant 56 : i32
    %c0_i32_339 = arith.constant 0 : i32
    %c0_i32_340 = arith.constant 0 : i32
    %565 = tpu.memref_slice %arg4[%564, %c0_i32_340] : memref<512x128xf32, #tpu.memory_space<any>> -> memref<1x128xf32, #tpu.memory_space<any>>
    %566 = tpu.memref_squeeze %565 : memref<1x128xf32, #tpu.memory_space<any>> -> memref<128xf32, #tpu.memory_space<any>>
    %c0_i32_341 = arith.constant 0 : i32
    %567 = tpu.memref_slice %arg5[%c0_i32_337, %c56_i32_338, %c0_i32_341] : memref<2x64x128xf32, #tpu.memory_space<vmem>> -> memref<1x1x128xf32, #tpu.memory_space<vmem>>
    %568 = tpu.memref_squeeze %567 : memref<1x1x128xf32, #tpu.memory_space<vmem>> -> memref<128xf32, #tpu.memory_space<vmem>>
    %569 = tpu.memref_slice %arg6[%c0_i32_339] : memref<2x!tpu.dma_semaphore, #tpu.memory_space<semaphore_mem>> -> memref<1x!tpu.dma_semaphore, #tpu.memory_space<semaphore_mem>>
    %570 = tpu.memref_squeeze %569 : memref<1x!tpu.dma_semaphore, #tpu.memory_space<semaphore_mem>> -> memref<!tpu.dma_semaphore, #tpu.memory_space<semaphore_mem>>
    tpu.enqueue_dma source(%566 : memref<128xf32, #tpu.memory_space<any>>) target(%568 : memref<128xf32, #tpu.memory_space<vmem>>) target_semaphore(%570 : memref<!tpu.dma_semaphore, #tpu.memory_space<semaphore_mem>>)
    %c0_i32_342 = arith.constant 0 : i32
    %571 = arith.addi %0, %c0_i32_342 : i32
    %c57_i32 = arith.constant 57 : i32
    %572 = arith.addi %571, %c57_i32 : i32
    %573 = arith.index_cast %572 : i32 to index
    %574 = memref.load %arg1[%573] : memref<256xi32, #tpu.memory_space<smem>>
    %c0_i32_343 = arith.constant 0 : i32
    %c57_i32_344 = arith.constant 57 : i32
    %c0_i32_345 = arith.constant 0 : i32
    %c0_i32_346 = arith.constant 0 : i32
    %575 = tpu.memref_slice %arg4[%574, %c0_i32_346] : memref<512x128xf32, #tpu.memory_space<any>> -> memref<1x128xf32, #tpu.memory_space<any>>
    %576 = tpu.memref_squeeze %575 : memref<1x128xf32, #tpu.memory_space<any>> -> memref<128xf32, #tpu.memory_space<any>>
    %c0_i32_347 = arith.constant 0 : i32
    %577 = tpu.memref_slice %arg5[%c0_i32_343, %c57_i32_344, %c0_i32_347] : memref<2x64x128xf32, #tpu.memory_space<vmem>> -> memref<1x1x128xf32, #tpu.memory_space<vmem>>
    %578 = tpu.memref_squeeze %577 : memref<1x1x128xf32, #tpu.memory_space<vmem>> -> memref<128xf32, #tpu.memory_space<vmem>>
    %579 = tpu.memref_slice %arg6[%c0_i32_345] : memref<2x!tpu.dma_semaphore, #tpu.memory_space<semaphore_mem>> -> memref<1x!tpu.dma_semaphore, #tpu.memory_space<semaphore_mem>>
    %580 = tpu.memref_squeeze %579 : memref<1x!tpu.dma_semaphore, #tpu.memory_space<semaphore_mem>> -> memref<!tpu.dma_semaphore, #tpu.memory_space<semaphore_mem>>
    tpu.enqueue_dma source(%576 : memref<128xf32, #tpu.memory_space<any>>) target(%578 : memref<128xf32, #tpu.memory_space<vmem>>) target_semaphore(%580 : memref<!tpu.dma_semaphore, #tpu.memory_space<semaphore_mem>>)
    %c0_i32_348 = arith.constant 0 : i32
    %581 = arith.addi %0, %c0_i32_348 : i32
    %c58_i32 = arith.constant 58 : i32
    %582 = arith.addi %581, %c58_i32 : i32
    %583 = arith.index_cast %582 : i32 to index
    %584 = memref.load %arg1[%583] : memref<256xi32, #tpu.memory_space<smem>>
    %c0_i32_349 = arith.constant 0 : i32
    %c58_i32_350 = arith.constant 58 : i32
    %c0_i32_351 = arith.constant 0 : i32
    %c0_i32_352 = arith.constant 0 : i32
    %585 = tpu.memref_slice %arg4[%584, %c0_i32_352] : memref<512x128xf32, #tpu.memory_space<any>> -> memref<1x128xf32, #tpu.memory_space<any>>
    %586 = tpu.memref_squeeze %585 : memref<1x128xf32, #tpu.memory_space<any>> -> memref<128xf32, #tpu.memory_space<any>>
    %c0_i32_353 = arith.constant 0 : i32
    %587 = tpu.memref_slice %arg5[%c0_i32_349, %c58_i32_350, %c0_i32_353] : memref<2x64x128xf32, #tpu.memory_space<vmem>> -> memref<1x1x128xf32, #tpu.memory_space<vmem>>
    %588 = tpu.memref_squeeze %587 : memref<1x1x128xf32, #tpu.memory_space<vmem>> -> memref<128xf32, #tpu.memory_space<vmem>>
    %589 = tpu.memref_slice %arg6[%c0_i32_351] : memref<2x!tpu.dma_semaphore, #tpu.memory_space<semaphore_mem>> -> memref<1x!tpu.dma_semaphore, #tpu.memory_space<semaphore_mem>>
    %590 = tpu.memref_squeeze %589 : memref<1x!tpu.dma_semaphore, #tpu.memory_space<semaphore_mem>> -> memref<!tpu.dma_semaphore, #tpu.memory_space<semaphore_mem>>
    tpu.enqueue_dma source(%586 : memref<128xf32, #tpu.memory_space<any>>) target(%588 : memref<128xf32, #tpu.memory_space<vmem>>) target_semaphore(%590 : memref<!tpu.dma_semaphore, #tpu.memory_space<semaphore_mem>>)
    %c0_i32_354 = arith.constant 0 : i32
    %591 = arith.addi %0, %c0_i32_354 : i32
    %c59_i32 = arith.constant 59 : i32
    %592 = arith.addi %591, %c59_i32 : i32
    %593 = arith.index_cast %592 : i32 to index
    %594 = memref.load %arg1[%593] : memref<256xi32, #tpu.memory_space<smem>>
    %c0_i32_355 = arith.constant 0 : i32
    %c59_i32_356 = arith.constant 59 : i32
    %c0_i32_357 = arith.constant 0 : i32
    %c0_i32_358 = arith.constant 0 : i32
    %595 = tpu.memref_slice %arg4[%594, %c0_i32_358] : memref<512x128xf32, #tpu.memory_space<any>> -> memref<1x128xf32, #tpu.memory_space<any>>
    %596 = tpu.memref_squeeze %595 : memref<1x128xf32, #tpu.memory_space<any>> -> memref<128xf32, #tpu.memory_space<any>>
    %c0_i32_359 = arith.constant 0 : i32
    %597 = tpu.memref_slice %arg5[%c0_i32_355, %c59_i32_356, %c0_i32_359] : memref<2x64x128xf32, #tpu.memory_space<vmem>> -> memref<1x1x128xf32, #tpu.memory_space<vmem>>
    %598 = tpu.memref_squeeze %597 : memref<1x1x128xf32, #tpu.memory_space<vmem>> -> memref<128xf32, #tpu.memory_space<vmem>>
    %599 = tpu.memref_slice %arg6[%c0_i32_357] : memref<2x!tpu.dma_semaphore, #tpu.memory_space<semaphore_mem>> -> memref<1x!tpu.dma_semaphore, #tpu.memory_space<semaphore_mem>>
    %600 = tpu.memref_squeeze %599 : memref<1x!tpu.dma_semaphore, #tpu.memory_space<semaphore_mem>> -> memref<!tpu.dma_semaphore, #tpu.memory_space<semaphore_mem>>
    tpu.enqueue_dma source(%596 : memref<128xf32, #tpu.memory_space<any>>) target(%598 : memref<128xf32, #tpu.memory_space<vmem>>) target_semaphore(%600 : memref<!tpu.dma_semaphore, #tpu.memory_space<semaphore_mem>>)
    %c0_i32_360 = arith.constant 0 : i32
    %601 = arith.addi %0, %c0_i32_360 : i32
    %c60_i32 = arith.constant 60 : i32
    %602 = arith.addi %601, %c60_i32 : i32
    %603 = arith.index_cast %602 : i32 to index
    %604 = memref.load %arg1[%603] : memref<256xi32, #tpu.memory_space<smem>>
    %c0_i32_361 = arith.constant 0 : i32
    %c60_i32_362 = arith.constant 60 : i32
    %c0_i32_363 = arith.constant 0 : i32
    %c0_i32_364 = arith.constant 0 : i32
    %605 = tpu.memref_slice %arg4[%604, %c0_i32_364] : memref<512x128xf32, #tpu.memory_space<any>> -> memref<1x128xf32, #tpu.memory_space<any>>
    %606 = tpu.memref_squeeze %605 : memref<1x128xf32, #tpu.memory_space<any>> -> memref<128xf32, #tpu.memory_space<any>>
    %c0_i32_365 = arith.constant 0 : i32
    %607 = tpu.memref_slice %arg5[%c0_i32_361, %c60_i32_362, %c0_i32_365] : memref<2x64x128xf32, #tpu.memory_space<vmem>> -> memref<1x1x128xf32, #tpu.memory_space<vmem>>
    %608 = tpu.memref_squeeze %607 : memref<1x1x128xf32, #tpu.memory_space<vmem>> -> memref<128xf32, #tpu.memory_space<vmem>>
    %609 = tpu.memref_slice %arg6[%c0_i32_363] : memref<2x!tpu.dma_semaphore, #tpu.memory_space<semaphore_mem>> -> memref<1x!tpu.dma_semaphore, #tpu.memory_space<semaphore_mem>>
    %610 = tpu.memref_squeeze %609 : memref<1x!tpu.dma_semaphore, #tpu.memory_space<semaphore_mem>> -> memref<!tpu.dma_semaphore, #tpu.memory_space<semaphore_mem>>
    tpu.enqueue_dma source(%606 : memref<128xf32, #tpu.memory_space<any>>) target(%608 : memref<128xf32, #tpu.memory_space<vmem>>) target_semaphore(%610 : memref<!tpu.dma_semaphore, #tpu.memory_space<semaphore_mem>>)
    %c0_i32_366 = arith.constant 0 : i32
    %611 = arith.addi %0, %c0_i32_366 : i32
    %c61_i32 = arith.constant 61 : i32
    %612 = arith.addi %611, %c61_i32 : i32
    %613 = arith.index_cast %612 : i32 to index
    %614 = memref.load %arg1[%613] : memref<256xi32, #tpu.memory_space<smem>>
    %c0_i32_367 = arith.constant 0 : i32
    %c61_i32_368 = arith.constant 61 : i32
    %c0_i32_369 = arith.constant 0 : i32
    %c0_i32_370 = arith.constant 0 : i32
    %615 = tpu.memref_slice %arg4[%614, %c0_i32_370] : memref<512x128xf32, #tpu.memory_space<any>> -> memref<1x128xf32, #tpu.memory_space<any>>
    %616 = tpu.memref_squeeze %615 : memref<1x128xf32, #tpu.memory_space<any>> -> memref<128xf32, #tpu.memory_space<any>>
    %c0_i32_371 = arith.constant 0 : i32
    %617 = tpu.memref_slice %arg5[%c0_i32_367, %c61_i32_368, %c0_i32_371] : memref<2x64x128xf32, #tpu.memory_space<vmem>> -> memref<1x1x128xf32, #tpu.memory_space<vmem>>
    %618 = tpu.memref_squeeze %617 : memref<1x1x128xf32, #tpu.memory_space<vmem>> -> memref<128xf32, #tpu.memory_space<vmem>>
    %619 = tpu.memref_slice %arg6[%c0_i32_369] : memref<2x!tpu.dma_semaphore, #tpu.memory_space<semaphore_mem>> -> memref<1x!tpu.dma_semaphore, #tpu.memory_space<semaphore_mem>>
    %620 = tpu.memref_squeeze %619 : memref<1x!tpu.dma_semaphore, #tpu.memory_space<semaphore_mem>> -> memref<!tpu.dma_semaphore, #tpu.memory_space<semaphore_mem>>
    tpu.enqueue_dma source(%616 : memref<128xf32, #tpu.memory_space<any>>) target(%618 : memref<128xf32, #tpu.memory_space<vmem>>) target_semaphore(%620 : memref<!tpu.dma_semaphore, #tpu.memory_space<semaphore_mem>>)
    %c0_i32_372 = arith.constant 0 : i32
    %621 = arith.addi %0, %c0_i32_372 : i32
    %c62_i32 = arith.constant 62 : i32
    %622 = arith.addi %621, %c62_i32 : i32
    %623 = arith.index_cast %622 : i32 to index
    %624 = memref.load %arg1[%623] : memref<256xi32, #tpu.memory_space<smem>>
    %c0_i32_373 = arith.constant 0 : i32
    %c62_i32_374 = arith.constant 62 : i32
    %c0_i32_375 = arith.constant 0 : i32
    %c0_i32_376 = arith.constant 0 : i32
    %625 = tpu.memref_slice %arg4[%624, %c0_i32_376] : memref<512x128xf32, #tpu.memory_space<any>> -> memref<1x128xf32, #tpu.memory_space<any>>
    %626 = tpu.memref_squeeze %625 : memref<1x128xf32, #tpu.memory_space<any>> -> memref<128xf32, #tpu.memory_space<any>>
    %c0_i32_377 = arith.constant 0 : i32
    %627 = tpu.memref_slice %arg5[%c0_i32_373, %c62_i32_374, %c0_i32_377] : memref<2x64x128xf32, #tpu.memory_space<vmem>> -> memref<1x1x128xf32, #tpu.memory_space<vmem>>
    %628 = tpu.memref_squeeze %627 : memref<1x1x128xf32, #tpu.memory_space<vmem>> -> memref<128xf32, #tpu.memory_space<vmem>>
    %629 = tpu.memref_slice %arg6[%c0_i32_375] : memref<2x!tpu.dma_semaphore, #tpu.memory_space<semaphore_mem>> -> memref<1x!tpu.dma_semaphore, #tpu.memory_space<semaphore_mem>>
    %630 = tpu.memref_squeeze %629 : memref<1x!tpu.dma_semaphore, #tpu.memory_space<semaphore_mem>> -> memref<!tpu.dma_semaphore, #tpu.memory_space<semaphore_mem>>
    tpu.enqueue_dma source(%626 : memref<128xf32, #tpu.memory_space<any>>) target(%628 : memref<128xf32, #tpu.memory_space<vmem>>) target_semaphore(%630 : memref<!tpu.dma_semaphore, #tpu.memory_space<semaphore_mem>>)
    %c0_i32_378 = arith.constant 0 : i32
    %631 = arith.addi %0, %c0_i32_378 : i32
    %c63_i32 = arith.constant 63 : i32
    %632 = arith.addi %631, %c63_i32 : i32
    %633 = arith.index_cast %632 : i32 to index
    %634 = memref.load %arg1[%633] : memref<256xi32, #tpu.memory_space<smem>>
    %c0_i32_379 = arith.constant 0 : i32
    %c63_i32_380 = arith.constant 63 : i32
    %c0_i32_381 = arith.constant 0 : i32
    %c0_i32_382 = arith.constant 0 : i32
    %635 = tpu.memref_slice %arg4[%634, %c0_i32_382] : memref<512x128xf32, #tpu.memory_space<any>> -> memref<1x128xf32, #tpu.memory_space<any>>
    %636 = tpu.memref_squeeze %635 : memref<1x128xf32, #tpu.memory_space<any>> -> memref<128xf32, #tpu.memory_space<any>>
    %c0_i32_383 = arith.constant 0 : i32
    %637 = tpu.memref_slice %arg5[%c0_i32_379, %c63_i32_380, %c0_i32_383] : memref<2x64x128xf32, #tpu.memory_space<vmem>> -> memref<1x1x128xf32, #tpu.memory_space<vmem>>
    %638 = tpu.memref_squeeze %637 : memref<1x1x128xf32, #tpu.memory_space<vmem>> -> memref<128xf32, #tpu.memory_space<vmem>>
    %639 = tpu.memref_slice %arg6[%c0_i32_381] : memref<2x!tpu.dma_semaphore, #tpu.memory_space<semaphore_mem>> -> memref<1x!tpu.dma_semaphore, #tpu.memory_space<semaphore_mem>>
    %640 = tpu.memref_squeeze %639 : memref<1x!tpu.dma_semaphore, #tpu.memory_space<semaphore_mem>> -> memref<!tpu.dma_semaphore, #tpu.memory_space<semaphore_mem>>
    tpu.enqueue_dma source(%636 : memref<128xf32, #tpu.memory_space<any>>) target(%638 : memref<128xf32, #tpu.memory_space<vmem>>) target_semaphore(%640 : memref<!tpu.dma_semaphore, #tpu.memory_space<semaphore_mem>>)
    %c64_i32 = arith.constant 64 : i32
    %641 = arith.addi %0, %c64_i32 : i32
    %c0_i32_384 = arith.constant 0 : i32
    %642 = arith.addi %641, %c0_i32_384 : i32
    %643 = arith.index_cast %642 : i32 to index
    %644 = memref.load %arg1[%643] : memref<256xi32, #tpu.memory_space<smem>>
    %c1_i32_385 = arith.constant 1 : i32
    %c0_i32_386 = arith.constant 0 : i32
    %c1_i32_387 = arith.constant 1 : i32
    %c0_i32_388 = arith.constant 0 : i32
    %645 = tpu.memref_slice %arg4[%644, %c0_i32_388] : memref<512x128xf32, #tpu.memory_space<any>> -> memref<1x128xf32, #tpu.memory_space<any>>
    %646 = tpu.memref_squeeze %645 : memref<1x128xf32, #tpu.memory_space<any>> -> memref<128xf32, #tpu.memory_space<any>>
    %c0_i32_389 = arith.constant 0 : i32
    %647 = tpu.memref_slice %arg5[%c1_i32_385, %c0_i32_386, %c0_i32_389] : memref<2x64x128xf32, #tpu.memory_space<vmem>> -> memref<1x1x128xf32, #tpu.memory_space<vmem>>
    %648 = tpu.memref_squeeze %647 : memref<1x1x128xf32, #tpu.memory_space<vmem>> -> memref<128xf32, #tpu.memory_space<vmem>>
    %649 = tpu.memref_slice %arg6[%c1_i32_387] : memref<2x!tpu.dma_semaphore, #tpu.memory_space<semaphore_mem>> -> memref<1x!tpu.dma_semaphore, #tpu.memory_space<semaphore_mem>>
    %650 = tpu.memref_squeeze %649 : memref<1x!tpu.dma_semaphore, #tpu.memory_space<semaphore_mem>> -> memref<!tpu.dma_semaphore, #tpu.memory_space<semaphore_mem>>
    tpu.enqueue_dma source(%646 : memref<128xf32, #tpu.memory_space<any>>) target(%648 : memref<128xf32, #tpu.memory_space<vmem>>) target_semaphore(%650 : memref<!tpu.dma_semaphore, #tpu.memory_space<semaphore_mem>>)
    %c64_i32_390 = arith.constant 64 : i32
    %651 = arith.addi %0, %c64_i32_390 : i32
    %c1_i32_391 = arith.constant 1 : i32
    %652 = arith.addi %651, %c1_i32_391 : i32
    %653 = arith.index_cast %652 : i32 to index
    %654 = memref.load %arg1[%653] : memref<256xi32, #tpu.memory_space<smem>>
    %c1_i32_392 = arith.constant 1 : i32
    %c1_i32_393 = arith.constant 1 : i32
    %c1_i32_394 = arith.constant 1 : i32
    %c0_i32_395 = arith.constant 0 : i32
    %655 = tpu.memref_slice %arg4[%654, %c0_i32_395] : memref<512x128xf32, #tpu.memory_space<any>> -> memref<1x128xf32, #tpu.memory_space<any>>
    %656 = tpu.memref_squeeze %655 : memref<1x128xf32, #tpu.memory_space<any>> -> memref<128xf32, #tpu.memory_space<any>>
    %c0_i32_396 = arith.constant 0 : i32
    %657 = tpu.memref_slice %arg5[%c1_i32_392, %c1_i32_393, %c0_i32_396] : memref<2x64x128xf32, #tpu.memory_space<vmem>> -> memref<1x1x128xf32, #tpu.memory_space<vmem>>
    %658 = tpu.memref_squeeze %657 : memref<1x1x128xf32, #tpu.memory_space<vmem>> -> memref<128xf32, #tpu.memory_space<vmem>>
    %659 = tpu.memref_slice %arg6[%c1_i32_394] : memref<2x!tpu.dma_semaphore, #tpu.memory_space<semaphore_mem>> -> memref<1x!tpu.dma_semaphore, #tpu.memory_space<semaphore_mem>>
    %660 = tpu.memref_squeeze %659 : memref<1x!tpu.dma_semaphore, #tpu.memory_space<semaphore_mem>> -> memref<!tpu.dma_semaphore, #tpu.memory_space<semaphore_mem>>
    tpu.enqueue_dma source(%656 : memref<128xf32, #tpu.memory_space<any>>) target(%658 : memref<128xf32, #tpu.memory_space<vmem>>) target_semaphore(%660 : memref<!tpu.dma_semaphore, #tpu.memory_space<semaphore_mem>>)
    %c64_i32_397 = arith.constant 64 : i32
    %661 = arith.addi %0, %c64_i32_397 : i32
    %c2_i32_398 = arith.constant 2 : i32
    %662 = arith.addi %661, %c2_i32_398 : i32
    %663 = arith.index_cast %662 : i32 to index
    %664 = memref.load %arg1[%663] : memref<256xi32, #tpu.memory_space<smem>>
    %c1_i32_399 = arith.constant 1 : i32
    %c2_i32_400 = arith.constant 2 : i32
    %c1_i32_401 = arith.constant 1 : i32
    %c0_i32_402 = arith.constant 0 : i32
    %665 = tpu.memref_slice %arg4[%664, %c0_i32_402] : memref<512x128xf32, #tpu.memory_space<any>> -> memref<1x128xf32, #tpu.memory_space<any>>
    %666 = tpu.memref_squeeze %665 : memref<1x128xf32, #tpu.memory_space<any>> -> memref<128xf32, #tpu.memory_space<any>>
    %c0_i32_403 = arith.constant 0 : i32
    %667 = tpu.memref_slice %arg5[%c1_i32_399, %c2_i32_400, %c0_i32_403] : memref<2x64x128xf32, #tpu.memory_space<vmem>> -> memref<1x1x128xf32, #tpu.memory_space<vmem>>
    %668 = tpu.memref_squeeze %667 : memref<1x1x128xf32, #tpu.memory_space<vmem>> -> memref<128xf32, #tpu.memory_space<vmem>>
    %669 = tpu.memref_slice %arg6[%c1_i32_401] : memref<2x!tpu.dma_semaphore, #tpu.memory_space<semaphore_mem>> -> memref<1x!tpu.dma_semaphore, #tpu.memory_space<semaphore_mem>>
    %670 = tpu.memref_squeeze %669 : memref<1x!tpu.dma_semaphore, #tpu.memory_space<semaphore_mem>> -> memref<!tpu.dma_semaphore, #tpu.memory_space<semaphore_mem>>
    tpu.enqueue_dma source(%666 : memref<128xf32, #tpu.memory_space<any>>) target(%668 : memref<128xf32, #tpu.memory_space<vmem>>) target_semaphore(%670 : memref<!tpu.dma_semaphore, #tpu.memory_space<semaphore_mem>>)
    %c64_i32_404 = arith.constant 64 : i32
    %671 = arith.addi %0, %c64_i32_404 : i32
    %c3_i32_405 = arith.constant 3 : i32
    %672 = arith.addi %671, %c3_i32_405 : i32
    %673 = arith.index_cast %672 : i32 to index
    %674 = memref.load %arg1[%673] : memref<256xi32, #tpu.memory_space<smem>>
    %c1_i32_406 = arith.constant 1 : i32
    %c3_i32_407 = arith.constant 3 : i32
    %c1_i32_408 = arith.constant 1 : i32
    %c0_i32_409 = arith.constant 0 : i32
    %675 = tpu.memref_slice %arg4[%674, %c0_i32_409] : memref<512x128xf32, #tpu.memory_space<any>> -> memref<1x128xf32, #tpu.memory_space<any>>
    %676 = tpu.memref_squeeze %675 : memref<1x128xf32, #tpu.memory_space<any>> -> memref<128xf32, #tpu.memory_space<any>>
    %c0_i32_410 = arith.constant 0 : i32
    %677 = tpu.memref_slice %arg5[%c1_i32_406, %c3_i32_407, %c0_i32_410] : memref<2x64x128xf32, #tpu.memory_space<vmem>> -> memref<1x1x128xf32, #tpu.memory_space<vmem>>
    %678 = tpu.memref_squeeze %677 : memref<1x1x128xf32, #tpu.memory_space<vmem>> -> memref<128xf32, #tpu.memory_space<vmem>>
    %679 = tpu.memref_slice %arg6[%c1_i32_408] : memref<2x!tpu.dma_semaphore, #tpu.memory_space<semaphore_mem>> -> memref<1x!tpu.dma_semaphore, #tpu.memory_space<semaphore_mem>>
    %680 = tpu.memref_squeeze %679 : memref<1x!tpu.dma_semaphore, #tpu.memory_space<semaphore_mem>> -> memref<!tpu.dma_semaphore, #tpu.memory_space<semaphore_mem>>
    tpu.enqueue_dma source(%676 : memref<128xf32, #tpu.memory_space<any>>) target(%678 : memref<128xf32, #tpu.memory_space<vmem>>) target_semaphore(%680 : memref<!tpu.dma_semaphore, #tpu.memory_space<semaphore_mem>>)
    %c64_i32_411 = arith.constant 64 : i32
    %681 = arith.addi %0, %c64_i32_411 : i32
    %c4_i32_412 = arith.constant 4 : i32
    %682 = arith.addi %681, %c4_i32_412 : i32
    %683 = arith.index_cast %682 : i32 to index
    %684 = memref.load %arg1[%683] : memref<256xi32, #tpu.memory_space<smem>>
    %c1_i32_413 = arith.constant 1 : i32
    %c4_i32_414 = arith.constant 4 : i32
    %c1_i32_415 = arith.constant 1 : i32
    %c0_i32_416 = arith.constant 0 : i32
    %685 = tpu.memref_slice %arg4[%684, %c0_i32_416] : memref<512x128xf32, #tpu.memory_space<any>> -> memref<1x128xf32, #tpu.memory_space<any>>
    %686 = tpu.memref_squeeze %685 : memref<1x128xf32, #tpu.memory_space<any>> -> memref<128xf32, #tpu.memory_space<any>>
    %c0_i32_417 = arith.constant 0 : i32
    %687 = tpu.memref_slice %arg5[%c1_i32_413, %c4_i32_414, %c0_i32_417] : memref<2x64x128xf32, #tpu.memory_space<vmem>> -> memref<1x1x128xf32, #tpu.memory_space<vmem>>
    %688 = tpu.memref_squeeze %687 : memref<1x1x128xf32, #tpu.memory_space<vmem>> -> memref<128xf32, #tpu.memory_space<vmem>>
    %689 = tpu.memref_slice %arg6[%c1_i32_415] : memref<2x!tpu.dma_semaphore, #tpu.memory_space<semaphore_mem>> -> memref<1x!tpu.dma_semaphore, #tpu.memory_space<semaphore_mem>>
    %690 = tpu.memref_squeeze %689 : memref<1x!tpu.dma_semaphore, #tpu.memory_space<semaphore_mem>> -> memref<!tpu.dma_semaphore, #tpu.memory_space<semaphore_mem>>
    tpu.enqueue_dma source(%686 : memref<128xf32, #tpu.memory_space<any>>) target(%688 : memref<128xf32, #tpu.memory_space<vmem>>) target_semaphore(%690 : memref<!tpu.dma_semaphore, #tpu.memory_space<semaphore_mem>>)
    %c64_i32_418 = arith.constant 64 : i32
    %691 = arith.addi %0, %c64_i32_418 : i32
    %c5_i32_419 = arith.constant 5 : i32
    %692 = arith.addi %691, %c5_i32_419 : i32
    %693 = arith.index_cast %692 : i32 to index
    %694 = memref.load %arg1[%693] : memref<256xi32, #tpu.memory_space<smem>>
    %c1_i32_420 = arith.constant 1 : i32
    %c5_i32_421 = arith.constant 5 : i32
    %c1_i32_422 = arith.constant 1 : i32
    %c0_i32_423 = arith.constant 0 : i32
    %695 = tpu.memref_slice %arg4[%694, %c0_i32_423] : memref<512x128xf32, #tpu.memory_space<any>> -> memref<1x128xf32, #tpu.memory_space<any>>
    %696 = tpu.memref_squeeze %695 : memref<1x128xf32, #tpu.memory_space<any>> -> memref<128xf32, #tpu.memory_space<any>>
    %c0_i32_424 = arith.constant 0 : i32
    %697 = tpu.memref_slice %arg5[%c1_i32_420, %c5_i32_421, %c0_i32_424] : memref<2x64x128xf32, #tpu.memory_space<vmem>> -> memref<1x1x128xf32, #tpu.memory_space<vmem>>
    %698 = tpu.memref_squeeze %697 : memref<1x1x128xf32, #tpu.memory_space<vmem>> -> memref<128xf32, #tpu.memory_space<vmem>>
    %699 = tpu.memref_slice %arg6[%c1_i32_422] : memref<2x!tpu.dma_semaphore, #tpu.memory_space<semaphore_mem>> -> memref<1x!tpu.dma_semaphore, #tpu.memory_space<semaphore_mem>>
    %700 = tpu.memref_squeeze %699 : memref<1x!tpu.dma_semaphore, #tpu.memory_space<semaphore_mem>> -> memref<!tpu.dma_semaphore, #tpu.memory_space<semaphore_mem>>
    tpu.enqueue_dma source(%696 : memref<128xf32, #tpu.memory_space<any>>) target(%698 : memref<128xf32, #tpu.memory_space<vmem>>) target_semaphore(%700 : memref<!tpu.dma_semaphore, #tpu.memory_space<semaphore_mem>>)
    %c64_i32_425 = arith.constant 64 : i32
    %701 = arith.addi %0, %c64_i32_425 : i32
    %c6_i32_426 = arith.constant 6 : i32
    %702 = arith.addi %701, %c6_i32_426 : i32
    %703 = arith.index_cast %702 : i32 to index
    %704 = memref.load %arg1[%703] : memref<256xi32, #tpu.memory_space<smem>>
    %c1_i32_427 = arith.constant 1 : i32
    %c6_i32_428 = arith.constant 6 : i32
    %c1_i32_429 = arith.constant 1 : i32
    %c0_i32_430 = arith.constant 0 : i32
    %705 = tpu.memref_slice %arg4[%704, %c0_i32_430] : memref<512x128xf32, #tpu.memory_space<any>> -> memref<1x128xf32, #tpu.memory_space<any>>
    %706 = tpu.memref_squeeze %705 : memref<1x128xf32, #tpu.memory_space<any>> -> memref<128xf32, #tpu.memory_space<any>>
    %c0_i32_431 = arith.constant 0 : i32
    %707 = tpu.memref_slice %arg5[%c1_i32_427, %c6_i32_428, %c0_i32_431] : memref<2x64x128xf32, #tpu.memory_space<vmem>> -> memref<1x1x128xf32, #tpu.memory_space<vmem>>
    %708 = tpu.memref_squeeze %707 : memref<1x1x128xf32, #tpu.memory_space<vmem>> -> memref<128xf32, #tpu.memory_space<vmem>>
    %709 = tpu.memref_slice %arg6[%c1_i32_429] : memref<2x!tpu.dma_semaphore, #tpu.memory_space<semaphore_mem>> -> memref<1x!tpu.dma_semaphore, #tpu.memory_space<semaphore_mem>>
    %710 = tpu.memref_squeeze %709 : memref<1x!tpu.dma_semaphore, #tpu.memory_space<semaphore_mem>> -> memref<!tpu.dma_semaphore, #tpu.memory_space<semaphore_mem>>
    tpu.enqueue_dma source(%706 : memref<128xf32, #tpu.memory_space<any>>) target(%708 : memref<128xf32, #tpu.memory_space<vmem>>) target_semaphore(%710 : memref<!tpu.dma_semaphore, #tpu.memory_space<semaphore_mem>>)
    %c64_i32_432 = arith.constant 64 : i32
    %711 = arith.addi %0, %c64_i32_432 : i32
    %c7_i32_433 = arith.constant 7 : i32
    %712 = arith.addi %711, %c7_i32_433 : i32
    %713 = arith.index_cast %712 : i32 to index
    %714 = memref.load %arg1[%713] : memref<256xi32, #tpu.memory_space<smem>>
    %c1_i32_434 = arith.constant 1 : i32
    %c7_i32_435 = arith.constant 7 : i32
    %c1_i32_436 = arith.constant 1 : i32
    %c0_i32_437 = arith.constant 0 : i32
    %715 = tpu.memref_slice %arg4[%714, %c0_i32_437] : memref<512x128xf32, #tpu.memory_space<any>> -> memref<1x128xf32, #tpu.memory_space<any>>
    %716 = tpu.memref_squeeze %715 : memref<1x128xf32, #tpu.memory_space<any>> -> memref<128xf32, #tpu.memory_space<any>>
    %c0_i32_438 = arith.constant 0 : i32
    %717 = tpu.memref_slice %arg5[%c1_i32_434, %c7_i32_435, %c0_i32_438] : memref<2x64x128xf32, #tpu.memory_space<vmem>> -> memref<1x1x128xf32, #tpu.memory_space<vmem>>
    %718 = tpu.memref_squeeze %717 : memref<1x1x128xf32, #tpu.memory_space<vmem>> -> memref<128xf32, #tpu.memory_space<vmem>>
    %719 = tpu.memref_slice %arg6[%c1_i32_436] : memref<2x!tpu.dma_semaphore, #tpu.memory_space<semaphore_mem>> -> memref<1x!tpu.dma_semaphore, #tpu.memory_space<semaphore_mem>>
    %720 = tpu.memref_squeeze %719 : memref<1x!tpu.dma_semaphore, #tpu.memory_space<semaphore_mem>> -> memref<!tpu.dma_semaphore, #tpu.memory_space<semaphore_mem>>
    tpu.enqueue_dma source(%716 : memref<128xf32, #tpu.memory_space<any>>) target(%718 : memref<128xf32, #tpu.memory_space<vmem>>) target_semaphore(%720 : memref<!tpu.dma_semaphore, #tpu.memory_space<semaphore_mem>>)
    %c64_i32_439 = arith.constant 64 : i32
    %721 = arith.addi %0, %c64_i32_439 : i32
    %c8_i32_440 = arith.constant 8 : i32
    %722 = arith.addi %721, %c8_i32_440 : i32
    %723 = arith.index_cast %722 : i32 to index
    %724 = memref.load %arg1[%723] : memref<256xi32, #tpu.memory_space<smem>>
    %c1_i32_441 = arith.constant 1 : i32
    %c8_i32_442 = arith.constant 8 : i32
    %c1_i32_443 = arith.constant 1 : i32
    %c0_i32_444 = arith.constant 0 : i32
    %725 = tpu.memref_slice %arg4[%724, %c0_i32_444] : memref<512x128xf32, #tpu.memory_space<any>> -> memref<1x128xf32, #tpu.memory_space<any>>
    %726 = tpu.memref_squeeze %725 : memref<1x128xf32, #tpu.memory_space<any>> -> memref<128xf32, #tpu.memory_space<any>>
    %c0_i32_445 = arith.constant 0 : i32
    %727 = tpu.memref_slice %arg5[%c1_i32_441, %c8_i32_442, %c0_i32_445] : memref<2x64x128xf32, #tpu.memory_space<vmem>> -> memref<1x1x128xf32, #tpu.memory_space<vmem>>
    %728 = tpu.memref_squeeze %727 : memref<1x1x128xf32, #tpu.memory_space<vmem>> -> memref<128xf32, #tpu.memory_space<vmem>>
    %729 = tpu.memref_slice %arg6[%c1_i32_443] : memref<2x!tpu.dma_semaphore, #tpu.memory_space<semaphore_mem>> -> memref<1x!tpu.dma_semaphore, #tpu.memory_space<semaphore_mem>>
    %730 = tpu.memref_squeeze %729 : memref<1x!tpu.dma_semaphore, #tpu.memory_space<semaphore_mem>> -> memref<!tpu.dma_semaphore, #tpu.memory_space<semaphore_mem>>
    tpu.enqueue_dma source(%726 : memref<128xf32, #tpu.memory_space<any>>) target(%728 : memref<128xf32, #tpu.memory_space<vmem>>) target_semaphore(%730 : memref<!tpu.dma_semaphore, #tpu.memory_space<semaphore_mem>>)
    %c64_i32_446 = arith.constant 64 : i32
    %731 = arith.addi %0, %c64_i32_446 : i32
    %c9_i32_447 = arith.constant 9 : i32
    %732 = arith.addi %731, %c9_i32_447 : i32
    %733 = arith.index_cast %732 : i32 to index
    %734 = memref.load %arg1[%733] : memref<256xi32, #tpu.memory_space<smem>>
    %c1_i32_448 = arith.constant 1 : i32
    %c9_i32_449 = arith.constant 9 : i32
    %c1_i32_450 = arith.constant 1 : i32
    %c0_i32_451 = arith.constant 0 : i32
    %735 = tpu.memref_slice %arg4[%734, %c0_i32_451] : memref<512x128xf32, #tpu.memory_space<any>> -> memref<1x128xf32, #tpu.memory_space<any>>
    %736 = tpu.memref_squeeze %735 : memref<1x128xf32, #tpu.memory_space<any>> -> memref<128xf32, #tpu.memory_space<any>>
    %c0_i32_452 = arith.constant 0 : i32
    %737 = tpu.memref_slice %arg5[%c1_i32_448, %c9_i32_449, %c0_i32_452] : memref<2x64x128xf32, #tpu.memory_space<vmem>> -> memref<1x1x128xf32, #tpu.memory_space<vmem>>
    %738 = tpu.memref_squeeze %737 : memref<1x1x128xf32, #tpu.memory_space<vmem>> -> memref<128xf32, #tpu.memory_space<vmem>>
    %739 = tpu.memref_slice %arg6[%c1_i32_450] : memref<2x!tpu.dma_semaphore, #tpu.memory_space<semaphore_mem>> -> memref<1x!tpu.dma_semaphore, #tpu.memory_space<semaphore_mem>>
    %740 = tpu.memref_squeeze %739 : memref<1x!tpu.dma_semaphore, #tpu.memory_space<semaphore_mem>> -> memref<!tpu.dma_semaphore, #tpu.memory_space<semaphore_mem>>
    tpu.enqueue_dma source(%736 : memref<128xf32, #tpu.memory_space<any>>) target(%738 : memref<128xf32, #tpu.memory_space<vmem>>) target_semaphore(%740 : memref<!tpu.dma_semaphore, #tpu.memory_space<semaphore_mem>>)
    %c64_i32_453 = arith.constant 64 : i32
    %741 = arith.addi %0, %c64_i32_453 : i32
    %c10_i32_454 = arith.constant 10 : i32
    %742 = arith.addi %741, %c10_i32_454 : i32
    %743 = arith.index_cast %742 : i32 to index
    %744 = memref.load %arg1[%743] : memref<256xi32, #tpu.memory_space<smem>>
    %c1_i32_455 = arith.constant 1 : i32
    %c10_i32_456 = arith.constant 10 : i32
    %c1_i32_457 = arith.constant 1 : i32
    %c0_i32_458 = arith.constant 0 : i32
    %745 = tpu.memref_slice %arg4[%744, %c0_i32_458] : memref<512x128xf32, #tpu.memory_space<any>> -> memref<1x128xf32, #tpu.memory_space<any>>
    %746 = tpu.memref_squeeze %745 : memref<1x128xf32, #tpu.memory_space<any>> -> memref<128xf32, #tpu.memory_space<any>>
    %c0_i32_459 = arith.constant 0 : i32
    %747 = tpu.memref_slice %arg5[%c1_i32_455, %c10_i32_456, %c0_i32_459] : memref<2x64x128xf32, #tpu.memory_space<vmem>> -> memref<1x1x128xf32, #tpu.memory_space<vmem>>
    %748 = tpu.memref_squeeze %747 : memref<1x1x128xf32, #tpu.memory_space<vmem>> -> memref<128xf32, #tpu.memory_space<vmem>>
    %749 = tpu.memref_slice %arg6[%c1_i32_457] : memref<2x!tpu.dma_semaphore, #tpu.memory_space<semaphore_mem>> -> memref<1x!tpu.dma_semaphore, #tpu.memory_space<semaphore_mem>>
    %750 = tpu.memref_squeeze %749 : memref<1x!tpu.dma_semaphore, #tpu.memory_space<semaphore_mem>> -> memref<!tpu.dma_semaphore, #tpu.memory_space<semaphore_mem>>
    tpu.enqueue_dma source(%746 : memref<128xf32, #tpu.memory_space<any>>) target(%748 : memref<128xf32, #tpu.memory_space<vmem>>) target_semaphore(%750 : memref<!tpu.dma_semaphore, #tpu.memory_space<semaphore_mem>>)
    %c64_i32_460 = arith.constant 64 : i32
    %751 = arith.addi %0, %c64_i32_460 : i32
    %c11_i32_461 = arith.constant 11 : i32
    %752 = arith.addi %751, %c11_i32_461 : i32
    %753 = arith.index_cast %752 : i32 to index
    %754 = memref.load %arg1[%753] : memref<256xi32, #tpu.memory_space<smem>>
    %c1_i32_462 = arith.constant 1 : i32
    %c11_i32_463 = arith.constant 11 : i32
    %c1_i32_464 = arith.constant 1 : i32
    %c0_i32_465 = arith.constant 0 : i32
    %755 = tpu.memref_slice %arg4[%754, %c0_i32_465] : memref<512x128xf32, #tpu.memory_space<any>> -> memref<1x128xf32, #tpu.memory_space<any>>
    %756 = tpu.memref_squeeze %755 : memref<1x128xf32, #tpu.memory_space<any>> -> memref<128xf32, #tpu.memory_space<any>>
    %c0_i32_466 = arith.constant 0 : i32
    %757 = tpu.memref_slice %arg5[%c1_i32_462, %c11_i32_463, %c0_i32_466] : memref<2x64x128xf32, #tpu.memory_space<vmem>> -> memref<1x1x128xf32, #tpu.memory_space<vmem>>
    %758 = tpu.memref_squeeze %757 : memref<1x1x128xf32, #tpu.memory_space<vmem>> -> memref<128xf32, #tpu.memory_space<vmem>>
    %759 = tpu.memref_slice %arg6[%c1_i32_464] : memref<2x!tpu.dma_semaphore, #tpu.memory_space<semaphore_mem>> -> memref<1x!tpu.dma_semaphore, #tpu.memory_space<semaphore_mem>>
    %760 = tpu.memref_squeeze %759 : memref<1x!tpu.dma_semaphore, #tpu.memory_space<semaphore_mem>> -> memref<!tpu.dma_semaphore, #tpu.memory_space<semaphore_mem>>
    tpu.enqueue_dma source(%756 : memref<128xf32, #tpu.memory_space<any>>) target(%758 : memref<128xf32, #tpu.memory_space<vmem>>) target_semaphore(%760 : memref<!tpu.dma_semaphore, #tpu.memory_space<semaphore_mem>>)
    %c64_i32_467 = arith.constant 64 : i32
    %761 = arith.addi %0, %c64_i32_467 : i32
    %c12_i32_468 = arith.constant 12 : i32
    %762 = arith.addi %761, %c12_i32_468 : i32
    %763 = arith.index_cast %762 : i32 to index
    %764 = memref.load %arg1[%763] : memref<256xi32, #tpu.memory_space<smem>>
    %c1_i32_469 = arith.constant 1 : i32
    %c12_i32_470 = arith.constant 12 : i32
    %c1_i32_471 = arith.constant 1 : i32
    %c0_i32_472 = arith.constant 0 : i32
    %765 = tpu.memref_slice %arg4[%764, %c0_i32_472] : memref<512x128xf32, #tpu.memory_space<any>> -> memref<1x128xf32, #tpu.memory_space<any>>
    %766 = tpu.memref_squeeze %765 : memref<1x128xf32, #tpu.memory_space<any>> -> memref<128xf32, #tpu.memory_space<any>>
    %c0_i32_473 = arith.constant 0 : i32
    %767 = tpu.memref_slice %arg5[%c1_i32_469, %c12_i32_470, %c0_i32_473] : memref<2x64x128xf32, #tpu.memory_space<vmem>> -> memref<1x1x128xf32, #tpu.memory_space<vmem>>
    %768 = tpu.memref_squeeze %767 : memref<1x1x128xf32, #tpu.memory_space<vmem>> -> memref<128xf32, #tpu.memory_space<vmem>>
    %769 = tpu.memref_slice %arg6[%c1_i32_471] : memref<2x!tpu.dma_semaphore, #tpu.memory_space<semaphore_mem>> -> memref<1x!tpu.dma_semaphore, #tpu.memory_space<semaphore_mem>>
    %770 = tpu.memref_squeeze %769 : memref<1x!tpu.dma_semaphore, #tpu.memory_space<semaphore_mem>> -> memref<!tpu.dma_semaphore, #tpu.memory_space<semaphore_mem>>
    tpu.enqueue_dma source(%766 : memref<128xf32, #tpu.memory_space<any>>) target(%768 : memref<128xf32, #tpu.memory_space<vmem>>) target_semaphore(%770 : memref<!tpu.dma_semaphore, #tpu.memory_space<semaphore_mem>>)
    %c64_i32_474 = arith.constant 64 : i32
    %771 = arith.addi %0, %c64_i32_474 : i32
    %c13_i32_475 = arith.constant 13 : i32
    %772 = arith.addi %771, %c13_i32_475 : i32
    %773 = arith.index_cast %772 : i32 to index
    %774 = memref.load %arg1[%773] : memref<256xi32, #tpu.memory_space<smem>>
    %c1_i32_476 = arith.constant 1 : i32
    %c13_i32_477 = arith.constant 13 : i32
    %c1_i32_478 = arith.constant 1 : i32
    %c0_i32_479 = arith.constant 0 : i32
    %775 = tpu.memref_slice %arg4[%774, %c0_i32_479] : memref<512x128xf32, #tpu.memory_space<any>> -> memref<1x128xf32, #tpu.memory_space<any>>
    %776 = tpu.memref_squeeze %775 : memref<1x128xf32, #tpu.memory_space<any>> -> memref<128xf32, #tpu.memory_space<any>>
    %c0_i32_480 = arith.constant 0 : i32
    %777 = tpu.memref_slice %arg5[%c1_i32_476, %c13_i32_477, %c0_i32_480] : memref<2x64x128xf32, #tpu.memory_space<vmem>> -> memref<1x1x128xf32, #tpu.memory_space<vmem>>
    %778 = tpu.memref_squeeze %777 : memref<1x1x128xf32, #tpu.memory_space<vmem>> -> memref<128xf32, #tpu.memory_space<vmem>>
    %779 = tpu.memref_slice %arg6[%c1_i32_478] : memref<2x!tpu.dma_semaphore, #tpu.memory_space<semaphore_mem>> -> memref<1x!tpu.dma_semaphore, #tpu.memory_space<semaphore_mem>>
    %780 = tpu.memref_squeeze %779 : memref<1x!tpu.dma_semaphore, #tpu.memory_space<semaphore_mem>> -> memref<!tpu.dma_semaphore, #tpu.memory_space<semaphore_mem>>
    tpu.enqueue_dma source(%776 : memref<128xf32, #tpu.memory_space<any>>) target(%778 : memref<128xf32, #tpu.memory_space<vmem>>) target_semaphore(%780 : memref<!tpu.dma_semaphore, #tpu.memory_space<semaphore_mem>>)
    %c64_i32_481 = arith.constant 64 : i32
    %781 = arith.addi %0, %c64_i32_481 : i32
    %c14_i32_482 = arith.constant 14 : i32
    %782 = arith.addi %781, %c14_i32_482 : i32
    %783 = arith.index_cast %782 : i32 to index
    %784 = memref.load %arg1[%783] : memref<256xi32, #tpu.memory_space<smem>>
    %c1_i32_483 = arith.constant 1 : i32
    %c14_i32_484 = arith.constant 14 : i32
    %c1_i32_485 = arith.constant 1 : i32
    %c0_i32_486 = arith.constant 0 : i32
    %785 = tpu.memref_slice %arg4[%784, %c0_i32_486] : memref<512x128xf32, #tpu.memory_space<any>> -> memref<1x128xf32, #tpu.memory_space<any>>
    %786 = tpu.memref_squeeze %785 : memref<1x128xf32, #tpu.memory_space<any>> -> memref<128xf32, #tpu.memory_space<any>>
    %c0_i32_487 = arith.constant 0 : i32
    %787 = tpu.memref_slice %arg5[%c1_i32_483, %c14_i32_484, %c0_i32_487] : memref<2x64x128xf32, #tpu.memory_space<vmem>> -> memref<1x1x128xf32, #tpu.memory_space<vmem>>
    %788 = tpu.memref_squeeze %787 : memref<1x1x128xf32, #tpu.memory_space<vmem>> -> memref<128xf32, #tpu.memory_space<vmem>>
    %789 = tpu.memref_slice %arg6[%c1_i32_485] : memref<2x!tpu.dma_semaphore, #tpu.memory_space<semaphore_mem>> -> memref<1x!tpu.dma_semaphore, #tpu.memory_space<semaphore_mem>>
    %790 = tpu.memref_squeeze %789 : memref<1x!tpu.dma_semaphore, #tpu.memory_space<semaphore_mem>> -> memref<!tpu.dma_semaphore, #tpu.memory_space<semaphore_mem>>
    tpu.enqueue_dma source(%786 : memref<128xf32, #tpu.memory_space<any>>) target(%788 : memref<128xf32, #tpu.memory_space<vmem>>) target_semaphore(%790 : memref<!tpu.dma_semaphore, #tpu.memory_space<semaphore_mem>>)
    %c64_i32_488 = arith.constant 64 : i32
    %791 = arith.addi %0, %c64_i32_488 : i32
    %c15_i32_489 = arith.constant 15 : i32
    %792 = arith.addi %791, %c15_i32_489 : i32
    %793 = arith.index_cast %792 : i32 to index
    %794 = memref.load %arg1[%793] : memref<256xi32, #tpu.memory_space<smem>>
    %c1_i32_490 = arith.constant 1 : i32
    %c15_i32_491 = arith.constant 15 : i32
    %c1_i32_492 = arith.constant 1 : i32
    %c0_i32_493 = arith.constant 0 : i32
    %795 = tpu.memref_slice %arg4[%794, %c0_i32_493] : memref<512x128xf32, #tpu.memory_space<any>> -> memref<1x128xf32, #tpu.memory_space<any>>
    %796 = tpu.memref_squeeze %795 : memref<1x128xf32, #tpu.memory_space<any>> -> memref<128xf32, #tpu.memory_space<any>>
    %c0_i32_494 = arith.constant 0 : i32
    %797 = tpu.memref_slice %arg5[%c1_i32_490, %c15_i32_491, %c0_i32_494] : memref<2x64x128xf32, #tpu.memory_space<vmem>> -> memref<1x1x128xf32, #tpu.memory_space<vmem>>
    %798 = tpu.memref_squeeze %797 : memref<1x1x128xf32, #tpu.memory_space<vmem>> -> memref<128xf32, #tpu.memory_space<vmem>>
    %799 = tpu.memref_slice %arg6[%c1_i32_492] : memref<2x!tpu.dma_semaphore, #tpu.memory_space<semaphore_mem>> -> memref<1x!tpu.dma_semaphore, #tpu.memory_space<semaphore_mem>>
    %800 = tpu.memref_squeeze %799 : memref<1x!tpu.dma_semaphore, #tpu.memory_space<semaphore_mem>> -> memref<!tpu.dma_semaphore, #tpu.memory_space<semaphore_mem>>
    tpu.enqueue_dma source(%796 : memref<128xf32, #tpu.memory_space<any>>) target(%798 : memref<128xf32, #tpu.memory_space<vmem>>) target_semaphore(%800 : memref<!tpu.dma_semaphore, #tpu.memory_space<semaphore_mem>>)
    %c64_i32_495 = arith.constant 64 : i32
    %801 = arith.addi %0, %c64_i32_495 : i32
    %c16_i32_496 = arith.constant 16 : i32
    %802 = arith.addi %801, %c16_i32_496 : i32
    %803 = arith.index_cast %802 : i32 to index
    %804 = memref.load %arg1[%803] : memref<256xi32, #tpu.memory_space<smem>>
    %c1_i32_497 = arith.constant 1 : i32
    %c16_i32_498 = arith.constant 16 : i32
    %c1_i32_499 = arith.constant 1 : i32
    %c0_i32_500 = arith.constant 0 : i32
    %805 = tpu.memref_slice %arg4[%804, %c0_i32_500] : memref<512x128xf32, #tpu.memory_space<any>> -> memref<1x128xf32, #tpu.memory_space<any>>
    %806 = tpu.memref_squeeze %805 : memref<1x128xf32, #tpu.memory_space<any>> -> memref<128xf32, #tpu.memory_space<any>>
    %c0_i32_501 = arith.constant 0 : i32
    %807 = tpu.memref_slice %arg5[%c1_i32_497, %c16_i32_498, %c0_i32_501] : memref<2x64x128xf32, #tpu.memory_space<vmem>> -> memref<1x1x128xf32, #tpu.memory_space<vmem>>
    %808 = tpu.memref_squeeze %807 : memref<1x1x128xf32, #tpu.memory_space<vmem>> -> memref<128xf32, #tpu.memory_space<vmem>>
    %809 = tpu.memref_slice %arg6[%c1_i32_499] : memref<2x!tpu.dma_semaphore, #tpu.memory_space<semaphore_mem>> -> memref<1x!tpu.dma_semaphore, #tpu.memory_space<semaphore_mem>>
    %810 = tpu.memref_squeeze %809 : memref<1x!tpu.dma_semaphore, #tpu.memory_space<semaphore_mem>> -> memref<!tpu.dma_semaphore, #tpu.memory_space<semaphore_mem>>
    tpu.enqueue_dma source(%806 : memref<128xf32, #tpu.memory_space<any>>) target(%808 : memref<128xf32, #tpu.memory_space<vmem>>) target_semaphore(%810 : memref<!tpu.dma_semaphore, #tpu.memory_space<semaphore_mem>>)
    %c64_i32_502 = arith.constant 64 : i32
    %811 = arith.addi %0, %c64_i32_502 : i32
    %c17_i32_503 = arith.constant 17 : i32
    %812 = arith.addi %811, %c17_i32_503 : i32
    %813 = arith.index_cast %812 : i32 to index
    %814 = memref.load %arg1[%813] : memref<256xi32, #tpu.memory_space<smem>>
    %c1_i32_504 = arith.constant 1 : i32
    %c17_i32_505 = arith.constant 17 : i32
    %c1_i32_506 = arith.constant 1 : i32
    %c0_i32_507 = arith.constant 0 : i32
    %815 = tpu.memref_slice %arg4[%814, %c0_i32_507] : memref<512x128xf32, #tpu.memory_space<any>> -> memref<1x128xf32, #tpu.memory_space<any>>
    %816 = tpu.memref_squeeze %815 : memref<1x128xf32, #tpu.memory_space<any>> -> memref<128xf32, #tpu.memory_space<any>>
    %c0_i32_508 = arith.constant 0 : i32
    %817 = tpu.memref_slice %arg5[%c1_i32_504, %c17_i32_505, %c0_i32_508] : memref<2x64x128xf32, #tpu.memory_space<vmem>> -> memref<1x1x128xf32, #tpu.memory_space<vmem>>
    %818 = tpu.memref_squeeze %817 : memref<1x1x128xf32, #tpu.memory_space<vmem>> -> memref<128xf32, #tpu.memory_space<vmem>>
    %819 = tpu.memref_slice %arg6[%c1_i32_506] : memref<2x!tpu.dma_semaphore, #tpu.memory_space<semaphore_mem>> -> memref<1x!tpu.dma_semaphore, #tpu.memory_space<semaphore_mem>>
    %820 = tpu.memref_squeeze %819 : memref<1x!tpu.dma_semaphore, #tpu.memory_space<semaphore_mem>> -> memref<!tpu.dma_semaphore, #tpu.memory_space<semaphore_mem>>
    tpu.enqueue_dma source(%816 : memref<128xf32, #tpu.memory_space<any>>) target(%818 : memref<128xf32, #tpu.memory_space<vmem>>) target_semaphore(%820 : memref<!tpu.dma_semaphore, #tpu.memory_space<semaphore_mem>>)
    %c64_i32_509 = arith.constant 64 : i32
    %821 = arith.addi %0, %c64_i32_509 : i32
    %c18_i32_510 = arith.constant 18 : i32
    %822 = arith.addi %821, %c18_i32_510 : i32
    %823 = arith.index_cast %822 : i32 to index
    %824 = memref.load %arg1[%823] : memref<256xi32, #tpu.memory_space<smem>>
    %c1_i32_511 = arith.constant 1 : i32
    %c18_i32_512 = arith.constant 18 : i32
    %c1_i32_513 = arith.constant 1 : i32
    %c0_i32_514 = arith.constant 0 : i32
    %825 = tpu.memref_slice %arg4[%824, %c0_i32_514] : memref<512x128xf32, #tpu.memory_space<any>> -> memref<1x128xf32, #tpu.memory_space<any>>
    %826 = tpu.memref_squeeze %825 : memref<1x128xf32, #tpu.memory_space<any>> -> memref<128xf32, #tpu.memory_space<any>>
    %c0_i32_515 = arith.constant 0 : i32
    %827 = tpu.memref_slice %arg5[%c1_i32_511, %c18_i32_512, %c0_i32_515] : memref<2x64x128xf32, #tpu.memory_space<vmem>> -> memref<1x1x128xf32, #tpu.memory_space<vmem>>
    %828 = tpu.memref_squeeze %827 : memref<1x1x128xf32, #tpu.memory_space<vmem>> -> memref<128xf32, #tpu.memory_space<vmem>>
    %829 = tpu.memref_slice %arg6[%c1_i32_513] : memref<2x!tpu.dma_semaphore, #tpu.memory_space<semaphore_mem>> -> memref<1x!tpu.dma_semaphore, #tpu.memory_space<semaphore_mem>>
    %830 = tpu.memref_squeeze %829 : memref<1x!tpu.dma_semaphore, #tpu.memory_space<semaphore_mem>> -> memref<!tpu.dma_semaphore, #tpu.memory_space<semaphore_mem>>
    tpu.enqueue_dma source(%826 : memref<128xf32, #tpu.memory_space<any>>) target(%828 : memref<128xf32, #tpu.memory_space<vmem>>) target_semaphore(%830 : memref<!tpu.dma_semaphore, #tpu.memory_space<semaphore_mem>>)
    %c64_i32_516 = arith.constant 64 : i32
    %831 = arith.addi %0, %c64_i32_516 : i32
    %c19_i32_517 = arith.constant 19 : i32
    %832 = arith.addi %831, %c19_i32_517 : i32
    %833 = arith.index_cast %832 : i32 to index
    %834 = memref.load %arg1[%833] : memref<256xi32, #tpu.memory_space<smem>>
    %c1_i32_518 = arith.constant 1 : i32
    %c19_i32_519 = arith.constant 19 : i32
    %c1_i32_520 = arith.constant 1 : i32
    %c0_i32_521 = arith.constant 0 : i32
    %835 = tpu.memref_slice %arg4[%834, %c0_i32_521] : memref<512x128xf32, #tpu.memory_space<any>> -> memref<1x128xf32, #tpu.memory_space<any>>
    %836 = tpu.memref_squeeze %835 : memref<1x128xf32, #tpu.memory_space<any>> -> memref<128xf32, #tpu.memory_space<any>>
    %c0_i32_522 = arith.constant 0 : i32
    %837 = tpu.memref_slice %arg5[%c1_i32_518, %c19_i32_519, %c0_i32_522] : memref<2x64x128xf32, #tpu.memory_space<vmem>> -> memref<1x1x128xf32, #tpu.memory_space<vmem>>
    %838 = tpu.memref_squeeze %837 : memref<1x1x128xf32, #tpu.memory_space<vmem>> -> memref<128xf32, #tpu.memory_space<vmem>>
    %839 = tpu.memref_slice %arg6[%c1_i32_520] : memref<2x!tpu.dma_semaphore, #tpu.memory_space<semaphore_mem>> -> memref<1x!tpu.dma_semaphore, #tpu.memory_space<semaphore_mem>>
    %840 = tpu.memref_squeeze %839 : memref<1x!tpu.dma_semaphore, #tpu.memory_space<semaphore_mem>> -> memref<!tpu.dma_semaphore, #tpu.memory_space<semaphore_mem>>
    tpu.enqueue_dma source(%836 : memref<128xf32, #tpu.memory_space<any>>) target(%838 : memref<128xf32, #tpu.memory_space<vmem>>) target_semaphore(%840 : memref<!tpu.dma_semaphore, #tpu.memory_space<semaphore_mem>>)
    %c64_i32_523 = arith.constant 64 : i32
    %841 = arith.addi %0, %c64_i32_523 : i32
    %c20_i32_524 = arith.constant 20 : i32
    %842 = arith.addi %841, %c20_i32_524 : i32
    %843 = arith.index_cast %842 : i32 to index
    %844 = memref.load %arg1[%843] : memref<256xi32, #tpu.memory_space<smem>>
    %c1_i32_525 = arith.constant 1 : i32
    %c20_i32_526 = arith.constant 20 : i32
    %c1_i32_527 = arith.constant 1 : i32
    %c0_i32_528 = arith.constant 0 : i32
    %845 = tpu.memref_slice %arg4[%844, %c0_i32_528] : memref<512x128xf32, #tpu.memory_space<any>> -> memref<1x128xf32, #tpu.memory_space<any>>
    %846 = tpu.memref_squeeze %845 : memref<1x128xf32, #tpu.memory_space<any>> -> memref<128xf32, #tpu.memory_space<any>>
    %c0_i32_529 = arith.constant 0 : i32
    %847 = tpu.memref_slice %arg5[%c1_i32_525, %c20_i32_526, %c0_i32_529] : memref<2x64x128xf32, #tpu.memory_space<vmem>> -> memref<1x1x128xf32, #tpu.memory_space<vmem>>
    %848 = tpu.memref_squeeze %847 : memref<1x1x128xf32, #tpu.memory_space<vmem>> -> memref<128xf32, #tpu.memory_space<vmem>>
    %849 = tpu.memref_slice %arg6[%c1_i32_527] : memref<2x!tpu.dma_semaphore, #tpu.memory_space<semaphore_mem>> -> memref<1x!tpu.dma_semaphore, #tpu.memory_space<semaphore_mem>>
    %850 = tpu.memref_squeeze %849 : memref<1x!tpu.dma_semaphore, #tpu.memory_space<semaphore_mem>> -> memref<!tpu.dma_semaphore, #tpu.memory_space<semaphore_mem>>
    tpu.enqueue_dma source(%846 : memref<128xf32, #tpu.memory_space<any>>) target(%848 : memref<128xf32, #tpu.memory_space<vmem>>) target_semaphore(%850 : memref<!tpu.dma_semaphore, #tpu.memory_space<semaphore_mem>>)
    %c64_i32_530 = arith.constant 64 : i32
    %851 = arith.addi %0, %c64_i32_530 : i32
    %c21_i32_531 = arith.constant 21 : i32
    %852 = arith.addi %851, %c21_i32_531 : i32
    %853 = arith.index_cast %852 : i32 to index
    %854 = memref.load %arg1[%853] : memref<256xi32, #tpu.memory_space<smem>>
    %c1_i32_532 = arith.constant 1 : i32
    %c21_i32_533 = arith.constant 21 : i32
    %c1_i32_534 = arith.constant 1 : i32
    %c0_i32_535 = arith.constant 0 : i32
    %855 = tpu.memref_slice %arg4[%854, %c0_i32_535] : memref<512x128xf32, #tpu.memory_space<any>> -> memref<1x128xf32, #tpu.memory_space<any>>
    %856 = tpu.memref_squeeze %855 : memref<1x128xf32, #tpu.memory_space<any>> -> memref<128xf32, #tpu.memory_space<any>>
    %c0_i32_536 = arith.constant 0 : i32
    %857 = tpu.memref_slice %arg5[%c1_i32_532, %c21_i32_533, %c0_i32_536] : memref<2x64x128xf32, #tpu.memory_space<vmem>> -> memref<1x1x128xf32, #tpu.memory_space<vmem>>
    %858 = tpu.memref_squeeze %857 : memref<1x1x128xf32, #tpu.memory_space<vmem>> -> memref<128xf32, #tpu.memory_space<vmem>>
    %859 = tpu.memref_slice %arg6[%c1_i32_534] : memref<2x!tpu.dma_semaphore, #tpu.memory_space<semaphore_mem>> -> memref<1x!tpu.dma_semaphore, #tpu.memory_space<semaphore_mem>>
    %860 = tpu.memref_squeeze %859 : memref<1x!tpu.dma_semaphore, #tpu.memory_space<semaphore_mem>> -> memref<!tpu.dma_semaphore, #tpu.memory_space<semaphore_mem>>
    tpu.enqueue_dma source(%856 : memref<128xf32, #tpu.memory_space<any>>) target(%858 : memref<128xf32, #tpu.memory_space<vmem>>) target_semaphore(%860 : memref<!tpu.dma_semaphore, #tpu.memory_space<semaphore_mem>>)
    %c64_i32_537 = arith.constant 64 : i32
    %861 = arith.addi %0, %c64_i32_537 : i32
    %c22_i32_538 = arith.constant 22 : i32
    %862 = arith.addi %861, %c22_i32_538 : i32
    %863 = arith.index_cast %862 : i32 to index
    %864 = memref.load %arg1[%863] : memref<256xi32, #tpu.memory_space<smem>>
    %c1_i32_539 = arith.constant 1 : i32
    %c22_i32_540 = arith.constant 22 : i32
    %c1_i32_541 = arith.constant 1 : i32
    %c0_i32_542 = arith.constant 0 : i32
    %865 = tpu.memref_slice %arg4[%864, %c0_i32_542] : memref<512x128xf32, #tpu.memory_space<any>> -> memref<1x128xf32, #tpu.memory_space<any>>
    %866 = tpu.memref_squeeze %865 : memref<1x128xf32, #tpu.memory_space<any>> -> memref<128xf32, #tpu.memory_space<any>>
    %c0_i32_543 = arith.constant 0 : i32
    %867 = tpu.memref_slice %arg5[%c1_i32_539, %c22_i32_540, %c0_i32_543] : memref<2x64x128xf32, #tpu.memory_space<vmem>> -> memref<1x1x128xf32, #tpu.memory_space<vmem>>
    %868 = tpu.memref_squeeze %867 : memref<1x1x128xf32, #tpu.memory_space<vmem>> -> memref<128xf32, #tpu.memory_space<vmem>>
    %869 = tpu.memref_slice %arg6[%c1_i32_541] : memref<2x!tpu.dma_semaphore, #tpu.memory_space<semaphore_mem>> -> memref<1x!tpu.dma_semaphore, #tpu.memory_space<semaphore_mem>>
    %870 = tpu.memref_squeeze %869 : memref<1x!tpu.dma_semaphore, #tpu.memory_space<semaphore_mem>> -> memref<!tpu.dma_semaphore, #tpu.memory_space<semaphore_mem>>
    tpu.enqueue_dma source(%866 : memref<128xf32, #tpu.memory_space<any>>) target(%868 : memref<128xf32, #tpu.memory_space<vmem>>) target_semaphore(%870 : memref<!tpu.dma_semaphore, #tpu.memory_space<semaphore_mem>>)
    %c64_i32_544 = arith.constant 64 : i32
    %871 = arith.addi %0, %c64_i32_544 : i32
    %c23_i32_545 = arith.constant 23 : i32
    %872 = arith.addi %871, %c23_i32_545 : i32
    %873 = arith.index_cast %872 : i32 to index
    %874 = memref.load %arg1[%873] : memref<256xi32, #tpu.memory_space<smem>>
    %c1_i32_546 = arith.constant 1 : i32
    %c23_i32_547 = arith.constant 23 : i32
    %c1_i32_548 = arith.constant 1 : i32
    %c0_i32_549 = arith.constant 0 : i32
    %875 = tpu.memref_slice %arg4[%874, %c0_i32_549] : memref<512x128xf32, #tpu.memory_space<any>> -> memref<1x128xf32, #tpu.memory_space<any>>
    %876 = tpu.memref_squeeze %875 : memref<1x128xf32, #tpu.memory_space<any>> -> memref<128xf32, #tpu.memory_space<any>>
    %c0_i32_550 = arith.constant 0 : i32
    %877 = tpu.memref_slice %arg5[%c1_i32_546, %c23_i32_547, %c0_i32_550] : memref<2x64x128xf32, #tpu.memory_space<vmem>> -> memref<1x1x128xf32, #tpu.memory_space<vmem>>
    %878 = tpu.memref_squeeze %877 : memref<1x1x128xf32, #tpu.memory_space<vmem>> -> memref<128xf32, #tpu.memory_space<vmem>>
    %879 = tpu.memref_slice %arg6[%c1_i32_548] : memref<2x!tpu.dma_semaphore, #tpu.memory_space<semaphore_mem>> -> memref<1x!tpu.dma_semaphore, #tpu.memory_space<semaphore_mem>>
    %880 = tpu.memref_squeeze %879 : memref<1x!tpu.dma_semaphore, #tpu.memory_space<semaphore_mem>> -> memref<!tpu.dma_semaphore, #tpu.memory_space<semaphore_mem>>
    tpu.enqueue_dma source(%876 : memref<128xf32, #tpu.memory_space<any>>) target(%878 : memref<128xf32, #tpu.memory_space<vmem>>) target_semaphore(%880 : memref<!tpu.dma_semaphore, #tpu.memory_space<semaphore_mem>>)
    %c64_i32_551 = arith.constant 64 : i32
    %881 = arith.addi %0, %c64_i32_551 : i32
    %c24_i32_552 = arith.constant 24 : i32
    %882 = arith.addi %881, %c24_i32_552 : i32
    %883 = arith.index_cast %882 : i32 to index
    %884 = memref.load %arg1[%883] : memref<256xi32, #tpu.memory_space<smem>>
    %c1_i32_553 = arith.constant 1 : i32
    %c24_i32_554 = arith.constant 24 : i32
    %c1_i32_555 = arith.constant 1 : i32
    %c0_i32_556 = arith.constant 0 : i32
    %885 = tpu.memref_slice %arg4[%884, %c0_i32_556] : memref<512x128xf32, #tpu.memory_space<any>> -> memref<1x128xf32, #tpu.memory_space<any>>
    %886 = tpu.memref_squeeze %885 : memref<1x128xf32, #tpu.memory_space<any>> -> memref<128xf32, #tpu.memory_space<any>>
    %c0_i32_557 = arith.constant 0 : i32
    %887 = tpu.memref_slice %arg5[%c1_i32_553, %c24_i32_554, %c0_i32_557] : memref<2x64x128xf32, #tpu.memory_space<vmem>> -> memref<1x1x128xf32, #tpu.memory_space<vmem>>
    %888 = tpu.memref_squeeze %887 : memref<1x1x128xf32, #tpu.memory_space<vmem>> -> memref<128xf32, #tpu.memory_space<vmem>>
    %889 = tpu.memref_slice %arg6[%c1_i32_555] : memref<2x!tpu.dma_semaphore, #tpu.memory_space<semaphore_mem>> -> memref<1x!tpu.dma_semaphore, #tpu.memory_space<semaphore_mem>>
    %890 = tpu.memref_squeeze %889 : memref<1x!tpu.dma_semaphore, #tpu.memory_space<semaphore_mem>> -> memref<!tpu.dma_semaphore, #tpu.memory_space<semaphore_mem>>
    tpu.enqueue_dma source(%886 : memref<128xf32, #tpu.memory_space<any>>) target(%888 : memref<128xf32, #tpu.memory_space<vmem>>) target_semaphore(%890 : memref<!tpu.dma_semaphore, #tpu.memory_space<semaphore_mem>>)
    %c64_i32_558 = arith.constant 64 : i32
    %891 = arith.addi %0, %c64_i32_558 : i32
    %c25_i32_559 = arith.constant 25 : i32
    %892 = arith.addi %891, %c25_i32_559 : i32
    %893 = arith.index_cast %892 : i32 to index
    %894 = memref.load %arg1[%893] : memref<256xi32, #tpu.memory_space<smem>>
    %c1_i32_560 = arith.constant 1 : i32
    %c25_i32_561 = arith.constant 25 : i32
    %c1_i32_562 = arith.constant 1 : i32
    %c0_i32_563 = arith.constant 0 : i32
    %895 = tpu.memref_slice %arg4[%894, %c0_i32_563] : memref<512x128xf32, #tpu.memory_space<any>> -> memref<1x128xf32, #tpu.memory_space<any>>
    %896 = tpu.memref_squeeze %895 : memref<1x128xf32, #tpu.memory_space<any>> -> memref<128xf32, #tpu.memory_space<any>>
    %c0_i32_564 = arith.constant 0 : i32
    %897 = tpu.memref_slice %arg5[%c1_i32_560, %c25_i32_561, %c0_i32_564] : memref<2x64x128xf32, #tpu.memory_space<vmem>> -> memref<1x1x128xf32, #tpu.memory_space<vmem>>
    %898 = tpu.memref_squeeze %897 : memref<1x1x128xf32, #tpu.memory_space<vmem>> -> memref<128xf32, #tpu.memory_space<vmem>>
    %899 = tpu.memref_slice %arg6[%c1_i32_562] : memref<2x!tpu.dma_semaphore, #tpu.memory_space<semaphore_mem>> -> memref<1x!tpu.dma_semaphore, #tpu.memory_space<semaphore_mem>>
    %900 = tpu.memref_squeeze %899 : memref<1x!tpu.dma_semaphore, #tpu.memory_space<semaphore_mem>> -> memref<!tpu.dma_semaphore, #tpu.memory_space<semaphore_mem>>
    tpu.enqueue_dma source(%896 : memref<128xf32, #tpu.memory_space<any>>) target(%898 : memref<128xf32, #tpu.memory_space<vmem>>) target_semaphore(%900 : memref<!tpu.dma_semaphore, #tpu.memory_space<semaphore_mem>>)
    %c64_i32_565 = arith.constant 64 : i32
    %901 = arith.addi %0, %c64_i32_565 : i32
    %c26_i32_566 = arith.constant 26 : i32
    %902 = arith.addi %901, %c26_i32_566 : i32
    %903 = arith.index_cast %902 : i32 to index
    %904 = memref.load %arg1[%903] : memref<256xi32, #tpu.memory_space<smem>>
    %c1_i32_567 = arith.constant 1 : i32
    %c26_i32_568 = arith.constant 26 : i32
    %c1_i32_569 = arith.constant 1 : i32
    %c0_i32_570 = arith.constant 0 : i32
    %905 = tpu.memref_slice %arg4[%904, %c0_i32_570] : memref<512x128xf32, #tpu.memory_space<any>> -> memref<1x128xf32, #tpu.memory_space<any>>
    %906 = tpu.memref_squeeze %905 : memref<1x128xf32, #tpu.memory_space<any>> -> memref<128xf32, #tpu.memory_space<any>>
    %c0_i32_571 = arith.constant 0 : i32
    %907 = tpu.memref_slice %arg5[%c1_i32_567, %c26_i32_568, %c0_i32_571] : memref<2x64x128xf32, #tpu.memory_space<vmem>> -> memref<1x1x128xf32, #tpu.memory_space<vmem>>
    %908 = tpu.memref_squeeze %907 : memref<1x1x128xf32, #tpu.memory_space<vmem>> -> memref<128xf32, #tpu.memory_space<vmem>>
    %909 = tpu.memref_slice %arg6[%c1_i32_569] : memref<2x!tpu.dma_semaphore, #tpu.memory_space<semaphore_mem>> -> memref<1x!tpu.dma_semaphore, #tpu.memory_space<semaphore_mem>>
    %910 = tpu.memref_squeeze %909 : memref<1x!tpu.dma_semaphore, #tpu.memory_space<semaphore_mem>> -> memref<!tpu.dma_semaphore, #tpu.memory_space<semaphore_mem>>
    tpu.enqueue_dma source(%906 : memref<128xf32, #tpu.memory_space<any>>) target(%908 : memref<128xf32, #tpu.memory_space<vmem>>) target_semaphore(%910 : memref<!tpu.dma_semaphore, #tpu.memory_space<semaphore_mem>>)
    %c64_i32_572 = arith.constant 64 : i32
    %911 = arith.addi %0, %c64_i32_572 : i32
    %c27_i32_573 = arith.constant 27 : i32
    %912 = arith.addi %911, %c27_i32_573 : i32
    %913 = arith.index_cast %912 : i32 to index
    %914 = memref.load %arg1[%913] : memref<256xi32, #tpu.memory_space<smem>>
    %c1_i32_574 = arith.constant 1 : i32
    %c27_i32_575 = arith.constant 27 : i32
    %c1_i32_576 = arith.constant 1 : i32
    %c0_i32_577 = arith.constant 0 : i32
    %915 = tpu.memref_slice %arg4[%914, %c0_i32_577] : memref<512x128xf32, #tpu.memory_space<any>> -> memref<1x128xf32, #tpu.memory_space<any>>
    %916 = tpu.memref_squeeze %915 : memref<1x128xf32, #tpu.memory_space<any>> -> memref<128xf32, #tpu.memory_space<any>>
    %c0_i32_578 = arith.constant 0 : i32
    %917 = tpu.memref_slice %arg5[%c1_i32_574, %c27_i32_575, %c0_i32_578] : memref<2x64x128xf32, #tpu.memory_space<vmem>> -> memref<1x1x128xf32, #tpu.memory_space<vmem>>
    %918 = tpu.memref_squeeze %917 : memref<1x1x128xf32, #tpu.memory_space<vmem>> -> memref<128xf32, #tpu.memory_space<vmem>>
    %919 = tpu.memref_slice %arg6[%c1_i32_576] : memref<2x!tpu.dma_semaphore, #tpu.memory_space<semaphore_mem>> -> memref<1x!tpu.dma_semaphore, #tpu.memory_space<semaphore_mem>>
    %920 = tpu.memref_squeeze %919 : memref<1x!tpu.dma_semaphore, #tpu.memory_space<semaphore_mem>> -> memref<!tpu.dma_semaphore, #tpu.memory_space<semaphore_mem>>
    tpu.enqueue_dma source(%916 : memref<128xf32, #tpu.memory_space<any>>) target(%918 : memref<128xf32, #tpu.memory_space<vmem>>) target_semaphore(%920 : memref<!tpu.dma_semaphore, #tpu.memory_space<semaphore_mem>>)
    %c64_i32_579 = arith.constant 64 : i32
    %921 = arith.addi %0, %c64_i32_579 : i32
    %c28_i32_580 = arith.constant 28 : i32
    %922 = arith.addi %921, %c28_i32_580 : i32
    %923 = arith.index_cast %922 : i32 to index
    %924 = memref.load %arg1[%923] : memref<256xi32, #tpu.memory_space<smem>>
    %c1_i32_581 = arith.constant 1 : i32
    %c28_i32_582 = arith.constant 28 : i32
    %c1_i32_583 = arith.constant 1 : i32
    %c0_i32_584 = arith.constant 0 : i32
    %925 = tpu.memref_slice %arg4[%924, %c0_i32_584] : memref<512x128xf32, #tpu.memory_space<any>> -> memref<1x128xf32, #tpu.memory_space<any>>
    %926 = tpu.memref_squeeze %925 : memref<1x128xf32, #tpu.memory_space<any>> -> memref<128xf32, #tpu.memory_space<any>>
    %c0_i32_585 = arith.constant 0 : i32
    %927 = tpu.memref_slice %arg5[%c1_i32_581, %c28_i32_582, %c0_i32_585] : memref<2x64x128xf32, #tpu.memory_space<vmem>> -> memref<1x1x128xf32, #tpu.memory_space<vmem>>
    %928 = tpu.memref_squeeze %927 : memref<1x1x128xf32, #tpu.memory_space<vmem>> -> memref<128xf32, #tpu.memory_space<vmem>>
    %929 = tpu.memref_slice %arg6[%c1_i32_583] : memref<2x!tpu.dma_semaphore, #tpu.memory_space<semaphore_mem>> -> memref<1x!tpu.dma_semaphore, #tpu.memory_space<semaphore_mem>>
    %930 = tpu.memref_squeeze %929 : memref<1x!tpu.dma_semaphore, #tpu.memory_space<semaphore_mem>> -> memref<!tpu.dma_semaphore, #tpu.memory_space<semaphore_mem>>
    tpu.enqueue_dma source(%926 : memref<128xf32, #tpu.memory_space<any>>) target(%928 : memref<128xf32, #tpu.memory_space<vmem>>) target_semaphore(%930 : memref<!tpu.dma_semaphore, #tpu.memory_space<semaphore_mem>>)
    %c64_i32_586 = arith.constant 64 : i32
    %931 = arith.addi %0, %c64_i32_586 : i32
    %c29_i32_587 = arith.constant 29 : i32
    %932 = arith.addi %931, %c29_i32_587 : i32
    %933 = arith.index_cast %932 : i32 to index
    %934 = memref.load %arg1[%933] : memref<256xi32, #tpu.memory_space<smem>>
    %c1_i32_588 = arith.constant 1 : i32
    %c29_i32_589 = arith.constant 29 : i32
    %c1_i32_590 = arith.constant 1 : i32
    %c0_i32_591 = arith.constant 0 : i32
    %935 = tpu.memref_slice %arg4[%934, %c0_i32_591] : memref<512x128xf32, #tpu.memory_space<any>> -> memref<1x128xf32, #tpu.memory_space<any>>
    %936 = tpu.memref_squeeze %935 : memref<1x128xf32, #tpu.memory_space<any>> -> memref<128xf32, #tpu.memory_space<any>>
    %c0_i32_592 = arith.constant 0 : i32
    %937 = tpu.memref_slice %arg5[%c1_i32_588, %c29_i32_589, %c0_i32_592] : memref<2x64x128xf32, #tpu.memory_space<vmem>> -> memref<1x1x128xf32, #tpu.memory_space<vmem>>
    %938 = tpu.memref_squeeze %937 : memref<1x1x128xf32, #tpu.memory_space<vmem>> -> memref<128xf32, #tpu.memory_space<vmem>>
    %939 = tpu.memref_slice %arg6[%c1_i32_590] : memref<2x!tpu.dma_semaphore, #tpu.memory_space<semaphore_mem>> -> memref<1x!tpu.dma_semaphore, #tpu.memory_space<semaphore_mem>>
    %940 = tpu.memref_squeeze %939 : memref<1x!tpu.dma_semaphore, #tpu.memory_space<semaphore_mem>> -> memref<!tpu.dma_semaphore, #tpu.memory_space<semaphore_mem>>
    tpu.enqueue_dma source(%936 : memref<128xf32, #tpu.memory_space<any>>) target(%938 : memref<128xf32, #tpu.memory_space<vmem>>) target_semaphore(%940 : memref<!tpu.dma_semaphore, #tpu.memory_space<semaphore_mem>>)
    %c64_i32_593 = arith.constant 64 : i32
    %941 = arith.addi %0, %c64_i32_593 : i32
    %c30_i32_594 = arith.constant 30 : i32
    %942 = arith.addi %941, %c30_i32_594 : i32
    %943 = arith.index_cast %942 : i32 to index
    %944 = memref.load %arg1[%943] : memref<256xi32, #tpu.memory_space<smem>>
    %c1_i32_595 = arith.constant 1 : i32
    %c30_i32_596 = arith.constant 30 : i32
    %c1_i32_597 = arith.constant 1 : i32
    %c0_i32_598 = arith.constant 0 : i32
    %945 = tpu.memref_slice %arg4[%944, %c0_i32_598] : memref<512x128xf32, #tpu.memory_space<any>> -> memref<1x128xf32, #tpu.memory_space<any>>
    %946 = tpu.memref_squeeze %945 : memref<1x128xf32, #tpu.memory_space<any>> -> memref<128xf32, #tpu.memory_space<any>>
    %c0_i32_599 = arith.constant 0 : i32
    %947 = tpu.memref_slice %arg5[%c1_i32_595, %c30_i32_596, %c0_i32_599] : memref<2x64x128xf32, #tpu.memory_space<vmem>> -> memref<1x1x128xf32, #tpu.memory_space<vmem>>
    %948 = tpu.memref_squeeze %947 : memref<1x1x128xf32, #tpu.memory_space<vmem>> -> memref<128xf32, #tpu.memory_space<vmem>>
    %949 = tpu.memref_slice %arg6[%c1_i32_597] : memref<2x!tpu.dma_semaphore, #tpu.memory_space<semaphore_mem>> -> memref<1x!tpu.dma_semaphore, #tpu.memory_space<semaphore_mem>>
    %950 = tpu.memref_squeeze %949 : memref<1x!tpu.dma_semaphore, #tpu.memory_space<semaphore_mem>> -> memref<!tpu.dma_semaphore, #tpu.memory_space<semaphore_mem>>
    tpu.enqueue_dma source(%946 : memref<128xf32, #tpu.memory_space<any>>) target(%948 : memref<128xf32, #tpu.memory_space<vmem>>) target_semaphore(%950 : memref<!tpu.dma_semaphore, #tpu.memory_space<semaphore_mem>>)
    %c64_i32_600 = arith.constant 64 : i32
    %951 = arith.addi %0, %c64_i32_600 : i32
    %c31_i32_601 = arith.constant 31 : i32
    %952 = arith.addi %951, %c31_i32_601 : i32
    %953 = arith.index_cast %952 : i32 to index
    %954 = memref.load %arg1[%953] : memref<256xi32, #tpu.memory_space<smem>>
    %c1_i32_602 = arith.constant 1 : i32
    %c31_i32_603 = arith.constant 31 : i32
    %c1_i32_604 = arith.constant 1 : i32
    %c0_i32_605 = arith.constant 0 : i32
    %955 = tpu.memref_slice %arg4[%954, %c0_i32_605] : memref<512x128xf32, #tpu.memory_space<any>> -> memref<1x128xf32, #tpu.memory_space<any>>
    %956 = tpu.memref_squeeze %955 : memref<1x128xf32, #tpu.memory_space<any>> -> memref<128xf32, #tpu.memory_space<any>>
    %c0_i32_606 = arith.constant 0 : i32
    %957 = tpu.memref_slice %arg5[%c1_i32_602, %c31_i32_603, %c0_i32_606] : memref<2x64x128xf32, #tpu.memory_space<vmem>> -> memref<1x1x128xf32, #tpu.memory_space<vmem>>
    %958 = tpu.memref_squeeze %957 : memref<1x1x128xf32, #tpu.memory_space<vmem>> -> memref<128xf32, #tpu.memory_space<vmem>>
    %959 = tpu.memref_slice %arg6[%c1_i32_604] : memref<2x!tpu.dma_semaphore, #tpu.memory_space<semaphore_mem>> -> memref<1x!tpu.dma_semaphore, #tpu.memory_space<semaphore_mem>>
    %960 = tpu.memref_squeeze %959 : memref<1x!tpu.dma_semaphore, #tpu.memory_space<semaphore_mem>> -> memref<!tpu.dma_semaphore, #tpu.memory_space<semaphore_mem>>
    tpu.enqueue_dma source(%956 : memref<128xf32, #tpu.memory_space<any>>) target(%958 : memref<128xf32, #tpu.memory_space<vmem>>) target_semaphore(%960 : memref<!tpu.dma_semaphore, #tpu.memory_space<semaphore_mem>>)
    %c64_i32_607 = arith.constant 64 : i32
    %961 = arith.addi %0, %c64_i32_607 : i32
    %c32_i32_608 = arith.constant 32 : i32
    %962 = arith.addi %961, %c32_i32_608 : i32
    %963 = arith.index_cast %962 : i32 to index
    %964 = memref.load %arg1[%963] : memref<256xi32, #tpu.memory_space<smem>>
    %c1_i32_609 = arith.constant 1 : i32
    %c32_i32_610 = arith.constant 32 : i32
    %c1_i32_611 = arith.constant 1 : i32
    %c0_i32_612 = arith.constant 0 : i32
    %965 = tpu.memref_slice %arg4[%964, %c0_i32_612] : memref<512x128xf32, #tpu.memory_space<any>> -> memref<1x128xf32, #tpu.memory_space<any>>
    %966 = tpu.memref_squeeze %965 : memref<1x128xf32, #tpu.memory_space<any>> -> memref<128xf32, #tpu.memory_space<any>>
    %c0_i32_613 = arith.constant 0 : i32
    %967 = tpu.memref_slice %arg5[%c1_i32_609, %c32_i32_610, %c0_i32_613] : memref<2x64x128xf32, #tpu.memory_space<vmem>> -> memref<1x1x128xf32, #tpu.memory_space<vmem>>
    %968 = tpu.memref_squeeze %967 : memref<1x1x128xf32, #tpu.memory_space<vmem>> -> memref<128xf32, #tpu.memory_space<vmem>>
    %969 = tpu.memref_slice %arg6[%c1_i32_611] : memref<2x!tpu.dma_semaphore, #tpu.memory_space<semaphore_mem>> -> memref<1x!tpu.dma_semaphore, #tpu.memory_space<semaphore_mem>>
    %970 = tpu.memref_squeeze %969 : memref<1x!tpu.dma_semaphore, #tpu.memory_space<semaphore_mem>> -> memref<!tpu.dma_semaphore, #tpu.memory_space<semaphore_mem>>
    tpu.enqueue_dma source(%966 : memref<128xf32, #tpu.memory_space<any>>) target(%968 : memref<128xf32, #tpu.memory_space<vmem>>) target_semaphore(%970 : memref<!tpu.dma_semaphore, #tpu.memory_space<semaphore_mem>>)
    %c64_i32_614 = arith.constant 64 : i32
    %971 = arith.addi %0, %c64_i32_614 : i32
    %c33_i32_615 = arith.constant 33 : i32
    %972 = arith.addi %971, %c33_i32_615 : i32
    %973 = arith.index_cast %972 : i32 to index
    %974 = memref.load %arg1[%973] : memref<256xi32, #tpu.memory_space<smem>>
    %c1_i32_616 = arith.constant 1 : i32
    %c33_i32_617 = arith.constant 33 : i32
    %c1_i32_618 = arith.constant 1 : i32
    %c0_i32_619 = arith.constant 0 : i32
    %975 = tpu.memref_slice %arg4[%974, %c0_i32_619] : memref<512x128xf32, #tpu.memory_space<any>> -> memref<1x128xf32, #tpu.memory_space<any>>
    %976 = tpu.memref_squeeze %975 : memref<1x128xf32, #tpu.memory_space<any>> -> memref<128xf32, #tpu.memory_space<any>>
    %c0_i32_620 = arith.constant 0 : i32
    %977 = tpu.memref_slice %arg5[%c1_i32_616, %c33_i32_617, %c0_i32_620] : memref<2x64x128xf32, #tpu.memory_space<vmem>> -> memref<1x1x128xf32, #tpu.memory_space<vmem>>
    %978 = tpu.memref_squeeze %977 : memref<1x1x128xf32, #tpu.memory_space<vmem>> -> memref<128xf32, #tpu.memory_space<vmem>>
    %979 = tpu.memref_slice %arg6[%c1_i32_618] : memref<2x!tpu.dma_semaphore, #tpu.memory_space<semaphore_mem>> -> memref<1x!tpu.dma_semaphore, #tpu.memory_space<semaphore_mem>>
    %980 = tpu.memref_squeeze %979 : memref<1x!tpu.dma_semaphore, #tpu.memory_space<semaphore_mem>> -> memref<!tpu.dma_semaphore, #tpu.memory_space<semaphore_mem>>
    tpu.enqueue_dma source(%976 : memref<128xf32, #tpu.memory_space<any>>) target(%978 : memref<128xf32, #tpu.memory_space<vmem>>) target_semaphore(%980 : memref<!tpu.dma_semaphore, #tpu.memory_space<semaphore_mem>>)
    %c64_i32_621 = arith.constant 64 : i32
    %981 = arith.addi %0, %c64_i32_621 : i32
    %c34_i32_622 = arith.constant 34 : i32
    %982 = arith.addi %981, %c34_i32_622 : i32
    %983 = arith.index_cast %982 : i32 to index
    %984 = memref.load %arg1[%983] : memref<256xi32, #tpu.memory_space<smem>>
    %c1_i32_623 = arith.constant 1 : i32
    %c34_i32_624 = arith.constant 34 : i32
    %c1_i32_625 = arith.constant 1 : i32
    %c0_i32_626 = arith.constant 0 : i32
    %985 = tpu.memref_slice %arg4[%984, %c0_i32_626] : memref<512x128xf32, #tpu.memory_space<any>> -> memref<1x128xf32, #tpu.memory_space<any>>
    %986 = tpu.memref_squeeze %985 : memref<1x128xf32, #tpu.memory_space<any>> -> memref<128xf32, #tpu.memory_space<any>>
    %c0_i32_627 = arith.constant 0 : i32
    %987 = tpu.memref_slice %arg5[%c1_i32_623, %c34_i32_624, %c0_i32_627] : memref<2x64x128xf32, #tpu.memory_space<vmem>> -> memref<1x1x128xf32, #tpu.memory_space<vmem>>
    %988 = tpu.memref_squeeze %987 : memref<1x1x128xf32, #tpu.memory_space<vmem>> -> memref<128xf32, #tpu.memory_space<vmem>>
    %989 = tpu.memref_slice %arg6[%c1_i32_625] : memref<2x!tpu.dma_semaphore, #tpu.memory_space<semaphore_mem>> -> memref<1x!tpu.dma_semaphore, #tpu.memory_space<semaphore_mem>>
    %990 = tpu.memref_squeeze %989 : memref<1x!tpu.dma_semaphore, #tpu.memory_space<semaphore_mem>> -> memref<!tpu.dma_semaphore, #tpu.memory_space<semaphore_mem>>
    tpu.enqueue_dma source(%986 : memref<128xf32, #tpu.memory_space<any>>) target(%988 : memref<128xf32, #tpu.memory_space<vmem>>) target_semaphore(%990 : memref<!tpu.dma_semaphore, #tpu.memory_space<semaphore_mem>>)
    %c64_i32_628 = arith.constant 64 : i32
    %991 = arith.addi %0, %c64_i32_628 : i32
    %c35_i32_629 = arith.constant 35 : i32
    %992 = arith.addi %991, %c35_i32_629 : i32
    %993 = arith.index_cast %992 : i32 to index
    %994 = memref.load %arg1[%993] : memref<256xi32, #tpu.memory_space<smem>>
    %c1_i32_630 = arith.constant 1 : i32
    %c35_i32_631 = arith.constant 35 : i32
    %c1_i32_632 = arith.constant 1 : i32
    %c0_i32_633 = arith.constant 0 : i32
    %995 = tpu.memref_slice %arg4[%994, %c0_i32_633] : memref<512x128xf32, #tpu.memory_space<any>> -> memref<1x128xf32, #tpu.memory_space<any>>
    %996 = tpu.memref_squeeze %995 : memref<1x128xf32, #tpu.memory_space<any>> -> memref<128xf32, #tpu.memory_space<any>>
    %c0_i32_634 = arith.constant 0 : i32
    %997 = tpu.memref_slice %arg5[%c1_i32_630, %c35_i32_631, %c0_i32_634] : memref<2x64x128xf32, #tpu.memory_space<vmem>> -> memref<1x1x128xf32, #tpu.memory_space<vmem>>
    %998 = tpu.memref_squeeze %997 : memref<1x1x128xf32, #tpu.memory_space<vmem>> -> memref<128xf32, #tpu.memory_space<vmem>>
    %999 = tpu.memref_slice %arg6[%c1_i32_632] : memref<2x!tpu.dma_semaphore, #tpu.memory_space<semaphore_mem>> -> memref<1x!tpu.dma_semaphore, #tpu.memory_space<semaphore_mem>>
    %1000 = tpu.memref_squeeze %999 : memref<1x!tpu.dma_semaphore, #tpu.memory_space<semaphore_mem>> -> memref<!tpu.dma_semaphore, #tpu.memory_space<semaphore_mem>>
    tpu.enqueue_dma source(%996 : memref<128xf32, #tpu.memory_space<any>>) target(%998 : memref<128xf32, #tpu.memory_space<vmem>>) target_semaphore(%1000 : memref<!tpu.dma_semaphore, #tpu.memory_space<semaphore_mem>>)
    %c64_i32_635 = arith.constant 64 : i32
    %1001 = arith.addi %0, %c64_i32_635 : i32
    %c36_i32_636 = arith.constant 36 : i32
    %1002 = arith.addi %1001, %c36_i32_636 : i32
    %1003 = arith.index_cast %1002 : i32 to index
    %1004 = memref.load %arg1[%1003] : memref<256xi32, #tpu.memory_space<smem>>
    %c1_i32_637 = arith.constant 1 : i32
    %c36_i32_638 = arith.constant 36 : i32
    %c1_i32_639 = arith.constant 1 : i32
    %c0_i32_640 = arith.constant 0 : i32
    %1005 = tpu.memref_slice %arg4[%1004, %c0_i32_640] : memref<512x128xf32, #tpu.memory_space<any>> -> memref<1x128xf32, #tpu.memory_space<any>>
    %1006 = tpu.memref_squeeze %1005 : memref<1x128xf32, #tpu.memory_space<any>> -> memref<128xf32, #tpu.memory_space<any>>
    %c0_i32_641 = arith.constant 0 : i32
    %1007 = tpu.memref_slice %arg5[%c1_i32_637, %c36_i32_638, %c0_i32_641] : memref<2x64x128xf32, #tpu.memory_space<vmem>> -> memref<1x1x128xf32, #tpu.memory_space<vmem>>
    %1008 = tpu.memref_squeeze %1007 : memref<1x1x128xf32, #tpu.memory_space<vmem>> -> memref<128xf32, #tpu.memory_space<vmem>>
    %1009 = tpu.memref_slice %arg6[%c1_i32_639] : memref<2x!tpu.dma_semaphore, #tpu.memory_space<semaphore_mem>> -> memref<1x!tpu.dma_semaphore, #tpu.memory_space<semaphore_mem>>
    %1010 = tpu.memref_squeeze %1009 : memref<1x!tpu.dma_semaphore, #tpu.memory_space<semaphore_mem>> -> memref<!tpu.dma_semaphore, #tpu.memory_space<semaphore_mem>>
    tpu.enqueue_dma source(%1006 : memref<128xf32, #tpu.memory_space<any>>) target(%1008 : memref<128xf32, #tpu.memory_space<vmem>>) target_semaphore(%1010 : memref<!tpu.dma_semaphore, #tpu.memory_space<semaphore_mem>>)
    %c64_i32_642 = arith.constant 64 : i32
    %1011 = arith.addi %0, %c64_i32_642 : i32
    %c37_i32_643 = arith.constant 37 : i32
    %1012 = arith.addi %1011, %c37_i32_643 : i32
    %1013 = arith.index_cast %1012 : i32 to index
    %1014 = memref.load %arg1[%1013] : memref<256xi32, #tpu.memory_space<smem>>
    %c1_i32_644 = arith.constant 1 : i32
    %c37_i32_645 = arith.constant 37 : i32
    %c1_i32_646 = arith.constant 1 : i32
    %c0_i32_647 = arith.constant 0 : i32
    %1015 = tpu.memref_slice %arg4[%1014, %c0_i32_647] : memref<512x128xf32, #tpu.memory_space<any>> -> memref<1x128xf32, #tpu.memory_space<any>>
    %1016 = tpu.memref_squeeze %1015 : memref<1x128xf32, #tpu.memory_space<any>> -> memref<128xf32, #tpu.memory_space<any>>
    %c0_i32_648 = arith.constant 0 : i32
    %1017 = tpu.memref_slice %arg5[%c1_i32_644, %c37_i32_645, %c0_i32_648] : memref<2x64x128xf32, #tpu.memory_space<vmem>> -> memref<1x1x128xf32, #tpu.memory_space<vmem>>
    %1018 = tpu.memref_squeeze %1017 : memref<1x1x128xf32, #tpu.memory_space<vmem>> -> memref<128xf32, #tpu.memory_space<vmem>>
    %1019 = tpu.memref_slice %arg6[%c1_i32_646] : memref<2x!tpu.dma_semaphore, #tpu.memory_space<semaphore_mem>> -> memref<1x!tpu.dma_semaphore, #tpu.memory_space<semaphore_mem>>
    %1020 = tpu.memref_squeeze %1019 : memref<1x!tpu.dma_semaphore, #tpu.memory_space<semaphore_mem>> -> memref<!tpu.dma_semaphore, #tpu.memory_space<semaphore_mem>>
    tpu.enqueue_dma source(%1016 : memref<128xf32, #tpu.memory_space<any>>) target(%1018 : memref<128xf32, #tpu.memory_space<vmem>>) target_semaphore(%1020 : memref<!tpu.dma_semaphore, #tpu.memory_space<semaphore_mem>>)
    %c64_i32_649 = arith.constant 64 : i32
    %1021 = arith.addi %0, %c64_i32_649 : i32
    %c38_i32_650 = arith.constant 38 : i32
    %1022 = arith.addi %1021, %c38_i32_650 : i32
    %1023 = arith.index_cast %1022 : i32 to index
    %1024 = memref.load %arg1[%1023] : memref<256xi32, #tpu.memory_space<smem>>
    %c1_i32_651 = arith.constant 1 : i32
    %c38_i32_652 = arith.constant 38 : i32
    %c1_i32_653 = arith.constant 1 : i32
    %c0_i32_654 = arith.constant 0 : i32
    %1025 = tpu.memref_slice %arg4[%1024, %c0_i32_654] : memref<512x128xf32, #tpu.memory_space<any>> -> memref<1x128xf32, #tpu.memory_space<any>>
    %1026 = tpu.memref_squeeze %1025 : memref<1x128xf32, #tpu.memory_space<any>> -> memref<128xf32, #tpu.memory_space<any>>
    %c0_i32_655 = arith.constant 0 : i32
    %1027 = tpu.memref_slice %arg5[%c1_i32_651, %c38_i32_652, %c0_i32_655] : memref<2x64x128xf32, #tpu.memory_space<vmem>> -> memref<1x1x128xf32, #tpu.memory_space<vmem>>
    %1028 = tpu.memref_squeeze %1027 : memref<1x1x128xf32, #tpu.memory_space<vmem>> -> memref<128xf32, #tpu.memory_space<vmem>>
    %1029 = tpu.memref_slice %arg6[%c1_i32_653] : memref<2x!tpu.dma_semaphore, #tpu.memory_space<semaphore_mem>> -> memref<1x!tpu.dma_semaphore, #tpu.memory_space<semaphore_mem>>
    %1030 = tpu.memref_squeeze %1029 : memref<1x!tpu.dma_semaphore, #tpu.memory_space<semaphore_mem>> -> memref<!tpu.dma_semaphore, #tpu.memory_space<semaphore_mem>>
    tpu.enqueue_dma source(%1026 : memref<128xf32, #tpu.memory_space<any>>) target(%1028 : memref<128xf32, #tpu.memory_space<vmem>>) target_semaphore(%1030 : memref<!tpu.dma_semaphore, #tpu.memory_space<semaphore_mem>>)
    %c64_i32_656 = arith.constant 64 : i32
    %1031 = arith.addi %0, %c64_i32_656 : i32
    %c39_i32_657 = arith.constant 39 : i32
    %1032 = arith.addi %1031, %c39_i32_657 : i32
    %1033 = arith.index_cast %1032 : i32 to index
    %1034 = memref.load %arg1[%1033] : memref<256xi32, #tpu.memory_space<smem>>
    %c1_i32_658 = arith.constant 1 : i32
    %c39_i32_659 = arith.constant 39 : i32
    %c1_i32_660 = arith.constant 1 : i32
    %c0_i32_661 = arith.constant 0 : i32
    %1035 = tpu.memref_slice %arg4[%1034, %c0_i32_661] : memref<512x128xf32, #tpu.memory_space<any>> -> memref<1x128xf32, #tpu.memory_space<any>>
    %1036 = tpu.memref_squeeze %1035 : memref<1x128xf32, #tpu.memory_space<any>> -> memref<128xf32, #tpu.memory_space<any>>
    %c0_i32_662 = arith.constant 0 : i32
    %1037 = tpu.memref_slice %arg5[%c1_i32_658, %c39_i32_659, %c0_i32_662] : memref<2x64x128xf32, #tpu.memory_space<vmem>> -> memref<1x1x128xf32, #tpu.memory_space<vmem>>
    %1038 = tpu.memref_squeeze %1037 : memref<1x1x128xf32, #tpu.memory_space<vmem>> -> memref<128xf32, #tpu.memory_space<vmem>>
    %1039 = tpu.memref_slice %arg6[%c1_i32_660] : memref<2x!tpu.dma_semaphore, #tpu.memory_space<semaphore_mem>> -> memref<1x!tpu.dma_semaphore, #tpu.memory_space<semaphore_mem>>
    %1040 = tpu.memref_squeeze %1039 : memref<1x!tpu.dma_semaphore, #tpu.memory_space<semaphore_mem>> -> memref<!tpu.dma_semaphore, #tpu.memory_space<semaphore_mem>>
    tpu.enqueue_dma source(%1036 : memref<128xf32, #tpu.memory_space<any>>) target(%1038 : memref<128xf32, #tpu.memory_space<vmem>>) target_semaphore(%1040 : memref<!tpu.dma_semaphore, #tpu.memory_space<semaphore_mem>>)
    %c64_i32_663 = arith.constant 64 : i32
    %1041 = arith.addi %0, %c64_i32_663 : i32
    %c40_i32_664 = arith.constant 40 : i32
    %1042 = arith.addi %1041, %c40_i32_664 : i32
    %1043 = arith.index_cast %1042 : i32 to index
    %1044 = memref.load %arg1[%1043] : memref<256xi32, #tpu.memory_space<smem>>
    %c1_i32_665 = arith.constant 1 : i32
    %c40_i32_666 = arith.constant 40 : i32
    %c1_i32_667 = arith.constant 1 : i32
    %c0_i32_668 = arith.constant 0 : i32
    %1045 = tpu.memref_slice %arg4[%1044, %c0_i32_668] : memref<512x128xf32, #tpu.memory_space<any>> -> memref<1x128xf32, #tpu.memory_space<any>>
    %1046 = tpu.memref_squeeze %1045 : memref<1x128xf32, #tpu.memory_space<any>> -> memref<128xf32, #tpu.memory_space<any>>
    %c0_i32_669 = arith.constant 0 : i32
    %1047 = tpu.memref_slice %arg5[%c1_i32_665, %c40_i32_666, %c0_i32_669] : memref<2x64x128xf32, #tpu.memory_space<vmem>> -> memref<1x1x128xf32, #tpu.memory_space<vmem>>
    %1048 = tpu.memref_squeeze %1047 : memref<1x1x128xf32, #tpu.memory_space<vmem>> -> memref<128xf32, #tpu.memory_space<vmem>>
    %1049 = tpu.memref_slice %arg6[%c1_i32_667] : memref<2x!tpu.dma_semaphore, #tpu.memory_space<semaphore_mem>> -> memref<1x!tpu.dma_semaphore, #tpu.memory_space<semaphore_mem>>
    %1050 = tpu.memref_squeeze %1049 : memref<1x!tpu.dma_semaphore, #tpu.memory_space<semaphore_mem>> -> memref<!tpu.dma_semaphore, #tpu.memory_space<semaphore_mem>>
    tpu.enqueue_dma source(%1046 : memref<128xf32, #tpu.memory_space<any>>) target(%1048 : memref<128xf32, #tpu.memory_space<vmem>>) target_semaphore(%1050 : memref<!tpu.dma_semaphore, #tpu.memory_space<semaphore_mem>>)
    %c64_i32_670 = arith.constant 64 : i32
    %1051 = arith.addi %0, %c64_i32_670 : i32
    %c41_i32_671 = arith.constant 41 : i32
    %1052 = arith.addi %1051, %c41_i32_671 : i32
    %1053 = arith.index_cast %1052 : i32 to index
    %1054 = memref.load %arg1[%1053] : memref<256xi32, #tpu.memory_space<smem>>
    %c1_i32_672 = arith.constant 1 : i32
    %c41_i32_673 = arith.constant 41 : i32
    %c1_i32_674 = arith.constant 1 : i32
    %c0_i32_675 = arith.constant 0 : i32
    %1055 = tpu.memref_slice %arg4[%1054, %c0_i32_675] : memref<512x128xf32, #tpu.memory_space<any>> -> memref<1x128xf32, #tpu.memory_space<any>>
    %1056 = tpu.memref_squeeze %1055 : memref<1x128xf32, #tpu.memory_space<any>> -> memref<128xf32, #tpu.memory_space<any>>
    %c0_i32_676 = arith.constant 0 : i32
    %1057 = tpu.memref_slice %arg5[%c1_i32_672, %c41_i32_673, %c0_i32_676] : memref<2x64x128xf32, #tpu.memory_space<vmem>> -> memref<1x1x128xf32, #tpu.memory_space<vmem>>
    %1058 = tpu.memref_squeeze %1057 : memref<1x1x128xf32, #tpu.memory_space<vmem>> -> memref<128xf32, #tpu.memory_space<vmem>>
    %1059 = tpu.memref_slice %arg6[%c1_i32_674] : memref<2x!tpu.dma_semaphore, #tpu.memory_space<semaphore_mem>> -> memref<1x!tpu.dma_semaphore, #tpu.memory_space<semaphore_mem>>
    %1060 = tpu.memref_squeeze %1059 : memref<1x!tpu.dma_semaphore, #tpu.memory_space<semaphore_mem>> -> memref<!tpu.dma_semaphore, #tpu.memory_space<semaphore_mem>>
    tpu.enqueue_dma source(%1056 : memref<128xf32, #tpu.memory_space<any>>) target(%1058 : memref<128xf32, #tpu.memory_space<vmem>>) target_semaphore(%1060 : memref<!tpu.dma_semaphore, #tpu.memory_space<semaphore_mem>>)
    %c64_i32_677 = arith.constant 64 : i32
    %1061 = arith.addi %0, %c64_i32_677 : i32
    %c42_i32_678 = arith.constant 42 : i32
    %1062 = arith.addi %1061, %c42_i32_678 : i32
    %1063 = arith.index_cast %1062 : i32 to index
    %1064 = memref.load %arg1[%1063] : memref<256xi32, #tpu.memory_space<smem>>
    %c1_i32_679 = arith.constant 1 : i32
    %c42_i32_680 = arith.constant 42 : i32
    %c1_i32_681 = arith.constant 1 : i32
    %c0_i32_682 = arith.constant 0 : i32
    %1065 = tpu.memref_slice %arg4[%1064, %c0_i32_682] : memref<512x128xf32, #tpu.memory_space<any>> -> memref<1x128xf32, #tpu.memory_space<any>>
    %1066 = tpu.memref_squeeze %1065 : memref<1x128xf32, #tpu.memory_space<any>> -> memref<128xf32, #tpu.memory_space<any>>
    %c0_i32_683 = arith.constant 0 : i32
    %1067 = tpu.memref_slice %arg5[%c1_i32_679, %c42_i32_680, %c0_i32_683] : memref<2x64x128xf32, #tpu.memory_space<vmem>> -> memref<1x1x128xf32, #tpu.memory_space<vmem>>
    %1068 = tpu.memref_squeeze %1067 : memref<1x1x128xf32, #tpu.memory_space<vmem>> -> memref<128xf32, #tpu.memory_space<vmem>>
    %1069 = tpu.memref_slice %arg6[%c1_i32_681] : memref<2x!tpu.dma_semaphore, #tpu.memory_space<semaphore_mem>> -> memref<1x!tpu.dma_semaphore, #tpu.memory_space<semaphore_mem>>
    %1070 = tpu.memref_squeeze %1069 : memref<1x!tpu.dma_semaphore, #tpu.memory_space<semaphore_mem>> -> memref<!tpu.dma_semaphore, #tpu.memory_space<semaphore_mem>>
    tpu.enqueue_dma source(%1066 : memref<128xf32, #tpu.memory_space<any>>) target(%1068 : memref<128xf32, #tpu.memory_space<vmem>>) target_semaphore(%1070 : memref<!tpu.dma_semaphore, #tpu.memory_space<semaphore_mem>>)
    %c64_i32_684 = arith.constant 64 : i32
    %1071 = arith.addi %0, %c64_i32_684 : i32
    %c43_i32_685 = arith.constant 43 : i32
    %1072 = arith.addi %1071, %c43_i32_685 : i32
    %1073 = arith.index_cast %1072 : i32 to index
    %1074 = memref.load %arg1[%1073] : memref<256xi32, #tpu.memory_space<smem>>
    %c1_i32_686 = arith.constant 1 : i32
    %c43_i32_687 = arith.constant 43 : i32
    %c1_i32_688 = arith.constant 1 : i32
    %c0_i32_689 = arith.constant 0 : i32
    %1075 = tpu.memref_slice %arg4[%1074, %c0_i32_689] : memref<512x128xf32, #tpu.memory_space<any>> -> memref<1x128xf32, #tpu.memory_space<any>>
    %1076 = tpu.memref_squeeze %1075 : memref<1x128xf32, #tpu.memory_space<any>> -> memref<128xf32, #tpu.memory_space<any>>
    %c0_i32_690 = arith.constant 0 : i32
    %1077 = tpu.memref_slice %arg5[%c1_i32_686, %c43_i32_687, %c0_i32_690] : memref<2x64x128xf32, #tpu.memory_space<vmem>> -> memref<1x1x128xf32, #tpu.memory_space<vmem>>
    %1078 = tpu.memref_squeeze %1077 : memref<1x1x128xf32, #tpu.memory_space<vmem>> -> memref<128xf32, #tpu.memory_space<vmem>>
    %1079 = tpu.memref_slice %arg6[%c1_i32_688] : memref<2x!tpu.dma_semaphore, #tpu.memory_space<semaphore_mem>> -> memref<1x!tpu.dma_semaphore, #tpu.memory_space<semaphore_mem>>
    %1080 = tpu.memref_squeeze %1079 : memref<1x!tpu.dma_semaphore, #tpu.memory_space<semaphore_mem>> -> memref<!tpu.dma_semaphore, #tpu.memory_space<semaphore_mem>>
    tpu.enqueue_dma source(%1076 : memref<128xf32, #tpu.memory_space<any>>) target(%1078 : memref<128xf32, #tpu.memory_space<vmem>>) target_semaphore(%1080 : memref<!tpu.dma_semaphore, #tpu.memory_space<semaphore_mem>>)
    %c64_i32_691 = arith.constant 64 : i32
    %1081 = arith.addi %0, %c64_i32_691 : i32
    %c44_i32_692 = arith.constant 44 : i32
    %1082 = arith.addi %1081, %c44_i32_692 : i32
    %1083 = arith.index_cast %1082 : i32 to index
    %1084 = memref.load %arg1[%1083] : memref<256xi32, #tpu.memory_space<smem>>
    %c1_i32_693 = arith.constant 1 : i32
    %c44_i32_694 = arith.constant 44 : i32
    %c1_i32_695 = arith.constant 1 : i32
    %c0_i32_696 = arith.constant 0 : i32
    %1085 = tpu.memref_slice %arg4[%1084, %c0_i32_696] : memref<512x128xf32, #tpu.memory_space<any>> -> memref<1x128xf32, #tpu.memory_space<any>>
    %1086 = tpu.memref_squeeze %1085 : memref<1x128xf32, #tpu.memory_space<any>> -> memref<128xf32, #tpu.memory_space<any>>
    %c0_i32_697 = arith.constant 0 : i32
    %1087 = tpu.memref_slice %arg5[%c1_i32_693, %c44_i32_694, %c0_i32_697] : memref<2x64x128xf32, #tpu.memory_space<vmem>> -> memref<1x1x128xf32, #tpu.memory_space<vmem>>
    %1088 = tpu.memref_squeeze %1087 : memref<1x1x128xf32, #tpu.memory_space<vmem>> -> memref<128xf32, #tpu.memory_space<vmem>>
    %1089 = tpu.memref_slice %arg6[%c1_i32_695] : memref<2x!tpu.dma_semaphore, #tpu.memory_space<semaphore_mem>> -> memref<1x!tpu.dma_semaphore, #tpu.memory_space<semaphore_mem>>
    %1090 = tpu.memref_squeeze %1089 : memref<1x!tpu.dma_semaphore, #tpu.memory_space<semaphore_mem>> -> memref<!tpu.dma_semaphore, #tpu.memory_space<semaphore_mem>>
    tpu.enqueue_dma source(%1086 : memref<128xf32, #tpu.memory_space<any>>) target(%1088 : memref<128xf32, #tpu.memory_space<vmem>>) target_semaphore(%1090 : memref<!tpu.dma_semaphore, #tpu.memory_space<semaphore_mem>>)
    %c64_i32_698 = arith.constant 64 : i32
    %1091 = arith.addi %0, %c64_i32_698 : i32
    %c45_i32_699 = arith.constant 45 : i32
    %1092 = arith.addi %1091, %c45_i32_699 : i32
    %1093 = arith.index_cast %1092 : i32 to index
    %1094 = memref.load %arg1[%1093] : memref<256xi32, #tpu.memory_space<smem>>
    %c1_i32_700 = arith.constant 1 : i32
    %c45_i32_701 = arith.constant 45 : i32
    %c1_i32_702 = arith.constant 1 : i32
    %c0_i32_703 = arith.constant 0 : i32
    %1095 = tpu.memref_slice %arg4[%1094, %c0_i32_703] : memref<512x128xf32, #tpu.memory_space<any>> -> memref<1x128xf32, #tpu.memory_space<any>>
    %1096 = tpu.memref_squeeze %1095 : memref<1x128xf32, #tpu.memory_space<any>> -> memref<128xf32, #tpu.memory_space<any>>
    %c0_i32_704 = arith.constant 0 : i32
    %1097 = tpu.memref_slice %arg5[%c1_i32_700, %c45_i32_701, %c0_i32_704] : memref<2x64x128xf32, #tpu.memory_space<vmem>> -> memref<1x1x128xf32, #tpu.memory_space<vmem>>
    %1098 = tpu.memref_squeeze %1097 : memref<1x1x128xf32, #tpu.memory_space<vmem>> -> memref<128xf32, #tpu.memory_space<vmem>>
    %1099 = tpu.memref_slice %arg6[%c1_i32_702] : memref<2x!tpu.dma_semaphore, #tpu.memory_space<semaphore_mem>> -> memref<1x!tpu.dma_semaphore, #tpu.memory_space<semaphore_mem>>
    %1100 = tpu.memref_squeeze %1099 : memref<1x!tpu.dma_semaphore, #tpu.memory_space<semaphore_mem>> -> memref<!tpu.dma_semaphore, #tpu.memory_space<semaphore_mem>>
    tpu.enqueue_dma source(%1096 : memref<128xf32, #tpu.memory_space<any>>) target(%1098 : memref<128xf32, #tpu.memory_space<vmem>>) target_semaphore(%1100 : memref<!tpu.dma_semaphore, #tpu.memory_space<semaphore_mem>>)
    %c64_i32_705 = arith.constant 64 : i32
    %1101 = arith.addi %0, %c64_i32_705 : i32
    %c46_i32_706 = arith.constant 46 : i32
    %1102 = arith.addi %1101, %c46_i32_706 : i32
    %1103 = arith.index_cast %1102 : i32 to index
    %1104 = memref.load %arg1[%1103] : memref<256xi32, #tpu.memory_space<smem>>
    %c1_i32_707 = arith.constant 1 : i32
    %c46_i32_708 = arith.constant 46 : i32
    %c1_i32_709 = arith.constant 1 : i32
    %c0_i32_710 = arith.constant 0 : i32
    %1105 = tpu.memref_slice %arg4[%1104, %c0_i32_710] : memref<512x128xf32, #tpu.memory_space<any>> -> memref<1x128xf32, #tpu.memory_space<any>>
    %1106 = tpu.memref_squeeze %1105 : memref<1x128xf32, #tpu.memory_space<any>> -> memref<128xf32, #tpu.memory_space<any>>
    %c0_i32_711 = arith.constant 0 : i32
    %1107 = tpu.memref_slice %arg5[%c1_i32_707, %c46_i32_708, %c0_i32_711] : memref<2x64x128xf32, #tpu.memory_space<vmem>> -> memref<1x1x128xf32, #tpu.memory_space<vmem>>
    %1108 = tpu.memref_squeeze %1107 : memref<1x1x128xf32, #tpu.memory_space<vmem>> -> memref<128xf32, #tpu.memory_space<vmem>>
    %1109 = tpu.memref_slice %arg6[%c1_i32_709] : memref<2x!tpu.dma_semaphore, #tpu.memory_space<semaphore_mem>> -> memref<1x!tpu.dma_semaphore, #tpu.memory_space<semaphore_mem>>
    %1110 = tpu.memref_squeeze %1109 : memref<1x!tpu.dma_semaphore, #tpu.memory_space<semaphore_mem>> -> memref<!tpu.dma_semaphore, #tpu.memory_space<semaphore_mem>>
    tpu.enqueue_dma source(%1106 : memref<128xf32, #tpu.memory_space<any>>) target(%1108 : memref<128xf32, #tpu.memory_space<vmem>>) target_semaphore(%1110 : memref<!tpu.dma_semaphore, #tpu.memory_space<semaphore_mem>>)
    %c64_i32_712 = arith.constant 64 : i32
    %1111 = arith.addi %0, %c64_i32_712 : i32
    %c47_i32_713 = arith.constant 47 : i32
    %1112 = arith.addi %1111, %c47_i32_713 : i32
    %1113 = arith.index_cast %1112 : i32 to index
    %1114 = memref.load %arg1[%1113] : memref<256xi32, #tpu.memory_space<smem>>
    %c1_i32_714 = arith.constant 1 : i32
    %c47_i32_715 = arith.constant 47 : i32
    %c1_i32_716 = arith.constant 1 : i32
    %c0_i32_717 = arith.constant 0 : i32
    %1115 = tpu.memref_slice %arg4[%1114, %c0_i32_717] : memref<512x128xf32, #tpu.memory_space<any>> -> memref<1x128xf32, #tpu.memory_space<any>>
    %1116 = tpu.memref_squeeze %1115 : memref<1x128xf32, #tpu.memory_space<any>> -> memref<128xf32, #tpu.memory_space<any>>
    %c0_i32_718 = arith.constant 0 : i32
    %1117 = tpu.memref_slice %arg5[%c1_i32_714, %c47_i32_715, %c0_i32_718] : memref<2x64x128xf32, #tpu.memory_space<vmem>> -> memref<1x1x128xf32, #tpu.memory_space<vmem>>
    %1118 = tpu.memref_squeeze %1117 : memref<1x1x128xf32, #tpu.memory_space<vmem>> -> memref<128xf32, #tpu.memory_space<vmem>>
    %1119 = tpu.memref_slice %arg6[%c1_i32_716] : memref<2x!tpu.dma_semaphore, #tpu.memory_space<semaphore_mem>> -> memref<1x!tpu.dma_semaphore, #tpu.memory_space<semaphore_mem>>
    %1120 = tpu.memref_squeeze %1119 : memref<1x!tpu.dma_semaphore, #tpu.memory_space<semaphore_mem>> -> memref<!tpu.dma_semaphore, #tpu.memory_space<semaphore_mem>>
    tpu.enqueue_dma source(%1116 : memref<128xf32, #tpu.memory_space<any>>) target(%1118 : memref<128xf32, #tpu.memory_space<vmem>>) target_semaphore(%1120 : memref<!tpu.dma_semaphore, #tpu.memory_space<semaphore_mem>>)
    %c64_i32_719 = arith.constant 64 : i32
    %1121 = arith.addi %0, %c64_i32_719 : i32
    %c48_i32_720 = arith.constant 48 : i32
    %1122 = arith.addi %1121, %c48_i32_720 : i32
    %1123 = arith.index_cast %1122 : i32 to index
    %1124 = memref.load %arg1[%1123] : memref<256xi32, #tpu.memory_space<smem>>
    %c1_i32_721 = arith.constant 1 : i32
    %c48_i32_722 = arith.constant 48 : i32
    %c1_i32_723 = arith.constant 1 : i32
    %c0_i32_724 = arith.constant 0 : i32
    %1125 = tpu.memref_slice %arg4[%1124, %c0_i32_724] : memref<512x128xf32, #tpu.memory_space<any>> -> memref<1x128xf32, #tpu.memory_space<any>>
    %1126 = tpu.memref_squeeze %1125 : memref<1x128xf32, #tpu.memory_space<any>> -> memref<128xf32, #tpu.memory_space<any>>
    %c0_i32_725 = arith.constant 0 : i32
    %1127 = tpu.memref_slice %arg5[%c1_i32_721, %c48_i32_722, %c0_i32_725] : memref<2x64x128xf32, #tpu.memory_space<vmem>> -> memref<1x1x128xf32, #tpu.memory_space<vmem>>
    %1128 = tpu.memref_squeeze %1127 : memref<1x1x128xf32, #tpu.memory_space<vmem>> -> memref<128xf32, #tpu.memory_space<vmem>>
    %1129 = tpu.memref_slice %arg6[%c1_i32_723] : memref<2x!tpu.dma_semaphore, #tpu.memory_space<semaphore_mem>> -> memref<1x!tpu.dma_semaphore, #tpu.memory_space<semaphore_mem>>
    %1130 = tpu.memref_squeeze %1129 : memref<1x!tpu.dma_semaphore, #tpu.memory_space<semaphore_mem>> -> memref<!tpu.dma_semaphore, #tpu.memory_space<semaphore_mem>>
    tpu.enqueue_dma source(%1126 : memref<128xf32, #tpu.memory_space<any>>) target(%1128 : memref<128xf32, #tpu.memory_space<vmem>>) target_semaphore(%1130 : memref<!tpu.dma_semaphore, #tpu.memory_space<semaphore_mem>>)
    %c64_i32_726 = arith.constant 64 : i32
    %1131 = arith.addi %0, %c64_i32_726 : i32
    %c49_i32_727 = arith.constant 49 : i32
    %1132 = arith.addi %1131, %c49_i32_727 : i32
    %1133 = arith.index_cast %1132 : i32 to index
    %1134 = memref.load %arg1[%1133] : memref<256xi32, #tpu.memory_space<smem>>
    %c1_i32_728 = arith.constant 1 : i32
    %c49_i32_729 = arith.constant 49 : i32
    %c1_i32_730 = arith.constant 1 : i32
    %c0_i32_731 = arith.constant 0 : i32
    %1135 = tpu.memref_slice %arg4[%1134, %c0_i32_731] : memref<512x128xf32, #tpu.memory_space<any>> -> memref<1x128xf32, #tpu.memory_space<any>>
    %1136 = tpu.memref_squeeze %1135 : memref<1x128xf32, #tpu.memory_space<any>> -> memref<128xf32, #tpu.memory_space<any>>
    %c0_i32_732 = arith.constant 0 : i32
    %1137 = tpu.memref_slice %arg5[%c1_i32_728, %c49_i32_729, %c0_i32_732] : memref<2x64x128xf32, #tpu.memory_space<vmem>> -> memref<1x1x128xf32, #tpu.memory_space<vmem>>
    %1138 = tpu.memref_squeeze %1137 : memref<1x1x128xf32, #tpu.memory_space<vmem>> -> memref<128xf32, #tpu.memory_space<vmem>>
    %1139 = tpu.memref_slice %arg6[%c1_i32_730] : memref<2x!tpu.dma_semaphore, #tpu.memory_space<semaphore_mem>> -> memref<1x!tpu.dma_semaphore, #tpu.memory_space<semaphore_mem>>
    %1140 = tpu.memref_squeeze %1139 : memref<1x!tpu.dma_semaphore, #tpu.memory_space<semaphore_mem>> -> memref<!tpu.dma_semaphore, #tpu.memory_space<semaphore_mem>>
    tpu.enqueue_dma source(%1136 : memref<128xf32, #tpu.memory_space<any>>) target(%1138 : memref<128xf32, #tpu.memory_space<vmem>>) target_semaphore(%1140 : memref<!tpu.dma_semaphore, #tpu.memory_space<semaphore_mem>>)
    %c64_i32_733 = arith.constant 64 : i32
    %1141 = arith.addi %0, %c64_i32_733 : i32
    %c50_i32_734 = arith.constant 50 : i32
    %1142 = arith.addi %1141, %c50_i32_734 : i32
    %1143 = arith.index_cast %1142 : i32 to index
    %1144 = memref.load %arg1[%1143] : memref<256xi32, #tpu.memory_space<smem>>
    %c1_i32_735 = arith.constant 1 : i32
    %c50_i32_736 = arith.constant 50 : i32
    %c1_i32_737 = arith.constant 1 : i32
    %c0_i32_738 = arith.constant 0 : i32
    %1145 = tpu.memref_slice %arg4[%1144, %c0_i32_738] : memref<512x128xf32, #tpu.memory_space<any>> -> memref<1x128xf32, #tpu.memory_space<any>>
    %1146 = tpu.memref_squeeze %1145 : memref<1x128xf32, #tpu.memory_space<any>> -> memref<128xf32, #tpu.memory_space<any>>
    %c0_i32_739 = arith.constant 0 : i32
    %1147 = tpu.memref_slice %arg5[%c1_i32_735, %c50_i32_736, %c0_i32_739] : memref<2x64x128xf32, #tpu.memory_space<vmem>> -> memref<1x1x128xf32, #tpu.memory_space<vmem>>
    %1148 = tpu.memref_squeeze %1147 : memref<1x1x128xf32, #tpu.memory_space<vmem>> -> memref<128xf32, #tpu.memory_space<vmem>>
    %1149 = tpu.memref_slice %arg6[%c1_i32_737] : memref<2x!tpu.dma_semaphore, #tpu.memory_space<semaphore_mem>> -> memref<1x!tpu.dma_semaphore, #tpu.memory_space<semaphore_mem>>
    %1150 = tpu.memref_squeeze %1149 : memref<1x!tpu.dma_semaphore, #tpu.memory_space<semaphore_mem>> -> memref<!tpu.dma_semaphore, #tpu.memory_space<semaphore_mem>>
    tpu.enqueue_dma source(%1146 : memref<128xf32, #tpu.memory_space<any>>) target(%1148 : memref<128xf32, #tpu.memory_space<vmem>>) target_semaphore(%1150 : memref<!tpu.dma_semaphore, #tpu.memory_space<semaphore_mem>>)
    %c64_i32_740 = arith.constant 64 : i32
    %1151 = arith.addi %0, %c64_i32_740 : i32
    %c51_i32_741 = arith.constant 51 : i32
    %1152 = arith.addi %1151, %c51_i32_741 : i32
    %1153 = arith.index_cast %1152 : i32 to index
    %1154 = memref.load %arg1[%1153] : memref<256xi32, #tpu.memory_space<smem>>
    %c1_i32_742 = arith.constant 1 : i32
    %c51_i32_743 = arith.constant 51 : i32
    %c1_i32_744 = arith.constant 1 : i32
    %c0_i32_745 = arith.constant 0 : i32
    %1155 = tpu.memref_slice %arg4[%1154, %c0_i32_745] : memref<512x128xf32, #tpu.memory_space<any>> -> memref<1x128xf32, #tpu.memory_space<any>>
    %1156 = tpu.memref_squeeze %1155 : memref<1x128xf32, #tpu.memory_space<any>> -> memref<128xf32, #tpu.memory_space<any>>
    %c0_i32_746 = arith.constant 0 : i32
    %1157 = tpu.memref_slice %arg5[%c1_i32_742, %c51_i32_743, %c0_i32_746] : memref<2x64x128xf32, #tpu.memory_space<vmem>> -> memref<1x1x128xf32, #tpu.memory_space<vmem>>
    %1158 = tpu.memref_squeeze %1157 : memref<1x1x128xf32, #tpu.memory_space<vmem>> -> memref<128xf32, #tpu.memory_space<vmem>>
    %1159 = tpu.memref_slice %arg6[%c1_i32_744] : memref<2x!tpu.dma_semaphore, #tpu.memory_space<semaphore_mem>> -> memref<1x!tpu.dma_semaphore, #tpu.memory_space<semaphore_mem>>
    %1160 = tpu.memref_squeeze %1159 : memref<1x!tpu.dma_semaphore, #tpu.memory_space<semaphore_mem>> -> memref<!tpu.dma_semaphore, #tpu.memory_space<semaphore_mem>>
    tpu.enqueue_dma source(%1156 : memref<128xf32, #tpu.memory_space<any>>) target(%1158 : memref<128xf32, #tpu.memory_space<vmem>>) target_semaphore(%1160 : memref<!tpu.dma_semaphore, #tpu.memory_space<semaphore_mem>>)
    %c64_i32_747 = arith.constant 64 : i32
    %1161 = arith.addi %0, %c64_i32_747 : i32
    %c52_i32_748 = arith.constant 52 : i32
    %1162 = arith.addi %1161, %c52_i32_748 : i32
    %1163 = arith.index_cast %1162 : i32 to index
    %1164 = memref.load %arg1[%1163] : memref<256xi32, #tpu.memory_space<smem>>
    %c1_i32_749 = arith.constant 1 : i32
    %c52_i32_750 = arith.constant 52 : i32
    %c1_i32_751 = arith.constant 1 : i32
    %c0_i32_752 = arith.constant 0 : i32
    %1165 = tpu.memref_slice %arg4[%1164, %c0_i32_752] : memref<512x128xf32, #tpu.memory_space<any>> -> memref<1x128xf32, #tpu.memory_space<any>>
    %1166 = tpu.memref_squeeze %1165 : memref<1x128xf32, #tpu.memory_space<any>> -> memref<128xf32, #tpu.memory_space<any>>
    %c0_i32_753 = arith.constant 0 : i32
    %1167 = tpu.memref_slice %arg5[%c1_i32_749, %c52_i32_750, %c0_i32_753] : memref<2x64x128xf32, #tpu.memory_space<vmem>> -> memref<1x1x128xf32, #tpu.memory_space<vmem>>
    %1168 = tpu.memref_squeeze %1167 : memref<1x1x128xf32, #tpu.memory_space<vmem>> -> memref<128xf32, #tpu.memory_space<vmem>>
    %1169 = tpu.memref_slice %arg6[%c1_i32_751] : memref<2x!tpu.dma_semaphore, #tpu.memory_space<semaphore_mem>> -> memref<1x!tpu.dma_semaphore, #tpu.memory_space<semaphore_mem>>
    %1170 = tpu.memref_squeeze %1169 : memref<1x!tpu.dma_semaphore, #tpu.memory_space<semaphore_mem>> -> memref<!tpu.dma_semaphore, #tpu.memory_space<semaphore_mem>>
    tpu.enqueue_dma source(%1166 : memref<128xf32, #tpu.memory_space<any>>) target(%1168 : memref<128xf32, #tpu.memory_space<vmem>>) target_semaphore(%1170 : memref<!tpu.dma_semaphore, #tpu.memory_space<semaphore_mem>>)
    %c64_i32_754 = arith.constant 64 : i32
    %1171 = arith.addi %0, %c64_i32_754 : i32
    %c53_i32_755 = arith.constant 53 : i32
    %1172 = arith.addi %1171, %c53_i32_755 : i32
    %1173 = arith.index_cast %1172 : i32 to index
    %1174 = memref.load %arg1[%1173] : memref<256xi32, #tpu.memory_space<smem>>
    %c1_i32_756 = arith.constant 1 : i32
    %c53_i32_757 = arith.constant 53 : i32
    %c1_i32_758 = arith.constant 1 : i32
    %c0_i32_759 = arith.constant 0 : i32
    %1175 = tpu.memref_slice %arg4[%1174, %c0_i32_759] : memref<512x128xf32, #tpu.memory_space<any>> -> memref<1x128xf32, #tpu.memory_space<any>>
    %1176 = tpu.memref_squeeze %1175 : memref<1x128xf32, #tpu.memory_space<any>> -> memref<128xf32, #tpu.memory_space<any>>
    %c0_i32_760 = arith.constant 0 : i32
    %1177 = tpu.memref_slice %arg5[%c1_i32_756, %c53_i32_757, %c0_i32_760] : memref<2x64x128xf32, #tpu.memory_space<vmem>> -> memref<1x1x128xf32, #tpu.memory_space<vmem>>
    %1178 = tpu.memref_squeeze %1177 : memref<1x1x128xf32, #tpu.memory_space<vmem>> -> memref<128xf32, #tpu.memory_space<vmem>>
    %1179 = tpu.memref_slice %arg6[%c1_i32_758] : memref<2x!tpu.dma_semaphore, #tpu.memory_space<semaphore_mem>> -> memref<1x!tpu.dma_semaphore, #tpu.memory_space<semaphore_mem>>
    %1180 = tpu.memref_squeeze %1179 : memref<1x!tpu.dma_semaphore, #tpu.memory_space<semaphore_mem>> -> memref<!tpu.dma_semaphore, #tpu.memory_space<semaphore_mem>>
    tpu.enqueue_dma source(%1176 : memref<128xf32, #tpu.memory_space<any>>) target(%1178 : memref<128xf32, #tpu.memory_space<vmem>>) target_semaphore(%1180 : memref<!tpu.dma_semaphore, #tpu.memory_space<semaphore_mem>>)
    %c64_i32_761 = arith.constant 64 : i32
    %1181 = arith.addi %0, %c64_i32_761 : i32
    %c54_i32_762 = arith.constant 54 : i32
    %1182 = arith.addi %1181, %c54_i32_762 : i32
    %1183 = arith.index_cast %1182 : i32 to index
    %1184 = memref.load %arg1[%1183] : memref<256xi32, #tpu.memory_space<smem>>
    %c1_i32_763 = arith.constant 1 : i32
    %c54_i32_764 = arith.constant 54 : i32
    %c1_i32_765 = arith.constant 1 : i32
    %c0_i32_766 = arith.constant 0 : i32
    %1185 = tpu.memref_slice %arg4[%1184, %c0_i32_766] : memref<512x128xf32, #tpu.memory_space<any>> -> memref<1x128xf32, #tpu.memory_space<any>>
    %1186 = tpu.memref_squeeze %1185 : memref<1x128xf32, #tpu.memory_space<any>> -> memref<128xf32, #tpu.memory_space<any>>
    %c0_i32_767 = arith.constant 0 : i32
    %1187 = tpu.memref_slice %arg5[%c1_i32_763, %c54_i32_764, %c0_i32_767] : memref<2x64x128xf32, #tpu.memory_space<vmem>> -> memref<1x1x128xf32, #tpu.memory_space<vmem>>
    %1188 = tpu.memref_squeeze %1187 : memref<1x1x128xf32, #tpu.memory_space<vmem>> -> memref<128xf32, #tpu.memory_space<vmem>>
    %1189 = tpu.memref_slice %arg6[%c1_i32_765] : memref<2x!tpu.dma_semaphore, #tpu.memory_space<semaphore_mem>> -> memref<1x!tpu.dma_semaphore, #tpu.memory_space<semaphore_mem>>
    %1190 = tpu.memref_squeeze %1189 : memref<1x!tpu.dma_semaphore, #tpu.memory_space<semaphore_mem>> -> memref<!tpu.dma_semaphore, #tpu.memory_space<semaphore_mem>>
    tpu.enqueue_dma source(%1186 : memref<128xf32, #tpu.memory_space<any>>) target(%1188 : memref<128xf32, #tpu.memory_space<vmem>>) target_semaphore(%1190 : memref<!tpu.dma_semaphore, #tpu.memory_space<semaphore_mem>>)
    %c64_i32_768 = arith.constant 64 : i32
    %1191 = arith.addi %0, %c64_i32_768 : i32
    %c55_i32_769 = arith.constant 55 : i32
    %1192 = arith.addi %1191, %c55_i32_769 : i32
    %1193 = arith.index_cast %1192 : i32 to index
    %1194 = memref.load %arg1[%1193] : memref<256xi32, #tpu.memory_space<smem>>
    %c1_i32_770 = arith.constant 1 : i32
    %c55_i32_771 = arith.constant 55 : i32
    %c1_i32_772 = arith.constant 1 : i32
    %c0_i32_773 = arith.constant 0 : i32
    %1195 = tpu.memref_slice %arg4[%1194, %c0_i32_773] : memref<512x128xf32, #tpu.memory_space<any>> -> memref<1x128xf32, #tpu.memory_space<any>>
    %1196 = tpu.memref_squeeze %1195 : memref<1x128xf32, #tpu.memory_space<any>> -> memref<128xf32, #tpu.memory_space<any>>
    %c0_i32_774 = arith.constant 0 : i32
    %1197 = tpu.memref_slice %arg5[%c1_i32_770, %c55_i32_771, %c0_i32_774] : memref<2x64x128xf32, #tpu.memory_space<vmem>> -> memref<1x1x128xf32, #tpu.memory_space<vmem>>
    %1198 = tpu.memref_squeeze %1197 : memref<1x1x128xf32, #tpu.memory_space<vmem>> -> memref<128xf32, #tpu.memory_space<vmem>>
    %1199 = tpu.memref_slice %arg6[%c1_i32_772] : memref<2x!tpu.dma_semaphore, #tpu.memory_space<semaphore_mem>> -> memref<1x!tpu.dma_semaphore, #tpu.memory_space<semaphore_mem>>
    %1200 = tpu.memref_squeeze %1199 : memref<1x!tpu.dma_semaphore, #tpu.memory_space<semaphore_mem>> -> memref<!tpu.dma_semaphore, #tpu.memory_space<semaphore_mem>>
    tpu.enqueue_dma source(%1196 : memref<128xf32, #tpu.memory_space<any>>) target(%1198 : memref<128xf32, #tpu.memory_space<vmem>>) target_semaphore(%1200 : memref<!tpu.dma_semaphore, #tpu.memory_space<semaphore_mem>>)
    %c64_i32_775 = arith.constant 64 : i32
    %1201 = arith.addi %0, %c64_i32_775 : i32
    %c56_i32_776 = arith.constant 56 : i32
    %1202 = arith.addi %1201, %c56_i32_776 : i32
    %1203 = arith.index_cast %1202 : i32 to index
    %1204 = memref.load %arg1[%1203] : memref<256xi32, #tpu.memory_space<smem>>
    %c1_i32_777 = arith.constant 1 : i32
    %c56_i32_778 = arith.constant 56 : i32
    %c1_i32_779 = arith.constant 1 : i32
    %c0_i32_780 = arith.constant 0 : i32
    %1205 = tpu.memref_slice %arg4[%1204, %c0_i32_780] : memref<512x128xf32, #tpu.memory_space<any>> -> memref<1x128xf32, #tpu.memory_space<any>>
    %1206 = tpu.memref_squeeze %1205 : memref<1x128xf32, #tpu.memory_space<any>> -> memref<128xf32, #tpu.memory_space<any>>
    %c0_i32_781 = arith.constant 0 : i32
    %1207 = tpu.memref_slice %arg5[%c1_i32_777, %c56_i32_778, %c0_i32_781] : memref<2x64x128xf32, #tpu.memory_space<vmem>> -> memref<1x1x128xf32, #tpu.memory_space<vmem>>
    %1208 = tpu.memref_squeeze %1207 : memref<1x1x128xf32, #tpu.memory_space<vmem>> -> memref<128xf32, #tpu.memory_space<vmem>>
    %1209 = tpu.memref_slice %arg6[%c1_i32_779] : memref<2x!tpu.dma_semaphore, #tpu.memory_space<semaphore_mem>> -> memref<1x!tpu.dma_semaphore, #tpu.memory_space<semaphore_mem>>
    %1210 = tpu.memref_squeeze %1209 : memref<1x!tpu.dma_semaphore, #tpu.memory_space<semaphore_mem>> -> memref<!tpu.dma_semaphore, #tpu.memory_space<semaphore_mem>>
    tpu.enqueue_dma source(%1206 : memref<128xf32, #tpu.memory_space<any>>) target(%1208 : memref<128xf32, #tpu.memory_space<vmem>>) target_semaphore(%1210 : memref<!tpu.dma_semaphore, #tpu.memory_space<semaphore_mem>>)
    %c64_i32_782 = arith.constant 64 : i32
    %1211 = arith.addi %0, %c64_i32_782 : i32
    %c57_i32_783 = arith.constant 57 : i32
    %1212 = arith.addi %1211, %c57_i32_783 : i32
    %1213 = arith.index_cast %1212 : i32 to index
    %1214 = memref.load %arg1[%1213] : memref<256xi32, #tpu.memory_space<smem>>
    %c1_i32_784 = arith.constant 1 : i32
    %c57_i32_785 = arith.constant 57 : i32
    %c1_i32_786 = arith.constant 1 : i32
    %c0_i32_787 = arith.constant 0 : i32
    %1215 = tpu.memref_slice %arg4[%1214, %c0_i32_787] : memref<512x128xf32, #tpu.memory_space<any>> -> memref<1x128xf32, #tpu.memory_space<any>>
    %1216 = tpu.memref_squeeze %1215 : memref<1x128xf32, #tpu.memory_space<any>> -> memref<128xf32, #tpu.memory_space<any>>
    %c0_i32_788 = arith.constant 0 : i32
    %1217 = tpu.memref_slice %arg5[%c1_i32_784, %c57_i32_785, %c0_i32_788] : memref<2x64x128xf32, #tpu.memory_space<vmem>> -> memref<1x1x128xf32, #tpu.memory_space<vmem>>
    %1218 = tpu.memref_squeeze %1217 : memref<1x1x128xf32, #tpu.memory_space<vmem>> -> memref<128xf32, #tpu.memory_space<vmem>>
    %1219 = tpu.memref_slice %arg6[%c1_i32_786] : memref<2x!tpu.dma_semaphore, #tpu.memory_space<semaphore_mem>> -> memref<1x!tpu.dma_semaphore, #tpu.memory_space<semaphore_mem>>
    %1220 = tpu.memref_squeeze %1219 : memref<1x!tpu.dma_semaphore, #tpu.memory_space<semaphore_mem>> -> memref<!tpu.dma_semaphore, #tpu.memory_space<semaphore_mem>>
    tpu.enqueue_dma source(%1216 : memref<128xf32, #tpu.memory_space<any>>) target(%1218 : memref<128xf32, #tpu.memory_space<vmem>>) target_semaphore(%1220 : memref<!tpu.dma_semaphore, #tpu.memory_space<semaphore_mem>>)
    %c64_i32_789 = arith.constant 64 : i32
    %1221 = arith.addi %0, %c64_i32_789 : i32
    %c58_i32_790 = arith.constant 58 : i32
    %1222 = arith.addi %1221, %c58_i32_790 : i32
    %1223 = arith.index_cast %1222 : i32 to index
    %1224 = memref.load %arg1[%1223] : memref<256xi32, #tpu.memory_space<smem>>
    %c1_i32_791 = arith.constant 1 : i32
    %c58_i32_792 = arith.constant 58 : i32
    %c1_i32_793 = arith.constant 1 : i32
    %c0_i32_794 = arith.constant 0 : i32
    %1225 = tpu.memref_slice %arg4[%1224, %c0_i32_794] : memref<512x128xf32, #tpu.memory_space<any>> -> memref<1x128xf32, #tpu.memory_space<any>>
    %1226 = tpu.memref_squeeze %1225 : memref<1x128xf32, #tpu.memory_space<any>> -> memref<128xf32, #tpu.memory_space<any>>
    %c0_i32_795 = arith.constant 0 : i32
    %1227 = tpu.memref_slice %arg5[%c1_i32_791, %c58_i32_792, %c0_i32_795] : memref<2x64x128xf32, #tpu.memory_space<vmem>> -> memref<1x1x128xf32, #tpu.memory_space<vmem>>
    %1228 = tpu.memref_squeeze %1227 : memref<1x1x128xf32, #tpu.memory_space<vmem>> -> memref<128xf32, #tpu.memory_space<vmem>>
    %1229 = tpu.memref_slice %arg6[%c1_i32_793] : memref<2x!tpu.dma_semaphore, #tpu.memory_space<semaphore_mem>> -> memref<1x!tpu.dma_semaphore, #tpu.memory_space<semaphore_mem>>
    %1230 = tpu.memref_squeeze %1229 : memref<1x!tpu.dma_semaphore, #tpu.memory_space<semaphore_mem>> -> memref<!tpu.dma_semaphore, #tpu.memory_space<semaphore_mem>>
    tpu.enqueue_dma source(%1226 : memref<128xf32, #tpu.memory_space<any>>) target(%1228 : memref<128xf32, #tpu.memory_space<vmem>>) target_semaphore(%1230 : memref<!tpu.dma_semaphore, #tpu.memory_space<semaphore_mem>>)
    %c64_i32_796 = arith.constant 64 : i32
    %1231 = arith.addi %0, %c64_i32_796 : i32
    %c59_i32_797 = arith.constant 59 : i32
    %1232 = arith.addi %1231, %c59_i32_797 : i32
    %1233 = arith.index_cast %1232 : i32 to index
    %1234 = memref.load %arg1[%1233] : memref<256xi32, #tpu.memory_space<smem>>
    %c1_i32_798 = arith.constant 1 : i32
    %c59_i32_799 = arith.constant 59 : i32
    %c1_i32_800 = arith.constant 1 : i32
    %c0_i32_801 = arith.constant 0 : i32
    %1235 = tpu.memref_slice %arg4[%1234, %c0_i32_801] : memref<512x128xf32, #tpu.memory_space<any>> -> memref<1x128xf32, #tpu.memory_space<any>>
    %1236 = tpu.memref_squeeze %1235 : memref<1x128xf32, #tpu.memory_space<any>> -> memref<128xf32, #tpu.memory_space<any>>
    %c0_i32_802 = arith.constant 0 : i32
    %1237 = tpu.memref_slice %arg5[%c1_i32_798, %c59_i32_799, %c0_i32_802] : memref<2x64x128xf32, #tpu.memory_space<vmem>> -> memref<1x1x128xf32, #tpu.memory_space<vmem>>
    %1238 = tpu.memref_squeeze %1237 : memref<1x1x128xf32, #tpu.memory_space<vmem>> -> memref<128xf32, #tpu.memory_space<vmem>>
    %1239 = tpu.memref_slice %arg6[%c1_i32_800] : memref<2x!tpu.dma_semaphore, #tpu.memory_space<semaphore_mem>> -> memref<1x!tpu.dma_semaphore, #tpu.memory_space<semaphore_mem>>
    %1240 = tpu.memref_squeeze %1239 : memref<1x!tpu.dma_semaphore, #tpu.memory_space<semaphore_mem>> -> memref<!tpu.dma_semaphore, #tpu.memory_space<semaphore_mem>>
    tpu.enqueue_dma source(%1236 : memref<128xf32, #tpu.memory_space<any>>) target(%1238 : memref<128xf32, #tpu.memory_space<vmem>>) target_semaphore(%1240 : memref<!tpu.dma_semaphore, #tpu.memory_space<semaphore_mem>>)
    %c64_i32_803 = arith.constant 64 : i32
    %1241 = arith.addi %0, %c64_i32_803 : i32
    %c60_i32_804 = arith.constant 60 : i32
    %1242 = arith.addi %1241, %c60_i32_804 : i32
    %1243 = arith.index_cast %1242 : i32 to index
    %1244 = memref.load %arg1[%1243] : memref<256xi32, #tpu.memory_space<smem>>
    %c1_i32_805 = arith.constant 1 : i32
    %c60_i32_806 = arith.constant 60 : i32
    %c1_i32_807 = arith.constant 1 : i32
    %c0_i32_808 = arith.constant 0 : i32
    %1245 = tpu.memref_slice %arg4[%1244, %c0_i32_808] : memref<512x128xf32, #tpu.memory_space<any>> -> memref<1x128xf32, #tpu.memory_space<any>>
    %1246 = tpu.memref_squeeze %1245 : memref<1x128xf32, #tpu.memory_space<any>> -> memref<128xf32, #tpu.memory_space<any>>
    %c0_i32_809 = arith.constant 0 : i32
    %1247 = tpu.memref_slice %arg5[%c1_i32_805, %c60_i32_806, %c0_i32_809] : memref<2x64x128xf32, #tpu.memory_space<vmem>> -> memref<1x1x128xf32, #tpu.memory_space<vmem>>
    %1248 = tpu.memref_squeeze %1247 : memref<1x1x128xf32, #tpu.memory_space<vmem>> -> memref<128xf32, #tpu.memory_space<vmem>>
    %1249 = tpu.memref_slice %arg6[%c1_i32_807] : memref<2x!tpu.dma_semaphore, #tpu.memory_space<semaphore_mem>> -> memref<1x!tpu.dma_semaphore, #tpu.memory_space<semaphore_mem>>
    %1250 = tpu.memref_squeeze %1249 : memref<1x!tpu.dma_semaphore, #tpu.memory_space<semaphore_mem>> -> memref<!tpu.dma_semaphore, #tpu.memory_space<semaphore_mem>>
    tpu.enqueue_dma source(%1246 : memref<128xf32, #tpu.memory_space<any>>) target(%1248 : memref<128xf32, #tpu.memory_space<vmem>>) target_semaphore(%1250 : memref<!tpu.dma_semaphore, #tpu.memory_space<semaphore_mem>>)
    %c64_i32_810 = arith.constant 64 : i32
    %1251 = arith.addi %0, %c64_i32_810 : i32
    %c61_i32_811 = arith.constant 61 : i32
    %1252 = arith.addi %1251, %c61_i32_811 : i32
    %1253 = arith.index_cast %1252 : i32 to index
    %1254 = memref.load %arg1[%1253] : memref<256xi32, #tpu.memory_space<smem>>
    %c1_i32_812 = arith.constant 1 : i32
    %c61_i32_813 = arith.constant 61 : i32
    %c1_i32_814 = arith.constant 1 : i32
    %c0_i32_815 = arith.constant 0 : i32
    %1255 = tpu.memref_slice %arg4[%1254, %c0_i32_815] : memref<512x128xf32, #tpu.memory_space<any>> -> memref<1x128xf32, #tpu.memory_space<any>>
    %1256 = tpu.memref_squeeze %1255 : memref<1x128xf32, #tpu.memory_space<any>> -> memref<128xf32, #tpu.memory_space<any>>
    %c0_i32_816 = arith.constant 0 : i32
    %1257 = tpu.memref_slice %arg5[%c1_i32_812, %c61_i32_813, %c0_i32_816] : memref<2x64x128xf32, #tpu.memory_space<vmem>> -> memref<1x1x128xf32, #tpu.memory_space<vmem>>
    %1258 = tpu.memref_squeeze %1257 : memref<1x1x128xf32, #tpu.memory_space<vmem>> -> memref<128xf32, #tpu.memory_space<vmem>>
    %1259 = tpu.memref_slice %arg6[%c1_i32_814] : memref<2x!tpu.dma_semaphore, #tpu.memory_space<semaphore_mem>> -> memref<1x!tpu.dma_semaphore, #tpu.memory_space<semaphore_mem>>
    %1260 = tpu.memref_squeeze %1259 : memref<1x!tpu.dma_semaphore, #tpu.memory_space<semaphore_mem>> -> memref<!tpu.dma_semaphore, #tpu.memory_space<semaphore_mem>>
    tpu.enqueue_dma source(%1256 : memref<128xf32, #tpu.memory_space<any>>) target(%1258 : memref<128xf32, #tpu.memory_space<vmem>>) target_semaphore(%1260 : memref<!tpu.dma_semaphore, #tpu.memory_space<semaphore_mem>>)
    %c64_i32_817 = arith.constant 64 : i32
    %1261 = arith.addi %0, %c64_i32_817 : i32
    %c62_i32_818 = arith.constant 62 : i32
    %1262 = arith.addi %1261, %c62_i32_818 : i32
    %1263 = arith.index_cast %1262 : i32 to index
    %1264 = memref.load %arg1[%1263] : memref<256xi32, #tpu.memory_space<smem>>
    %c1_i32_819 = arith.constant 1 : i32
    %c62_i32_820 = arith.constant 62 : i32
    %c1_i32_821 = arith.constant 1 : i32
    %c0_i32_822 = arith.constant 0 : i32
    %1265 = tpu.memref_slice %arg4[%1264, %c0_i32_822] : memref<512x128xf32, #tpu.memory_space<any>> -> memref<1x128xf32, #tpu.memory_space<any>>
    %1266 = tpu.memref_squeeze %1265 : memref<1x128xf32, #tpu.memory_space<any>> -> memref<128xf32, #tpu.memory_space<any>>
    %c0_i32_823 = arith.constant 0 : i32
    %1267 = tpu.memref_slice %arg5[%c1_i32_819, %c62_i32_820, %c0_i32_823] : memref<2x64x128xf32, #tpu.memory_space<vmem>> -> memref<1x1x128xf32, #tpu.memory_space<vmem>>
    %1268 = tpu.memref_squeeze %1267 : memref<1x1x128xf32, #tpu.memory_space<vmem>> -> memref<128xf32, #tpu.memory_space<vmem>>
    %1269 = tpu.memref_slice %arg6[%c1_i32_821] : memref<2x!tpu.dma_semaphore, #tpu.memory_space<semaphore_mem>> -> memref<1x!tpu.dma_semaphore, #tpu.memory_space<semaphore_mem>>
    %1270 = tpu.memref_squeeze %1269 : memref<1x!tpu.dma_semaphore, #tpu.memory_space<semaphore_mem>> -> memref<!tpu.dma_semaphore, #tpu.memory_space<semaphore_mem>>
    tpu.enqueue_dma source(%1266 : memref<128xf32, #tpu.memory_space<any>>) target(%1268 : memref<128xf32, #tpu.memory_space<vmem>>) target_semaphore(%1270 : memref<!tpu.dma_semaphore, #tpu.memory_space<semaphore_mem>>)
    %c64_i32_824 = arith.constant 64 : i32
    %1271 = arith.addi %0, %c64_i32_824 : i32
    %c63_i32_825 = arith.constant 63 : i32
    %1272 = arith.addi %1271, %c63_i32_825 : i32
    %1273 = arith.index_cast %1272 : i32 to index
    %1274 = memref.load %arg1[%1273] : memref<256xi32, #tpu.memory_space<smem>>
    %c1_i32_826 = arith.constant 1 : i32
    %c63_i32_827 = arith.constant 63 : i32
    %c1_i32_828 = arith.constant 1 : i32
    %c0_i32_829 = arith.constant 0 : i32
    %1275 = tpu.memref_slice %arg4[%1274, %c0_i32_829] : memref<512x128xf32, #tpu.memory_space<any>> -> memref<1x128xf32, #tpu.memory_space<any>>
    %1276 = tpu.memref_squeeze %1275 : memref<1x128xf32, #tpu.memory_space<any>> -> memref<128xf32, #tpu.memory_space<any>>
    %c0_i32_830 = arith.constant 0 : i32
    %1277 = tpu.memref_slice %arg5[%c1_i32_826, %c63_i32_827, %c0_i32_830] : memref<2x64x128xf32, #tpu.memory_space<vmem>> -> memref<1x1x128xf32, #tpu.memory_space<vmem>>
    %1278 = tpu.memref_squeeze %1277 : memref<1x1x128xf32, #tpu.memory_space<vmem>> -> memref<128xf32, #tpu.memory_space<vmem>>
    %1279 = tpu.memref_slice %arg6[%c1_i32_828] : memref<2x!tpu.dma_semaphore, #tpu.memory_space<semaphore_mem>> -> memref<1x!tpu.dma_semaphore, #tpu.memory_space<semaphore_mem>>
    %1280 = tpu.memref_squeeze %1279 : memref<1x!tpu.dma_semaphore, #tpu.memory_space<semaphore_mem>> -> memref<!tpu.dma_semaphore, #tpu.memory_space<semaphore_mem>>
    tpu.enqueue_dma source(%1276 : memref<128xf32, #tpu.memory_space<any>>) target(%1278 : memref<128xf32, #tpu.memory_space<vmem>>) target_semaphore(%1280 : memref<!tpu.dma_semaphore, #tpu.memory_space<semaphore_mem>>)
    %c0_i32_831 = arith.constant 0 : i32
    %c0_i32_832 = arith.constant 0 : i32
    %c0_i32_833 = arith.constant 0 : i32
    %c0_i32_834 = arith.constant 0 : i32
    %1281 = tpu.memref_slice %arg4[%c0_i32_833, %c0_i32_834] : memref<512x128xf32, #tpu.memory_space<any>> -> memref<64x128xf32, #tpu.memory_space<any>>
    %c0_i32_835 = arith.constant 0 : i32
    %c0_i32_836 = arith.constant 0 : i32
    %1282 = tpu.memref_slice %arg5[%c0_i32_831, %c0_i32_835, %c0_i32_836] : memref<2x64x128xf32, #tpu.memory_space<vmem>> -> memref<1x64x128xf32, #tpu.memory_space<vmem>>
    %1283 = tpu.memref_squeeze %1282 : memref<1x64x128xf32, #tpu.memory_space<vmem>> -> memref<64x128xf32, #tpu.memory_space<vmem>>
    %1284 = tpu.memref_slice %arg6[%c0_i32_832] : memref<2x!tpu.dma_semaphore, #tpu.memory_space<semaphore_mem>> -> memref<1x!tpu.dma_semaphore, #tpu.memory_space<semaphore_mem>>
    %1285 = tpu.memref_squeeze %1284 : memref<1x!tpu.dma_semaphore, #tpu.memory_space<semaphore_mem>> -> memref<!tpu.dma_semaphore, #tpu.memory_space<semaphore_mem>>
    tpu.wait_dma2 semaphore(%1285 : memref<!tpu.dma_semaphore, #tpu.memory_space<semaphore_mem>>) src(%1281 : memref<64x128xf32, #tpu.memory_space<any>>) dst(%1283 : memref<64x128xf32, #tpu.memory_space<vmem>>)
    %c0 = arith.constant 0 : index
    %c0_837 = arith.constant 0 : index
    %c0_838 = arith.constant 0 : index
    %1286 = vector.load %arg2[%c0, %c0_837, %c0_838] : memref<2x64x1xi32, #tpu.memory_space<vmem>>, vector<1x64x1xi32>
    %1287 = vector.shape_cast %1286 : vector<1x64x1xi32> to vector<64x1xi32>
    %c0_i32_839 = arith.constant 0 : i32
    %1288 = vector.broadcast %c0_i32_839 : i32 to vector<64x1xi32>
    %1289 = arith.cmpi ne, %1287, %1288 : vector<64x1xi32>
    %1290 = arith.extui %1289 : vector<64x1xi1> to vector<64x1xi32>
    %1291 = arith.sitofp %1290 : vector<64x1xi32> to vector<64x1xf32>
    %c0_840 = arith.constant 0 : index
    %c0_841 = arith.constant 0 : index
    %c0_842 = arith.constant 0 : index
    %1292 = vector.load %arg5[%c0_840, %c0_841, %c0_842] : memref<2x64x128xf32, #tpu.memory_space<vmem>>, vector<1x64x128xf32>
    %1293 = vector.shape_cast %1292 : vector<1x64x128xf32> to vector<64x128xf32>
    %cst = arith.constant 11.3137083 : f32
    %1294 = vector.broadcast %cst : f32 to vector<64x128xf32>
    %1295 = arith.mulf %1293, %1294 : vector<64x128xf32>
    %c0_843 = arith.constant 0 : index
    %c0_844 = arith.constant 0 : index
    %1296 = vector.load %arg3[%c0_843, %c0_844] : memref<64x128xf32, #tpu.memory_space<vmem>>, vector<64x128xf32>
    %1297 = arith.addf %1295, %1296 : vector<64x128xf32>
    %1298 = vector.broadcast %1291 : vector<64x1xf32> to vector<64x128xf32>
    %1299 = arith.mulf %1297, %1298 : vector<64x128xf32>
    %c0_845 = arith.constant 0 : index
    %c0_846 = arith.constant 0 : index
    %c0_847 = arith.constant 0 : index
    %1300 = vector.load %arg5[%c0_845, %c0_846, %c0_847] : memref<2x64x128xf32, #tpu.memory_space<vmem>>, vector<1x64x128xf32>
    %1301 = vector.shape_cast %1300 : vector<1x64x128xf32> to vector<64x128xf32>
    %1302 = vector.shape_cast %1299 : vector<64x128xf32> to vector<1x64x128xf32>
    tpu.vector_store %arg5[%c0_845, %c0_846, %c0_847], %1302 {strides = array<i32>} : memref<2x64x128xf32, #tpu.memory_space<vmem>>, vector<1x64x128xf32>,
    %c1_i32_848 = arith.constant 1 : i32
    %c1_i32_849 = arith.constant 1 : i32
    %c0_i32_850 = arith.constant 0 : i32
    %c0_i32_851 = arith.constant 0 : i32
    %1303 = tpu.memref_slice %arg4[%c0_i32_850, %c0_i32_851] : memref<512x128xf32, #tpu.memory_space<any>> -> memref<64x128xf32, #tpu.memory_space<any>>
    %c0_i32_852 = arith.constant 0 : i32
    %c0_i32_853 = arith.constant 0 : i32
    %1304 = tpu.memref_slice %arg5[%c1_i32_848, %c0_i32_852, %c0_i32_853] : memref<2x64x128xf32, #tpu.memory_space<vmem>> -> memref<1x64x128xf32, #tpu.memory_space<vmem>>
    %1305 = tpu.memref_squeeze %1304 : memref<1x64x128xf32, #tpu.memory_space<vmem>> -> memref<64x128xf32, #tpu.memory_space<vmem>>
    %1306 = tpu.memref_slice %arg6[%c1_i32_849] : memref<2x!tpu.dma_semaphore, #tpu.memory_space<semaphore_mem>> -> memref<1x!tpu.dma_semaphore, #tpu.memory_space<semaphore_mem>>
    %1307 = tpu.memref_squeeze %1306 : memref<1x!tpu.dma_semaphore, #tpu.memory_space<semaphore_mem>> -> memref<!tpu.dma_semaphore, #tpu.memory_space<semaphore_mem>>
    tpu.wait_dma2 semaphore(%1307 : memref<!tpu.dma_semaphore, #tpu.memory_space<semaphore_mem>>) src(%1303 : memref<64x128xf32, #tpu.memory_space<any>>) dst(%1305 : memref<64x128xf32, #tpu.memory_space<vmem>>)
    %c1 = arith.constant 1 : index
    %c0_854 = arith.constant 0 : index
    %c0_855 = arith.constant 0 : index
    %1308 = vector.load %arg2[%c1, %c0_854, %c0_855] : memref<2x64x1xi32, #tpu.memory_space<vmem>>, vector<1x64x1xi32>
    %1309 = vector.shape_cast %1308 : vector<1x64x1xi32> to vector<64x1xi32>
    %c0_i32_856 = arith.constant 0 : i32
    %1310 = vector.broadcast %c0_i32_856 : i32 to vector<64x1xi32>
    %1311 = arith.cmpi ne, %1309, %1310 : vector<64x1xi32>
    %1312 = arith.extui %1311 : vector<64x1xi1> to vector<64x1xi32>
    %1313 = arith.sitofp %1312 : vector<64x1xi32> to vector<64x1xf32>
    %c1_857 = arith.constant 1 : index
    %c0_858 = arith.constant 0 : index
    %c0_859 = arith.constant 0 : index
    %1314 = vector.load %arg5[%c1_857, %c0_858, %c0_859] : memref<2x64x128xf32, #tpu.memory_space<vmem>>, vector<1x64x128xf32>
    %1315 = vector.shape_cast %1314 : vector<1x64x128xf32> to vector<64x128xf32>
    %cst_860 = arith.constant 11.3137083 : f32
    %1316 = vector.broadcast %cst_860 : f32 to vector<64x128xf32>
    %1317 = arith.mulf %1315, %1316 : vector<64x128xf32>
    %c0_861 = arith.constant 0 : index
    %c0_862 = arith.constant 0 : index
    %1318 = vector.load %arg3[%c0_861, %c0_862] : memref<64x128xf32, #tpu.memory_space<vmem>>, vector<64x128xf32>
    %1319 = arith.addf %1317, %1318 : vector<64x128xf32>
    %1320 = vector.broadcast %1313 : vector<64x1xf32> to vector<64x128xf32>
    %1321 = arith.mulf %1319, %1320 : vector<64x128xf32>
    %c1_863 = arith.constant 1 : index
    %c0_864 = arith.constant 0 : index
    %c0_865 = arith.constant 0 : index
    %1322 = vector.load %arg5[%c1_863, %c0_864, %c0_865] : memref<2x64x128xf32, #tpu.memory_space<vmem>>, vector<1x64x128xf32>
    %1323 = vector.shape_cast %1322 : vector<1x64x128xf32> to vector<64x128xf32>
    %1324 = vector.shape_cast %1321 : vector<64x128xf32> to vector<1x64x128xf32>
    tpu.vector_store %arg5[%c1_863, %c0_864, %c0_865], %1324 {strides = array<i32>} : memref<2x64x128xf32, #tpu.memory_space<vmem>>, vector<1x64x128xf32>,
    return
  }
  func.func @transform_0(%arg0: i32, %arg1: memref<256xi32, #tpu.memory_space<smem>>) -> (i32, i32, i32) {
    %c0_i32 = arith.constant 0 : i32
    %c0_i32_0 = arith.constant 0 : i32
    %c0_i32_1 = arith.constant 0 : i32
    return %arg0, %c0_i32, %c0_i32_0 : i32, i32, i32
  }
  func.func @transform_1(%arg0: i32, %arg1: memref<256xi32, #tpu.memory_space<smem>>) -> (i32, i32) {
    %c0_i32 = arith.constant 0 : i32
    %c0_i32_0 = arith.constant 0 : i32
    %c0_i32_1 = arith.constant 0 : i32
    return %c0_i32, %c0_i32_0 : i32, i32
  }
  func.func @transform_3(%arg0: i32, %arg1: memref<256xi32, #tpu.memory_space<smem>>) -> (i32, i32, i32) {
    %c0_i32 = arith.constant 0 : i32
    %c0_i32_0 = arith.constant 0 : i32
    %c0_i32_1 = arith.constant 0 : i32
    return %arg0, %c0_i32, %c0_i32_0 : i32, i32, i32
  }
}

</mosaic_0001>

<bundles_post_ra>
// kernel: tpu_custom_call.1
= control target key start
LH: loop header
LB: loop body
LE: loop exit
PB: predicated region body
PF: predicated region fallthrough
CT: control target
= control target key end

     0   :  { %s6102_s18 = smov [#allocation4]   ;;  %s7889_s0 = inlined_call_operand.vmem [shape: s32[256], index: 0, kind: input, shape index: {}]   ;;  %s7890_s1 = inlined_call_operand.vmem [shape: s32[4,64,1], index: 1, kind: input, shape index: {}]   ;;  %s7891_s2 = inlined_call_operand.vmem [shape: f32[64,128], index: 2, kind: input, shape index: {}]   ;;  %s7892_s3 = inlined_call_operand.hbm [shape: f32[512,128], index: 3, kind: input, shape index: {}]   ;;  %s7893_s4 = inlined_call_operand.hbm [shape: f32[4,64,128], index: 4, kind: output, shape index: {}]  }
   0x1   :  { %7897 = sst [smem:[#allocation272_spill]] %s7890_s1  ;;  %s10_s17 = sshll.u32 %s7889_s0, 4  ;;  %s11_s17 = int_to_ptr.vmem [resolvable:$true] %s10_s17 }
   0x2   :  { %13 = dma.vmem_to_smem %s11_s17, 32, %s6102_s18, [#allocation3] }
   0x3   :  { %6076 = dma.done.wait [#allocation3], 32 }
   0x4   :  { %6077 = vsyncadd [#allocation3], 4294967264 }
   0x5   :  { %16 = sfence }
   0x6   :  { %17 = vsyncpa [#allocation6], 0 }
   0x7   :  { %19 = vsyncpa [#allocation6 + $0x1], 0  ;;  %s6135_s19 = smov 0   ;;  %s6137_s20 = smov 0  }
   0x8   :  { %s6139_s21 = smov 0   ;;  %s6141_s22 = smov 0  }
   0x9 LB: > { %s2799_s0 = sadd.s32 4294967295, %s6100_s22   ;;  %s2800_s23 = sadd.s32 4294967294, %s6100_s22   ;;  %s6100_s22 = sphi %s6141_s22, %s7913_s22   ;;  %s6096_s21 = sphi %s6139_s21, %s7912_s21   ;;  %s6092_s20 = sphi %s6137_s20, %s7911_s20   ;;  %s6088_s19 = sphi %s6135_s19, %s7910_s19  }
   0xa   : > { %s6158_s24 = sadd.s32 1, %s6100_s22   ;;  %s79_s25 = sadd.s32 1, %s6096_s21 }
   0xb   : > { %s76_s26 = ssub.s32 %s6100_s22, %s6158_s24  ;;  %p89_p0 = scmp.ne.s32.totalorder %s6096_s21, %s6092_s20 }
   0xc   : > { %p77_p1 = scmp.eq.s32.totalorder %s76_s26, 0  ;;  %p90_p2 = scmp.eq.s32.totalorder %s2799_s0, 1 }
   0xd   : > { %p95_p3 = scmp.ne.s32.totalorder %s6092_s20, %s6088_s19  ;;  %p96_p4 = scmp.eq.s32.totalorder %s2800_s23, 1 }
   0xe   : > { %s6168_s27 = scalar_select %p77_p1, %s6096_s21, %s79_s25  }
   0xf   : > { %p6170_p5 = por %p90_p2, %p89_p0  ;;  %p6174_p6 = por %p96_p4, %p95_p3 }
  0x10   : > { %7898 = sst [smem:[#allocation269_spill]] %s6168_s27  ;;  %p2803_p7 = scmp.ge.s32.totalorder %s6100_s22, 1 }
  0x11   : > { %p127_p8 = scmp.lt.s32.totalorder %s6100_s22, 3 }
  0x13   : > { %p128_p9 = pnand %p2803_p7, %p127_p8 }
  0x15   : > { %131 = sbr.rel (%p128_p9) target bundleno = 1974 (0x7b6), region = 28 }
  0x1a   : > { %s7894_s30 = sand.u32 1, %s6092_s20   ;;  %s2805_s5 = sshll.u32 %s2799_s0, 1 }
  0x1b   : > { %s2804_s6 = sshll.u32 %s7894_s30, 7  ;;  %p151_p10 = scmp.lt.s32.totalorder %s2805_s5, 3 }
  0x1c   : > { %s6183_s7 = sshll.u32 %s2799_s0, 7  ;;  %s6186_s9 = scalar_lea.vmem [#allocation5], %s2804_s6 }
  0x1d   : > { %s7915_s5 = smov (!%p151_p10, %s2805_s5), 3  ;;  %s159_s8 = sld [smem:[#allocation4 + %s6183_s7]] }
  0x1e   : > { %s170_s10 = sshll.u32 %s6186_s9, 4  ;;  %s2857_s11 = sshll.u32 %s7915_s5, 6  ;;  %s6189_s10 = int_to_ptr.vmem [resolvable:$true] %s170_s10 }
  0x1f   : > { %s7901_s1 = sld [smem:[#allocation272_spill]]  ;;  %s174_s15 = sadd.s32 1, %s6183_s7 }
  0x20   : > { %s175_s16 = sld [smem:[#allocation4 + %s174_s15]]  ;;  %s177_s17 = scalar_lea.vmem %s6186_s9, 1 [#allocation5] }
  0x21   : > { %s6198_s18 = sshll.u32 %s177_s17, 4  ;;  %s191_s0 = sadd.s32 2, %s6183_s7 }
  0x22   : > { %7902 = sst [smem:[#allocation270_spill]] %s6198_s18  ;;  %s194_s6 = scalar_lea.vmem %s6186_s9, 2 [#allocation5] }
  0x23   : > { %s192_s23 = sld [smem:[#allocation4 + %s191_s0]]  ;;  %s160_s5 = scalar_lea.hbm %s7892_s3, %s159_s8 }
  0x24   : > { %s168_s30 = sshll.u32 %s160_s5, 4  ;;  %s6206_s27 = sshll.u32 %s194_s6, 4  ;;  %s169_s30 = int_to_ptr.hbm [resolvable:$true] %s168_s30 }
  0x25   : > { %s6194_s14 = scalar_lea.vmem %s7901_s1, %s2857_s11  ;;  %7903 = sst [smem:[#allocation271_spill]] %s6206_s27 }
  0x26   : > { %s2960_s11 = sshra.s32 %s169_s30, 4  ;;  %s6212_s17 = scalar_lea.hbm %s7892_s3, 512  ;;  %s2961_s11 = int_to_ptr.hbm [resolvable:$true] %s2960_s11 }
  0x27   : > { %s2962_s12 = scalar_lea.hbm %s2961_s11, 1  ;;  %p2965_p12 = scmp.lt.s32.totalorder %s2961_s11, %s7892_s3 }
  0x28   : > { %p2963_p11 = scmp.ne.s32.totalorder %s2961_s11, %s2962_s12  ;;  %p2966_p13 = scmp.lt.s32.totalorder %s6212_s17, %s2962_s12 }
  0x2a   : > { %p2967_p0 = por %p2966_p13, %p2965_p12 }
  0x2c   : > { %p2968_p1 = pnand %p2967_p0, %p2963_p11 }
  0x2e   : > { %2971 = shalt.err (!%p2968_p1)  }
  0x2f   : > { %173 = dma.hbm_to_vmem [thread:$0]  %s169_s30, 16, %s6189_s10, [#allocation2] }
  0x30   : > { %s176_s26 = scalar_lea.hbm %s7892_s3, %s175_s16  ;;  %s208_s5 = sadd.s32 3, %s6183_s7 }
  0x31   : > { %s185_s6 = sshll.u32 %s176_s26, 4  ;;  %s193_s18 = scalar_lea.hbm %s7892_s3, %s192_s23  ;;  %s186_s6 = int_to_ptr.hbm [resolvable:$true] %s185_s6 }
  0x32   : > { %s202_s11 = sshll.u32 %s193_s18, 4  ;;  %s2984_s12 = sshra.s32 %s186_s6, 4  ;;  %s2985_s12 = int_to_ptr.hbm [resolvable:$true] %s2984_s12  ;;  %s203_s11 = int_to_ptr.hbm [resolvable:$true] %s202_s11 }
  0x33   : > { %s2986_s0 = scalar_lea.hbm %s2985_s12, 1  ;;  %p2989_p3 = scmp.lt.s32.totalorder %s2985_s12, %s7892_s3 }
  0x34   : > { %p2987_p2 = scmp.ne.s32.totalorder %s2985_s12, %s2986_s0  ;;  %p2990_p4 = scmp.lt.s32.totalorder %s6212_s17, %s2986_s0 }
  0x36   : > { %p2991_p7 = por %p2990_p4, %p2989_p3 }
  0x38   : > { %p2992_p8 = pnand %p2991_p7, %p2987_p2 }
  0x3a   : > { %2995 = shalt.err (!%p2992_p8)  }
  0x3b   : > { %s7904_s30 = sld [smem:[#allocation270_spill]]  ;;  %s3008_s8 = sshra.s32 %s203_s11, 4  ;;  %s3009_s8 = int_to_ptr.hbm [resolvable:$true] %s3008_s8 }
  0x3c   : > { %s209_s23 = sld [smem:[#allocation4 + %s208_s5]]  ;;  %s3010_s25 = scalar_lea.hbm %s3009_s8, 1 }
  0x3d   : > { %p3011_p9 = scmp.ne.s32.totalorder %s3009_s8, %s3010_s25  ;;  %p3013_p10 = scmp.lt.s32.totalorder %s3009_s8, %s7892_s3 }
  0x3e   : > { %p3014_p11 = scmp.lt.s32.totalorder %s6212_s17, %s3010_s25 }
  0x40   : > { %p3015_p12 = por %p3014_p11, %p3013_p10 }
  0x41   : > { %s7905_s16 = int_to_ptr.vmem [resolvable:$true] %s7904_s30 }
  0x42   : > { %190 = dma.hbm_to_vmem [thread:$0]  %s186_s6, 16, %s7905_s16, [#allocation2] }
  0x43   : > { %p3016_p13 = pnand %p3015_p12, %p3011_p9 }
  0x45   : > { %3019 = shalt.err (!%p3016_p13)  }
  0x46   : > { %s7906_s1 = sld [smem:[#allocation271_spill]]  ;;  %s211_s5 = scalar_lea.vmem %s6186_s9, 3 [#allocation5] }
  0x47   : > { %s225_s6 = sadd.s32 4, %s6183_s7  ;;  %s221_s15 = sshll.u32 %s211_s5, 4  ;;  %s222_s15 = int_to_ptr.vmem [resolvable:$true] %s221_s15 }
  0x48   : > { %s226_s18 = sld [smem:[#allocation4 + %s225_s6]]  ;;  %s228_s12 = scalar_lea.vmem %s6186_s9, 4 [#allocation5] }
  0x49   : > { %s6241_s0 = sshll.u32 %s228_s12, 4  ;;  %s242_s30 = sadd.s32 5, %s6183_s7  ;;  %s239_s0 = int_to_ptr.vmem [resolvable:$true] %s6241_s0 }
  0x4a   : > { %s210_s25 = scalar_lea.hbm %s7892_s3, %s209_s23  ;;  %s6248_s13 = sld [smem:[#allocation4 + %s242_s30]] }
  0x4b   : > { %s219_s26 = sshll.u32 %s210_s25, 4  ;;  %s220_s26 = int_to_ptr.hbm [resolvable:$true] %s219_s26 }
  0x4c   : > { %s7907_s27 = int_to_ptr.vmem [resolvable:$true] %s7906_s1  ;;  %s3032_s1 = sshra.s32 %s220_s26, 4  ;;  %s3033_s1 = int_to_ptr.hbm [resolvable:$true] %s3032_s1 }
  0x4d   : > { %207 = dma.hbm_to_vmem [thread:$0]  %s203_s11, 16, %s7907_s27, [#allocation2] }
  0x4e   : > { %s245_s11 = scalar_lea.vmem %s6186_s9, 5 [#allocation5]  ;;  %s3034_s27 = scalar_lea.hbm %s3033_s1, 1 }
  0x4f   : > { %p3035_p0 = scmp.ne.s32.totalorder %s3033_s1, %s3034_s27  ;;  %p3037_p1 = scmp.lt.s32.totalorder %s3033_s1, %s7892_s3 }
  0x50   : > { %p3038_p2 = scmp.lt.s32.totalorder %s6212_s17, %s3034_s27 }
  0x52   : > { %p3039_p3 = por %p3038_p2, %p3037_p1 }
  0x54   : > { %p3040_p4 = pnand %p3039_p3, %p3035_p0 }
  0x56   : > { %3043 = shalt.err (!%p3040_p4)  }
  0x57   : > { %224 = dma.hbm_to_vmem [thread:$0]  %s220_s26, 16, %s222_s15, [#allocation2] }
  0x58   : > { %s227_s30 = scalar_lea.hbm %s7892_s3, %s226_s18  ;;  %s6258_s16 = sshll.u32 %s245_s11, 4  ;;  %s256_s16 = int_to_ptr.vmem [resolvable:$true] %s6258_s16 }
  0x59   : > { %s236_s8 = sshll.u32 %s227_s30, 4  ;;  %s259_s25 = sadd.s32 6, %s6183_s7  ;;  %s237_s8 = int_to_ptr.hbm [resolvable:$true] %s236_s8 }
  0x5a   : > { %s3056_s5 = sshra.s32 %s237_s8, 4  ;;  %s3057_s5 = int_to_ptr.hbm [resolvable:$true] %s3056_s5 }
  0x5b   : > { %s3058_s1 = scalar_lea.hbm %s3057_s5, 1  ;;  %p3061_p8 = scmp.lt.s32.totalorder %s3057_s5, %s7892_s3 }
  0x5c   : > { %p3059_p7 = scmp.ne.s32.totalorder %s3057_s5, %s3058_s1  ;;  %p3062_p9 = scmp.lt.s32.totalorder %s6212_s17, %s3058_s1 }
  0x5e   : > { %p3063_p10 = por %p3062_p9, %p3061_p8 }
  0x60   : > { %p3064_p11 = pnand %p3063_p10, %p3059_p7 }
  0x62   : > { %3067 = shalt.err (!%p3064_p11)  }
  0x63   : > { %241 = dma.hbm_to_vmem [thread:$0]  %s237_s8, 16, %s239_s0, [#allocation2] }
  0x64   : > { %s244_s26 = scalar_lea.hbm %s7892_s3, %s6248_s13  ;;  %s260_s11 = sld [smem:[#allocation4 + %s259_s25]] }
  0x65   : > { %s253_s23 = sshll.u32 %s244_s26, 4  ;;  %s262_s12 = scalar_lea.vmem %s6186_s9, 6 [#allocation5]  ;;  %s254_s23 = int_to_ptr.hbm [resolvable:$true] %s253_s23 }
  0x66   : > { %s6273_s30 = sshll.u32 %s262_s12, 4  ;;  %s3080_s5 = sshra.s32 %s254_s23, 4  ;;  %s3081_s5 = int_to_ptr.hbm [resolvable:$true] %s3080_s5  ;;  %s273_s30 = int_to_ptr.vmem [resolvable:$true] %s6273_s30 }
  0x67   : > { %s3082_s1 = scalar_lea.hbm %s3081_s5, 1  ;;  %p3085_p13 = scmp.lt.s32.totalorder %s3081_s5, %s7892_s3 }
  0x68   : > { %p3083_p12 = scmp.ne.s32.totalorder %s3081_s5, %s3082_s1  ;;  %p3086_p0 = scmp.lt.s32.totalorder %s6212_s17, %s3082_s1 }
  0x6a   : > { %p3087_p1 = por %p3086_p0, %p3085_p13 }
  0x6c   : > { %p3088_p2 = pnand %p3087_p1, %p3083_p12 }
  0x6e   : > { %3091 = shalt.err (!%p3088_p2)  }
  0x6f   : > { %258 = dma.hbm_to_vmem [thread:$0]  %s254_s23, 16, %s256_s16, [#allocation2] }
  0x70   : > { %s276_s0 = sadd.s32 7, %s6183_s7  ;;  %s279_s8 = scalar_lea.vmem %s6186_s9, 7 [#allocation5] }
  0x71   : > { %s277_s13 = sld [smem:[#allocation4 + %s276_s0]]  ;;  %s261_s18 = scalar_lea.hbm %s7892_s3, %s260_s11 }
  0x72   : > { %s270_s26 = sshll.u32 %s261_s18, 4  ;;  %s6285_s12 = sshll.u32 %s279_s8, 4  ;;  %s271_s26 = int_to_ptr.hbm [resolvable:$true] %s270_s26  ;;  %s290_s12 = int_to_ptr.vmem [resolvable:$true] %s6285_s12 }
  0x73   : > { %s293_s5 = sadd.s32 8, %s6183_s7  ;;  %s3104_s1 = sshra.s32 %s271_s26, 4  ;;  %s3105_s1 = int_to_ptr.hbm [resolvable:$true] %s3104_s1 }
  0x74   : > { %s3106_s16 = scalar_lea.hbm %s3105_s1, 1  ;;  %p3109_p4 = scmp.lt.s32.totalorder %s3105_s1, %s7892_s3 }
  0x75   : > { %p3107_p3 = scmp.ne.s32.totalorder %s3105_s1, %s3106_s16  ;;  %p3110_p7 = scmp.lt.s32.totalorder %s6212_s17, %s3106_s16 }
  0x77   : > { %p3111_p8 = por %p3110_p7, %p3109_p4 }
  0x79   : > { %p3112_p9 = pnand %p3111_p8, %p3107_p3 }
  0x7b   : > { %3115 = shalt.err (!%p3112_p9)  }
  0x7c   : > { %275 = dma.hbm_to_vmem [thread:$0]  %s271_s26, 16, %s273_s30, [#allocation2] }
  0x7d   : > { %s294_s11 = sld [smem:[#allocation4 + %s293_s5]]  ;;  %s296_s6 = scalar_lea.vmem %s6186_s9, 8 [#allocation5] }
  0x7e   : > { %s278_s25 = scalar_lea.hbm %s7892_s3, %s277_s13  ;;  %s6297_s18 = sshll.u32 %s296_s6, 4  ;;  %s307_s18 = int_to_ptr.vmem [resolvable:$true] %s6297_s18 }
  0x7f   : > { %s287_s15 = sshll.u32 %s278_s25, 4  ;;  %s310_s1 = sadd.s32 9, %s6183_s7  ;;  %s288_s15 = int_to_ptr.hbm [resolvable:$true] %s287_s15 }
  0x80   : > { %s3128_s16 = sshra.s32 %s288_s15, 4  ;;  %s3129_s16 = int_to_ptr.hbm [resolvable:$true] %s3128_s16 }
  0x81   : > { %s3130_s23 = scalar_lea.hbm %s3129_s16, 1  ;;  %p3133_p11 = scmp.lt.s32.totalorder %s3129_s16, %s7892_s3 }
  0x82   : > { %p3131_p10 = scmp.ne.s32.totalorder %s3129_s16, %s3130_s23  ;;  %p3134_p12 = scmp.lt.s32.totalorder %s6212_s17, %s3130_s23 }
  0x84   : > { %p3135_p13 = por %p3134_p12, %p3133_p11 }
  0x86   : > { %p3136_p0 = pnand %p3135_p13, %p3131_p10 }
  0x88   : > { %3139 = shalt.err (!%p3136_p0)  }
  0x89   : > { %292 = dma.hbm_to_vmem [thread:$0]  %s288_s15, 16, %s290_s12, [#allocation2] }
  0x8a   : > { %s311_s13 = sld [smem:[#allocation4 + %s310_s1]]  ;;  %s313_s5 = scalar_lea.vmem %s6186_s9, 9 [#allocation5] }
  0x8b   : > { %s295_s0 = scalar_lea.hbm %s7892_s3, %s294_s11  ;;  %s6309_s25 = sshll.u32 %s313_s5, 4  ;;  %s324_s25 = int_to_ptr.vmem [resolvable:$true] %s6309_s25 }
  0x8c   : > { %s304_s8 = sshll.u32 %s295_s0, 4  ;;  %s327_s16 = sadd.s32 10, %s6183_s7  ;;  %s305_s8 = int_to_ptr.hbm [resolvable:$true] %s304_s8 }
  0x8d   : > { %s3152_s23 = sshra.s32 %s305_s8, 4  ;;  %s3153_s23 = int_to_ptr.hbm [resolvable:$true] %s3152_s23 }
  0x8e   : > { %s3154_s30 = scalar_lea.hbm %s3153_s23, 1  ;;  %p3157_p2 = scmp.lt.s32.totalorder %s3153_s23, %s7892_s3 }
  0x8f   : > { %p3155_p1 = scmp.ne.s32.totalorder %s3153_s23, %s3154_s30  ;;  %p3158_p3 = scmp.lt.s32.totalorder %s6212_s17, %s3154_s30 }
  0x91   : > { %p3159_p4 = por %p3158_p3, %p3157_p2 }
  0x93   : > { %p3160_p7 = pnand %p3159_p4, %p3155_p1 }
  0x95   : > { %3163 = shalt.err (!%p3160_p7)  }
  0x96   : > { %309 = dma.hbm_to_vmem [thread:$0]  %s305_s8, 16, %s307_s18, [#allocation2] }
  0x97   : > { %s328_s11 = sld [smem:[#allocation4 + %s327_s16]]  ;;  %s330_s1 = scalar_lea.vmem %s6186_s9, 10 [#allocation5] }
  0x98   : > { %s312_s27 = scalar_lea.hbm %s7892_s3, %s311_s13  ;;  %s6321_s0 = sshll.u32 %s330_s1, 4  ;;  %s341_s0 = int_to_ptr.vmem [resolvable:$true] %s6321_s0 }
  0x99   : > { %s321_s6 = sshll.u32 %s312_s27, 4  ;;  %s344_s23 = sadd.s32 11, %s6183_s7  ;;  %s322_s6 = int_to_ptr.hbm [resolvable:$true] %s321_s6 }
  0x9a   : > { %s3176_s30 = sshra.s32 %s322_s6, 4  ;;  %s3177_s30 = int_to_ptr.hbm [resolvable:$true] %s3176_s30 }
  0x9b   : > { %s3178_s12 = scalar_lea.hbm %s3177_s30, 1  ;;  %p3181_p9 = scmp.lt.s32.totalorder %s3177_s30, %s7892_s3 }
  0x9c   : > { %p3179_p8 = scmp.ne.s32.totalorder %s3177_s30, %s3178_s12  ;;  %p3182_p10 = scmp.lt.s32.totalorder %s6212_s17, %s3178_s12 }
  0x9e   : > { %p3183_p11 = por %p3182_p10, %p3181_p9 }
  0xa0   : > { %p3184_p12 = pnand %p3183_p11, %p3179_p8 }
  0xa2   : > { %3187 = shalt.err (!%p3184_p12)  }
  0xa3   : > { %326 = dma.hbm_to_vmem [thread:$0]  %s322_s6, 16, %s324_s25, [#allocation2] }
  0xa4   : > { %s345_s13 = sld [smem:[#allocation4 + %s344_s23]]  ;;  %s347_s16 = scalar_lea.vmem %s6186_s9, 11 [#allocation5] }
  0xa5   : > { %s329_s26 = scalar_lea.hbm %s7892_s3, %s328_s11  ;;  %s6333_s27 = sshll.u32 %s347_s16, 4  ;;  %s358_s27 = int_to_ptr.vmem [resolvable:$true] %s6333_s27 }
  0xa6   : > { %s338_s5 = sshll.u32 %s329_s26, 4  ;;  %s361_s30 = sadd.s32 12, %s6183_s7  ;;  %s339_s5 = int_to_ptr.hbm [resolvable:$true] %s338_s5 }
  0xa7   : > { %s3200_s12 = sshra.s32 %s339_s5, 4  ;;  %s3201_s12 = int_to_ptr.hbm [resolvable:$true] %s3200_s12 }
  0xa8   : > { %s3202_s18 = scalar_lea.hbm %s3201_s12, 1  ;;  %p3205_p0 = scmp.lt.s32.totalorder %s3201_s12, %s7892_s3 }
  0xa9   : > { %p3203_p13 = scmp.ne.s32.totalorder %s3201_s12, %s3202_s18  ;;  %p3206_p1 = scmp.lt.s32.totalorder %s6212_s17, %s3202_s18 }
  0xab   : > { %p3207_p2 = por %p3206_p1, %p3205_p0 }
  0xad   : > { %p3208_p3 = pnand %p3207_p2, %p3203_p13 }
  0xaf   : > { %3211 = shalt.err (!%p3208_p3)  }
  0xb0   : > { %343 = dma.hbm_to_vmem [thread:$0]  %s339_s5, 16, %s341_s0, [#allocation2] }
  0xb1   : > { %s362_s11 = sld [smem:[#allocation4 + %s361_s30]]  ;;  %s364_s23 = scalar_lea.vmem %s6186_s9, 12 [#allocation5] }
  0xb2   : > { %s346_s15 = scalar_lea.hbm %s7892_s3, %s345_s13  ;;  %s6345_s26 = sshll.u32 %s364_s23, 4  ;;  %s375_s26 = int_to_ptr.vmem [resolvable:$true] %s6345_s26 }
  0xb3   : > { %s355_s1 = sshll.u32 %s346_s15, 4  ;;  %s378_s12 = sadd.s32 13, %s6183_s7  ;;  %s356_s1 = int_to_ptr.hbm [resolvable:$true] %s355_s1 }
  0xb4   : > { %s3224_s18 = sshra.s32 %s356_s1, 4  ;;  %s3225_s18 = int_to_ptr.hbm [resolvable:$true] %s3224_s18 }
  0xb5   : > { %s3226_s25 = scalar_lea.hbm %s3225_s18, 1  ;;  %p3229_p7 = scmp.lt.s32.totalorder %s3225_s18, %s7892_s3 }
  0xb6   : > { %p3227_p4 = scmp.ne.s32.totalorder %s3225_s18, %s3226_s25  ;;  %p3230_p8 = scmp.lt.s32.totalorder %s6212_s17, %s3226_s25 }
  0xb8   : > { %p3231_p9 = por %p3230_p8, %p3229_p7 }
  0xba   : > { %p3232_p10 = pnand %p3231_p9, %p3227_p4 }
  0xbc   : > { %3235 = shalt.err (!%p3232_p10)  }
  0xbd   : > { %360 = dma.hbm_to_vmem [thread:$0]  %s356_s1, 16, %s358_s27, [#allocation2] }
  0xbe   : > { %s379_s13 = sld [smem:[#allocation4 + %s378_s12]]  ;;  %s381_s30 = scalar_lea.vmem %s6186_s9, 13 [#allocation5] }
  0xbf   : > { %s363_s8 = scalar_lea.hbm %s7892_s3, %s362_s11  ;;  %s6357_s15 = sshll.u32 %s381_s30, 4  ;;  %s392_s15 = int_to_ptr.vmem [resolvable:$true] %s6357_s15 }
  0xc0   : > { %s372_s16 = sshll.u32 %s363_s8, 4  ;;  %s395_s18 = sadd.s32 14, %s6183_s7  ;;  %s373_s16 = int_to_ptr.hbm [resolvable:$true] %s372_s16 }
  0xc1   : > { %s3248_s25 = sshra.s32 %s373_s16, 4  ;;  %s3249_s25 = int_to_ptr.hbm [resolvable:$true] %s3248_s25 }
  0xc2   : > { %s3250_s0 = scalar_lea.hbm %s3249_s25, 1  ;;  %p3253_p12 = scmp.lt.s32.totalorder %s3249_s25, %s7892_s3 }
  0xc3   : > { %p3251_p11 = scmp.ne.s32.totalorder %s3249_s25, %s3250_s0  ;;  %p3254_p13 = scmp.lt.s32.totalorder %s6212_s17, %s3250_s0 }
  0xc5   : > { %p3255_p0 = por %p3254_p13, %p3253_p12 }
  0xc7   : > { %p3256_p1 = pnand %p3255_p0, %p3251_p11 }
  0xc9   : > { %3259 = shalt.err (!%p3256_p1)  }
  0xca   : > { %377 = dma.hbm_to_vmem [thread:$0]  %s373_s16, 16, %s375_s26, [#allocation2] }
  0xcb   : > { %s396_s11 = sld [smem:[#allocation4 + %s395_s18]]  ;;  %s398_s12 = scalar_lea.vmem %s6186_s9, 14 [#allocation5] }
  0xcc   : > { %s380_s6 = scalar_lea.hbm %s7892_s3, %s379_s13  ;;  %s6369_s8 = sshll.u32 %s398_s12, 4  ;;  %s409_s8 = int_to_ptr.vmem [resolvable:$true] %s6369_s8 }
  0xcd   : > { %s389_s23 = sshll.u32 %s380_s6, 4  ;;  %s412_s25 = sadd.s32 15, %s6183_s7  ;;  %s390_s23 = int_to_ptr.hbm [resolvable:$true] %s389_s23 }
  0xce   : > { %s3272_s0 = sshra.s32 %s390_s23, 4  ;;  %s3273_s0 = int_to_ptr.hbm [resolvable:$true] %s3272_s0 }
  0xcf   : > { %s3274_s27 = scalar_lea.hbm %s3273_s0, 1  ;;  %p3277_p3 = scmp.lt.s32.totalorder %s3273_s0, %s7892_s3 }
  0xd0   : > { %p3275_p2 = scmp.ne.s32.totalorder %s3273_s0, %s3274_s27  ;;  %p3278_p4 = scmp.lt.s32.totalorder %s6212_s17, %s3274_s27 }
  0xd2   : > { %p3279_p7 = por %p3278_p4, %p3277_p3 }
  0xd4   : > { %p3280_p8 = pnand %p3279_p7, %p3275_p2 }
  0xd6   : > { %3283 = shalt.err (!%p3280_p8)  }
  0xd7   : > { %394 = dma.hbm_to_vmem [thread:$0]  %s390_s23, 16, %s392_s15, [#allocation2] }
  0xd8   : > { %s413_s13 = sld [smem:[#allocation4 + %s412_s25]]  ;;  %s415_s18 = scalar_lea.vmem %s6186_s9, 15 [#allocation5] }
  0xd9   : > { %s397_s5 = scalar_lea.hbm %s7892_s3, %s396_s11  ;;  %s6381_s6 = sshll.u32 %s415_s18, 4  ;;  %s426_s6 = int_to_ptr.vmem [resolvable:$true] %s6381_s6 }
  0xda   : > { %s406_s30 = sshll.u32 %s397_s5, 4  ;;  %s429_s0 = sadd.s32 16, %s6183_s7  ;;  %s407_s30 = int_to_ptr.hbm [resolvable:$true] %s406_s30 }
  0xdb   : > { %s3296_s27 = sshra.s32 %s407_s30, 4  ;;  %s3297_s27 = int_to_ptr.hbm [resolvable:$true] %s3296_s27 }
  0xdc   : > { %s3298_s26 = scalar_lea.hbm %s3297_s27, 1  ;;  %p3301_p10 = scmp.lt.s32.totalorder %s3297_s27, %s7892_s3 }
  0xdd   : > { %p3299_p9 = scmp.ne.s32.totalorder %s3297_s27, %s3298_s26  ;;  %p3302_p11 = scmp.lt.s32.totalorder %s6212_s17, %s3298_s26 }
  0xdf   : > { %p3303_p12 = por %p3302_p11, %p3301_p10 }
  0xe1   : > { %p3304_p13 = pnand %p3303_p12, %p3299_p9 }
  0xe3   : > { %3307 = shalt.err (!%p3304_p13)  }
  0xe4   : > { %411 = dma.hbm_to_vmem [thread:$0]  %s407_s30, 16, %s409_s8, [#allocation2] }
  0xe5   : > { %s430_s11 = sld [smem:[#allocation4 + %s429_s0]]  ;;  %s432_s25 = scalar_lea.vmem %s6186_s9, 16 [#allocation5] }
  0xe6   : > { %s414_s1 = scalar_lea.hbm %s7892_s3, %s413_s13  ;;  %s6393_s5 = sshll.u32 %s432_s25, 4  ;;  %s443_s5 = int_to_ptr.vmem [resolvable:$true] %s6393_s5 }
  0xe7   : > { %s423_s12 = sshll.u32 %s414_s1, 4  ;;  %s446_s27 = sadd.s32 17, %s6183_s7  ;;  %s424_s12 = int_to_ptr.hbm [resolvable:$true] %s423_s12 }
  0xe8   : > { %s3320_s26 = sshra.s32 %s424_s12, 4  ;;  %s3321_s26 = int_to_ptr.hbm [resolvable:$true] %s3320_s26 }
  0xe9   : > { %s3322_s15 = scalar_lea.hbm %s3321_s26, 1  ;;  %p3325_p1 = scmp.lt.s32.totalorder %s3321_s26, %s7892_s3 }
  0xea   : > { %p3323_p0 = scmp.ne.s32.totalorder %s3321_s26, %s3322_s15  ;;  %p3326_p2 = scmp.lt.s32.totalorder %s6212_s17, %s3322_s15 }
  0xec   : > { %p3327_p3 = por %p3326_p2, %p3325_p1 }
  0xee   : > { %p3328_p4 = pnand %p3327_p3, %p3323_p0 }
  0xf0   : > { %3331 = shalt.err (!%p3328_p4)  }
  0xf1   : > { %428 = dma.hbm_to_vmem [thread:$0]  %s424_s12, 16, %s426_s6, [#allocation2] }
  0xf2   : > { %s447_s13 = sld [smem:[#allocation4 + %s446_s27]]  ;;  %s449_s0 = scalar_lea.vmem %s6186_s9, 17 [#allocation5] }
  0xf3   : > { %s431_s16 = scalar_lea.hbm %s7892_s3, %s430_s11  ;;  %s6405_s1 = sshll.u32 %s449_s0, 4  ;;  %s460_s1 = int_to_ptr.vmem [resolvable:$true] %s6405_s1 }
  0xf4   : > { %s440_s18 = sshll.u32 %s431_s16, 4  ;;  %s463_s26 = sadd.s32 18, %s6183_s7  ;;  %s441_s18 = int_to_ptr.hbm [resolvable:$true] %s440_s18 }
  0xf5   : > { %s3344_s15 = sshra.s32 %s441_s18, 4  ;;  %s3345_s15 = int_to_ptr.hbm [resolvable:$true] %s3344_s15 }
  0xf6   : > { %s3346_s8 = scalar_lea.hbm %s3345_s15, 1  ;;  %p3349_p8 = scmp.lt.s32.totalorder %s3345_s15, %s7892_s3 }
  0xf7   : > { %p3347_p7 = scmp.ne.s32.totalorder %s3345_s15, %s3346_s8  ;;  %p3350_p9 = scmp.lt.s32.totalorder %s6212_s17, %s3346_s8 }
  0xf9   : > { %p3351_p10 = por %p3350_p9, %p3349_p8 }
  0xfb   : > { %p3352_p11 = pnand %p3351_p10, %p3347_p7 }
  0xfd   : > { %3355 = shalt.err (!%p3352_p11)  }
  0xfe   : > { %445 = dma.hbm_to_vmem [thread:$0]  %s441_s18, 16, %s443_s5, [#allocation2] }
  0xff   : > { %s464_s11 = sld [smem:[#allocation4 + %s463_s26]]  ;;  %s466_s27 = scalar_lea.vmem %s6186_s9, 18 [#allocation5] }
 0x100   : > { %s448_s23 = scalar_lea.hbm %s7892_s3, %s447_s13  ;;  %s6417_s16 = sshll.u32 %s466_s27, 4  ;;  %s477_s16 = int_to_ptr.vmem [resolvable:$true] %s6417_s16 }
 0x101   : > { %s457_s25 = sshll.u32 %s448_s23, 4  ;;  %s480_s15 = sadd.s32 19, %s6183_s7  ;;  %s458_s25 = int_to_ptr.hbm [resolvable:$true] %s457_s25 }
 0x102   : > { %s3368_s8 = sshra.s32 %s458_s25, 4  ;;  %s3369_s8 = int_to_ptr.hbm [resolvable:$true] %s3368_s8 }
 0x103   : > { %s3370_s6 = scalar_lea.hbm %s3369_s8, 1  ;;  %p3373_p13 = scmp.lt.s32.totalorder %s3369_s8, %s7892_s3 }
 0x104   : > { %p3371_p12 = scmp.ne.s32.totalorder %s3369_s8, %s3370_s6  ;;  %p3374_p0 = scmp.lt.s32.totalorder %s6212_s17, %s3370_s6 }
 0x106   : > { %p3375_p1 = por %p3374_p0, %p3373_p13 }
 0x108   : > { %p3376_p2 = pnand %p3375_p1, %p3371_p12 }
 0x10a   : > { %3379 = shalt.err (!%p3376_p2)  }
 0x10b   : > { %462 = dma.hbm_to_vmem [thread:$0]  %s458_s25, 16, %s460_s1, [#allocation2] }
 0x10c   : > { %s481_s13 = sld [smem:[#allocation4 + %s480_s15]]  ;;  %s483_s26 = scalar_lea.vmem %s6186_s9, 19 [#allocation5] }
 0x10d   : > { %s465_s30 = scalar_lea.hbm %s7892_s3, %s464_s11  ;;  %s6429_s23 = sshll.u32 %s483_s26, 4  ;;  %s494_s23 = int_to_ptr.vmem [resolvable:$true] %s6429_s23 }
 0x10e   : > { %s474_s0 = sshll.u32 %s465_s30, 4  ;;  %s497_s8 = sadd.s32 20, %s6183_s7  ;;  %s475_s0 = int_to_ptr.hbm [resolvable:$true] %s474_s0 }
 0x10f   : > { %s3392_s6 = sshra.s32 %s475_s0, 4  ;;  %s3393_s6 = int_to_ptr.hbm [resolvable:$true] %s3392_s6 }
 0x110   : > { %s3394_s5 = scalar_lea.hbm %s3393_s6, 1  ;;  %p3397_p4 = scmp.lt.s32.totalorder %s3393_s6, %s7892_s3 }
 0x111   : > { %p3395_p3 = scmp.ne.s32.totalorder %s3393_s6, %s3394_s5  ;;  %p3398_p7 = scmp.lt.s32.totalorder %s6212_s17, %s3394_s5 }
 0x113   : > { %p3399_p8 = por %p3398_p7, %p3397_p4 }
 0x115   : > { %p3400_p9 = pnand %p3399_p8, %p3395_p3 }
 0x117   : > { %3403 = shalt.err (!%p3400_p9)  }
 0x118   : > { %479 = dma.hbm_to_vmem [thread:$0]  %s475_s0, 16, %s477_s16, [#allocation2] }
 0x119   : > { %s498_s11 = sld [smem:[#allocation4 + %s497_s8]]  ;;  %s500_s15 = scalar_lea.vmem %s6186_s9, 20 [#allocation5] }
 0x11a   : > { %s482_s12 = scalar_lea.hbm %s7892_s3, %s481_s13  ;;  %s6441_s30 = sshll.u32 %s500_s15, 4  ;;  %s511_s30 = int_to_ptr.vmem [resolvable:$true] %s6441_s30 }
 0x11b   : > { %s491_s27 = sshll.u32 %s482_s12, 4  ;;  %s514_s6 = sadd.s32 21, %s6183_s7  ;;  %s492_s27 = int_to_ptr.hbm [resolvable:$true] %s491_s27 }
 0x11c   : > { %s3416_s5 = sshra.s32 %s492_s27, 4  ;;  %s3417_s5 = int_to_ptr.hbm [resolvable:$true] %s3416_s5 }
 0x11d   : > { %s3418_s1 = scalar_lea.hbm %s3417_s5, 1  ;;  %p3421_p11 = scmp.lt.s32.totalorder %s3417_s5, %s7892_s3 }
 0x11e   : > { %p3419_p10 = scmp.ne.s32.totalorder %s3417_s5, %s3418_s1  ;;  %p3422_p12 = scmp.lt.s32.totalorder %s6212_s17, %s3418_s1 }
 0x120   : > { %p3423_p13 = por %p3422_p12, %p3421_p11 }
 0x122   : > { %p3424_p0 = pnand %p3423_p13, %p3419_p10 }
 0x124   : > { %3427 = shalt.err (!%p3424_p0)  }
 0x125   : > { %496 = dma.hbm_to_vmem [thread:$0]  %s492_s27, 16, %s494_s23, [#allocation2] }
 0x126   : > { %s515_s13 = sld [smem:[#allocation4 + %s514_s6]]  ;;  %s517_s8 = scalar_lea.vmem %s6186_s9, 21 [#allocation5] }
 0x127   : > { %s499_s18 = scalar_lea.hbm %s7892_s3, %s498_s11  ;;  %s6453_s12 = sshll.u32 %s517_s8, 4  ;;  %s528_s12 = int_to_ptr.vmem [resolvable:$true] %s6453_s12 }
 0x128   : > { %s508_s26 = sshll.u32 %s499_s18, 4  ;;  %s531_s5 = sadd.s32 22, %s6183_s7  ;;  %s509_s26 = int_to_ptr.hbm [resolvable:$true] %s508_s26 }
 0x129   : > { %s3440_s1 = sshra.s32 %s509_s26, 4  ;;  %s3441_s1 = int_to_ptr.hbm [resolvable:$true] %s3440_s1 }
 0x12a   : > { %s3442_s16 = scalar_lea.hbm %s3441_s1, 1  ;;  %p3445_p2 = scmp.lt.s32.totalorder %s3441_s1, %s7892_s3 }
 0x12b   : > { %p3443_p1 = scmp.ne.s32.totalorder %s3441_s1, %s3442_s16  ;;  %p3446_p3 = scmp.lt.s32.totalorder %s6212_s17, %s3442_s16 }
 0x12d   : > { %p3447_p4 = por %p3446_p3, %p3445_p2 }
 0x12f   : > { %p3448_p7 = pnand %p3447_p4, %p3443_p1 }
 0x131   : > { %3451 = shalt.err (!%p3448_p7)  }
 0x132   : > { %513 = dma.hbm_to_vmem [thread:$0]  %s509_s26, 16, %s511_s30, [#allocation2] }
 0x133   : > { %s532_s11 = sld [smem:[#allocation4 + %s531_s5]]  ;;  %s534_s6 = scalar_lea.vmem %s6186_s9, 22 [#allocation5] }
 0x134   : > { %s516_s25 = scalar_lea.hbm %s7892_s3, %s515_s13  ;;  %s6465_s18 = sshll.u32 %s534_s6, 4  ;;  %s545_s18 = int_to_ptr.vmem [resolvable:$true] %s6465_s18 }
 0x135   : > { %s525_s15 = sshll.u32 %s516_s25, 4  ;;  %s548_s1 = sadd.s32 23, %s6183_s7  ;;  %s526_s15 = int_to_ptr.hbm [resolvable:$true] %s525_s15 }
 0x136   : > { %s3464_s16 = sshra.s32 %s526_s15, 4  ;;  %s3465_s16 = int_to_ptr.hbm [resolvable:$true] %s3464_s16 }
 0x137   : > { %s3466_s23 = scalar_lea.hbm %s3465_s16, 1  ;;  %p3469_p9 = scmp.lt.s32.totalorder %s3465_s16, %s7892_s3 }
 0x138   : > { %p3467_p8 = scmp.ne.s32.totalorder %s3465_s16, %s3466_s23  ;;  %p3470_p10 = scmp.lt.s32.totalorder %s6212_s17, %s3466_s23 }
 0x13a   : > { %p3471_p11 = por %p3470_p10, %p3469_p9 }
 0x13c   : > { %p3472_p12 = pnand %p3471_p11, %p3467_p8 }
 0x13e   : > { %3475 = shalt.err (!%p3472_p12)  }
 0x13f   : > { %530 = dma.hbm_to_vmem [thread:$0]  %s526_s15, 16, %s528_s12, [#allocation2] }
 0x140   : > { %s549_s13 = sld [smem:[#allocation4 + %s548_s1]]  ;;  %s551_s5 = scalar_lea.vmem %s6186_s9, 23 [#allocation5] }
 0x141   : > { %s533_s0 = scalar_lea.hbm %s7892_s3, %s532_s11  ;;  %s6477_s25 = sshll.u32 %s551_s5, 4  ;;  %s562_s25 = int_to_ptr.vmem [resolvable:$true] %s6477_s25 }
 0x142   : > { %s542_s8 = sshll.u32 %s533_s0, 4  ;;  %s565_s16 = sadd.s32 24, %s6183_s7  ;;  %s543_s8 = int_to_ptr.hbm [resolvable:$true] %s542_s8 }
 0x143   : > { %s3488_s23 = sshra.s32 %s543_s8, 4  ;;  %s3489_s23 = int_to_ptr.hbm [resolvable:$true] %s3488_s23 }
 0x144   : > { %s3490_s30 = scalar_lea.hbm %s3489_s23, 1  ;;  %p3493_p0 = scmp.lt.s32.totalorder %s3489_s23, %s7892_s3 }
 0x145   : > { %p3491_p13 = scmp.ne.s32.totalorder %s3489_s23, %s3490_s30  ;;  %p3494_p1 = scmp.lt.s32.totalorder %s6212_s17, %s3490_s30 }
 0x147   : > { %p3495_p2 = por %p3494_p1, %p3493_p0 }
 0x149   : > { %p3496_p3 = pnand %p3495_p2, %p3491_p13 }
 0x14b   : > { %3499 = shalt.err (!%p3496_p3)  }
 0x14c   : > { %547 = dma.hbm_to_vmem [thread:$0]  %s543_s8, 16, %s545_s18, [#allocation2] }
 0x14d   : > { %s566_s11 = sld [smem:[#allocation4 + %s565_s16]]  ;;  %s568_s1 = scalar_lea.vmem %s6186_s9, 24 [#allocation5] }
 0x14e   : > { %s550_s27 = scalar_lea.hbm %s7892_s3, %s549_s13  ;;  %s6489_s0 = sshll.u32 %s568_s1, 4  ;;  %s579_s0 = int_to_ptr.vmem [resolvable:$true] %s6489_s0 }
 0x14f   : > { %s559_s6 = sshll.u32 %s550_s27, 4  ;;  %s582_s23 = sadd.s32 25, %s6183_s7  ;;  %s560_s6 = int_to_ptr.hbm [resolvable:$true] %s559_s6 }
 0x150   : > { %s3512_s30 = sshra.s32 %s560_s6, 4  ;;  %s3513_s30 = int_to_ptr.hbm [resolvable:$true] %s3512_s30 }
 0x151   : > { %s3514_s12 = scalar_lea.hbm %s3513_s30, 1  ;;  %p3517_p7 = scmp.lt.s32.totalorder %s3513_s30, %s7892_s3 }
 0x152   : > { %p3515_p4 = scmp.ne.s32.totalorder %s3513_s30, %s3514_s12  ;;  %p3518_p8 = scmp.lt.s32.totalorder %s6212_s17, %s3514_s12 }
 0x154   : > { %p3519_p9 = por %p3518_p8, %p3517_p7 }
 0x156   : > { %p3520_p10 = pnand %p3519_p9, %p3515_p4 }
 0x158   : > { %3523 = shalt.err (!%p3520_p10)  }
 0x159   : > { %564 = dma.hbm_to_vmem [thread:$0]  %s560_s6, 16, %s562_s25, [#allocation2] }
 0x15a   : > { %s583_s13 = sld [smem:[#allocation4 + %s582_s23]]  ;;  %s585_s16 = scalar_lea.vmem %s6186_s9, 25 [#allocation5] }
 0x15b   : > { %s567_s26 = scalar_lea.hbm %s7892_s3, %s566_s11  ;;  %s6501_s27 = sshll.u32 %s585_s16, 4  ;;  %s596_s27 = int_to_ptr.vmem [resolvable:$true] %s6501_s27 }
 0x15c   : > { %s576_s5 = sshll.u32 %s567_s26, 4  ;;  %s599_s30 = sadd.s32 26, %s6183_s7  ;;  %s577_s5 = int_to_ptr.hbm [resolvable:$true] %s576_s5 }
 0x15d   : > { %s3536_s12 = sshra.s32 %s577_s5, 4  ;;  %s3537_s12 = int_to_ptr.hbm [resolvable:$true] %s3536_s12 }
 0x15e   : > { %s3538_s18 = scalar_lea.hbm %s3537_s12, 1  ;;  %p3541_p12 = scmp.lt.s32.totalorder %s3537_s12, %s7892_s3 }
 0x15f   : > { %p3539_p11 = scmp.ne.s32.totalorder %s3537_s12, %s3538_s18  ;;  %p3542_p13 = scmp.lt.s32.totalorder %s6212_s17, %s3538_s18 }
 0x161   : > { %p3543_p0 = por %p3542_p13, %p3541_p12 }
 0x163   : > { %p3544_p1 = pnand %p3543_p0, %p3539_p11 }
 0x165   : > { %3547 = shalt.err (!%p3544_p1)  }
 0x166   : > { %581 = dma.hbm_to_vmem [thread:$0]  %s577_s5, 16, %s579_s0, [#allocation2] }
 0x167   : > { %s600_s11 = sld [smem:[#allocation4 + %s599_s30]]  ;;  %s602_s23 = scalar_lea.vmem %s6186_s9, 26 [#allocation5] }
 0x168   : > { %s584_s15 = scalar_lea.hbm %s7892_s3, %s583_s13  ;;  %s6513_s26 = sshll.u32 %s602_s23, 4  ;;  %s613_s26 = int_to_ptr.vmem [resolvable:$true] %s6513_s26 }
 0x169   : > { %s593_s1 = sshll.u32 %s584_s15, 4  ;;  %s616_s12 = sadd.s32 27, %s6183_s7  ;;  %s594_s1 = int_to_ptr.hbm [resolvable:$true] %s593_s1 }
 0x16a   : > { %s3560_s18 = sshra.s32 %s594_s1, 4  ;;  %s3561_s18 = int_to_ptr.hbm [resolvable:$true] %s3560_s18 }
 0x16b   : > { %s3562_s25 = scalar_lea.hbm %s3561_s18, 1  ;;  %p3565_p3 = scmp.lt.s32.totalorder %s3561_s18, %s7892_s3 }
 0x16c   : > { %p3563_p2 = scmp.ne.s32.totalorder %s3561_s18, %s3562_s25  ;;  %p3566_p4 = scmp.lt.s32.totalorder %s6212_s17, %s3562_s25 }
 0x16e   : > { %p3567_p7 = por %p3566_p4, %p3565_p3 }
 0x170   : > { %p3568_p8 = pnand %p3567_p7, %p3563_p2 }
 0x172   : > { %3571 = shalt.err (!%p3568_p8)  }
 0x173   : > { %598 = dma.hbm_to_vmem [thread:$0]  %s594_s1, 16, %s596_s27, [#allocation2] }
 0x174   : > { %s617_s13 = sld [smem:[#allocation4 + %s616_s12]]  ;;  %s619_s30 = scalar_lea.vmem %s6186_s9, 27 [#allocation5] }
 0x175   : > { %s601_s8 = scalar_lea.hbm %s7892_s3, %s600_s11  ;;  %s6525_s15 = sshll.u32 %s619_s30, 4  ;;  %s630_s15 = int_to_ptr.vmem [resolvable:$true] %s6525_s15 }
 0x176   : > { %s610_s16 = sshll.u32 %s601_s8, 4  ;;  %s633_s18 = sadd.s32 28, %s6183_s7  ;;  %s611_s16 = int_to_ptr.hbm [resolvable:$true] %s610_s16 }
 0x177   : > { %s3584_s25 = sshra.s32 %s611_s16, 4  ;;  %s3585_s25 = int_to_ptr.hbm [resolvable:$true] %s3584_s25 }
 0x178   : > { %s3586_s0 = scalar_lea.hbm %s3585_s25, 1  ;;  %p3589_p10 = scmp.lt.s32.totalorder %s3585_s25, %s7892_s3 }
 0x179   : > { %p3587_p9 = scmp.ne.s32.totalorder %s3585_s25, %s3586_s0  ;;  %p3590_p11 = scmp.lt.s32.totalorder %s6212_s17, %s3586_s0 }
 0x17b   : > { %p3591_p12 = por %p3590_p11, %p3589_p10 }
 0x17d   : > { %p3592_p13 = pnand %p3591_p12, %p3587_p9 }
 0x17f   : > { %3595 = shalt.err (!%p3592_p13)  }
 0x180   : > { %615 = dma.hbm_to_vmem [thread:$0]  %s611_s16, 16, %s613_s26, [#allocation2] }
 0x181   : > { %s634_s11 = sld [smem:[#allocation4 + %s633_s18]]  ;;  %s636_s12 = scalar_lea.vmem %s6186_s9, 28 [#allocation5] }
 0x182   : > { %s618_s6 = scalar_lea.hbm %s7892_s3, %s617_s13  ;;  %s6537_s8 = sshll.u32 %s636_s12, 4  ;;  %s647_s8 = int_to_ptr.vmem [resolvable:$true] %s6537_s8 }
 0x183   : > { %s627_s23 = sshll.u32 %s618_s6, 4  ;;  %s650_s25 = sadd.s32 29, %s6183_s7  ;;  %s628_s23 = int_to_ptr.hbm [resolvable:$true] %s627_s23 }
 0x184   : > { %s3608_s0 = sshra.s32 %s628_s23, 4  ;;  %s3609_s0 = int_to_ptr.hbm [resolvable:$true] %s3608_s0 }
 0x185   : > { %s3610_s27 = scalar_lea.hbm %s3609_s0, 1  ;;  %p3613_p1 = scmp.lt.s32.totalorder %s3609_s0, %s7892_s3 }
 0x186   : > { %p3611_p0 = scmp.ne.s32.totalorder %s3609_s0, %s3610_s27  ;;  %p3614_p2 = scmp.lt.s32.totalorder %s6212_s17, %s3610_s27 }
 0x188   : > { %p3615_p3 = por %p3614_p2, %p3613_p1 }
 0x18a   : > { %p3616_p4 = pnand %p3615_p3, %p3611_p0 }
 0x18c   : > { %3619 = shalt.err (!%p3616_p4)  }
 0x18d   : > { %632 = dma.hbm_to_vmem [thread:$0]  %s628_s23, 16, %s630_s15, [#allocation2] }
 0x18e   : > { %s651_s13 = sld [smem:[#allocation4 + %s650_s25]]  ;;  %s653_s18 = scalar_lea.vmem %s6186_s9, 29 [#allocation5] }
 0x18f   : > { %s635_s5 = scalar_lea.hbm %s7892_s3, %s634_s11  ;;  %s6549_s6 = sshll.u32 %s653_s18, 4  ;;  %s664_s6 = int_to_ptr.vmem [resolvable:$true] %s6549_s6 }
 0x190   : > { %s644_s30 = sshll.u32 %s635_s5, 4  ;;  %s667_s0 = sadd.s32 30, %s6183_s7  ;;  %s645_s30 = int_to_ptr.hbm [resolvable:$true] %s644_s30 }
 0x191   : > { %s3632_s27 = sshra.s32 %s645_s30, 4  ;;  %s3633_s27 = int_to_ptr.hbm [resolvable:$true] %s3632_s27 }
 0x192   : > { %s3634_s26 = scalar_lea.hbm %s3633_s27, 1  ;;  %p3637_p8 = scmp.lt.s32.totalorder %s3633_s27, %s7892_s3 }
 0x193   : > { %p3635_p7 = scmp.ne.s32.totalorder %s3633_s27, %s3634_s26  ;;  %p3638_p9 = scmp.lt.s32.totalorder %s6212_s17, %s3634_s26 }
 0x195   : > { %p3639_p10 = por %p3638_p9, %p3637_p8 }
 0x197   : > { %p3640_p11 = pnand %p3639_p10, %p3635_p7 }
 0x199   : > { %3643 = shalt.err (!%p3640_p11)  }
 0x19a   : > { %649 = dma.hbm_to_vmem [thread:$0]  %s645_s30, 16, %s647_s8, [#allocation2] }
 0x19b   : > { %s668_s11 = sld [smem:[#allocation4 + %s667_s0]]  ;;  %s670_s25 = scalar_lea.vmem %s6186_s9, 30 [#allocation5] }
 0x19c   : > { %s652_s1 = scalar_lea.hbm %s7892_s3, %s651_s13  ;;  %s6561_s5 = sshll.u32 %s670_s25, 4  ;;  %s681_s5 = int_to_ptr.vmem [resolvable:$true] %s6561_s5 }
 0x19d   : > { %s661_s12 = sshll.u32 %s652_s1, 4  ;;  %s684_s27 = sadd.s32 31, %s6183_s7  ;;  %s662_s12 = int_to_ptr.hbm [resolvable:$true] %s661_s12 }
 0x19e   : > { %s3656_s26 = sshra.s32 %s662_s12, 4  ;;  %s3657_s26 = int_to_ptr.hbm [resolvable:$true] %s3656_s26 }
 0x19f   : > { %s3658_s15 = scalar_lea.hbm %s3657_s26, 1  ;;  %p3661_p13 = scmp.lt.s32.totalorder %s3657_s26, %s7892_s3 }
 0x1a0   : > { %p3659_p12 = scmp.ne.s32.totalorder %s3657_s26, %s3658_s15  ;;  %p3662_p0 = scmp.lt.s32.totalorder %s6212_s17, %s3658_s15 }
 0x1a2   : > { %p3663_p1 = por %p3662_p0, %p3661_p13 }
 0x1a4   : > { %p3664_p2 = pnand %p3663_p1, %p3659_p12 }
 0x1a6   : > { %3667 = shalt.err (!%p3664_p2)  }
 0x1a7   : > { %666 = dma.hbm_to_vmem [thread:$0]  %s662_s12, 16, %s664_s6, [#allocation2] }
 0x1a8   : > { %s685_s13 = sld [smem:[#allocation4 + %s684_s27]]  ;;  %s687_s0 = scalar_lea.vmem %s6186_s9, 31 [#allocation5] }
 0x1a9   : > { %s669_s16 = scalar_lea.hbm %s7892_s3, %s668_s11  ;;  %s6573_s1 = sshll.u32 %s687_s0, 4  ;;  %s698_s1 = int_to_ptr.vmem [resolvable:$true] %s6573_s1 }
 0x1aa   : > { %s678_s18 = sshll.u32 %s669_s16, 4  ;;  %s701_s26 = sadd.s32 32, %s6183_s7  ;;  %s679_s18 = int_to_ptr.hbm [resolvable:$true] %s678_s18 }
 0x1ab   : > { %s3680_s15 = sshra.s32 %s679_s18, 4  ;;  %s3681_s15 = int_to_ptr.hbm [resolvable:$true] %s3680_s15 }
 0x1ac   : > { %s3682_s8 = scalar_lea.hbm %s3681_s15, 1  ;;  %p3685_p4 = scmp.lt.s32.totalorder %s3681_s15, %s7892_s3 }
 0x1ad   : > { %p3683_p3 = scmp.ne.s32.totalorder %s3681_s15, %s3682_s8  ;;  %p3686_p7 = scmp.lt.s32.totalorder %s6212_s17, %s3682_s8 }
 0x1af   : > { %p3687_p8 = por %p3686_p7, %p3685_p4 }
 0x1b1   : > { %p3688_p9 = pnand %p3687_p8, %p3683_p3 }
 0x1b3   : > { %3691 = shalt.err (!%p3688_p9)  }
 0x1b4   : > { %683 = dma.hbm_to_vmem [thread:$0]  %s679_s18, 16, %s681_s5, [#allocation2] }
 0x1b5   : > { %s702_s11 = sld [smem:[#allocation4 + %s701_s26]]  ;;  %s704_s27 = scalar_lea.vmem %s6186_s9, 32 [#allocation5] }
 0x1b6   : > { %s686_s23 = scalar_lea.hbm %s7892_s3, %s685_s13  ;;  %s6585_s16 = sshll.u32 %s704_s27, 4  ;;  %s715_s16 = int_to_ptr.vmem [resolvable:$true] %s6585_s16 }
 0x1b7   : > { %s695_s25 = sshll.u32 %s686_s23, 4  ;;  %s718_s15 = sadd.s32 33, %s6183_s7  ;;  %s696_s25 = int_to_ptr.hbm [resolvable:$true] %s695_s25 }
 0x1b8   : > { %s3704_s8 = sshra.s32 %s696_s25, 4  ;;  %s3705_s8 = int_to_ptr.hbm [resolvable:$true] %s3704_s8 }
 0x1b9   : > { %s3706_s6 = scalar_lea.hbm %s3705_s8, 1  ;;  %p3709_p11 = scmp.lt.s32.totalorder %s3705_s8, %s7892_s3 }
 0x1ba   : > { %p3707_p10 = scmp.ne.s32.totalorder %s3705_s8, %s3706_s6  ;;  %p3710_p12 = scmp.lt.s32.totalorder %s6212_s17, %s3706_s6 }
 0x1bc   : > { %p3711_p13 = por %p3710_p12, %p3709_p11 }
 0x1be   : > { %p3712_p0 = pnand %p3711_p13, %p3707_p10 }
 0x1c0   : > { %3715 = shalt.err (!%p3712_p0)  }
 0x1c1   : > { %700 = dma.hbm_to_vmem [thread:$0]  %s696_s25, 16, %s698_s1, [#allocation2] }
 0x1c2   : > { %s719_s13 = sld [smem:[#allocation4 + %s718_s15]]  ;;  %s721_s26 = scalar_lea.vmem %s6186_s9, 33 [#allocation5] }
 0x1c3   : > { %s703_s30 = scalar_lea.hbm %s7892_s3, %s702_s11  ;;  %s6597_s23 = sshll.u32 %s721_s26, 4  ;;  %s732_s23 = int_to_ptr.vmem [resolvable:$true] %s6597_s23 }
 0x1c4   : > { %s712_s0 = sshll.u32 %s703_s30, 4  ;;  %s735_s8 = sadd.s32 34, %s6183_s7  ;;  %s713_s0 = int_to_ptr.hbm [resolvable:$true] %s712_s0 }
 0x1c5   : > { %s3728_s6 = sshra.s32 %s713_s0, 4  ;;  %s3729_s6 = int_to_ptr.hbm [resolvable:$true] %s3728_s6 }
 0x1c6   : > { %s3730_s5 = scalar_lea.hbm %s3729_s6, 1  ;;  %p3733_p2 = scmp.lt.s32.totalorder %s3729_s6, %s7892_s3 }
 0x1c7   : > { %p3731_p1 = scmp.ne.s32.totalorder %s3729_s6, %s3730_s5  ;;  %p3734_p3 = scmp.lt.s32.totalorder %s6212_s17, %s3730_s5 }
 0x1c9   : > { %p3735_p4 = por %p3734_p3, %p3733_p2 }
 0x1cb   : > { %p3736_p7 = pnand %p3735_p4, %p3731_p1 }
 0x1cd   : > { %3739 = shalt.err (!%p3736_p7)  }
 0x1ce   : > { %717 = dma.hbm_to_vmem [thread:$0]  %s713_s0, 16, %s715_s16, [#allocation2] }
 0x1cf   : > { %s736_s11 = sld [smem:[#allocation4 + %s735_s8]]  ;;  %s738_s15 = scalar_lea.vmem %s6186_s9, 34 [#allocation5] }
 0x1d0   : > { %s720_s12 = scalar_lea.hbm %s7892_s3, %s719_s13  ;;  %s6609_s30 = sshll.u32 %s738_s15, 4  ;;  %s749_s30 = int_to_ptr.vmem [resolvable:$true] %s6609_s30 }
 0x1d1   : > { %s729_s27 = sshll.u32 %s720_s12, 4  ;;  %s752_s6 = sadd.s32 35, %s6183_s7  ;;  %s730_s27 = int_to_ptr.hbm [resolvable:$true] %s729_s27 }
 0x1d2   : > { %s3752_s5 = sshra.s32 %s730_s27, 4  ;;  %s3753_s5 = int_to_ptr.hbm [resolvable:$true] %s3752_s5 }
 0x1d3   : > { %s3754_s1 = scalar_lea.hbm %s3753_s5, 1  ;;  %p3757_p9 = scmp.lt.s32.totalorder %s3753_s5, %s7892_s3 }
 0x1d4   : > { %p3755_p8 = scmp.ne.s32.totalorder %s3753_s5, %s3754_s1  ;;  %p3758_p10 = scmp.lt.s32.totalorder %s6212_s17, %s3754_s1 }
 0x1d6   : > { %p3759_p11 = por %p3758_p10, %p3757_p9 }
 0x1d8   : > { %p3760_p12 = pnand %p3759_p11, %p3755_p8 }
 0x1da   : > { %3763 = shalt.err (!%p3760_p12)  }
 0x1db   : > { %734 = dma.hbm_to_vmem [thread:$0]  %s730_s27, 16, %s732_s23, [#allocation2] }
 0x1dc   : > { %s753_s13 = sld [smem:[#allocation4 + %s752_s6]]  ;;  %s755_s8 = scalar_lea.vmem %s6186_s9, 35 [#allocation5] }
 0x1dd   : > { %s737_s18 = scalar_lea.hbm %s7892_s3, %s736_s11  ;;  %s6621_s12 = sshll.u32 %s755_s8, 4  ;;  %s766_s12 = int_to_ptr.vmem [resolvable:$true] %s6621_s12 }
 0x1de   : > { %s746_s26 = sshll.u32 %s737_s18, 4  ;;  %s769_s5 = sadd.s32 36, %s6183_s7  ;;  %s747_s26 = int_to_ptr.hbm [resolvable:$true] %s746_s26 }
 0x1df   : > { %s3776_s1 = sshra.s32 %s747_s26, 4  ;;  %s3777_s1 = int_to_ptr.hbm [resolvable:$true] %s3776_s1 }
 0x1e0   : > { %s3778_s16 = scalar_lea.hbm %s3777_s1, 1  ;;  %p3781_p0 = scmp.lt.s32.totalorder %s3777_s1, %s7892_s3 }
 0x1e1   : > { %p3779_p13 = scmp.ne.s32.totalorder %s3777_s1, %s3778_s16  ;;  %p3782_p1 = scmp.lt.s32.totalorder %s6212_s17, %s3778_s16 }
 0x1e3   : > { %p3783_p2 = por %p3782_p1, %p3781_p0 }
 0x1e5   : > { %p3784_p3 = pnand %p3783_p2, %p3779_p13 }
 0x1e7   : > { %3787 = shalt.err (!%p3784_p3)  }
 0x1e8   : > { %751 = dma.hbm_to_vmem [thread:$0]  %s747_s26, 16, %s749_s30, [#allocation2] }
 0x1e9   : > { %s770_s11 = sld [smem:[#allocation4 + %s769_s5]]  ;;  %s772_s6 = scalar_lea.vmem %s6186_s9, 36 [#allocation5] }
 0x1ea   : > { %s754_s25 = scalar_lea.hbm %s7892_s3, %s753_s13  ;;  %s6633_s18 = sshll.u32 %s772_s6, 4  ;;  %s783_s18 = int_to_ptr.vmem [resolvable:$true] %s6633_s18 }
 0x1eb   : > { %s763_s15 = sshll.u32 %s754_s25, 4  ;;  %s786_s1 = sadd.s32 37, %s6183_s7  ;;  %s764_s15 = int_to_ptr.hbm [resolvable:$true] %s763_s15 }
 0x1ec   : > { %s3800_s16 = sshra.s32 %s764_s15, 4  ;;  %s3801_s16 = int_to_ptr.hbm [resolvable:$true] %s3800_s16 }
 0x1ed   : > { %s3802_s23 = scalar_lea.hbm %s3801_s16, 1  ;;  %p3805_p7 = scmp.lt.s32.totalorder %s3801_s16, %s7892_s3 }
 0x1ee   : > { %p3803_p4 = scmp.ne.s32.totalorder %s3801_s16, %s3802_s23  ;;  %p3806_p8 = scmp.lt.s32.totalorder %s6212_s17, %s3802_s23 }
 0x1f0   : > { %p3807_p9 = por %p3806_p8, %p3805_p7 }
 0x1f2   : > { %p3808_p10 = pnand %p3807_p9, %p3803_p4 }
 0x1f4   : > { %3811 = shalt.err (!%p3808_p10)  }
 0x1f5   : > { %768 = dma.hbm_to_vmem [thread:$0]  %s764_s15, 16, %s766_s12, [#allocation2] }
 0x1f6   : > { %s787_s13 = sld [smem:[#allocation4 + %s786_s1]]  ;;  %s789_s5 = scalar_lea.vmem %s6186_s9, 37 [#allocation5] }
 0x1f7   : > { %s771_s0 = scalar_lea.hbm %s7892_s3, %s770_s11  ;;  %s6645_s25 = sshll.u32 %s789_s5, 4  ;;  %s800_s25 = int_to_ptr.vmem [resolvable:$true] %s6645_s25 }
 0x1f8   : > { %s780_s8 = sshll.u32 %s771_s0, 4  ;;  %s803_s16 = sadd.s32 38, %s6183_s7  ;;  %s781_s8 = int_to_ptr.hbm [resolvable:$true] %s780_s8 }
 0x1f9   : > { %s3824_s23 = sshra.s32 %s781_s8, 4  ;;  %s3825_s23 = int_to_ptr.hbm [resolvable:$true] %s3824_s23 }
 0x1fa   : > { %s3826_s30 = scalar_lea.hbm %s3825_s23, 1  ;;  %p3829_p12 = scmp.lt.s32.totalorder %s3825_s23, %s7892_s3 }
 0x1fb   : > { %p3827_p11 = scmp.ne.s32.totalorder %s3825_s23, %s3826_s30  ;;  %p3830_p13 = scmp.lt.s32.totalorder %s6212_s17, %s3826_s30 }
 0x1fd   : > { %p3831_p0 = por %p3830_p13, %p3829_p12 }
 0x1ff   : > { %p3832_p1 = pnand %p3831_p0, %p3827_p11 }
 0x201   : > { %3835 = shalt.err (!%p3832_p1)  }
 0x202   : > { %785 = dma.hbm_to_vmem [thread:$0]  %s781_s8, 16, %s783_s18, [#allocation2] }
 0x203   : > { %s804_s11 = sld [smem:[#allocation4 + %s803_s16]]  ;;  %s806_s1 = scalar_lea.vmem %s6186_s9, 38 [#allocation5] }
 0x204   : > { %s788_s27 = scalar_lea.hbm %s7892_s3, %s787_s13  ;;  %s6657_s0 = sshll.u32 %s806_s1, 4  ;;  %s817_s0 = int_to_ptr.vmem [resolvable:$true] %s6657_s0 }
 0x205   : > { %s797_s6 = sshll.u32 %s788_s27, 4  ;;  %s820_s23 = sadd.s32 39, %s6183_s7  ;;  %s798_s6 = int_to_ptr.hbm [resolvable:$true] %s797_s6 }
 0x206   : > { %s3848_s30 = sshra.s32 %s798_s6, 4  ;;  %s3849_s30 = int_to_ptr.hbm [resolvable:$true] %s3848_s30 }
 0x207   : > { %s3850_s12 = scalar_lea.hbm %s3849_s30, 1  ;;  %p3853_p3 = scmp.lt.s32.totalorder %s3849_s30, %s7892_s3 }
 0x208   : > { %p3851_p2 = scmp.ne.s32.totalorder %s3849_s30, %s3850_s12  ;;  %p3854_p4 = scmp.lt.s32.totalorder %s6212_s17, %s3850_s12 }
 0x20a   : > { %p3855_p7 = por %p3854_p4, %p3853_p3 }
 0x20c   : > { %p3856_p8 = pnand %p3855_p7, %p3851_p2 }
 0x20e   : > { %3859 = shalt.err (!%p3856_p8)  }
 0x20f   : > { %802 = dma.hbm_to_vmem [thread:$0]  %s798_s6, 16, %s800_s25, [#allocation2] }
 0x210   : > { %s821_s13 = sld [smem:[#allocation4 + %s820_s23]]  ;;  %s823_s16 = scalar_lea.vmem %s6186_s9, 39 [#allocation5] }
 0x211   : > { %s805_s26 = scalar_lea.hbm %s7892_s3, %s804_s11  ;;  %s6669_s27 = sshll.u32 %s823_s16, 4  ;;  %s834_s27 = int_to_ptr.vmem [resolvable:$true] %s6669_s27 }
 0x212   : > { %s814_s5 = sshll.u32 %s805_s26, 4  ;;  %s837_s30 = sadd.s32 40, %s6183_s7  ;;  %s815_s5 = int_to_ptr.hbm [resolvable:$true] %s814_s5 }
 0x213   : > { %s3872_s12 = sshra.s32 %s815_s5, 4  ;;  %s3873_s12 = int_to_ptr.hbm [resolvable:$true] %s3872_s12 }
 0x214   : > { %s3874_s18 = scalar_lea.hbm %s3873_s12, 1  ;;  %p3877_p10 = scmp.lt.s32.totalorder %s3873_s12, %s7892_s3 }
 0x215   : > { %p3875_p9 = scmp.ne.s32.totalorder %s3873_s12, %s3874_s18  ;;  %p3878_p11 = scmp.lt.s32.totalorder %s6212_s17, %s3874_s18 }
 0x217   : > { %p3879_p12 = por %p3878_p11, %p3877_p10 }
 0x219   : > { %p3880_p13 = pnand %p3879_p12, %p3875_p9 }
 0x21b   : > { %3883 = shalt.err (!%p3880_p13)  }
 0x21c   : > { %819 = dma.hbm_to_vmem [thread:$0]  %s815_s5, 16, %s817_s0, [#allocation2] }
 0x21d   : > { %s838_s11 = sld [smem:[#allocation4 + %s837_s30]]  ;;  %s840_s23 = scalar_lea.vmem %s6186_s9, 40 [#allocation5] }
 0x21e   : > { %s822_s15 = scalar_lea.hbm %s7892_s3, %s821_s13  ;;  %s6681_s26 = sshll.u32 %s840_s23, 4  ;;  %s851_s26 = int_to_ptr.vmem [resolvable:$true] %s6681_s26 }
 0x21f   : > { %s831_s1 = sshll.u32 %s822_s15, 4  ;;  %s854_s12 = sadd.s32 41, %s6183_s7  ;;  %s832_s1 = int_to_ptr.hbm [resolvable:$true] %s831_s1 }
 0x220   : > { %s3896_s18 = sshra.s32 %s832_s1, 4  ;;  %s3897_s18 = int_to_ptr.hbm [resolvable:$true] %s3896_s18 }
 0x221   : > { %s3898_s25 = scalar_lea.hbm %s3897_s18, 1  ;;  %p3901_p1 = scmp.lt.s32.totalorder %s3897_s18, %s7892_s3 }
 0x222   : > { %p3899_p0 = scmp.ne.s32.totalorder %s3897_s18, %s3898_s25  ;;  %p3902_p2 = scmp.lt.s32.totalorder %s6212_s17, %s3898_s25 }
 0x224   : > { %p3903_p3 = por %p3902_p2, %p3901_p1 }
 0x226   : > { %p3904_p4 = pnand %p3903_p3, %p3899_p0 }
 0x228   : > { %3907 = shalt.err (!%p3904_p4)  }
 0x229   : > { %836 = dma.hbm_to_vmem [thread:$0]  %s832_s1, 16, %s834_s27, [#allocation2] }
 0x22a   : > { %s855_s13 = sld [smem:[#allocation4 + %s854_s12]]  ;;  %s857_s30 = scalar_lea.vmem %s6186_s9, 41 [#allocation5] }
 0x22b   : > { %s839_s8 = scalar_lea.hbm %s7892_s3, %s838_s11  ;;  %s6693_s15 = sshll.u32 %s857_s30, 4  ;;  %s868_s15 = int_to_ptr.vmem [resolvable:$true] %s6693_s15 }
 0x22c   : > { %s848_s16 = sshll.u32 %s839_s8, 4  ;;  %s871_s18 = sadd.s32 42, %s6183_s7  ;;  %s849_s16 = int_to_ptr.hbm [resolvable:$true] %s848_s16 }
 0x22d   : > { %s3920_s25 = sshra.s32 %s849_s16, 4  ;;  %s3921_s25 = int_to_ptr.hbm [resolvable:$true] %s3920_s25 }
 0x22e   : > { %s3922_s0 = scalar_lea.hbm %s3921_s25, 1  ;;  %p3925_p8 = scmp.lt.s32.totalorder %s3921_s25, %s7892_s3 }
 0x22f   : > { %p3923_p7 = scmp.ne.s32.totalorder %s3921_s25, %s3922_s0  ;;  %p3926_p9 = scmp.lt.s32.totalorder %s6212_s17, %s3922_s0 }
 0x231   : > { %p3927_p10 = por %p3926_p9, %p3925_p8 }
 0x233   : > { %p3928_p11 = pnand %p3927_p10, %p3923_p7 }
 0x235   : > { %3931 = shalt.err (!%p3928_p11)  }
 0x236   : > { %853 = dma.hbm_to_vmem [thread:$0]  %s849_s16, 16, %s851_s26, [#allocation2] }
 0x237   : > { %s872_s11 = sld [smem:[#allocation4 + %s871_s18]]  ;;  %s874_s12 = scalar_lea.vmem %s6186_s9, 42 [#allocation5] }
 0x238   : > { %s856_s6 = scalar_lea.hbm %s7892_s3, %s855_s13  ;;  %s6705_s8 = sshll.u32 %s874_s12, 4  ;;  %s885_s8 = int_to_ptr.vmem [resolvable:$true] %s6705_s8 }
 0x239   : > { %s865_s23 = sshll.u32 %s856_s6, 4  ;;  %s888_s25 = sadd.s32 43, %s6183_s7  ;;  %s866_s23 = int_to_ptr.hbm [resolvable:$true] %s865_s23 }
 0x23a   : > { %s3944_s0 = sshra.s32 %s866_s23, 4  ;;  %s3945_s0 = int_to_ptr.hbm [resolvable:$true] %s3944_s0 }
 0x23b   : > { %s3946_s27 = scalar_lea.hbm %s3945_s0, 1  ;;  %p3949_p13 = scmp.lt.s32.totalorder %s3945_s0, %s7892_s3 }
 0x23c   : > { %p3947_p12 = scmp.ne.s32.totalorder %s3945_s0, %s3946_s27  ;;  %p3950_p0 = scmp.lt.s32.totalorder %s6212_s17, %s3946_s27 }
 0x23e   : > { %p3951_p1 = por %p3950_p0, %p3949_p13 }
 0x240   : > { %p3952_p2 = pnand %p3951_p1, %p3947_p12 }
 0x242   : > { %3955 = shalt.err (!%p3952_p2)  }
 0x243   : > { %870 = dma.hbm_to_vmem [thread:$0]  %s866_s23, 16, %s868_s15, [#allocation2] }
 0x244   : > { %s889_s13 = sld [smem:[#allocation4 + %s888_s25]]  ;;  %s891_s18 = scalar_lea.vmem %s6186_s9, 43 [#allocation5] }
 0x245   : > { %s873_s5 = scalar_lea.hbm %s7892_s3, %s872_s11  ;;  %s6717_s6 = sshll.u32 %s891_s18, 4  ;;  %s902_s6 = int_to_ptr.vmem [resolvable:$true] %s6717_s6 }
 0x246   : > { %s882_s30 = sshll.u32 %s873_s5, 4  ;;  %s905_s0 = sadd.s32 44, %s6183_s7  ;;  %s883_s30 = int_to_ptr.hbm [resolvable:$true] %s882_s30 }
 0x247   : > { %s3968_s27 = sshra.s32 %s883_s30, 4  ;;  %s3969_s27 = int_to_ptr.hbm [resolvable:$true] %s3968_s27 }
 0x248   : > { %s3970_s26 = scalar_lea.hbm %s3969_s27, 1  ;;  %p3973_p4 = scmp.lt.s32.totalorder %s3969_s27, %s7892_s3 }
 0x249   : > { %p3971_p3 = scmp.ne.s32.totalorder %s3969_s27, %s3970_s26  ;;  %p3974_p7 = scmp.lt.s32.totalorder %s6212_s17, %s3970_s26 }
 0x24b   : > { %p3975_p8 = por %p3974_p7, %p3973_p4 }
 0x24d   : > { %p3976_p9 = pnand %p3975_p8, %p3971_p3 }
 0x24f   : > { %3979 = shalt.err (!%p3976_p9)  }
 0x250   : > { %887 = dma.hbm_to_vmem [thread:$0]  %s883_s30, 16, %s885_s8, [#allocation2] }
 0x251   : > { %s906_s11 = sld [smem:[#allocation4 + %s905_s0]]  ;;  %s908_s25 = scalar_lea.vmem %s6186_s9, 44 [#allocation5] }
 0x252   : > { %s890_s1 = scalar_lea.hbm %s7892_s3, %s889_s13  ;;  %s6729_s5 = sshll.u32 %s908_s25, 4  ;;  %s919_s5 = int_to_ptr.vmem [resolvable:$true] %s6729_s5 }
 0x253   : > { %s899_s12 = sshll.u32 %s890_s1, 4  ;;  %s922_s27 = sadd.s32 45, %s6183_s7  ;;  %s900_s12 = int_to_ptr.hbm [resolvable:$true] %s899_s12 }
 0x254   : > { %s3992_s26 = sshra.s32 %s900_s12, 4  ;;  %s3993_s26 = int_to_ptr.hbm [resolvable:$true] %s3992_s26 }
 0x255   : > { %s3994_s15 = scalar_lea.hbm %s3993_s26, 1  ;;  %p3997_p11 = scmp.lt.s32.totalorder %s3993_s26, %s7892_s3 }
 0x256   : > { %p3995_p10 = scmp.ne.s32.totalorder %s3993_s26, %s3994_s15  ;;  %p3998_p12 = scmp.lt.s32.totalorder %s6212_s17, %s3994_s15 }
 0x258   : > { %p3999_p13 = por %p3998_p12, %p3997_p11 }
 0x25a   : > { %p4000_p0 = pnand %p3999_p13, %p3995_p10 }
 0x25c   : > { %4003 = shalt.err (!%p4000_p0)  }
 0x25d   : > { %904 = dma.hbm_to_vmem [thread:$0]  %s900_s12, 16, %s902_s6, [#allocation2] }
 0x25e   : > { %s923_s13 = sld [smem:[#allocation4 + %s922_s27]]  ;;  %s925_s0 = scalar_lea.vmem %s6186_s9, 45 [#allocation5] }
 0x25f   : > { %s907_s16 = scalar_lea.hbm %s7892_s3, %s906_s11  ;;  %s6741_s1 = sshll.u32 %s925_s0, 4  ;;  %s936_s1 = int_to_ptr.vmem [resolvable:$true] %s6741_s1 }
 0x260   : > { %s916_s18 = sshll.u32 %s907_s16, 4  ;;  %s939_s26 = sadd.s32 46, %s6183_s7  ;;  %s917_s18 = int_to_ptr.hbm [resolvable:$true] %s916_s18 }
 0x261   : > { %s4016_s15 = sshra.s32 %s917_s18, 4  ;;  %s4017_s15 = int_to_ptr.hbm [resolvable:$true] %s4016_s15 }
 0x262   : > { %s4018_s8 = scalar_lea.hbm %s4017_s15, 1  ;;  %p4021_p2 = scmp.lt.s32.totalorder %s4017_s15, %s7892_s3 }
 0x263   : > { %p4019_p1 = scmp.ne.s32.totalorder %s4017_s15, %s4018_s8  ;;  %p4022_p3 = scmp.lt.s32.totalorder %s6212_s17, %s4018_s8 }
 0x265   : > { %p4023_p4 = por %p4022_p3, %p4021_p2 }
 0x267   : > { %p4024_p7 = pnand %p4023_p4, %p4019_p1 }
 0x269   : > { %4027 = shalt.err (!%p4024_p7)  }
 0x26a   : > { %921 = dma.hbm_to_vmem [thread:$0]  %s917_s18, 16, %s919_s5, [#allocation2] }
 0x26b   : > { %s940_s11 = sld [smem:[#allocation4 + %s939_s26]]  ;;  %s942_s27 = scalar_lea.vmem %s6186_s9, 46 [#allocation5] }
 0x26c   : > { %s924_s23 = scalar_lea.hbm %s7892_s3, %s923_s13  ;;  %s6753_s16 = sshll.u32 %s942_s27, 4  ;;  %s953_s16 = int_to_ptr.vmem [resolvable:$true] %s6753_s16 }
 0x26d   : > { %s933_s25 = sshll.u32 %s924_s23, 4  ;;  %s956_s15 = sadd.s32 47, %s6183_s7  ;;  %s934_s25 = int_to_ptr.hbm [resolvable:$true] %s933_s25 }
 0x26e   : > { %s4040_s8 = sshra.s32 %s934_s25, 4  ;;  %s4041_s8 = int_to_ptr.hbm [resolvable:$true] %s4040_s8 }
 0x26f   : > { %s4042_s6 = scalar_lea.hbm %s4041_s8, 1  ;;  %p4045_p9 = scmp.lt.s32.totalorder %s4041_s8, %s7892_s3 }
 0x270   : > { %p4043_p8 = scmp.ne.s32.totalorder %s4041_s8, %s4042_s6  ;;  %p4046_p10 = scmp.lt.s32.totalorder %s6212_s17, %s4042_s6 }
 0x272   : > { %p4047_p11 = por %p4046_p10, %p4045_p9 }
 0x274   : > { %p4048_p12 = pnand %p4047_p11, %p4043_p8 }
 0x276   : > { %4051 = shalt.err (!%p4048_p12)  }
 0x277   : > { %938 = dma.hbm_to_vmem [thread:$0]  %s934_s25, 16, %s936_s1, [#allocation2] }
 0x278   : > { %s957_s13 = sld [smem:[#allocation4 + %s956_s15]]  ;;  %s959_s26 = scalar_lea.vmem %s6186_s9, 47 [#allocation5] }
 0x279   : > { %s941_s30 = scalar_lea.hbm %s7892_s3, %s940_s11  ;;  %s6765_s23 = sshll.u32 %s959_s26, 4  ;;  %s970_s23 = int_to_ptr.vmem [resolvable:$true] %s6765_s23 }
 0x27a   : > { %s950_s0 = sshll.u32 %s941_s30, 4  ;;  %s973_s8 = sadd.s32 48, %s6183_s7  ;;  %s951_s0 = int_to_ptr.hbm [resolvable:$true] %s950_s0 }
 0x27b   : > { %s4064_s6 = sshra.s32 %s951_s0, 4  ;;  %s4065_s6 = int_to_ptr.hbm [resolvable:$true] %s4064_s6 }
 0x27c   : > { %s4066_s5 = scalar_lea.hbm %s4065_s6, 1  ;;  %p4069_p0 = scmp.lt.s32.totalorder %s4065_s6, %s7892_s3 }
 0x27d   : > { %p4067_p13 = scmp.ne.s32.totalorder %s4065_s6, %s4066_s5  ;;  %p4070_p1 = scmp.lt.s32.totalorder %s6212_s17, %s4066_s5 }
 0x27f   : > { %p4071_p2 = por %p4070_p1, %p4069_p0 }
 0x281   : > { %p4072_p3 = pnand %p4071_p2, %p4067_p13 }
 0x283   : > { %4075 = shalt.err (!%p4072_p3)  }
 0x284   : > { %955 = dma.hbm_to_vmem [thread:$0]  %s951_s0, 16, %s953_s16, [#allocation2] }
 0x285   : > { %s974_s11 = sld [smem:[#allocation4 + %s973_s8]]  ;;  %s976_s15 = scalar_lea.vmem %s6186_s9, 48 [#allocation5] }
 0x286   : > { %s958_s12 = scalar_lea.hbm %s7892_s3, %s957_s13  ;;  %s6777_s30 = sshll.u32 %s976_s15, 4  ;;  %s987_s30 = int_to_ptr.vmem [resolvable:$true] %s6777_s30 }
 0x287   : > { %s967_s27 = sshll.u32 %s958_s12, 4  ;;  %s990_s6 = sadd.s32 49, %s6183_s7  ;;  %s968_s27 = int_to_ptr.hbm [resolvable:$true] %s967_s27 }
 0x288   : > { %s4088_s5 = sshra.s32 %s968_s27, 4  ;;  %s4089_s5 = int_to_ptr.hbm [resolvable:$true] %s4088_s5 }
 0x289   : > { %s4090_s1 = scalar_lea.hbm %s4089_s5, 1  ;;  %p4093_p7 = scmp.lt.s32.totalorder %s4089_s5, %s7892_s3 }
 0x28a   : > { %p4091_p4 = scmp.ne.s32.totalorder %s4089_s5, %s4090_s1  ;;  %p4094_p8 = scmp.lt.s32.totalorder %s6212_s17, %s4090_s1 }
 0x28c   : > { %p4095_p9 = por %p4094_p8, %p4093_p7 }
 0x28e   : > { %p4096_p10 = pnand %p4095_p9, %p4091_p4 }
 0x290   : > { %4099 = shalt.err (!%p4096_p10)  }
 0x291   : > { %972 = dma.hbm_to_vmem [thread:$0]  %s968_s27, 16, %s970_s23, [#allocation2] }
 0x292   : > { %s991_s13 = sld [smem:[#allocation4 + %s990_s6]]  ;;  %s993_s8 = scalar_lea.vmem %s6186_s9, 49 [#allocation5] }
 0x293   : > { %s975_s18 = scalar_lea.hbm %s7892_s3, %s974_s11  ;;  %s6789_s12 = sshll.u32 %s993_s8, 4  ;;  %s1004_s12 = int_to_ptr.vmem [resolvable:$true] %s6789_s12 }
 0x294   : > { %s984_s26 = sshll.u32 %s975_s18, 4  ;;  %s1007_s5 = sadd.s32 50, %s6183_s7  ;;  %s985_s26 = int_to_ptr.hbm [resolvable:$true] %s984_s26 }
 0x295   : > { %s4112_s1 = sshra.s32 %s985_s26, 4  ;;  %s4113_s1 = int_to_ptr.hbm [resolvable:$true] %s4112_s1 }
 0x296   : > { %s4114_s16 = scalar_lea.hbm %s4113_s1, 1  ;;  %p4117_p12 = scmp.lt.s32.totalorder %s4113_s1, %s7892_s3 }
 0x297   : > { %p4115_p11 = scmp.ne.s32.totalorder %s4113_s1, %s4114_s16  ;;  %p4118_p13 = scmp.lt.s32.totalorder %s6212_s17, %s4114_s16 }
 0x299   : > { %p4119_p0 = por %p4118_p13, %p4117_p12 }
 0x29b   : > { %p4120_p1 = pnand %p4119_p0, %p4115_p11 }
 0x29d   : > { %4123 = shalt.err (!%p4120_p1)  }
 0x29e   : > { %989 = dma.hbm_to_vmem [thread:$0]  %s985_s26, 16, %s987_s30, [#allocation2] }
 0x29f   : > { %s1008_s11 = sld [smem:[#allocation4 + %s1007_s5]]  ;;  %s1010_s6 = scalar_lea.vmem %s6186_s9, 50 [#allocation5] }
 0x2a0   : > { %s992_s25 = scalar_lea.hbm %s7892_s3, %s991_s13  ;;  %s6801_s18 = sshll.u32 %s1010_s6, 4  ;;  %s1021_s18 = int_to_ptr.vmem [resolvable:$true] %s6801_s18 }
 0x2a1   : > { %s1001_s15 = sshll.u32 %s992_s25, 4  ;;  %s1024_s1 = sadd.s32 51, %s6183_s7  ;;  %s1002_s15 = int_to_ptr.hbm [resolvable:$true] %s1001_s15 }
 0x2a2   : > { %s4136_s16 = sshra.s32 %s1002_s15, 4  ;;  %s4137_s16 = int_to_ptr.hbm [resolvable:$true] %s4136_s16 }
 0x2a3   : > { %s4138_s23 = scalar_lea.hbm %s4137_s16, 1  ;;  %p4141_p3 = scmp.lt.s32.totalorder %s4137_s16, %s7892_s3 }
 0x2a4   : > { %p4139_p2 = scmp.ne.s32.totalorder %s4137_s16, %s4138_s23  ;;  %p4142_p4 = scmp.lt.s32.totalorder %s6212_s17, %s4138_s23 }
 0x2a6   : > { %p4143_p7 = por %p4142_p4, %p4141_p3 }
 0x2a8   : > { %p4144_p8 = pnand %p4143_p7, %p4139_p2 }
 0x2aa   : > { %4147 = shalt.err (!%p4144_p8)  }
 0x2ab   : > { %1006 = dma.hbm_to_vmem [thread:$0]  %s1002_s15, 16, %s1004_s12, [#allocation2] }
 0x2ac   : > { %s1025_s13 = sld [smem:[#allocation4 + %s1024_s1]]  ;;  %s1027_s5 = scalar_lea.vmem %s6186_s9, 51 [#allocation5] }
 0x2ad   : > { %s1009_s0 = scalar_lea.hbm %s7892_s3, %s1008_s11  ;;  %s6813_s25 = sshll.u32 %s1027_s5, 4  ;;  %s1038_s25 = int_to_ptr.vmem [resolvable:$true] %s6813_s25 }
 0x2ae   : > { %s1018_s8 = sshll.u32 %s1009_s0, 4  ;;  %s1041_s16 = sadd.s32 52, %s6183_s7  ;;  %s1019_s8 = int_to_ptr.hbm [resolvable:$true] %s1018_s8 }
 0x2af   : > { %s4160_s23 = sshra.s32 %s1019_s8, 4  ;;  %s4161_s23 = int_to_ptr.hbm [resolvable:$true] %s4160_s23 }
 0x2b0   : > { %s4162_s30 = scalar_lea.hbm %s4161_s23, 1  ;;  %p4165_p10 = scmp.lt.s32.totalorder %s4161_s23, %s7892_s3 }
 0x2b1   : > { %p4163_p9 = scmp.ne.s32.totalorder %s4161_s23, %s4162_s30  ;;  %p4166_p11 = scmp.lt.s32.totalorder %s6212_s17, %s4162_s30 }
 0x2b3   : > { %p4167_p12 = por %p4166_p11, %p4165_p10 }
 0x2b5   : > { %p4168_p13 = pnand %p4167_p12, %p4163_p9 }
 0x2b7   : > { %4171 = shalt.err (!%p4168_p13)  }
 0x2b8   : > { %1023 = dma.hbm_to_vmem [thread:$0]  %s1019_s8, 16, %s1021_s18, [#allocation2] }
 0x2b9   : > { %s1042_s11 = sld [smem:[#allocation4 + %s1041_s16]]  ;;  %s1044_s1 = scalar_lea.vmem %s6186_s9, 52 [#allocation5] }
 0x2ba   : > { %s1026_s27 = scalar_lea.hbm %s7892_s3, %s1025_s13  ;;  %s6825_s0 = sshll.u32 %s1044_s1, 4  ;;  %s1055_s0 = int_to_ptr.vmem [resolvable:$true] %s6825_s0 }
 0x2bb   : > { %s1035_s6 = sshll.u32 %s1026_s27, 4  ;;  %s1058_s23 = sadd.s32 53, %s6183_s7  ;;  %s1036_s6 = int_to_ptr.hbm [resolvable:$true] %s1035_s6 }
 0x2bc   : > { %s4184_s30 = sshra.s32 %s1036_s6, 4  ;;  %s4185_s30 = int_to_ptr.hbm [resolvable:$true] %s4184_s30 }
 0x2bd   : > { %s4186_s12 = scalar_lea.hbm %s4185_s30, 1  ;;  %p4189_p1 = scmp.lt.s32.totalorder %s4185_s30, %s7892_s3 }
 0x2be   : > { %p4187_p0 = scmp.ne.s32.totalorder %s4185_s30, %s4186_s12  ;;  %p4190_p2 = scmp.lt.s32.totalorder %s6212_s17, %s4186_s12 }
 0x2c0   : > { %p4191_p3 = por %p4190_p2, %p4189_p1 }
 0x2c2   : > { %p4192_p4 = pnand %p4191_p3, %p4187_p0 }
 0x2c4   : > { %4195 = shalt.err (!%p4192_p4)  }
 0x2c5   : > { %1040 = dma.hbm_to_vmem [thread:$0]  %s1036_s6, 16, %s1038_s25, [#allocation2] }
 0x2c6   : > { %s1059_s13 = sld [smem:[#allocation4 + %s1058_s23]]  ;;  %s1061_s16 = scalar_lea.vmem %s6186_s9, 53 [#allocation5] }
 0x2c7   : > { %s1043_s26 = scalar_lea.hbm %s7892_s3, %s1042_s11  ;;  %s6837_s27 = sshll.u32 %s1061_s16, 4  ;;  %s1072_s27 = int_to_ptr.vmem [resolvable:$true] %s6837_s27 }
 0x2c8   : > { %s1052_s5 = sshll.u32 %s1043_s26, 4  ;;  %s1075_s30 = sadd.s32 54, %s6183_s7  ;;  %s1053_s5 = int_to_ptr.hbm [resolvable:$true] %s1052_s5 }
 0x2c9   : > { %s4208_s12 = sshra.s32 %s1053_s5, 4  ;;  %s4209_s12 = int_to_ptr.hbm [resolvable:$true] %s4208_s12 }
 0x2ca   : > { %s4210_s18 = scalar_lea.hbm %s4209_s12, 1  ;;  %p4213_p8 = scmp.lt.s32.totalorder %s4209_s12, %s7892_s3 }
 0x2cb   : > { %p4211_p7 = scmp.ne.s32.totalorder %s4209_s12, %s4210_s18  ;;  %p4214_p9 = scmp.lt.s32.totalorder %s6212_s17, %s4210_s18 }
 0x2cd   : > { %p4215_p10 = por %p4214_p9, %p4213_p8 }
 0x2cf   : > { %p4216_p11 = pnand %p4215_p10, %p4211_p7 }
 0x2d1   : > { %4219 = shalt.err (!%p4216_p11)  }
 0x2d2   : > { %1057 = dma.hbm_to_vmem [thread:$0]  %s1053_s5, 16, %s1055_s0, [#allocation2] }
 0x2d3   : > { %s1076_s11 = sld [smem:[#allocation4 + %s1075_s30]]  ;;  %s1078_s23 = scalar_lea.vmem %s6186_s9, 54 [#allocation5] }
 0x2d4   : > { %s1060_s15 = scalar_lea.hbm %s7892_s3, %s1059_s13  ;;  %s6849_s26 = sshll.u32 %s1078_s23, 4  ;;  %s1089_s26 = int_to_ptr.vmem [resolvable:$true] %s6849_s26 }
 0x2d5   : > { %s1069_s1 = sshll.u32 %s1060_s15, 4  ;;  %s1092_s12 = sadd.s32 55, %s6183_s7  ;;  %s1070_s1 = int_to_ptr.hbm [resolvable:$true] %s1069_s1 }
 0x2d6   : > { %s4232_s18 = sshra.s32 %s1070_s1, 4  ;;  %s4233_s18 = int_to_ptr.hbm [resolvable:$true] %s4232_s18 }
 0x2d7   : > { %s4234_s25 = scalar_lea.hbm %s4233_s18, 1  ;;  %p4237_p13 = scmp.lt.s32.totalorder %s4233_s18, %s7892_s3 }
 0x2d8   : > { %p4235_p12 = scmp.ne.s32.totalorder %s4233_s18, %s4234_s25  ;;  %p4238_p0 = scmp.lt.s32.totalorder %s6212_s17, %s4234_s25 }
 0x2da   : > { %p4239_p1 = por %p4238_p0, %p4237_p13 }
 0x2dc   : > { %p4240_p2 = pnand %p4239_p1, %p4235_p12 }
 0x2de   : > { %4243 = shalt.err (!%p4240_p2)  }
 0x2df   : > { %1074 = dma.hbm_to_vmem [thread:$0]  %s1070_s1, 16, %s1072_s27, [#allocation2] }
 0x2e0   : > { %s1093_s13 = sld [smem:[#allocation4 + %s1092_s12]]  ;;  %s1095_s30 = scalar_lea.vmem %s6186_s9, 55 [#allocation5] }
 0x2e1   : > { %s1077_s8 = scalar_lea.hbm %s7892_s3, %s1076_s11  ;;  %s6861_s15 = sshll.u32 %s1095_s30, 4  ;;  %s1106_s15 = int_to_ptr.vmem [resolvable:$true] %s6861_s15 }
 0x2e2   : > { %s1086_s16 = sshll.u32 %s1077_s8, 4  ;;  %s1109_s18 = sadd.s32 56, %s6183_s7  ;;  %s1087_s16 = int_to_ptr.hbm [resolvable:$true] %s1086_s16 }
 0x2e3   : > { %s4256_s25 = sshra.s32 %s1087_s16, 4  ;;  %s4257_s25 = int_to_ptr.hbm [resolvable:$true] %s4256_s25 }
 0x2e4   : > { %s4258_s0 = scalar_lea.hbm %s4257_s25, 1  ;;  %p4261_p4 = scmp.lt.s32.totalorder %s4257_s25, %s7892_s3 }
 0x2e5   : > { %p4259_p3 = scmp.ne.s32.totalorder %s4257_s25, %s4258_s0  ;;  %p4262_p7 = scmp.lt.s32.totalorder %s6212_s17, %s4258_s0 }
 0x2e7   : > { %p4263_p8 = por %p4262_p7, %p4261_p4 }
 0x2e9   : > { %p4264_p9 = pnand %p4263_p8, %p4259_p3 }
 0x2eb   : > { %4267 = shalt.err (!%p4264_p9)  }
 0x2ec   : > { %1091 = dma.hbm_to_vmem [thread:$0]  %s1087_s16, 16, %s1089_s26, [#allocation2] }
 0x2ed   : > { %s1110_s11 = sld [smem:[#allocation4 + %s1109_s18]]  ;;  %s1112_s12 = scalar_lea.vmem %s6186_s9, 56 [#allocation5] }
 0x2ee   : > { %s1094_s6 = scalar_lea.hbm %s7892_s3, %s1093_s13  ;;  %s6873_s8 = sshll.u32 %s1112_s12, 4  ;;  %s1123_s8 = int_to_ptr.vmem [resolvable:$true] %s6873_s8 }
 0x2ef   : > { %s1103_s23 = sshll.u32 %s1094_s6, 4  ;;  %s1126_s25 = sadd.s32 57, %s6183_s7  ;;  %s1104_s23 = int_to_ptr.hbm [resolvable:$true] %s1103_s23 }
 0x2f0   : > { %s4280_s0 = sshra.s32 %s1104_s23, 4  ;;  %s4281_s0 = int_to_ptr.hbm [resolvable:$true] %s4280_s0 }
 0x2f1   : > { %s4282_s27 = scalar_lea.hbm %s4281_s0, 1  ;;  %p4285_p11 = scmp.lt.s32.totalorder %s4281_s0, %s7892_s3 }
 0x2f2   : > { %p4283_p10 = scmp.ne.s32.totalorder %s4281_s0, %s4282_s27  ;;  %p4286_p12 = scmp.lt.s32.totalorder %s6212_s17, %s4282_s27 }
 0x2f4   : > { %p4287_p13 = por %p4286_p12, %p4285_p11 }
 0x2f6   : > { %p4288_p0 = pnand %p4287_p13, %p4283_p10 }
 0x2f8   : > { %4291 = shalt.err (!%p4288_p0)  }
 0x2f9   : > { %1108 = dma.hbm_to_vmem [thread:$0]  %s1104_s23, 16, %s1106_s15, [#allocation2] }
 0x2fa   : > { %s1127_s13 = sld [smem:[#allocation4 + %s1126_s25]]  ;;  %s1129_s18 = scalar_lea.vmem %s6186_s9, 57 [#allocation5] }
 0x2fb   : > { %s1111_s5 = scalar_lea.hbm %s7892_s3, %s1110_s11  ;;  %s6885_s6 = sshll.u32 %s1129_s18, 4  ;;  %s1140_s6 = int_to_ptr.vmem [resolvable:$true] %s6885_s6 }
 0x2fc   : > { %s1120_s30 = sshll.u32 %s1111_s5, 4  ;;  %s1143_s0 = sadd.s32 58, %s6183_s7  ;;  %s1121_s30 = int_to_ptr.hbm [resolvable:$true] %s1120_s30 }
 0x2fd   : > { %s4304_s27 = sshra.s32 %s1121_s30, 4  ;;  %s4305_s27 = int_to_ptr.hbm [resolvable:$true] %s4304_s27 }
 0x2fe   : > { %s4306_s26 = scalar_lea.hbm %s4305_s27, 1  ;;  %p4309_p2 = scmp.lt.s32.totalorder %s4305_s27, %s7892_s3 }
 0x2ff   : > { %p4307_p1 = scmp.ne.s32.totalorder %s4305_s27, %s4306_s26  ;;  %p4310_p3 = scmp.lt.s32.totalorder %s6212_s17, %s4306_s26 }
 0x301   : > { %p4311_p4 = por %p4310_p3, %p4309_p2 }
 0x303   : > { %p4312_p7 = pnand %p4311_p4, %p4307_p1 }
 0x305   : > { %4315 = shalt.err (!%p4312_p7)  }
 0x306   : > { %1125 = dma.hbm_to_vmem [thread:$0]  %s1121_s30, 16, %s1123_s8, [#allocation2] }
 0x307   : > { %s1144_s11 = sld [smem:[#allocation4 + %s1143_s0]]  ;;  %s1146_s25 = scalar_lea.vmem %s6186_s9, 58 [#allocation5] }
 0x308   : > { %s1128_s1 = scalar_lea.hbm %s7892_s3, %s1127_s13  ;;  %s6897_s5 = sshll.u32 %s1146_s25, 4  ;;  %s1157_s5 = int_to_ptr.vmem [resolvable:$true] %s6897_s5 }
 0x309   : > { %s1137_s12 = sshll.u32 %s1128_s1, 4  ;;  %s1160_s27 = sadd.s32 59, %s6183_s7  ;;  %s1138_s12 = int_to_ptr.hbm [resolvable:$true] %s1137_s12 }
 0x30a   : > { %s4328_s26 = sshra.s32 %s1138_s12, 4  ;;  %s4329_s26 = int_to_ptr.hbm [resolvable:$true] %s4328_s26 }
 0x30b   : > { %s4330_s15 = scalar_lea.hbm %s4329_s26, 1  ;;  %p4333_p9 = scmp.lt.s32.totalorder %s4329_s26, %s7892_s3 }
 0x30c   : > { %p4331_p8 = scmp.ne.s32.totalorder %s4329_s26, %s4330_s15  ;;  %p4334_p10 = scmp.lt.s32.totalorder %s6212_s17, %s4330_s15 }
 0x30e   : > { %p4335_p11 = por %p4334_p10, %p4333_p9 }
 0x310   : > { %p4336_p12 = pnand %p4335_p11, %p4331_p8 }
 0x312   : > { %4339 = shalt.err (!%p4336_p12)  }
 0x313   : > { %1142 = dma.hbm_to_vmem [thread:$0]  %s1138_s12, 16, %s1140_s6, [#allocation2] }
 0x314   : > { %s1161_s13 = sld [smem:[#allocation4 + %s1160_s27]]  ;;  %s1163_s0 = scalar_lea.vmem %s6186_s9, 59 [#allocation5] }
 0x315   : > { %s1145_s16 = scalar_lea.hbm %s7892_s3, %s1144_s11  ;;  %s6909_s1 = sshll.u32 %s1163_s0, 4  ;;  %s1174_s1 = int_to_ptr.vmem [resolvable:$true] %s6909_s1 }
 0x316   : > { %s1154_s18 = sshll.u32 %s1145_s16, 4  ;;  %s1177_s26 = sadd.s32 60, %s6183_s7  ;;  %s1155_s18 = int_to_ptr.hbm [resolvable:$true] %s1154_s18 }
 0x317   : > { %s4352_s15 = sshra.s32 %s1155_s18, 4  ;;  %s4353_s15 = int_to_ptr.hbm [resolvable:$true] %s4352_s15 }
 0x318   : > { %s4354_s8 = scalar_lea.hbm %s4353_s15, 1  ;;  %p4357_p0 = scmp.lt.s32.totalorder %s4353_s15, %s7892_s3 }
 0x319   : > { %p4355_p13 = scmp.ne.s32.totalorder %s4353_s15, %s4354_s8  ;;  %p4358_p1 = scmp.lt.s32.totalorder %s6212_s17, %s4354_s8 }
 0x31b   : > { %p4359_p2 = por %p4358_p1, %p4357_p0 }
 0x31d   : > { %p4360_p3 = pnand %p4359_p2, %p4355_p13 }
 0x31f   : > { %4363 = shalt.err (!%p4360_p3)  }
 0x320   : > { %1159 = dma.hbm_to_vmem [thread:$0]  %s1155_s18, 16, %s1157_s5, [#allocation2] }
 0x321   : > { %s1178_s11 = sld [smem:[#allocation4 + %s1177_s26]]  ;;  %s1180_s27 = scalar_lea.vmem %s6186_s9, 60 [#allocation5] }
 0x322   : > { %s1162_s23 = scalar_lea.hbm %s7892_s3, %s1161_s13  ;;  %s6921_s16 = sshll.u32 %s1180_s27, 4  ;;  %s1191_s16 = int_to_ptr.vmem [resolvable:$true] %s6921_s16 }
 0x323   : > { %s1171_s25 = sshll.u32 %s1162_s23, 4  ;;  %s1194_s15 = sadd.s32 61, %s6183_s7  ;;  %s1172_s25 = int_to_ptr.hbm [resolvable:$true] %s1171_s25 }
 0x324   : > { %s4376_s8 = sshra.s32 %s1172_s25, 4  ;;  %s4377_s8 = int_to_ptr.hbm [resolvable:$true] %s4376_s8 }
 0x325   : > { %s4378_s6 = scalar_lea.hbm %s4377_s8, 1  ;;  %p4381_p7 = scmp.lt.s32.totalorder %s4377_s8, %s7892_s3 }
 0x326   : > { %p4379_p4 = scmp.ne.s32.totalorder %s4377_s8, %s4378_s6  ;;  %p4382_p8 = scmp.lt.s32.totalorder %s6212_s17, %s4378_s6 }
 0x328   : > { %p4383_p9 = por %p4382_p8, %p4381_p7 }
 0x32a   : > { %p4384_p10 = pnand %p4383_p9, %p4379_p4 }
 0x32c   : > { %4387 = shalt.err (!%p4384_p10)  }
 0x32d   : > { %1176 = dma.hbm_to_vmem [thread:$0]  %s1172_s25, 16, %s1174_s1, [#allocation2] }
 0x32e   : > { %s1195_s13 = sld [smem:[#allocation4 + %s1194_s15]]  ;;  %s1197_s26 = scalar_lea.vmem %s6186_s9, 61 [#allocation5] }
 0x32f   : > { %s1179_s30 = scalar_lea.hbm %s7892_s3, %s1178_s11  ;;  %s6933_s23 = sshll.u32 %s1197_s26, 4  ;;  %s1208_s23 = int_to_ptr.vmem [resolvable:$true] %s6933_s23 }
 0x330   : > { %s1188_s0 = sshll.u32 %s1179_s30, 4  ;;  %s1211_s8 = sadd.s32 62, %s6183_s7  ;;  %s1189_s0 = int_to_ptr.hbm [resolvable:$true] %s1188_s0 }
 0x331   : > { %s4400_s6 = sshra.s32 %s1189_s0, 4  ;;  %s4401_s6 = int_to_ptr.hbm [resolvable:$true] %s4400_s6 }
 0x332   : > { %s4402_s5 = scalar_lea.hbm %s4401_s6, 1  ;;  %p4405_p12 = scmp.lt.s32.totalorder %s4401_s6, %s7892_s3 }
 0x333   : > { %p4403_p11 = scmp.ne.s32.totalorder %s4401_s6, %s4402_s5  ;;  %p4406_p13 = scmp.lt.s32.totalorder %s6212_s17, %s4402_s5 }
 0x335   : > { %p4407_p0 = por %p4406_p13, %p4405_p12 }
 0x337   : > { %p4408_p1 = pnand %p4407_p0, %p4403_p11 }
 0x339   : > { %4411 = shalt.err (!%p4408_p1)  }
 0x33a   : > { %1193 = dma.hbm_to_vmem [thread:$0]  %s1189_s0, 16, %s1191_s16, [#allocation2] }
 0x33b   : > { %s1212_s11 = sld [smem:[#allocation4 + %s1211_s8]]  ;;  %s1214_s15 = scalar_lea.vmem %s6186_s9, 62 [#allocation5] }
 0x33c   : > { %s1196_s12 = scalar_lea.hbm %s7892_s3, %s1195_s13  ;;  %s6945_s30 = sshll.u32 %s1214_s15, 4  ;;  %s1225_s30 = int_to_ptr.vmem [resolvable:$true] %s6945_s30 }
 0x33d   : > { %s1205_s27 = sshll.u32 %s1196_s12, 4  ;;  %s1228_s6 = sadd.s32 63, %s6183_s7  ;;  %s1206_s27 = int_to_ptr.hbm [resolvable:$true] %s1205_s27 }
 0x33e   : > { %s4424_s5 = sshra.s32 %s1206_s27, 4  ;;  %s4425_s5 = int_to_ptr.hbm [resolvable:$true] %s4424_s5 }
 0x33f   : > { %s4426_s1 = scalar_lea.hbm %s4425_s5, 1  ;;  %p4429_p3 = scmp.lt.s32.totalorder %s4425_s5, %s7892_s3 }
 0x340   : > { %p4427_p2 = scmp.ne.s32.totalorder %s4425_s5, %s4426_s1  ;;  %p4430_p4 = scmp.lt.s32.totalorder %s6212_s17, %s4426_s1 }
 0x342   : > { %p4431_p7 = por %p4430_p4, %p4429_p3 }
 0x344   : > { %p4432_p8 = pnand %p4431_p7, %p4427_p2 }
 0x346   : > { %4435 = shalt.err (!%p4432_p8)  }
 0x347   : > { %1210 = dma.hbm_to_vmem [thread:$0]  %s1206_s27, 16, %s1208_s23, [#allocation2] }
 0x348   : > { %s1229_s13 = sld [smem:[#allocation4 + %s1228_s6]]  ;;  %s1231_s8 = scalar_lea.vmem %s6186_s9, 63 [#allocation5] }
 0x349   : > { %s1213_s18 = scalar_lea.hbm %s7892_s3, %s1212_s11  ;;  %s6957_s12 = sshll.u32 %s1231_s8, 4  ;;  %s1242_s12 = int_to_ptr.vmem [resolvable:$true] %s6957_s12 }
 0x34a   : > { %s1222_s26 = sshll.u32 %s1213_s18, 4  ;;  %s1245_s5 = sadd.s32 64, %s6183_s7  ;;  %s1223_s26 = int_to_ptr.hbm [resolvable:$true] %s1222_s26 }
 0x34b   : > { %s4448_s1 = sshra.s32 %s1223_s26, 4  ;;  %s4449_s1 = int_to_ptr.hbm [resolvable:$true] %s4448_s1 }
 0x34c   : > { %s4450_s16 = scalar_lea.hbm %s4449_s1, 1  ;;  %p4453_p10 = scmp.lt.s32.totalorder %s4449_s1, %s7892_s3 }
 0x34d   : > { %p4451_p9 = scmp.ne.s32.totalorder %s4449_s1, %s4450_s16  ;;  %p4454_p11 = scmp.lt.s32.totalorder %s6212_s17, %s4450_s16 }
 0x34f   : > { %p4455_p12 = por %p4454_p11, %p4453_p10 }
 0x351   : > { %p4456_p13 = pnand %p4455_p12, %p4451_p9 }
 0x353   : > { %4459 = shalt.err (!%p4456_p13)  }
 0x354   : > { %1227 = dma.hbm_to_vmem [thread:$0]  %s1223_s26, 16, %s1225_s30, [#allocation2] }
 0x355   : > { %s1246_s11 = sld [smem:[#allocation4 + %s1245_s5]]  ;;  %s1248_s6 = scalar_lea.vmem %s6186_s9, 64 [#allocation5] }
 0x356   : > { %s1230_s25 = scalar_lea.hbm %s7892_s3, %s1229_s13  ;;  %s6969_s18 = sshll.u32 %s1248_s6, 4  ;;  %s1260_s18 = int_to_ptr.vmem [resolvable:$true] %s6969_s18 }
 0x357   : > { %s1239_s15 = sshll.u32 %s1230_s25, 4  ;;  %s1263_s1 = sadd.s32 65, %s6183_s7  ;;  %s1240_s15 = int_to_ptr.hbm [resolvable:$true] %s1239_s15 }
 0x358   : > { %s4472_s16 = sshra.s32 %s1240_s15, 4  ;;  %s4473_s16 = int_to_ptr.hbm [resolvable:$true] %s4472_s16 }
 0x359   : > { %s4474_s23 = scalar_lea.hbm %s4473_s16, 1  ;;  %p4477_p1 = scmp.lt.s32.totalorder %s4473_s16, %s7892_s3 }
 0x35a   : > { %p4475_p0 = scmp.ne.s32.totalorder %s4473_s16, %s4474_s23  ;;  %p4478_p2 = scmp.lt.s32.totalorder %s6212_s17, %s4474_s23 }
 0x35c   : > { %p4479_p3 = por %p4478_p2, %p4477_p1 }
 0x35e   : > { %p4480_p4 = pnand %p4479_p3, %p4475_p0 }
 0x360   : > { %4483 = shalt.err (!%p4480_p4)  }
 0x361   : > { %1244 = dma.hbm_to_vmem [thread:$0]  %s1240_s15, 16, %s1242_s12, [#allocation2] }
 0x362   : > { %s1264_s13 = sld [smem:[#allocation4 + %s1263_s1]]  ;;  %s1266_s5 = scalar_lea.vmem %s6186_s9, 65 [#allocation5] }
 0x363   : > { %s1247_s0 = scalar_lea.hbm %s7892_s3, %s1246_s11  ;;  %s6981_s25 = sshll.u32 %s1266_s5, 4  ;;  %s1277_s25 = int_to_ptr.vmem [resolvable:$true] %s6981_s25 }
 0x364   : > { %s1257_s8 = sshll.u32 %s1247_s0, 4  ;;  %s1280_s16 = sadd.s32 66, %s6183_s7  ;;  %s1258_s8 = int_to_ptr.hbm [resolvable:$true] %s1257_s8 }
 0x365   : > { %s4496_s23 = sshra.s32 %s1258_s8, 4  ;;  %s4497_s23 = int_to_ptr.hbm [resolvable:$true] %s4496_s23 }
 0x366   : > { %s4498_s30 = scalar_lea.hbm %s4497_s23, 1  ;;  %p4501_p8 = scmp.lt.s32.totalorder %s4497_s23, %s7892_s3 }
 0x367   : > { %p4499_p7 = scmp.ne.s32.totalorder %s4497_s23, %s4498_s30  ;;  %p4502_p9 = scmp.lt.s32.totalorder %s6212_s17, %s4498_s30 }
 0x369   : > { %p4503_p10 = por %p4502_p9, %p4501_p8 }
 0x36b   : > { %p4504_p11 = pnand %p4503_p10, %p4499_p7 }
 0x36d   : > { %4507 = shalt.err (!%p4504_p11)  }
 0x36e   : > { %1262 = dma.hbm_to_vmem [thread:$0]  %s1258_s8, 16, %s1260_s18, [#allocation2 + $0x1] }
 0x36f   : > { %s1281_s11 = sld [smem:[#allocation4 + %s1280_s16]]  ;;  %s1283_s1 = scalar_lea.vmem %s6186_s9, 66 [#allocation5] }
 0x370   : > { %s1265_s27 = scalar_lea.hbm %s7892_s3, %s1264_s13  ;;  %s6993_s0 = sshll.u32 %s1283_s1, 4  ;;  %s1294_s0 = int_to_ptr.vmem [resolvable:$true] %s6993_s0 }
 0x371   : > { %s1274_s6 = sshll.u32 %s1265_s27, 4  ;;  %s1297_s23 = sadd.s32 67, %s6183_s7  ;;  %s1275_s6 = int_to_ptr.hbm [resolvable:$true] %s1274_s6 }
 0x372   : > { %s4520_s30 = sshra.s32 %s1275_s6, 4  ;;  %s4521_s30 = int_to_ptr.hbm [resolvable:$true] %s4520_s30 }
 0x373   : > { %s4522_s12 = scalar_lea.hbm %s4521_s30, 1  ;;  %p4525_p13 = scmp.lt.s32.totalorder %s4521_s30, %s7892_s3 }
 0x374   : > { %p4523_p12 = scmp.ne.s32.totalorder %s4521_s30, %s4522_s12  ;;  %p4526_p0 = scmp.lt.s32.totalorder %s6212_s17, %s4522_s12 }
 0x376   : > { %p4527_p1 = por %p4526_p0, %p4525_p13 }
 0x378   : > { %p4528_p2 = pnand %p4527_p1, %p4523_p12 }
 0x37a   : > { %4531 = shalt.err (!%p4528_p2)  }
 0x37b   : > { %1279 = dma.hbm_to_vmem [thread:$0]  %s1275_s6, 16, %s1277_s25, [#allocation2 + $0x1] }
 0x37c   : > { %s1298_s13 = sld [smem:[#allocation4 + %s1297_s23]]  ;;  %s1300_s16 = scalar_lea.vmem %s6186_s9, 67 [#allocation5] }
 0x37d   : > { %s1282_s26 = scalar_lea.hbm %s7892_s3, %s1281_s11  ;;  %s7005_s27 = sshll.u32 %s1300_s16, 4  ;;  %s1311_s27 = int_to_ptr.vmem [resolvable:$true] %s7005_s27 }
 0x37e   : > { %s1291_s5 = sshll.u32 %s1282_s26, 4  ;;  %s1314_s30 = sadd.s32 68, %s6183_s7  ;;  %s1292_s5 = int_to_ptr.hbm [resolvable:$true] %s1291_s5 }
 0x37f   : > { %s4544_s12 = sshra.s32 %s1292_s5, 4  ;;  %s4545_s12 = int_to_ptr.hbm [resolvable:$true] %s4544_s12 }
 0x380   : > { %s4546_s18 = scalar_lea.hbm %s4545_s12, 1  ;;  %p4549_p4 = scmp.lt.s32.totalorder %s4545_s12, %s7892_s3 }
 0x381   : > { %p4547_p3 = scmp.ne.s32.totalorder %s4545_s12, %s4546_s18  ;;  %p4550_p7 = scmp.lt.s32.totalorder %s6212_s17, %s4546_s18 }
 0x383   : > { %p4551_p8 = por %p4550_p7, %p4549_p4 }
 0x385   : > { %p4552_p9 = pnand %p4551_p8, %p4547_p3 }
 0x387   : > { %4555 = shalt.err (!%p4552_p9)  }
 0x388   : > { %1296 = dma.hbm_to_vmem [thread:$0]  %s1292_s5, 16, %s1294_s0, [#allocation2 + $0x1] }
 0x389   : > { %s1315_s11 = sld [smem:[#allocation4 + %s1314_s30]]  ;;  %s1317_s23 = scalar_lea.vmem %s6186_s9, 68 [#allocation5] }
 0x38a   : > { %s1299_s15 = scalar_lea.hbm %s7892_s3, %s1298_s13  ;;  %s7017_s26 = sshll.u32 %s1317_s23, 4  ;;  %s1328_s26 = int_to_ptr.vmem [resolvable:$true] %s7017_s26 }
 0x38b   : > { %s1308_s1 = sshll.u32 %s1299_s15, 4  ;;  %s1331_s12 = sadd.s32 69, %s6183_s7  ;;  %s1309_s1 = int_to_ptr.hbm [resolvable:$true] %s1308_s1 }
 0x38c   : > { %s4568_s18 = sshra.s32 %s1309_s1, 4  ;;  %s4569_s18 = int_to_ptr.hbm [resolvable:$true] %s4568_s18 }
 0x38d   : > { %s4570_s25 = scalar_lea.hbm %s4569_s18, 1  ;;  %p4573_p11 = scmp.lt.s32.totalorder %s4569_s18, %s7892_s3 }
 0x38e   : > { %p4571_p10 = scmp.ne.s32.totalorder %s4569_s18, %s4570_s25  ;;  %p4574_p12 = scmp.lt.s32.totalorder %s6212_s17, %s4570_s25 }
 0x390   : > { %p4575_p13 = por %p4574_p12, %p4573_p11 }
 0x392   : > { %p4576_p0 = pnand %p4575_p13, %p4571_p10 }
 0x394   : > { %4579 = shalt.err (!%p4576_p0)  }
 0x395   : > { %1313 = dma.hbm_to_vmem [thread:$0]  %s1309_s1, 16, %s1311_s27, [#allocation2 + $0x1] }
 0x396   : > { %s1332_s13 = sld [smem:[#allocation4 + %s1331_s12]]  ;;  %s1334_s30 = scalar_lea.vmem %s6186_s9, 69 [#allocation5] }
 0x397   : > { %s1316_s8 = scalar_lea.hbm %s7892_s3, %s1315_s11  ;;  %s7029_s15 = sshll.u32 %s1334_s30, 4  ;;  %s1345_s15 = int_to_ptr.vmem [resolvable:$true] %s7029_s15 }
 0x398   : > { %s1325_s16 = sshll.u32 %s1316_s8, 4  ;;  %s1348_s18 = sadd.s32 70, %s6183_s7  ;;  %s1326_s16 = int_to_ptr.hbm [resolvable:$true] %s1325_s16 }
 0x399   : > { %s4592_s25 = sshra.s32 %s1326_s16, 4  ;;  %s4593_s25 = int_to_ptr.hbm [resolvable:$true] %s4592_s25 }
 0x39a   : > { %s4594_s0 = scalar_lea.hbm %s4593_s25, 1  ;;  %p4597_p2 = scmp.lt.s32.totalorder %s4593_s25, %s7892_s3 }
 0x39b   : > { %p4595_p1 = scmp.ne.s32.totalorder %s4593_s25, %s4594_s0  ;;  %p4598_p3 = scmp.lt.s32.totalorder %s6212_s17, %s4594_s0 }
 0x39d   : > { %p4599_p4 = por %p4598_p3, %p4597_p2 }
 0x39f   : > { %p4600_p7 = pnand %p4599_p4, %p4595_p1 }
 0x3a1   : > { %4603 = shalt.err (!%p4600_p7)  }
 0x3a2   : > { %1330 = dma.hbm_to_vmem [thread:$0]  %s1326_s16, 16, %s1328_s26, [#allocation2 + $0x1] }
 0x3a3   : > { %s1349_s11 = sld [smem:[#allocation4 + %s1348_s18]]  ;;  %s1351_s12 = scalar_lea.vmem %s6186_s9, 70 [#allocation5] }
 0x3a4   : > { %s1333_s6 = scalar_lea.hbm %s7892_s3, %s1332_s13  ;;  %s7041_s8 = sshll.u32 %s1351_s12, 4  ;;  %s1362_s8 = int_to_ptr.vmem [resolvable:$true] %s7041_s8 }
 0x3a5   : > { %s1342_s23 = sshll.u32 %s1333_s6, 4  ;;  %s1365_s25 = sadd.s32 71, %s6183_s7  ;;  %s1343_s23 = int_to_ptr.hbm [resolvable:$true] %s1342_s23 }
 0x3a6   : > { %s4616_s0 = sshra.s32 %s1343_s23, 4  ;;  %s4617_s0 = int_to_ptr.hbm [resolvable:$true] %s4616_s0 }
 0x3a7   : > { %s4618_s27 = scalar_lea.hbm %s4617_s0, 1  ;;  %p4621_p9 = scmp.lt.s32.totalorder %s4617_s0, %s7892_s3 }
 0x3a8   : > { %p4619_p8 = scmp.ne.s32.totalorder %s4617_s0, %s4618_s27  ;;  %p4622_p10 = scmp.lt.s32.totalorder %s6212_s17, %s4618_s27 }
 0x3aa   : > { %p4623_p11 = por %p4622_p10, %p4621_p9 }
 0x3ac   : > { %p4624_p12 = pnand %p4623_p11, %p4619_p8 }
 0x3ae   : > { %4627 = shalt.err (!%p4624_p12)  }
 0x3af   : > { %1347 = dma.hbm_to_vmem [thread:$0]  %s1343_s23, 16, %s1345_s15, [#allocation2 + $0x1] }
 0x3b0   : > { %s1366_s13 = sld [smem:[#allocation4 + %s1365_s25]]  ;;  %s1368_s18 = scalar_lea.vmem %s6186_s9, 71 [#allocation5] }
 0x3b1   : > { %s1350_s5 = scalar_lea.hbm %s7892_s3, %s1349_s11  ;;  %s7053_s6 = sshll.u32 %s1368_s18, 4  ;;  %s1379_s6 = int_to_ptr.vmem [resolvable:$true] %s7053_s6 }
 0x3b2   : > { %s1359_s30 = sshll.u32 %s1350_s5, 4  ;;  %s1382_s0 = sadd.s32 72, %s6183_s7  ;;  %s1360_s30 = int_to_ptr.hbm [resolvable:$true] %s1359_s30 }
 0x3b3   : > { %s4640_s27 = sshra.s32 %s1360_s30, 4  ;;  %s4641_s27 = int_to_ptr.hbm [resolvable:$true] %s4640_s27 }
 0x3b4   : > { %s4642_s26 = scalar_lea.hbm %s4641_s27, 1  ;;  %p4645_p0 = scmp.lt.s32.totalorder %s4641_s27, %s7892_s3 }
 0x3b5   : > { %p4643_p13 = scmp.ne.s32.totalorder %s4641_s27, %s4642_s26  ;;  %p4646_p1 = scmp.lt.s32.totalorder %s6212_s17, %s4642_s26 }
 0x3b7   : > { %p4647_p2 = por %p4646_p1, %p4645_p0 }
 0x3b9   : > { %p4648_p3 = pnand %p4647_p2, %p4643_p13 }
 0x3bb   : > { %4651 = shalt.err (!%p4648_p3)  }
 0x3bc   : > { %1364 = dma.hbm_to_vmem [thread:$0]  %s1360_s30, 16, %s1362_s8, [#allocation2 + $0x1] }
 0x3bd   : > { %s1383_s11 = sld [smem:[#allocation4 + %s1382_s0]]  ;;  %s1385_s25 = scalar_lea.vmem %s6186_s9, 72 [#allocation5] }
 0x3be   : > { %s1367_s1 = scalar_lea.hbm %s7892_s3, %s1366_s13  ;;  %s7065_s5 = sshll.u32 %s1385_s25, 4  ;;  %s1396_s5 = int_to_ptr.vmem [resolvable:$true] %s7065_s5 }
 0x3bf   : > { %s1376_s12 = sshll.u32 %s1367_s1, 4  ;;  %s1399_s27 = sadd.s32 73, %s6183_s7  ;;  %s1377_s12 = int_to_ptr.hbm [resolvable:$true] %s1376_s12 }
 0x3c0   : > { %s4664_s26 = sshra.s32 %s1377_s12, 4  ;;  %s4665_s26 = int_to_ptr.hbm [resolvable:$true] %s4664_s26 }
 0x3c1   : > { %s4666_s15 = scalar_lea.hbm %s4665_s26, 1  ;;  %p4669_p7 = scmp.lt.s32.totalorder %s4665_s26, %s7892_s3 }
 0x3c2   : > { %p4667_p4 = scmp.ne.s32.totalorder %s4665_s26, %s4666_s15  ;;  %p4670_p8 = scmp.lt.s32.totalorder %s6212_s17, %s4666_s15 }
 0x3c4   : > { %p4671_p9 = por %p4670_p8, %p4669_p7 }
 0x3c6   : > { %p4672_p10 = pnand %p4671_p9, %p4667_p4 }
 0x3c8   : > { %4675 = shalt.err (!%p4672_p10)  }
 0x3c9   : > { %1381 = dma.hbm_to_vmem [thread:$0]  %s1377_s12, 16, %s1379_s6, [#allocation2 + $0x1] }
 0x3ca   : > { %s1400_s13 = sld [smem:[#allocation4 + %s1399_s27]]  ;;  %s1402_s0 = scalar_lea.vmem %s6186_s9, 73 [#allocation5] }
 0x3cb   : > { %s1384_s16 = scalar_lea.hbm %s7892_s3, %s1383_s11  ;;  %s7077_s1 = sshll.u32 %s1402_s0, 4  ;;  %s1413_s1 = int_to_ptr.vmem [resolvable:$true] %s7077_s1 }
 0x3cc   : > { %s1393_s18 = sshll.u32 %s1384_s16, 4  ;;  %s1416_s26 = sadd.s32 74, %s6183_s7  ;;  %s1394_s18 = int_to_ptr.hbm [resolvable:$true] %s1393_s18 }
 0x3cd   : > { %s4688_s15 = sshra.s32 %s1394_s18, 4  ;;  %s4689_s15 = int_to_ptr.hbm [resolvable:$true] %s4688_s15 }
 0x3ce   : > { %s4690_s8 = scalar_lea.hbm %s4689_s15, 1  ;;  %p4693_p12 = scmp.lt.s32.totalorder %s4689_s15, %s7892_s3 }
 0x3cf   : > { %p4691_p11 = scmp.ne.s32.totalorder %s4689_s15, %s4690_s8  ;;  %p4694_p13 = scmp.lt.s32.totalorder %s6212_s17, %s4690_s8 }
 0x3d1   : > { %p4695_p0 = por %p4694_p13, %p4693_p12 }
 0x3d3   : > { %p4696_p1 = pnand %p4695_p0, %p4691_p11 }
 0x3d5   : > { %4699 = shalt.err (!%p4696_p1)  }
 0x3d6   : > { %1398 = dma.hbm_to_vmem [thread:$0]  %s1394_s18, 16, %s1396_s5, [#allocation2 + $0x1] }
 0x3d7   : > { %s1417_s11 = sld [smem:[#allocation4 + %s1416_s26]]  ;;  %s1419_s27 = scalar_lea.vmem %s6186_s9, 74 [#allocation5] }
 0x3d8   : > { %s1401_s23 = scalar_lea.hbm %s7892_s3, %s1400_s13  ;;  %s7089_s16 = sshll.u32 %s1419_s27, 4  ;;  %s1430_s16 = int_to_ptr.vmem [resolvable:$true] %s7089_s16 }
 0x3d9   : > { %s1410_s25 = sshll.u32 %s1401_s23, 4  ;;  %s1433_s15 = sadd.s32 75, %s6183_s7  ;;  %s1411_s25 = int_to_ptr.hbm [resolvable:$true] %s1410_s25 }
 0x3da   : > { %s4712_s8 = sshra.s32 %s1411_s25, 4  ;;  %s4713_s8 = int_to_ptr.hbm [resolvable:$true] %s4712_s8 }
 0x3db   : > { %s4714_s6 = scalar_lea.hbm %s4713_s8, 1  ;;  %p4717_p3 = scmp.lt.s32.totalorder %s4713_s8, %s7892_s3 }
 0x3dc   : > { %p4715_p2 = scmp.ne.s32.totalorder %s4713_s8, %s4714_s6  ;;  %p4718_p4 = scmp.lt.s32.totalorder %s6212_s17, %s4714_s6 }
 0x3de   : > { %p4719_p7 = por %p4718_p4, %p4717_p3 }
 0x3e0   : > { %p4720_p8 = pnand %p4719_p7, %p4715_p2 }
 0x3e2   : > { %4723 = shalt.err (!%p4720_p8)  }
 0x3e3   : > { %1415 = dma.hbm_to_vmem [thread:$0]  %s1411_s25, 16, %s1413_s1, [#allocation2 + $0x1] }
 0x3e4   : > { %s1434_s13 = sld [smem:[#allocation4 + %s1433_s15]]  ;;  %s1436_s26 = scalar_lea.vmem %s6186_s9, 75 [#allocation5] }
 0x3e5   : > { %s1418_s30 = scalar_lea.hbm %s7892_s3, %s1417_s11  ;;  %s7101_s23 = sshll.u32 %s1436_s26, 4  ;;  %s1447_s23 = int_to_ptr.vmem [resolvable:$true] %s7101_s23 }
 0x3e6   : > { %s1427_s0 = sshll.u32 %s1418_s30, 4  ;;  %s1450_s8 = sadd.s32 76, %s6183_s7  ;;  %s1428_s0 = int_to_ptr.hbm [resolvable:$true] %s1427_s0 }
 0x3e7   : > { %s4736_s6 = sshra.s32 %s1428_s0, 4  ;;  %s4737_s6 = int_to_ptr.hbm [resolvable:$true] %s4736_s6 }
 0x3e8   : > { %s4738_s5 = scalar_lea.hbm %s4737_s6, 1  ;;  %p4741_p10 = scmp.lt.s32.totalorder %s4737_s6, %s7892_s3 }
 0x3e9   : > { %p4739_p9 = scmp.ne.s32.totalorder %s4737_s6, %s4738_s5  ;;  %p4742_p11 = scmp.lt.s32.totalorder %s6212_s17, %s4738_s5 }
 0x3eb   : > { %p4743_p12 = por %p4742_p11, %p4741_p10 }
 0x3ed   : > { %p4744_p13 = pnand %p4743_p12, %p4739_p9 }
 0x3ef   : > { %4747 = shalt.err (!%p4744_p13)  }
 0x3f0   : > { %1432 = dma.hbm_to_vmem [thread:$0]  %s1428_s0, 16, %s1430_s16, [#allocation2 + $0x1] }
 0x3f1   : > { %s1451_s11 = sld [smem:[#allocation4 + %s1450_s8]]  ;;  %s1453_s15 = scalar_lea.vmem %s6186_s9, 76 [#allocation5] }
 0x3f2   : > { %s1435_s12 = scalar_lea.hbm %s7892_s3, %s1434_s13  ;;  %s7113_s30 = sshll.u32 %s1453_s15, 4  ;;  %s1464_s30 = int_to_ptr.vmem [resolvable:$true] %s7113_s30 }
 0x3f3   : > { %s1444_s27 = sshll.u32 %s1435_s12, 4  ;;  %s1467_s6 = sadd.s32 77, %s6183_s7  ;;  %s1445_s27 = int_to_ptr.hbm [resolvable:$true] %s1444_s27 }
 0x3f4   : > { %s4760_s5 = sshra.s32 %s1445_s27, 4  ;;  %s4761_s5 = int_to_ptr.hbm [resolvable:$true] %s4760_s5 }
 0x3f5   : > { %s4762_s1 = scalar_lea.hbm %s4761_s5, 1  ;;  %p4765_p1 = scmp.lt.s32.totalorder %s4761_s5, %s7892_s3 }
 0x3f6   : > { %p4763_p0 = scmp.ne.s32.totalorder %s4761_s5, %s4762_s1  ;;  %p4766_p2 = scmp.lt.s32.totalorder %s6212_s17, %s4762_s1 }
 0x3f8   : > { %p4767_p3 = por %p4766_p2, %p4765_p1 }
 0x3fa   : > { %p4768_p4 = pnand %p4767_p3, %p4763_p0 }
 0x3fc   : > { %4771 = shalt.err (!%p4768_p4)  }
 0x3fd   : > { %1449 = dma.hbm_to_vmem [thread:$0]  %s1445_s27, 16, %s1447_s23, [#allocation2 + $0x1] }
 0x3fe   : > { %s1468_s13 = sld [smem:[#allocation4 + %s1467_s6]]  ;;  %s1470_s8 = scalar_lea.vmem %s6186_s9, 77 [#allocation5] }
 0x3ff   : > { %s1452_s18 = scalar_lea.hbm %s7892_s3, %s1451_s11  ;;  %s7125_s12 = sshll.u32 %s1470_s8, 4  ;;  %s1481_s12 = int_to_ptr.vmem [resolvable:$true] %s7125_s12 }
 0x400   : > { %s1461_s26 = sshll.u32 %s1452_s18, 4  ;;  %s1484_s5 = sadd.s32 78, %s6183_s7  ;;  %s1462_s26 = int_to_ptr.hbm [resolvable:$true] %s1461_s26 }
 0x401   : > { %s4784_s1 = sshra.s32 %s1462_s26, 4  ;;  %s4785_s1 = int_to_ptr.hbm [resolvable:$true] %s4784_s1 }
 0x402   : > { %s4786_s16 = scalar_lea.hbm %s4785_s1, 1  ;;  %p4789_p8 = scmp.lt.s32.totalorder %s4785_s1, %s7892_s3 }
 0x403   : > { %p4787_p7 = scmp.ne.s32.totalorder %s4785_s1, %s4786_s16  ;;  %p4790_p9 = scmp.lt.s32.totalorder %s6212_s17, %s4786_s16 }
 0x405   : > { %p4791_p10 = por %p4790_p9, %p4789_p8 }
 0x407   : > { %p4792_p11 = pnand %p4791_p10, %p4787_p7 }
 0x409   : > { %4795 = shalt.err (!%p4792_p11)  }
 0x40a   : > { %1466 = dma.hbm_to_vmem [thread:$0]  %s1462_s26, 16, %s1464_s30, [#allocation2 + $0x1] }
 0x40b   : > { %s1485_s11 = sld [smem:[#allocation4 + %s1484_s5]]  ;;  %s1487_s6 = scalar_lea.vmem %s6186_s9, 78 [#allocation5] }
 0x40c   : > { %s1469_s25 = scalar_lea.hbm %s7892_s3, %s1468_s13  ;;  %s7137_s18 = sshll.u32 %s1487_s6, 4  ;;  %s1498_s18 = int_to_ptr.vmem [resolvable:$true] %s7137_s18 }
 0x40d   : > { %s1478_s15 = sshll.u32 %s1469_s25, 4  ;;  %s1501_s1 = sadd.s32 79, %s6183_s7  ;;  %s1479_s15 = int_to_ptr.hbm [resolvable:$true] %s1478_s15 }
 0x40e   : > { %s4808_s16 = sshra.s32 %s1479_s15, 4  ;;  %s4809_s16 = int_to_ptr.hbm [resolvable:$true] %s4808_s16 }
 0x40f   : > { %s4810_s23 = scalar_lea.hbm %s4809_s16, 1  ;;  %p4813_p13 = scmp.lt.s32.totalorder %s4809_s16, %s7892_s3 }
 0x410   : > { %p4811_p12 = scmp.ne.s32.totalorder %s4809_s16, %s4810_s23  ;;  %p4814_p0 = scmp.lt.s32.totalorder %s6212_s17, %s4810_s23 }
 0x412   : > { %p4815_p1 = por %p4814_p0, %p4813_p13 }
 0x414   : > { %p4816_p2 = pnand %p4815_p1, %p4811_p12 }
 0x416   : > { %4819 = shalt.err (!%p4816_p2)  }
 0x417   : > { %1483 = dma.hbm_to_vmem [thread:$0]  %s1479_s15, 16, %s1481_s12, [#allocation2 + $0x1] }
 0x418   : > { %s1502_s13 = sld [smem:[#allocation4 + %s1501_s1]]  ;;  %s1504_s5 = scalar_lea.vmem %s6186_s9, 79 [#allocation5] }
 0x419   : > { %s1486_s0 = scalar_lea.hbm %s7892_s3, %s1485_s11  ;;  %s7149_s25 = sshll.u32 %s1504_s5, 4  ;;  %s1515_s25 = int_to_ptr.vmem [resolvable:$true] %s7149_s25 }
 0x41a   : > { %s1495_s8 = sshll.u32 %s1486_s0, 4  ;;  %s1518_s16 = sadd.s32 80, %s6183_s7  ;;  %s1496_s8 = int_to_ptr.hbm [resolvable:$true] %s1495_s8 }
 0x41b   : > { %s4832_s23 = sshra.s32 %s1496_s8, 4  ;;  %s4833_s23 = int_to_ptr.hbm [resolvable:$true] %s4832_s23 }
 0x41c   : > { %s4834_s30 = scalar_lea.hbm %s4833_s23, 1  ;;  %p4837_p4 = scmp.lt.s32.totalorder %s4833_s23, %s7892_s3 }
 0x41d   : > { %p4835_p3 = scmp.ne.s32.totalorder %s4833_s23, %s4834_s30  ;;  %p4838_p7 = scmp.lt.s32.totalorder %s6212_s17, %s4834_s30 }
 0x41f   : > { %p4839_p8 = por %p4838_p7, %p4837_p4 }
 0x421   : > { %p4840_p9 = pnand %p4839_p8, %p4835_p3 }
 0x423   : > { %4843 = shalt.err (!%p4840_p9)  }
 0x424   : > { %1500 = dma.hbm_to_vmem [thread:$0]  %s1496_s8, 16, %s1498_s18, [#allocation2 + $0x1] }
 0x425   : > { %s1519_s11 = sld [smem:[#allocation4 + %s1518_s16]]  ;;  %s1521_s1 = scalar_lea.vmem %s6186_s9, 80 [#allocation5] }
 0x426   : > { %s1503_s27 = scalar_lea.hbm %s7892_s3, %s1502_s13  ;;  %s7161_s0 = sshll.u32 %s1521_s1, 4  ;;  %s1532_s0 = int_to_ptr.vmem [resolvable:$true] %s7161_s0 }
 0x427   : > { %s1512_s6 = sshll.u32 %s1503_s27, 4  ;;  %s1535_s23 = sadd.s32 81, %s6183_s7  ;;  %s1513_s6 = int_to_ptr.hbm [resolvable:$true] %s1512_s6 }
 0x428   : > { %s4856_s30 = sshra.s32 %s1513_s6, 4  ;;  %s4857_s30 = int_to_ptr.hbm [resolvable:$true] %s4856_s30 }
 0x429   : > { %s4858_s12 = scalar_lea.hbm %s4857_s30, 1  ;;  %p4861_p11 = scmp.lt.s32.totalorder %s4857_s30, %s7892_s3 }
 0x42a   : > { %p4859_p10 = scmp.ne.s32.totalorder %s4857_s30, %s4858_s12  ;;  %p4862_p12 = scmp.lt.s32.totalorder %s6212_s17, %s4858_s12 }
 0x42c   : > { %p4863_p13 = por %p4862_p12, %p4861_p11 }
 0x42e   : > { %p4864_p0 = pnand %p4863_p13, %p4859_p10 }
 0x430   : > { %4867 = shalt.err (!%p4864_p0)  }
 0x431   : > { %1517 = dma.hbm_to_vmem [thread:$0]  %s1513_s6, 16, %s1515_s25, [#allocation2 + $0x1] }
 0x432   : > { %s1536_s13 = sld [smem:[#allocation4 + %s1535_s23]]  ;;  %s1538_s16 = scalar_lea.vmem %s6186_s9, 81 [#allocation5] }
 0x433   : > { %s1520_s26 = scalar_lea.hbm %s7892_s3, %s1519_s11  ;;  %s7173_s27 = sshll.u32 %s1538_s16, 4  ;;  %s1549_s27 = int_to_ptr.vmem [resolvable:$true] %s7173_s27 }
 0x434   : > { %s1529_s5 = sshll.u32 %s1520_s26, 4  ;;  %s1552_s30 = sadd.s32 82, %s6183_s7  ;;  %s1530_s5 = int_to_ptr.hbm [resolvable:$true] %s1529_s5 }
 0x435   : > { %s4880_s12 = sshra.s32 %s1530_s5, 4  ;;  %s4881_s12 = int_to_ptr.hbm [resolvable:$true] %s4880_s12 }
 0x436   : > { %s4882_s18 = scalar_lea.hbm %s4881_s12, 1  ;;  %p4885_p2 = scmp.lt.s32.totalorder %s4881_s12, %s7892_s3 }
 0x437   : > { %p4883_p1 = scmp.ne.s32.totalorder %s4881_s12, %s4882_s18  ;;  %p4886_p3 = scmp.lt.s32.totalorder %s6212_s17, %s4882_s18 }
 0x439   : > { %p4887_p4 = por %p4886_p3, %p4885_p2 }
 0x43b   : > { %p4888_p7 = pnand %p4887_p4, %p4883_p1 }
 0x43d   : > { %4891 = shalt.err (!%p4888_p7)  }
 0x43e   : > { %1534 = dma.hbm_to_vmem [thread:$0]  %s1530_s5, 16, %s1532_s0, [#allocation2 + $0x1] }
 0x43f   : > { %s1553_s11 = sld [smem:[#allocation4 + %s1552_s30]]  ;;  %s1555_s23 = scalar_lea.vmem %s6186_s9, 82 [#allocation5] }
 0x440   : > { %s1537_s15 = scalar_lea.hbm %s7892_s3, %s1536_s13  ;;  %s7185_s26 = sshll.u32 %s1555_s23, 4  ;;  %s1566_s26 = int_to_ptr.vmem [resolvable:$true] %s7185_s26 }
 0x441   : > { %s1546_s1 = sshll.u32 %s1537_s15, 4  ;;  %s1569_s12 = sadd.s32 83, %s6183_s7  ;;  %s1547_s1 = int_to_ptr.hbm [resolvable:$true] %s1546_s1 }
 0x442   : > { %s4904_s18 = sshra.s32 %s1547_s1, 4  ;;  %s4905_s18 = int_to_ptr.hbm [resolvable:$true] %s4904_s18 }
 0x443   : > { %s4906_s25 = scalar_lea.hbm %s4905_s18, 1  ;;  %p4909_p9 = scmp.lt.s32.totalorder %s4905_s18, %s7892_s3 }
 0x444   : > { %p4907_p8 = scmp.ne.s32.totalorder %s4905_s18, %s4906_s25  ;;  %p4910_p10 = scmp.lt.s32.totalorder %s6212_s17, %s4906_s25 }
 0x446   : > { %p4911_p11 = por %p4910_p10, %p4909_p9 }
 0x448   : > { %p4912_p12 = pnand %p4911_p11, %p4907_p8 }
 0x44a   : > { %4915 = shalt.err (!%p4912_p12)  }
 0x44b   : > { %1551 = dma.hbm_to_vmem [thread:$0]  %s1547_s1, 16, %s1549_s27, [#allocation2 + $0x1] }
 0x44c   : > { %s1570_s13 = sld [smem:[#allocation4 + %s1569_s12]]  ;;  %s1572_s30 = scalar_lea.vmem %s6186_s9, 83 [#allocation5] }
 0x44d   : > { %s1554_s8 = scalar_lea.hbm %s7892_s3, %s1553_s11  ;;  %s7197_s15 = sshll.u32 %s1572_s30, 4  ;;  %s1583_s15 = int_to_ptr.vmem [resolvable:$true] %s7197_s15 }
 0x44e   : > { %s1563_s16 = sshll.u32 %s1554_s8, 4  ;;  %s1586_s18 = sadd.s32 84, %s6183_s7  ;;  %s1564_s16 = int_to_ptr.hbm [resolvable:$true] %s1563_s16 }
 0x44f   : > { %s4928_s25 = sshra.s32 %s1564_s16, 4  ;;  %s4929_s25 = int_to_ptr.hbm [resolvable:$true] %s4928_s25 }
 0x450   : > { %s4930_s0 = scalar_lea.hbm %s4929_s25, 1  ;;  %p4933_p0 = scmp.lt.s32.totalorder %s4929_s25, %s7892_s3 }
 0x451   : > { %p4931_p13 = scmp.ne.s32.totalorder %s4929_s25, %s4930_s0  ;;  %p4934_p1 = scmp.lt.s32.totalorder %s6212_s17, %s4930_s0 }
 0x453   : > { %p4935_p2 = por %p4934_p1, %p4933_p0 }
 0x455   : > { %p4936_p3 = pnand %p4935_p2, %p4931_p13 }
 0x457   : > { %4939 = shalt.err (!%p4936_p3)  }
 0x458   : > { %1568 = dma.hbm_to_vmem [thread:$0]  %s1564_s16, 16, %s1566_s26, [#allocation2 + $0x1] }
 0x459   : > { %s1587_s11 = sld [smem:[#allocation4 + %s1586_s18]]  ;;  %s1589_s12 = scalar_lea.vmem %s6186_s9, 84 [#allocation5] }
 0x45a   : > { %s1571_s6 = scalar_lea.hbm %s7892_s3, %s1570_s13  ;;  %s7209_s8 = sshll.u32 %s1589_s12, 4  ;;  %s1600_s8 = int_to_ptr.vmem [resolvable:$true] %s7209_s8 }
 0x45b   : > { %s1580_s23 = sshll.u32 %s1571_s6, 4  ;;  %s1603_s25 = sadd.s32 85, %s6183_s7  ;;  %s1581_s23 = int_to_ptr.hbm [resolvable:$true] %s1580_s23 }
 0x45c   : > { %s4952_s0 = sshra.s32 %s1581_s23, 4  ;;  %s4953_s0 = int_to_ptr.hbm [resolvable:$true] %s4952_s0 }
 0x45d   : > { %s4954_s27 = scalar_lea.hbm %s4953_s0, 1  ;;  %p4957_p7 = scmp.lt.s32.totalorder %s4953_s0, %s7892_s3 }
 0x45e   : > { %p4955_p4 = scmp.ne.s32.totalorder %s4953_s0, %s4954_s27  ;;  %p4958_p8 = scmp.lt.s32.totalorder %s6212_s17, %s4954_s27 }
 0x460   : > { %p4959_p9 = por %p4958_p8, %p4957_p7 }
 0x462   : > { %p4960_p10 = pnand %p4959_p9, %p4955_p4 }
 0x464   : > { %4963 = shalt.err (!%p4960_p10)  }
 0x465   : > { %1585 = dma.hbm_to_vmem [thread:$0]  %s1581_s23, 16, %s1583_s15, [#allocation2 + $0x1] }
 0x466   : > { %s1604_s13 = sld [smem:[#allocation4 + %s1603_s25]]  ;;  %s1606_s18 = scalar_lea.vmem %s6186_s9, 85 [#allocation5] }
 0x467   : > { %s1588_s5 = scalar_lea.hbm %s7892_s3, %s1587_s11  ;;  %s7221_s6 = sshll.u32 %s1606_s18, 4  ;;  %s1617_s6 = int_to_ptr.vmem [resolvable:$true] %s7221_s6 }
 0x468   : > { %s1597_s30 = sshll.u32 %s1588_s5, 4  ;;  %s1620_s0 = sadd.s32 86, %s6183_s7  ;;  %s1598_s30 = int_to_ptr.hbm [resolvable:$true] %s1597_s30 }
 0x469   : > { %s4976_s27 = sshra.s32 %s1598_s30, 4  ;;  %s4977_s27 = int_to_ptr.hbm [resolvable:$true] %s4976_s27 }
 0x46a   : > { %s4978_s26 = scalar_lea.hbm %s4977_s27, 1  ;;  %p4981_p12 = scmp.lt.s32.totalorder %s4977_s27, %s7892_s3 }
 0x46b   : > { %p4979_p11 = scmp.ne.s32.totalorder %s4977_s27, %s4978_s26  ;;  %p4982_p13 = scmp.lt.s32.totalorder %s6212_s17, %s4978_s26 }
 0x46d   : > { %p4983_p0 = por %p4982_p13, %p4981_p12 }
 0x46f   : > { %p4984_p1 = pnand %p4983_p0, %p4979_p11 }
 0x471   : > { %4987 = shalt.err (!%p4984_p1)  }
 0x472   : > { %1602 = dma.hbm_to_vmem [thread:$0]  %s1598_s30, 16, %s1600_s8, [#allocation2 + $0x1] }
 0x473   : > { %s1621_s11 = sld [smem:[#allocation4 + %s1620_s0]]  ;;  %s1623_s25 = scalar_lea.vmem %s6186_s9, 86 [#allocation5] }
 0x474   : > { %s1605_s1 = scalar_lea.hbm %s7892_s3, %s1604_s13  ;;  %s7233_s5 = sshll.u32 %s1623_s25, 4  ;;  %s1634_s5 = int_to_ptr.vmem [resolvable:$true] %s7233_s5 }
 0x475   : > { %s1614_s12 = sshll.u32 %s1605_s1, 4  ;;  %s1637_s27 = sadd.s32 87, %s6183_s7  ;;  %s1615_s12 = int_to_ptr.hbm [resolvable:$true] %s1614_s12 }
 0x476   : > { %s5000_s26 = sshra.s32 %s1615_s12, 4  ;;  %s5001_s26 = int_to_ptr.hbm [resolvable:$true] %s5000_s26 }
 0x477   : > { %s5002_s15 = scalar_lea.hbm %s5001_s26, 1  ;;  %p5005_p3 = scmp.lt.s32.totalorder %s5001_s26, %s7892_s3 }
 0x478   : > { %p5003_p2 = scmp.ne.s32.totalorder %s5001_s26, %s5002_s15  ;;  %p5006_p4 = scmp.lt.s32.totalorder %s6212_s17, %s5002_s15 }
 0x47a   : > { %p5007_p7 = por %p5006_p4, %p5005_p3 }
 0x47c   : > { %p5008_p8 = pnand %p5007_p7, %p5003_p2 }
 0x47e   : > { %5011 = shalt.err (!%p5008_p8)  }
 0x47f   : > { %1619 = dma.hbm_to_vmem [thread:$0]  %s1615_s12, 16, %s1617_s6, [#allocation2 + $0x1] }
 0x480   : > { %s1638_s13 = sld [smem:[#allocation4 + %s1637_s27]]  ;;  %s1640_s0 = scalar_lea.vmem %s6186_s9, 87 [#allocation5] }
 0x481   : > { %s1622_s16 = scalar_lea.hbm %s7892_s3, %s1621_s11  ;;  %s7245_s1 = sshll.u32 %s1640_s0, 4  ;;  %s1651_s1 = int_to_ptr.vmem [resolvable:$true] %s7245_s1 }
 0x482   : > { %s1631_s18 = sshll.u32 %s1622_s16, 4  ;;  %s1654_s26 = sadd.s32 88, %s6183_s7  ;;  %s1632_s18 = int_to_ptr.hbm [resolvable:$true] %s1631_s18 }
 0x483   : > { %s5024_s15 = sshra.s32 %s1632_s18, 4  ;;  %s5025_s15 = int_to_ptr.hbm [resolvable:$true] %s5024_s15 }
 0x484   : > { %s5026_s8 = scalar_lea.hbm %s5025_s15, 1  ;;  %p5029_p10 = scmp.lt.s32.totalorder %s5025_s15, %s7892_s3 }
 0x485   : > { %p5027_p9 = scmp.ne.s32.totalorder %s5025_s15, %s5026_s8  ;;  %p5030_p11 = scmp.lt.s32.totalorder %s6212_s17, %s5026_s8 }
 0x487   : > { %p5031_p12 = por %p5030_p11, %p5029_p10 }
 0x489   : > { %p5032_p13 = pnand %p5031_p12, %p5027_p9 }
 0x48b   : > { %5035 = shalt.err (!%p5032_p13)  }
 0x48c   : > { %1636 = dma.hbm_to_vmem [thread:$0]  %s1632_s18, 16, %s1634_s5, [#allocation2 + $0x1] }
 0x48d   : > { %s1655_s11 = sld [smem:[#allocation4 + %s1654_s26]]  ;;  %s1657_s27 = scalar_lea.vmem %s6186_s9, 88 [#allocation5] }
 0x48e   : > { %s1639_s23 = scalar_lea.hbm %s7892_s3, %s1638_s13  ;;  %s7257_s16 = sshll.u32 %s1657_s27, 4  ;;  %s1668_s16 = int_to_ptr.vmem [resolvable:$true] %s7257_s16 }
 0x48f   : > { %s1648_s25 = sshll.u32 %s1639_s23, 4  ;;  %s1671_s15 = sadd.s32 89, %s6183_s7  ;;  %s1649_s25 = int_to_ptr.hbm [resolvable:$true] %s1648_s25 }
 0x490   : > { %s5048_s8 = sshra.s32 %s1649_s25, 4  ;;  %s5049_s8 = int_to_ptr.hbm [resolvable:$true] %s5048_s8 }
 0x491   : > { %s5050_s6 = scalar_lea.hbm %s5049_s8, 1  ;;  %p5053_p1 = scmp.lt.s32.totalorder %s5049_s8, %s7892_s3 }
 0x492   : > { %p5051_p0 = scmp.ne.s32.totalorder %s5049_s8, %s5050_s6  ;;  %p5054_p2 = scmp.lt.s32.totalorder %s6212_s17, %s5050_s6 }
 0x494   : > { %p5055_p3 = por %p5054_p2, %p5053_p1 }
 0x496   : > { %p5056_p4 = pnand %p5055_p3, %p5051_p0 }
 0x498   : > { %5059 = shalt.err (!%p5056_p4)  }
 0x499   : > { %1653 = dma.hbm_to_vmem [thread:$0]  %s1649_s25, 16, %s1651_s1, [#allocation2 + $0x1] }
 0x49a   : > { %s1672_s13 = sld [smem:[#allocation4 + %s1671_s15]]  ;;  %s1674_s26 = scalar_lea.vmem %s6186_s9, 89 [#allocation5] }
 0x49b   : > { %s1656_s30 = scalar_lea.hbm %s7892_s3, %s1655_s11  ;;  %s7269_s23 = sshll.u32 %s1674_s26, 4  ;;  %s1685_s23 = int_to_ptr.vmem [resolvable:$true] %s7269_s23 }
 0x49c   : > { %s1665_s0 = sshll.u32 %s1656_s30, 4  ;;  %s1688_s8 = sadd.s32 90, %s6183_s7  ;;  %s1666_s0 = int_to_ptr.hbm [resolvable:$true] %s1665_s0 }
 0x49d   : > { %s5072_s6 = sshra.s32 %s1666_s0, 4  ;;  %s5073_s6 = int_to_ptr.hbm [resolvable:$true] %s5072_s6 }
 0x49e   : > { %s5074_s5 = scalar_lea.hbm %s5073_s6, 1  ;;  %p5077_p8 = scmp.lt.s32.totalorder %s5073_s6, %s7892_s3 }
 0x49f   : > { %p5075_p7 = scmp.ne.s32.totalorder %s5073_s6, %s5074_s5  ;;  %p5078_p9 = scmp.lt.s32.totalorder %s6212_s17, %s5074_s5 }
 0x4a1   : > { %p5079_p10 = por %p5078_p9, %p5077_p8 }
 0x4a3   : > { %p5080_p11 = pnand %p5079_p10, %p5075_p7 }
 0x4a5   : > { %5083 = shalt.err (!%p5080_p11)  }
 0x4a6   : > { %1670 = dma.hbm_to_vmem [thread:$0]  %s1666_s0, 16, %s1668_s16, [#allocation2 + $0x1] }
 0x4a7   : > { %s1689_s11 = sld [smem:[#allocation4 + %s1688_s8]]  ;;  %s1691_s15 = scalar_lea.vmem %s6186_s9, 90 [#allocation5] }
 0x4a8   : > { %s1673_s12 = scalar_lea.hbm %s7892_s3, %s1672_s13  ;;  %s7281_s30 = sshll.u32 %s1691_s15, 4  ;;  %s1702_s30 = int_to_ptr.vmem [resolvable:$true] %s7281_s30 }
 0x4a9   : > { %s1682_s27 = sshll.u32 %s1673_s12, 4  ;;  %s1705_s6 = sadd.s32 91, %s6183_s7  ;;  %s1683_s27 = int_to_ptr.hbm [resolvable:$true] %s1682_s27 }
 0x4aa   : > { %s5096_s5 = sshra.s32 %s1683_s27, 4  ;;  %s5097_s5 = int_to_ptr.hbm [resolvable:$true] %s5096_s5 }
 0x4ab   : > { %s5098_s1 = scalar_lea.hbm %s5097_s5, 1  ;;  %p5101_p13 = scmp.lt.s32.totalorder %s5097_s5, %s7892_s3 }
 0x4ac   : > { %p5099_p12 = scmp.ne.s32.totalorder %s5097_s5, %s5098_s1  ;;  %p5102_p0 = scmp.lt.s32.totalorder %s6212_s17, %s5098_s1 }
 0x4ae   : > { %p5103_p1 = por %p5102_p0, %p5101_p13 }
 0x4b0   : > { %p5104_p2 = pnand %p5103_p1, %p5099_p12 }
 0x4b2   : > { %5107 = shalt.err (!%p5104_p2)  }
 0x4b3   : > { %1687 = dma.hbm_to_vmem [thread:$0]  %s1683_s27, 16, %s1685_s23, [#allocation2 + $0x1] }
 0x4b4   : > { %s1706_s13 = sld [smem:[#allocation4 + %s1705_s6]]  ;;  %s1708_s8 = scalar_lea.vmem %s6186_s9, 91 [#allocation5] }
 0x4b5   : > { %s1690_s18 = scalar_lea.hbm %s7892_s3, %s1689_s11  ;;  %s7293_s12 = sshll.u32 %s1708_s8, 4  ;;  %s1719_s12 = int_to_ptr.vmem [resolvable:$true] %s7293_s12 }
 0x4b6   : > { %s1699_s26 = sshll.u32 %s1690_s18, 4  ;;  %s1722_s5 = sadd.s32 92, %s6183_s7  ;;  %s1700_s26 = int_to_ptr.hbm [resolvable:$true] %s1699_s26 }
 0x4b7   : > { %s5120_s1 = sshra.s32 %s1700_s26, 4  ;;  %s5121_s1 = int_to_ptr.hbm [resolvable:$true] %s5120_s1 }
 0x4b8   : > { %s5122_s16 = scalar_lea.hbm %s5121_s1, 1  ;;  %p5125_p4 = scmp.lt.s32.totalorder %s5121_s1, %s7892_s3 }
 0x4b9   : > { %p5123_p3 = scmp.ne.s32.totalorder %s5121_s1, %s5122_s16  ;;  %p5126_p7 = scmp.lt.s32.totalorder %s6212_s17, %s5122_s16 }
 0x4bb   : > { %p5127_p8 = por %p5126_p7, %p5125_p4 }
 0x4bd   : > { %p5128_p9 = pnand %p5127_p8, %p5123_p3 }
 0x4bf   : > { %5131 = shalt.err (!%p5128_p9)  }
 0x4c0   : > { %1704 = dma.hbm_to_vmem [thread:$0]  %s1700_s26, 16, %s1702_s30, [#allocation2 + $0x1] }
 0x4c1   : > { %s1723_s11 = sld [smem:[#allocation4 + %s1722_s5]]  ;;  %s1725_s6 = scalar_lea.vmem %s6186_s9, 92 [#allocation5] }
 0x4c2   : > { %s1707_s25 = scalar_lea.hbm %s7892_s3, %s1706_s13  ;;  %s7305_s18 = sshll.u32 %s1725_s6, 4  ;;  %s1736_s18 = int_to_ptr.vmem [resolvable:$true] %s7305_s18 }
 0x4c3   : > { %s1716_s15 = sshll.u32 %s1707_s25, 4  ;;  %s1739_s1 = sadd.s32 93, %s6183_s7  ;;  %s1717_s15 = int_to_ptr.hbm [resolvable:$true] %s1716_s15 }
 0x4c4   : > { %s5144_s16 = sshra.s32 %s1717_s15, 4  ;;  %s5145_s16 = int_to_ptr.hbm [resolvable:$true] %s5144_s16 }
 0x4c5   : > { %s5146_s23 = scalar_lea.hbm %s5145_s16, 1  ;;  %p5149_p11 = scmp.lt.s32.totalorder %s5145_s16, %s7892_s3 }
 0x4c6   : > { %p5147_p10 = scmp.ne.s32.totalorder %s5145_s16, %s5146_s23  ;;  %p5150_p12 = scmp.lt.s32.totalorder %s6212_s17, %s5146_s23 }
 0x4c8   : > { %p5151_p13 = por %p5150_p12, %p5149_p11 }
 0x4ca   : > { %p5152_p0 = pnand %p5151_p13, %p5147_p10 }
 0x4cc   : > { %5155 = shalt.err (!%p5152_p0)  }
 0x4cd   : > { %1721 = dma.hbm_to_vmem [thread:$0]  %s1717_s15, 16, %s1719_s12, [#allocation2 + $0x1] }
 0x4ce   : > { %s1740_s13 = sld [smem:[#allocation4 + %s1739_s1]]  ;;  %s1742_s5 = scalar_lea.vmem %s6186_s9, 93 [#allocation5] }
 0x4cf   : > { %s1724_s0 = scalar_lea.hbm %s7892_s3, %s1723_s11  ;;  %s7317_s25 = sshll.u32 %s1742_s5, 4  ;;  %s1753_s25 = int_to_ptr.vmem [resolvable:$true] %s7317_s25 }
 0x4d0   : > { %s1733_s8 = sshll.u32 %s1724_s0, 4  ;;  %s1756_s16 = sadd.s32 94, %s6183_s7  ;;  %s1734_s8 = int_to_ptr.hbm [resolvable:$true] %s1733_s8 }
 0x4d1   : > { %s5168_s23 = sshra.s32 %s1734_s8, 4  ;;  %s5169_s23 = int_to_ptr.hbm [resolvable:$true] %s5168_s23 }
 0x4d2   : > { %s5170_s30 = scalar_lea.hbm %s5169_s23, 1  ;;  %p5173_p2 = scmp.lt.s32.totalorder %s5169_s23, %s7892_s3 }
 0x4d3   : > { %p5171_p1 = scmp.ne.s32.totalorder %s5169_s23, %s5170_s30  ;;  %p5174_p3 = scmp.lt.s32.totalorder %s6212_s17, %s5170_s30 }
 0x4d5   : > { %p5175_p4 = por %p5174_p3, %p5173_p2 }
 0x4d7   : > { %p5176_p7 = pnand %p5175_p4, %p5171_p1 }
 0x4d9   : > { %5179 = shalt.err (!%p5176_p7)  }
 0x4da   : > { %1738 = dma.hbm_to_vmem [thread:$0]  %s1734_s8, 16, %s1736_s18, [#allocation2 + $0x1] }
 0x4db   : > { %s1757_s11 = sld [smem:[#allocation4 + %s1756_s16]]  ;;  %s1759_s1 = scalar_lea.vmem %s6186_s9, 94 [#allocation5] }
 0x4dc   : > { %s1741_s27 = scalar_lea.hbm %s7892_s3, %s1740_s13  ;;  %s7329_s0 = sshll.u32 %s1759_s1, 4  ;;  %s1770_s0 = int_to_ptr.vmem [resolvable:$true] %s7329_s0 }
 0x4dd   : > { %s1750_s6 = sshll.u32 %s1741_s27, 4  ;;  %s1773_s23 = sadd.s32 95, %s6183_s7  ;;  %s1751_s6 = int_to_ptr.hbm [resolvable:$true] %s1750_s6 }
 0x4de   : > { %s5192_s30 = sshra.s32 %s1751_s6, 4  ;;  %s5193_s30 = int_to_ptr.hbm [resolvable:$true] %s5192_s30 }
 0x4df   : > { %s5194_s12 = scalar_lea.hbm %s5193_s30, 1  ;;  %p5197_p9 = scmp.lt.s32.totalorder %s5193_s30, %s7892_s3 }
 0x4e0   : > { %p5195_p8 = scmp.ne.s32.totalorder %s5193_s30, %s5194_s12  ;;  %p5198_p10 = scmp.lt.s32.totalorder %s6212_s17, %s5194_s12 }
 0x4e2   : > { %p5199_p11 = por %p5198_p10, %p5197_p9 }
 0x4e4   : > { %p5200_p12 = pnand %p5199_p11, %p5195_p8 }
 0x4e6   : > { %5203 = shalt.err (!%p5200_p12)  }
 0x4e7   : > { %1755 = dma.hbm_to_vmem [thread:$0]  %s1751_s6, 16, %s1753_s25, [#allocation2 + $0x1] }
 0x4e8   : > { %s1774_s13 = sld [smem:[#allocation4 + %s1773_s23]]  ;;  %s1776_s16 = scalar_lea.vmem %s6186_s9, 95 [#allocation5] }
 0x4e9   : > { %s1758_s26 = scalar_lea.hbm %s7892_s3, %s1757_s11  ;;  %s7341_s27 = sshll.u32 %s1776_s16, 4  ;;  %s1787_s27 = int_to_ptr.vmem [resolvable:$true] %s7341_s27 }
 0x4ea   : > { %s1767_s5 = sshll.u32 %s1758_s26, 4  ;;  %s1790_s30 = sadd.s32 96, %s6183_s7  ;;  %s1768_s5 = int_to_ptr.hbm [resolvable:$true] %s1767_s5 }
 0x4eb   : > { %s5216_s12 = sshra.s32 %s1768_s5, 4  ;;  %s5217_s12 = int_to_ptr.hbm [resolvable:$true] %s5216_s12 }
 0x4ec   : > { %s5218_s18 = scalar_lea.hbm %s5217_s12, 1  ;;  %p5221_p0 = scmp.lt.s32.totalorder %s5217_s12, %s7892_s3 }
 0x4ed   : > { %p5219_p13 = scmp.ne.s32.totalorder %s5217_s12, %s5218_s18  ;;  %p5222_p1 = scmp.lt.s32.totalorder %s6212_s17, %s5218_s18 }
 0x4ef   : > { %p5223_p2 = por %p5222_p1, %p5221_p0 }
 0x4f1   : > { %p5224_p3 = pnand %p5223_p2, %p5219_p13 }
 0x4f3   : > { %5227 = shalt.err (!%p5224_p3)  }
 0x4f4   : > { %1772 = dma.hbm_to_vmem [thread:$0]  %s1768_s5, 16, %s1770_s0, [#allocation2 + $0x1] }
 0x4f5   : > { %s1791_s11 = sld [smem:[#allocation4 + %s1790_s30]]  ;;  %s1793_s23 = scalar_lea.vmem %s6186_s9, 96 [#allocation5] }
 0x4f6   : > { %s1775_s15 = scalar_lea.hbm %s7892_s3, %s1774_s13  ;;  %s7353_s26 = sshll.u32 %s1793_s23, 4  ;;  %s1804_s26 = int_to_ptr.vmem [resolvable:$true] %s7353_s26 }
 0x4f7   : > { %s1784_s1 = sshll.u32 %s1775_s15, 4  ;;  %s1807_s12 = sadd.s32 97, %s6183_s7  ;;  %s1785_s1 = int_to_ptr.hbm [resolvable:$true] %s1784_s1 }
 0x4f8   : > { %s5240_s18 = sshra.s32 %s1785_s1, 4  ;;  %s5241_s18 = int_to_ptr.hbm [resolvable:$true] %s5240_s18 }
 0x4f9   : > { %s5242_s25 = scalar_lea.hbm %s5241_s18, 1  ;;  %p5245_p7 = scmp.lt.s32.totalorder %s5241_s18, %s7892_s3 }
 0x4fa   : > { %p5243_p4 = scmp.ne.s32.totalorder %s5241_s18, %s5242_s25  ;;  %p5246_p8 = scmp.lt.s32.totalorder %s6212_s17, %s5242_s25 }
 0x4fc   : > { %p5247_p9 = por %p5246_p8, %p5245_p7 }
 0x4fe   : > { %p5248_p10 = pnand %p5247_p9, %p5243_p4 }
 0x500   : > { %5251 = shalt.err (!%p5248_p10)  }
 0x501   : > { %1789 = dma.hbm_to_vmem [thread:$0]  %s1785_s1, 16, %s1787_s27, [#allocation2 + $0x1] }
 0x502   : > { %s1808_s13 = sld [smem:[#allocation4 + %s1807_s12]]  ;;  %s1810_s30 = scalar_lea.vmem %s6186_s9, 97 [#allocation5] }
 0x503   : > { %s1792_s8 = scalar_lea.hbm %s7892_s3, %s1791_s11  ;;  %s7365_s15 = sshll.u32 %s1810_s30, 4  ;;  %s1821_s15 = int_to_ptr.vmem [resolvable:$true] %s7365_s15 }
 0x504   : > { %s1801_s16 = sshll.u32 %s1792_s8, 4  ;;  %s1824_s18 = sadd.s32 98, %s6183_s7  ;;  %s1802_s16 = int_to_ptr.hbm [resolvable:$true] %s1801_s16 }
 0x505   : > { %s5264_s25 = sshra.s32 %s1802_s16, 4  ;;  %s5265_s25 = int_to_ptr.hbm [resolvable:$true] %s5264_s25 }
 0x506   : > { %s5266_s0 = scalar_lea.hbm %s5265_s25, 1  ;;  %p5269_p12 = scmp.lt.s32.totalorder %s5265_s25, %s7892_s3 }
 0x507   : > { %p5267_p11 = scmp.ne.s32.totalorder %s5265_s25, %s5266_s0  ;;  %p5270_p13 = scmp.lt.s32.totalorder %s6212_s17, %s5266_s0 }
 0x509   : > { %p5271_p0 = por %p5270_p13, %p5269_p12 }
 0x50b   : > { %p5272_p1 = pnand %p5271_p0, %p5267_p11 }
 0x50d   : > { %5275 = shalt.err (!%p5272_p1)  }
 0x50e   : > { %1806 = dma.hbm_to_vmem [thread:$0]  %s1802_s16, 16, %s1804_s26, [#allocation2 + $0x1] }
 0x50f   : > { %s1825_s11 = sld [smem:[#allocation4 + %s1824_s18]]  ;;  %s1827_s12 = scalar_lea.vmem %s6186_s9, 98 [#allocation5] }
 0x510   : > { %s1809_s6 = scalar_lea.hbm %s7892_s3, %s1808_s13  ;;  %s7377_s8 = sshll.u32 %s1827_s12, 4  ;;  %s1838_s8 = int_to_ptr.vmem [resolvable:$true] %s7377_s8 }
 0x511   : > { %s1818_s23 = sshll.u32 %s1809_s6, 4  ;;  %s1841_s25 = sadd.s32 99, %s6183_s7  ;;  %s1819_s23 = int_to_ptr.hbm [resolvable:$true] %s1818_s23 }
 0x512   : > { %s5288_s0 = sshra.s32 %s1819_s23, 4  ;;  %s5289_s0 = int_to_ptr.hbm [resolvable:$true] %s5288_s0 }
 0x513   : > { %s5290_s27 = scalar_lea.hbm %s5289_s0, 1  ;;  %p5293_p3 = scmp.lt.s32.totalorder %s5289_s0, %s7892_s3 }
 0x514   : > { %p5291_p2 = scmp.ne.s32.totalorder %s5289_s0, %s5290_s27  ;;  %p5294_p4 = scmp.lt.s32.totalorder %s6212_s17, %s5290_s27 }
 0x516   : > { %p5295_p7 = por %p5294_p4, %p5293_p3 }
 0x518   : > { %p5296_p8 = pnand %p5295_p7, %p5291_p2 }
 0x51a   : > { %5299 = shalt.err (!%p5296_p8)  }
 0x51b   : > { %1823 = dma.hbm_to_vmem [thread:$0]  %s1819_s23, 16, %s1821_s15, [#allocation2 + $0x1] }
 0x51c   : > { %s1842_s13 = sld [smem:[#allocation4 + %s1841_s25]]  ;;  %s1844_s18 = scalar_lea.vmem %s6186_s9, 99 [#allocation5] }
 0x51d   : > { %s1826_s5 = scalar_lea.hbm %s7892_s3, %s1825_s11  ;;  %s7389_s6 = sshll.u32 %s1844_s18, 4  ;;  %s1855_s6 = int_to_ptr.vmem [resolvable:$true] %s7389_s6 }
 0x51e   : > { %s1835_s30 = sshll.u32 %s1826_s5, 4  ;;  %s1858_s0 = sadd.s32 100, %s6183_s7  ;;  %s1836_s30 = int_to_ptr.hbm [resolvable:$true] %s1835_s30 }
 0x51f   : > { %s5312_s27 = sshra.s32 %s1836_s30, 4  ;;  %s5313_s27 = int_to_ptr.hbm [resolvable:$true] %s5312_s27 }
 0x520   : > { %s5314_s26 = scalar_lea.hbm %s5313_s27, 1  ;;  %p5317_p10 = scmp.lt.s32.totalorder %s5313_s27, %s7892_s3 }
 0x521   : > { %p5315_p9 = scmp.ne.s32.totalorder %s5313_s27, %s5314_s26  ;;  %p5318_p11 = scmp.lt.s32.totalorder %s6212_s17, %s5314_s26 }
 0x523   : > { %p5319_p12 = por %p5318_p11, %p5317_p10 }
 0x525   : > { %p5320_p13 = pnand %p5319_p12, %p5315_p9 }
 0x527   : > { %5323 = shalt.err (!%p5320_p13)  }
 0x528   : > { %1840 = dma.hbm_to_vmem [thread:$0]  %s1836_s30, 16, %s1838_s8, [#allocation2 + $0x1] }
 0x529   : > { %s1859_s11 = sld [smem:[#allocation4 + %s1858_s0]]  ;;  %s1861_s25 = scalar_lea.vmem %s6186_s9, 100 [#allocation5] }
 0x52a   : > { %s1843_s1 = scalar_lea.hbm %s7892_s3, %s1842_s13  ;;  %s7401_s5 = sshll.u32 %s1861_s25, 4  ;;  %s1872_s5 = int_to_ptr.vmem [resolvable:$true] %s7401_s5 }
 0x52b   : > { %s1852_s12 = sshll.u32 %s1843_s1, 4  ;;  %s1875_s27 = sadd.s32 101, %s6183_s7  ;;  %s1853_s12 = int_to_ptr.hbm [resolvable:$true] %s1852_s12 }
 0x52c   : > { %s5336_s26 = sshra.s32 %s1853_s12, 4  ;;  %s5337_s26 = int_to_ptr.hbm [resolvable:$true] %s5336_s26 }
 0x52d   : > { %s5338_s15 = scalar_lea.hbm %s5337_s26, 1  ;;  %p5341_p1 = scmp.lt.s32.totalorder %s5337_s26, %s7892_s3 }
 0x52e   : > { %p5339_p0 = scmp.ne.s32.totalorder %s5337_s26, %s5338_s15  ;;  %p5342_p2 = scmp.lt.s32.totalorder %s6212_s17, %s5338_s15 }
 0x530   : > { %p5343_p3 = por %p5342_p2, %p5341_p1 }
 0x532   : > { %p5344_p4 = pnand %p5343_p3, %p5339_p0 }
 0x534   : > { %5347 = shalt.err (!%p5344_p4)  }
 0x535   : > { %1857 = dma.hbm_to_vmem [thread:$0]  %s1853_s12, 16, %s1855_s6, [#allocation2 + $0x1] }
 0x536   : > { %s1876_s13 = sld [smem:[#allocation4 + %s1875_s27]]  ;;  %s1878_s0 = scalar_lea.vmem %s6186_s9, 101 [#allocation5] }
 0x537   : > { %s1860_s16 = scalar_lea.hbm %s7892_s3, %s1859_s11  ;;  %s7413_s1 = sshll.u32 %s1878_s0, 4  ;;  %s1889_s1 = int_to_ptr.vmem [resolvable:$true] %s7413_s1 }
 0x538   : > { %s1869_s18 = sshll.u32 %s1860_s16, 4  ;;  %s1892_s26 = sadd.s32 102, %s6183_s7  ;;  %s1870_s18 = int_to_ptr.hbm [resolvable:$true] %s1869_s18 }
 0x539   : > { %s5360_s15 = sshra.s32 %s1870_s18, 4  ;;  %s5361_s15 = int_to_ptr.hbm [resolvable:$true] %s5360_s15 }
 0x53a   : > { %s5362_s8 = scalar_lea.hbm %s5361_s15, 1  ;;  %p5365_p8 = scmp.lt.s32.totalorder %s5361_s15, %s7892_s3 }
 0x53b   : > { %p5363_p7 = scmp.ne.s32.totalorder %s5361_s15, %s5362_s8  ;;  %p5366_p9 = scmp.lt.s32.totalorder %s6212_s17, %s5362_s8 }
 0x53d   : > { %p5367_p10 = por %p5366_p9, %p5365_p8 }
 0x53f   : > { %p5368_p11 = pnand %p5367_p10, %p5363_p7 }
 0x541   : > { %5371 = shalt.err (!%p5368_p11)  }
 0x542   : > { %1874 = dma.hbm_to_vmem [thread:$0]  %s1870_s18, 16, %s1872_s5, [#allocation2 + $0x1] }
 0x543   : > { %s1893_s11 = sld [smem:[#allocation4 + %s1892_s26]]  ;;  %s1895_s27 = scalar_lea.vmem %s6186_s9, 102 [#allocation5] }
 0x544   : > { %s1877_s23 = scalar_lea.hbm %s7892_s3, %s1876_s13  ;;  %s7425_s16 = sshll.u32 %s1895_s27, 4  ;;  %s1906_s16 = int_to_ptr.vmem [resolvable:$true] %s7425_s16 }
 0x545   : > { %s1886_s25 = sshll.u32 %s1877_s23, 4  ;;  %s1909_s15 = sadd.s32 103, %s6183_s7  ;;  %s1887_s25 = int_to_ptr.hbm [resolvable:$true] %s1886_s25 }
 0x546   : > { %s5384_s8 = sshra.s32 %s1887_s25, 4  ;;  %s5385_s8 = int_to_ptr.hbm [resolvable:$true] %s5384_s8 }
 0x547   : > { %s5386_s6 = scalar_lea.hbm %s5385_s8, 1  ;;  %p5389_p13 = scmp.lt.s32.totalorder %s5385_s8, %s7892_s3 }
 0x548   : > { %p5387_p12 = scmp.ne.s32.totalorder %s5385_s8, %s5386_s6  ;;  %p5390_p0 = scmp.lt.s32.totalorder %s6212_s17, %s5386_s6 }
 0x54a   : > { %p5391_p1 = por %p5390_p0, %p5389_p13 }
 0x54c   : > { %p5392_p2 = pnand %p5391_p1, %p5387_p12 }
 0x54e   : > { %5395 = shalt.err (!%p5392_p2)  }
 0x54f   : > { %1891 = dma.hbm_to_vmem [thread:$0]  %s1887_s25, 16, %s1889_s1, [#allocation2 + $0x1] }
 0x550   : > { %s1910_s13 = sld [smem:[#allocation4 + %s1909_s15]]  ;;  %s1912_s26 = scalar_lea.vmem %s6186_s9, 103 [#allocation5] }
 0x551   : > { %s1894_s30 = scalar_lea.hbm %s7892_s3, %s1893_s11  ;;  %s7437_s23 = sshll.u32 %s1912_s26, 4  ;;  %s1923_s23 = int_to_ptr.vmem [resolvable:$true] %s7437_s23 }
 0x552   : > { %s1903_s0 = sshll.u32 %s1894_s30, 4  ;;  %s1926_s8 = sadd.s32 104, %s6183_s7  ;;  %s1904_s0 = int_to_ptr.hbm [resolvable:$true] %s1903_s0 }
 0x553   : > { %s5408_s6 = sshra.s32 %s1904_s0, 4  ;;  %s5409_s6 = int_to_ptr.hbm [resolvable:$true] %s5408_s6 }
 0x554   : > { %s5410_s5 = scalar_lea.hbm %s5409_s6, 1  ;;  %p5413_p4 = scmp.lt.s32.totalorder %s5409_s6, %s7892_s3 }
 0x555   : > { %p5411_p3 = scmp.ne.s32.totalorder %s5409_s6, %s5410_s5  ;;  %p5414_p7 = scmp.lt.s32.totalorder %s6212_s17, %s5410_s5 }
 0x557   : > { %p5415_p8 = por %p5414_p7, %p5413_p4 }
 0x559   : > { %p5416_p9 = pnand %p5415_p8, %p5411_p3 }
 0x55b   : > { %5419 = shalt.err (!%p5416_p9)  }
 0x55c   : > { %1908 = dma.hbm_to_vmem [thread:$0]  %s1904_s0, 16, %s1906_s16, [#allocation2 + $0x1] }
 0x55d   : > { %s1927_s11 = sld [smem:[#allocation4 + %s1926_s8]]  ;;  %s1929_s15 = scalar_lea.vmem %s6186_s9, 104 [#allocation5] }
 0x55e   : > { %s1911_s12 = scalar_lea.hbm %s7892_s3, %s1910_s13  ;;  %s7449_s30 = sshll.u32 %s1929_s15, 4  ;;  %s1940_s30 = int_to_ptr.vmem [resolvable:$true] %s7449_s30 }
 0x55f   : > { %s1920_s27 = sshll.u32 %s1911_s12, 4  ;;  %s1943_s6 = sadd.s32 105, %s6183_s7  ;;  %s1921_s27 = int_to_ptr.hbm [resolvable:$true] %s1920_s27 }
 0x560   : > { %s5432_s5 = sshra.s32 %s1921_s27, 4  ;;  %s5433_s5 = int_to_ptr.hbm [resolvable:$true] %s5432_s5 }
 0x561   : > { %s5434_s1 = scalar_lea.hbm %s5433_s5, 1  ;;  %p5437_p11 = scmp.lt.s32.totalorder %s5433_s5, %s7892_s3 }
 0x562   : > { %p5435_p10 = scmp.ne.s32.totalorder %s5433_s5, %s5434_s1  ;;  %p5438_p12 = scmp.lt.s32.totalorder %s6212_s17, %s5434_s1 }
 0x564   : > { %p5439_p13 = por %p5438_p12, %p5437_p11 }
 0x566   : > { %p5440_p0 = pnand %p5439_p13, %p5435_p10 }
 0x568   : > { %5443 = shalt.err (!%p5440_p0)  }
 0x569   : > { %1925 = dma.hbm_to_vmem [thread:$0]  %s1921_s27, 16, %s1923_s23, [#allocation2 + $0x1] }
 0x56a   : > { %s1944_s13 = sld [smem:[#allocation4 + %s1943_s6]]  ;;  %s1946_s8 = scalar_lea.vmem %s6186_s9, 105 [#allocation5] }
 0x56b   : > { %s1928_s18 = scalar_lea.hbm %s7892_s3, %s1927_s11  ;;  %s7461_s12 = sshll.u32 %s1946_s8, 4  ;;  %s1957_s12 = int_to_ptr.vmem [resolvable:$true] %s7461_s12 }
 0x56c   : > { %s1937_s26 = sshll.u32 %s1928_s18, 4  ;;  %s1960_s5 = sadd.s32 106, %s6183_s7  ;;  %s1938_s26 = int_to_ptr.hbm [resolvable:$true] %s1937_s26 }
 0x56d   : > { %s5456_s1 = sshra.s32 %s1938_s26, 4  ;;  %s5457_s1 = int_to_ptr.hbm [resolvable:$true] %s5456_s1 }
 0x56e   : > { %s5458_s16 = scalar_lea.hbm %s5457_s1, 1  ;;  %p5461_p2 = scmp.lt.s32.totalorder %s5457_s1, %s7892_s3 }
 0x56f   : > { %p5459_p1 = scmp.ne.s32.totalorder %s5457_s1, %s5458_s16  ;;  %p5462_p3 = scmp.lt.s32.totalorder %s6212_s17, %s5458_s16 }
 0x571   : > { %p5463_p4 = por %p5462_p3, %p5461_p2 }
 0x573   : > { %p5464_p7 = pnand %p5463_p4, %p5459_p1 }
 0x575   : > { %5467 = shalt.err (!%p5464_p7)  }
 0x576   : > { %1942 = dma.hbm_to_vmem [thread:$0]  %s1938_s26, 16, %s1940_s30, [#allocation2 + $0x1] }
 0x577   : > { %s1961_s11 = sld [smem:[#allocation4 + %s1960_s5]]  ;;  %s1963_s6 = scalar_lea.vmem %s6186_s9, 106 [#allocation5] }
 0x578   : > { %s1945_s25 = scalar_lea.hbm %s7892_s3, %s1944_s13  ;;  %s7473_s18 = sshll.u32 %s1963_s6, 4  ;;  %s1974_s18 = int_to_ptr.vmem [resolvable:$true] %s7473_s18 }
 0x579   : > { %s1954_s15 = sshll.u32 %s1945_s25, 4  ;;  %s1977_s1 = sadd.s32 107, %s6183_s7  ;;  %s1955_s15 = int_to_ptr.hbm [resolvable:$true] %s1954_s15 }
 0x57a   : > { %s5480_s16 = sshra.s32 %s1955_s15, 4  ;;  %s5481_s16 = int_to_ptr.hbm [resolvable:$true] %s5480_s16 }
 0x57b   : > { %s5482_s23 = scalar_lea.hbm %s5481_s16, 1  ;;  %p5485_p9 = scmp.lt.s32.totalorder %s5481_s16, %s7892_s3 }
 0x57c   : > { %p5483_p8 = scmp.ne.s32.totalorder %s5481_s16, %s5482_s23  ;;  %p5486_p10 = scmp.lt.s32.totalorder %s6212_s17, %s5482_s23 }
 0x57e   : > { %p5487_p11 = por %p5486_p10, %p5485_p9 }
 0x580   : > { %p5488_p12 = pnand %p5487_p11, %p5483_p8 }
 0x582   : > { %5491 = shalt.err (!%p5488_p12)  }
 0x583   : > { %1959 = dma.hbm_to_vmem [thread:$0]  %s1955_s15, 16, %s1957_s12, [#allocation2 + $0x1] }
 0x584   : > { %s1978_s13 = sld [smem:[#allocation4 + %s1977_s1]]  ;;  %s1980_s5 = scalar_lea.vmem %s6186_s9, 107 [#allocation5] }
 0x585   : > { %s1962_s0 = scalar_lea.hbm %s7892_s3, %s1961_s11  ;;  %s7485_s25 = sshll.u32 %s1980_s5, 4  ;;  %s1991_s25 = int_to_ptr.vmem [resolvable:$true] %s7485_s25 }
 0x586   : > { %s1971_s8 = sshll.u32 %s1962_s0, 4  ;;  %s1994_s16 = sadd.s32 108, %s6183_s7  ;;  %s1972_s8 = int_to_ptr.hbm [resolvable:$true] %s1971_s8 }
 0x587   : > { %s5504_s23 = sshra.s32 %s1972_s8, 4  ;;  %s5505_s23 = int_to_ptr.hbm [resolvable:$true] %s5504_s23 }
 0x588   : > { %s5506_s30 = scalar_lea.hbm %s5505_s23, 1  ;;  %p5509_p0 = scmp.lt.s32.totalorder %s5505_s23, %s7892_s3 }
 0x589   : > { %p5507_p13 = scmp.ne.s32.totalorder %s5505_s23, %s5506_s30  ;;  %p5510_p1 = scmp.lt.s32.totalorder %s6212_s17, %s5506_s30 }
 0x58b   : > { %p5511_p2 = por %p5510_p1, %p5509_p0 }
 0x58d   : > { %p5512_p3 = pnand %p5511_p2, %p5507_p13 }
 0x58f   : > { %5515 = shalt.err (!%p5512_p3)  }
 0x590   : > { %1976 = dma.hbm_to_vmem [thread:$0]  %s1972_s8, 16, %s1974_s18, [#allocation2 + $0x1] }
 0x591   : > { %s1995_s11 = sld [smem:[#allocation4 + %s1994_s16]]  ;;  %s1997_s1 = scalar_lea.vmem %s6186_s9, 108 [#allocation5] }
 0x592   : > { %s1979_s27 = scalar_lea.hbm %s7892_s3, %s1978_s13  ;;  %s7497_s0 = sshll.u32 %s1997_s1, 4  ;;  %s2008_s0 = int_to_ptr.vmem [resolvable:$true] %s7497_s0 }
 0x593   : > { %s1988_s6 = sshll.u32 %s1979_s27, 4  ;;  %s2011_s23 = sadd.s32 109, %s6183_s7  ;;  %s1989_s6 = int_to_ptr.hbm [resolvable:$true] %s1988_s6 }
 0x594   : > { %s5528_s30 = sshra.s32 %s1989_s6, 4  ;;  %s5529_s30 = int_to_ptr.hbm [resolvable:$true] %s5528_s30 }
 0x595   : > { %s5530_s12 = scalar_lea.hbm %s5529_s30, 1  ;;  %p5533_p7 = scmp.lt.s32.totalorder %s5529_s30, %s7892_s3 }
 0x596   : > { %p5531_p4 = scmp.ne.s32.totalorder %s5529_s30, %s5530_s12  ;;  %p5534_p8 = scmp.lt.s32.totalorder %s6212_s17, %s5530_s12 }
 0x598   : > { %p5535_p9 = por %p5534_p8, %p5533_p7 }
 0x59a   : > { %p5536_p10 = pnand %p5535_p9, %p5531_p4 }
 0x59c   : > { %5539 = shalt.err (!%p5536_p10)  }
 0x59d   : > { %1993 = dma.hbm_to_vmem [thread:$0]  %s1989_s6, 16, %s1991_s25, [#allocation2 + $0x1] }
 0x59e   : > { %s2012_s13 = sld [smem:[#allocation4 + %s2011_s23]]  ;;  %s2014_s16 = scalar_lea.vmem %s6186_s9, 109 [#allocation5] }
 0x59f   : > { %s1996_s26 = scalar_lea.hbm %s7892_s3, %s1995_s11  ;;  %s7509_s27 = sshll.u32 %s2014_s16, 4  ;;  %s2025_s27 = int_to_ptr.vmem [resolvable:$true] %s7509_s27 }
 0x5a0   : > { %s2005_s5 = sshll.u32 %s1996_s26, 4  ;;  %s2028_s30 = sadd.s32 110, %s6183_s7  ;;  %s2006_s5 = int_to_ptr.hbm [resolvable:$true] %s2005_s5 }
 0x5a1   : > { %s5552_s12 = sshra.s32 %s2006_s5, 4  ;;  %s5553_s12 = int_to_ptr.hbm [resolvable:$true] %s5552_s12 }
 0x5a2   : > { %s5554_s18 = scalar_lea.hbm %s5553_s12, 1  ;;  %p5557_p12 = scmp.lt.s32.totalorder %s5553_s12, %s7892_s3 }
 0x5a3   : > { %p5555_p11 = scmp.ne.s32.totalorder %s5553_s12, %s5554_s18  ;;  %p5558_p13 = scmp.lt.s32.totalorder %s6212_s17, %s5554_s18 }
 0x5a5   : > { %p5559_p0 = por %p5558_p13, %p5557_p12 }
 0x5a7   : > { %p5560_p1 = pnand %p5559_p0, %p5555_p11 }
 0x5a9   : > { %5563 = shalt.err (!%p5560_p1)  }
 0x5aa   : > { %2010 = dma.hbm_to_vmem [thread:$0]  %s2006_s5, 16, %s2008_s0, [#allocation2 + $0x1] }
 0x5ab   : > { %s2029_s11 = sld [smem:[#allocation4 + %s2028_s30]]  ;;  %s2031_s23 = scalar_lea.vmem %s6186_s9, 110 [#allocation5] }
 0x5ac   : > { %s2013_s15 = scalar_lea.hbm %s7892_s3, %s2012_s13  ;;  %s7521_s26 = sshll.u32 %s2031_s23, 4  ;;  %s2042_s26 = int_to_ptr.vmem [resolvable:$true] %s7521_s26 }
 0x5ad   : > { %s2022_s1 = sshll.u32 %s2013_s15, 4  ;;  %s2045_s12 = sadd.s32 111, %s6183_s7  ;;  %s2023_s1 = int_to_ptr.hbm [resolvable:$true] %s2022_s1 }
 0x5ae   : > { %s5576_s18 = sshra.s32 %s2023_s1, 4  ;;  %s5577_s18 = int_to_ptr.hbm [resolvable:$true] %s5576_s18 }
 0x5af   : > { %s5578_s25 = scalar_lea.hbm %s5577_s18, 1  ;;  %p5581_p3 = scmp.lt.s32.totalorder %s5577_s18, %s7892_s3 }
 0x5b0   : > { %p5579_p2 = scmp.ne.s32.totalorder %s5577_s18, %s5578_s25  ;;  %p5582_p4 = scmp.lt.s32.totalorder %s6212_s17, %s5578_s25 }
 0x5b2   : > { %p5583_p7 = por %p5582_p4, %p5581_p3 }
 0x5b4   : > { %p5584_p8 = pnand %p5583_p7, %p5579_p2 }
 0x5b6   : > { %5587 = shalt.err (!%p5584_p8)  }
 0x5b7   : > { %2027 = dma.hbm_to_vmem [thread:$0]  %s2023_s1, 16, %s2025_s27, [#allocation2 + $0x1] }
 0x5b8   : > { %s2046_s13 = sld [smem:[#allocation4 + %s2045_s12]]  ;;  %s2048_s30 = scalar_lea.vmem %s6186_s9, 111 [#allocation5] }
 0x5b9   : > { %s2030_s8 = scalar_lea.hbm %s7892_s3, %s2029_s11  ;;  %s7533_s15 = sshll.u32 %s2048_s30, 4  ;;  %s2059_s15 = int_to_ptr.vmem [resolvable:$true] %s7533_s15 }
 0x5ba   : > { %s2039_s16 = sshll.u32 %s2030_s8, 4  ;;  %s2062_s18 = sadd.s32 112, %s6183_s7  ;;  %s2040_s16 = int_to_ptr.hbm [resolvable:$true] %s2039_s16 }
 0x5bb   : > { %s5600_s25 = sshra.s32 %s2040_s16, 4  ;;  %s5601_s25 = int_to_ptr.hbm [resolvable:$true] %s5600_s25 }
 0x5bc   : > { %s5602_s0 = scalar_lea.hbm %s5601_s25, 1  ;;  %p5605_p10 = scmp.lt.s32.totalorder %s5601_s25, %s7892_s3 }
 0x5bd   : > { %p5603_p9 = scmp.ne.s32.totalorder %s5601_s25, %s5602_s0  ;;  %p5606_p11 = scmp.lt.s32.totalorder %s6212_s17, %s5602_s0 }
 0x5bf   : > { %p5607_p12 = por %p5606_p11, %p5605_p10 }
 0x5c1   : > { %p5608_p13 = pnand %p5607_p12, %p5603_p9 }
 0x5c3   : > { %5611 = shalt.err (!%p5608_p13)  }
 0x5c4   : > { %2044 = dma.hbm_to_vmem [thread:$0]  %s2040_s16, 16, %s2042_s26, [#allocation2 + $0x1] }
 0x5c5   : > { %s2063_s11 = sld [smem:[#allocation4 + %s2062_s18]]  ;;  %s2065_s12 = scalar_lea.vmem %s6186_s9, 112 [#allocation5] }
 0x5c6   : > { %s2047_s6 = scalar_lea.hbm %s7892_s3, %s2046_s13  ;;  %s7545_s8 = sshll.u32 %s2065_s12, 4  ;;  %s2076_s8 = int_to_ptr.vmem [resolvable:$true] %s7545_s8 }
 0x5c7   : > { %s2056_s23 = sshll.u32 %s2047_s6, 4  ;;  %s2079_s25 = sadd.s32 113, %s6183_s7  ;;  %s2057_s23 = int_to_ptr.hbm [resolvable:$true] %s2056_s23 }
 0x5c8   : > { %s5624_s0 = sshra.s32 %s2057_s23, 4  ;;  %s5625_s0 = int_to_ptr.hbm [resolvable:$true] %s5624_s0 }
 0x5c9   : > { %s5626_s27 = scalar_lea.hbm %s5625_s0, 1  ;;  %p5629_p1 = scmp.lt.s32.totalorder %s5625_s0, %s7892_s3 }
 0x5ca   : > { %p5627_p0 = scmp.ne.s32.totalorder %s5625_s0, %s5626_s27  ;;  %p5630_p2 = scmp.lt.s32.totalorder %s6212_s17, %s5626_s27 }
 0x5cc   : > { %p5631_p3 = por %p5630_p2, %p5629_p1 }
 0x5ce   : > { %p5632_p4 = pnand %p5631_p3, %p5627_p0 }
 0x5d0   : > { %5635 = shalt.err (!%p5632_p4)  }
 0x5d1   : > { %2061 = dma.hbm_to_vmem [thread:$0]  %s2057_s23, 16, %s2059_s15, [#allocation2 + $0x1] }
 0x5d2   : > { %s2080_s13 = sld [smem:[#allocation4 + %s2079_s25]]  ;;  %s2082_s18 = scalar_lea.vmem %s6186_s9, 113 [#allocation5] }
 0x5d3   : > { %s2064_s5 = scalar_lea.hbm %s7892_s3, %s2063_s11  ;;  %s7557_s6 = sshll.u32 %s2082_s18, 4  ;;  %s2093_s6 = int_to_ptr.vmem [resolvable:$true] %s7557_s6 }
 0x5d4   : > { %s2073_s30 = sshll.u32 %s2064_s5, 4  ;;  %s2096_s0 = sadd.s32 114, %s6183_s7  ;;  %s2074_s30 = int_to_ptr.hbm [resolvable:$true] %s2073_s30 }
 0x5d5   : > { %s5648_s27 = sshra.s32 %s2074_s30, 4  ;;  %s5649_s27 = int_to_ptr.hbm [resolvable:$true] %s5648_s27 }
 0x5d6   : > { %s5650_s26 = scalar_lea.hbm %s5649_s27, 1  ;;  %p5653_p8 = scmp.lt.s32.totalorder %s5649_s27, %s7892_s3 }
 0x5d7   : > { %p5651_p7 = scmp.ne.s32.totalorder %s5649_s27, %s5650_s26  ;;  %p5654_p9 = scmp.lt.s32.totalorder %s6212_s17, %s5650_s26 }
 0x5d9   : > { %p5655_p10 = por %p5654_p9, %p5653_p8 }
 0x5db   : > { %p5656_p11 = pnand %p5655_p10, %p5651_p7 }
 0x5dd   : > { %5659 = shalt.err (!%p5656_p11)  }
 0x5de   : > { %2078 = dma.hbm_to_vmem [thread:$0]  %s2074_s30, 16, %s2076_s8, [#allocation2 + $0x1] }
 0x5df   : > { %s2097_s11 = sld [smem:[#allocation4 + %s2096_s0]]  ;;  %s2099_s25 = scalar_lea.vmem %s6186_s9, 114 [#allocation5] }
 0x5e0   : > { %s2081_s1 = scalar_lea.hbm %s7892_s3, %s2080_s13  ;;  %s7569_s5 = sshll.u32 %s2099_s25, 4  ;;  %s2110_s5 = int_to_ptr.vmem [resolvable:$true] %s7569_s5 }
 0x5e1   : > { %s2090_s12 = sshll.u32 %s2081_s1, 4  ;;  %s2113_s27 = sadd.s32 115, %s6183_s7  ;;  %s2091_s12 = int_to_ptr.hbm [resolvable:$true] %s2090_s12 }
 0x5e2   : > { %s5672_s26 = sshra.s32 %s2091_s12, 4  ;;  %s5673_s26 = int_to_ptr.hbm [resolvable:$true] %s5672_s26 }
 0x5e3   : > { %s5674_s15 = scalar_lea.hbm %s5673_s26, 1  ;;  %p5677_p13 = scmp.lt.s32.totalorder %s5673_s26, %s7892_s3 }
 0x5e4   : > { %p5675_p12 = scmp.ne.s32.totalorder %s5673_s26, %s5674_s15  ;;  %p5678_p0 = scmp.lt.s32.totalorder %s6212_s17, %s5674_s15 }
 0x5e6   : > { %p5679_p1 = por %p5678_p0, %p5677_p13 }
 0x5e8   : > { %p5680_p2 = pnand %p5679_p1, %p5675_p12 }
 0x5ea   : > { %5683 = shalt.err (!%p5680_p2)  }
 0x5eb   : > { %2095 = dma.hbm_to_vmem [thread:$0]  %s2091_s12, 16, %s2093_s6, [#allocation2 + $0x1] }
 0x5ec   : > { %s2114_s13 = sld [smem:[#allocation4 + %s2113_s27]]  ;;  %s2116_s0 = scalar_lea.vmem %s6186_s9, 115 [#allocation5] }
 0x5ed   : > { %s2098_s16 = scalar_lea.hbm %s7892_s3, %s2097_s11  ;;  %s7581_s1 = sshll.u32 %s2116_s0, 4  ;;  %s2127_s1 = int_to_ptr.vmem [resolvable:$true] %s7581_s1 }
 0x5ee   : > { %s2107_s18 = sshll.u32 %s2098_s16, 4  ;;  %s2130_s26 = sadd.s32 116, %s6183_s7  ;;  %s2108_s18 = int_to_ptr.hbm [resolvable:$true] %s2107_s18 }
 0x5ef   : > { %s5696_s15 = sshra.s32 %s2108_s18, 4  ;;  %s5697_s15 = int_to_ptr.hbm [resolvable:$true] %s5696_s15 }
 0x5f0   : > { %s5698_s8 = scalar_lea.hbm %s5697_s15, 1  ;;  %p5701_p4 = scmp.lt.s32.totalorder %s5697_s15, %s7892_s3 }
 0x5f1   : > { %p5699_p3 = scmp.ne.s32.totalorder %s5697_s15, %s5698_s8  ;;  %p5702_p7 = scmp.lt.s32.totalorder %s6212_s17, %s5698_s8 }
 0x5f3   : > { %p5703_p8 = por %p5702_p7, %p5701_p4 }
 0x5f5   : > { %p5704_p9 = pnand %p5703_p8, %p5699_p3 }
 0x5f7   : > { %5707 = shalt.err (!%p5704_p9)  }
 0x5f8   : > { %2112 = dma.hbm_to_vmem [thread:$0]  %s2108_s18, 16, %s2110_s5, [#allocation2 + $0x1] }
 0x5f9   : > { %s2131_s11 = sld [smem:[#allocation4 + %s2130_s26]]  ;;  %s2133_s27 = scalar_lea.vmem %s6186_s9, 116 [#allocation5] }
 0x5fa   : > { %s2115_s23 = scalar_lea.hbm %s7892_s3, %s2114_s13  ;;  %s7593_s16 = sshll.u32 %s2133_s27, 4  ;;  %s2144_s16 = int_to_ptr.vmem [resolvable:$true] %s7593_s16 }
 0x5fb   : > { %s2124_s25 = sshll.u32 %s2115_s23, 4  ;;  %s2147_s15 = sadd.s32 117, %s6183_s7  ;;  %s2125_s25 = int_to_ptr.hbm [resolvable:$true] %s2124_s25 }
 0x5fc   : > { %s5720_s8 = sshra.s32 %s2125_s25, 4  ;;  %s5721_s8 = int_to_ptr.hbm [resolvable:$true] %s5720_s8 }
 0x5fd   : > { %s5722_s6 = scalar_lea.hbm %s5721_s8, 1  ;;  %p5725_p11 = scmp.lt.s32.totalorder %s5721_s8, %s7892_s3 }
 0x5fe   : > { %p5723_p10 = scmp.ne.s32.totalorder %s5721_s8, %s5722_s6  ;;  %p5726_p12 = scmp.lt.s32.totalorder %s6212_s17, %s5722_s6 }
 0x600   : > { %p5727_p13 = por %p5726_p12, %p5725_p11 }
 0x602   : > { %p5728_p0 = pnand %p5727_p13, %p5723_p10 }
 0x604   : > { %5731 = shalt.err (!%p5728_p0)  }
 0x605   : > { %2129 = dma.hbm_to_vmem [thread:$0]  %s2125_s25, 16, %s2127_s1, [#allocation2 + $0x1] }
 0x606   : > { %s2148_s13 = sld [smem:[#allocation4 + %s2147_s15]]  ;;  %s2150_s26 = scalar_lea.vmem %s6186_s9, 117 [#allocation5] }
 0x607   : > { %s2132_s30 = scalar_lea.hbm %s7892_s3, %s2131_s11  ;;  %s7605_s23 = sshll.u32 %s2150_s26, 4  ;;  %s2161_s23 = int_to_ptr.vmem [resolvable:$true] %s7605_s23 }
 0x608   : > { %s2141_s0 = sshll.u32 %s2132_s30, 4  ;;  %s2164_s8 = sadd.s32 118, %s6183_s7  ;;  %s2142_s0 = int_to_ptr.hbm [resolvable:$true] %s2141_s0 }
 0x609   : > { %s5744_s6 = sshra.s32 %s2142_s0, 4  ;;  %s5745_s6 = int_to_ptr.hbm [resolvable:$true] %s5744_s6 }
 0x60a   : > { %s5746_s5 = scalar_lea.hbm %s5745_s6, 1  ;;  %p5749_p2 = scmp.lt.s32.totalorder %s5745_s6, %s7892_s3 }
 0x60b   : > { %p5747_p1 = scmp.ne.s32.totalorder %s5745_s6, %s5746_s5  ;;  %p5750_p3 = scmp.lt.s32.totalorder %s6212_s17, %s5746_s5 }
 0x60d   : > { %p5751_p4 = por %p5750_p3, %p5749_p2 }
 0x60f   : > { %p5752_p7 = pnand %p5751_p4, %p5747_p1 }
 0x611   : > { %5755 = shalt.err (!%p5752_p7)  }
 0x612   : > { %2146 = dma.hbm_to_vmem [thread:$0]  %s2142_s0, 16, %s2144_s16, [#allocation2 + $0x1] }
 0x613   : > { %s2165_s11 = sld [smem:[#allocation4 + %s2164_s8]]  ;;  %s2167_s15 = scalar_lea.vmem %s6186_s9, 118 [#allocation5] }
 0x614   : > { %s2149_s12 = scalar_lea.hbm %s7892_s3, %s2148_s13  ;;  %s7617_s30 = sshll.u32 %s2167_s15, 4  ;;  %s2178_s30 = int_to_ptr.vmem [resolvable:$true] %s7617_s30 }
 0x615   : > { %s2158_s27 = sshll.u32 %s2149_s12, 4  ;;  %s2181_s6 = sadd.s32 119, %s6183_s7  ;;  %s2159_s27 = int_to_ptr.hbm [resolvable:$true] %s2158_s27 }
 0x616   : > { %s5768_s5 = sshra.s32 %s2159_s27, 4  ;;  %s5769_s5 = int_to_ptr.hbm [resolvable:$true] %s5768_s5 }
 0x617   : > { %s5770_s1 = scalar_lea.hbm %s5769_s5, 1  ;;  %p5773_p9 = scmp.lt.s32.totalorder %s5769_s5, %s7892_s3 }
 0x618   : > { %p5771_p8 = scmp.ne.s32.totalorder %s5769_s5, %s5770_s1  ;;  %p5774_p10 = scmp.lt.s32.totalorder %s6212_s17, %s5770_s1 }
 0x61a   : > { %p5775_p11 = por %p5774_p10, %p5773_p9 }
 0x61c   : > { %p5776_p12 = pnand %p5775_p11, %p5771_p8 }
 0x61e   : > { %5779 = shalt.err (!%p5776_p12)  }
 0x61f   : > { %2163 = dma.hbm_to_vmem [thread:$0]  %s2159_s27, 16, %s2161_s23, [#allocation2 + $0x1] }
 0x620   : > { %s2182_s13 = sld [smem:[#allocation4 + %s2181_s6]]  ;;  %s2184_s8 = scalar_lea.vmem %s6186_s9, 119 [#allocation5] }
 0x621   : > { %s2166_s18 = scalar_lea.hbm %s7892_s3, %s2165_s11  ;;  %s7629_s12 = sshll.u32 %s2184_s8, 4  ;;  %s2195_s12 = int_to_ptr.vmem [resolvable:$true] %s7629_s12 }
 0x622   : > { %s2175_s26 = sshll.u32 %s2166_s18, 4  ;;  %s2198_s5 = sadd.s32 120, %s6183_s7  ;;  %s2176_s26 = int_to_ptr.hbm [resolvable:$true] %s2175_s26 }
 0x623   : > { %s5792_s1 = sshra.s32 %s2176_s26, 4  ;;  %s5793_s1 = int_to_ptr.hbm [resolvable:$true] %s5792_s1 }
 0x624   : > { %s5794_s16 = scalar_lea.hbm %s5793_s1, 1  ;;  %p5797_p0 = scmp.lt.s32.totalorder %s5793_s1, %s7892_s3 }
 0x625   : > { %p5795_p13 = scmp.ne.s32.totalorder %s5793_s1, %s5794_s16  ;;  %p5798_p1 = scmp.lt.s32.totalorder %s6212_s17, %s5794_s16 }
 0x627   : > { %p5799_p2 = por %p5798_p1, %p5797_p0 }
 0x629   : > { %p5800_p3 = pnand %p5799_p2, %p5795_p13 }
 0x62b   : > { %5803 = shalt.err (!%p5800_p3)  }
 0x62c   : > { %2180 = dma.hbm_to_vmem [thread:$0]  %s2176_s26, 16, %s2178_s30, [#allocation2 + $0x1] }
 0x62d   : > { %s2199_s11 = sld [smem:[#allocation4 + %s2198_s5]]  ;;  %s2201_s6 = scalar_lea.vmem %s6186_s9, 120 [#allocation5] }
 0x62e   : > { %s2183_s25 = scalar_lea.hbm %s7892_s3, %s2182_s13  ;;  %s7641_s18 = sshll.u32 %s2201_s6, 4  ;;  %s2212_s18 = int_to_ptr.vmem [resolvable:$true] %s7641_s18 }
 0x62f   : > { %s2192_s15 = sshll.u32 %s2183_s25, 4  ;;  %s2215_s1 = sadd.s32 121, %s6183_s7  ;;  %s2193_s15 = int_to_ptr.hbm [resolvable:$true] %s2192_s15 }
 0x630   : > { %s5816_s16 = sshra.s32 %s2193_s15, 4  ;;  %s5817_s16 = int_to_ptr.hbm [resolvable:$true] %s5816_s16 }
 0x631   : > { %s5818_s23 = scalar_lea.hbm %s5817_s16, 1  ;;  %p5821_p7 = scmp.lt.s32.totalorder %s5817_s16, %s7892_s3 }
 0x632   : > { %p5819_p4 = scmp.ne.s32.totalorder %s5817_s16, %s5818_s23  ;;  %p5822_p8 = scmp.lt.s32.totalorder %s6212_s17, %s5818_s23 }
 0x634   : > { %p5823_p9 = por %p5822_p8, %p5821_p7 }
 0x636   : > { %p5824_p10 = pnand %p5823_p9, %p5819_p4 }
 0x638   : > { %5827 = shalt.err (!%p5824_p10)  }
 0x639   : > { %2197 = dma.hbm_to_vmem [thread:$0]  %s2193_s15, 16, %s2195_s12, [#allocation2 + $0x1] }
 0x63a   : > { %s2216_s13 = sld [smem:[#allocation4 + %s2215_s1]]  ;;  %s2218_s5 = scalar_lea.vmem %s6186_s9, 121 [#allocation5] }
 0x63b   : > { %s2200_s0 = scalar_lea.hbm %s7892_s3, %s2199_s11  ;;  %s7653_s25 = sshll.u32 %s2218_s5, 4  ;;  %s2229_s25 = int_to_ptr.vmem [resolvable:$true] %s7653_s25 }
 0x63c   : > { %s2209_s8 = sshll.u32 %s2200_s0, 4  ;;  %s2232_s16 = sadd.s32 122, %s6183_s7  ;;  %s2210_s8 = int_to_ptr.hbm [resolvable:$true] %s2209_s8 }
 0x63d   : > { %s5840_s23 = sshra.s32 %s2210_s8, 4  ;;  %s5841_s23 = int_to_ptr.hbm [resolvable:$true] %s5840_s23 }
 0x63e   : > { %s5842_s30 = scalar_lea.hbm %s5841_s23, 1  ;;  %p5845_p12 = scmp.lt.s32.totalorder %s5841_s23, %s7892_s3 }
 0x63f   : > { %p5843_p11 = scmp.ne.s32.totalorder %s5841_s23, %s5842_s30  ;;  %p5846_p13 = scmp.lt.s32.totalorder %s6212_s17, %s5842_s30 }
 0x641   : > { %p5847_p0 = por %p5846_p13, %p5845_p12 }
 0x643   : > { %p5848_p1 = pnand %p5847_p0, %p5843_p11 }
 0x645   : > { %5851 = shalt.err (!%p5848_p1)  }
 0x646   : > { %2214 = dma.hbm_to_vmem [thread:$0]  %s2210_s8, 16, %s2212_s18, [#allocation2 + $0x1] }
 0x647   : > { %s2233_s11 = sld [smem:[#allocation4 + %s2232_s16]]  ;;  %s2235_s1 = scalar_lea.vmem %s6186_s9, 122 [#allocation5] }
 0x648   : > { %s2217_s27 = scalar_lea.hbm %s7892_s3, %s2216_s13  ;;  %s7665_s0 = sshll.u32 %s2235_s1, 4  ;;  %s2246_s0 = int_to_ptr.vmem [resolvable:$true] %s7665_s0 }
 0x649   : > { %s2226_s6 = sshll.u32 %s2217_s27, 4  ;;  %s2249_s23 = sadd.s32 123, %s6183_s7  ;;  %s2227_s6 = int_to_ptr.hbm [resolvable:$true] %s2226_s6 }
 0x64a   : > { %s5864_s30 = sshra.s32 %s2227_s6, 4  ;;  %s5865_s30 = int_to_ptr.hbm [resolvable:$true] %s5864_s30 }
 0x64b   : > { %s5866_s12 = scalar_lea.hbm %s5865_s30, 1  ;;  %p5869_p3 = scmp.lt.s32.totalorder %s5865_s30, %s7892_s3 }
 0x64c   : > { %p5867_p2 = scmp.ne.s32.totalorder %s5865_s30, %s5866_s12  ;;  %p5870_p4 = scmp.lt.s32.totalorder %s6212_s17, %s5866_s12 }
 0x64e   : > { %p5871_p7 = por %p5870_p4, %p5869_p3 }
 0x650   : > { %p5872_p8 = pnand %p5871_p7, %p5867_p2 }
 0x652   : > { %5875 = shalt.err (!%p5872_p8)  }
 0x653   : > { %2231 = dma.hbm_to_vmem [thread:$0]  %s2227_s6, 16, %s2229_s25, [#allocation2 + $0x1] }
 0x654   : > { %s2250_s13 = sld [smem:[#allocation4 + %s2249_s23]]  ;;  %s2252_s16 = scalar_lea.vmem %s6186_s9, 123 [#allocation5] }
 0x655   : > { %s2234_s26 = scalar_lea.hbm %s7892_s3, %s2233_s11  ;;  %s7677_s27 = sshll.u32 %s2252_s16, 4  ;;  %s2263_s27 = int_to_ptr.vmem [resolvable:$true] %s7677_s27 }
 0x656   : > { %s2243_s5 = sshll.u32 %s2234_s26, 4  ;;  %s2266_s30 = sadd.s32 124, %s6183_s7  ;;  %s2244_s5 = int_to_ptr.hbm [resolvable:$true] %s2243_s5 }
 0x657   : > { %s5888_s12 = sshra.s32 %s2244_s5, 4  ;;  %s5889_s12 = int_to_ptr.hbm [resolvable:$true] %s5888_s12 }
 0x658   : > { %s5890_s18 = scalar_lea.hbm %s5889_s12, 1  ;;  %p5893_p10 = scmp.lt.s32.totalorder %s5889_s12, %s7892_s3 }
 0x659   : > { %p5891_p9 = scmp.ne.s32.totalorder %s5889_s12, %s5890_s18  ;;  %p5894_p11 = scmp.lt.s32.totalorder %s6212_s17, %s5890_s18 }
 0x65b   : > { %p5895_p12 = por %p5894_p11, %p5893_p10 }
 0x65d   : > { %p5896_p13 = pnand %p5895_p12, %p5891_p9 }
 0x65f   : > { %5899 = shalt.err (!%p5896_p13)  }
 0x660   : > { %2248 = dma.hbm_to_vmem [thread:$0]  %s2244_s5, 16, %s2246_s0, [#allocation2 + $0x1] }
 0x661   : > { %s2267_s11 = sld [smem:[#allocation4 + %s2266_s30]]  ;;  %s2269_s23 = scalar_lea.vmem %s6186_s9, 124 [#allocation5] }
 0x662   : > { %s2251_s15 = scalar_lea.hbm %s7892_s3, %s2250_s13  ;;  %s7689_s26 = sshll.u32 %s2269_s23, 4  ;;  %s2280_s26 = int_to_ptr.vmem [resolvable:$true] %s7689_s26 }
 0x663   : > { %s2260_s1 = sshll.u32 %s2251_s15, 4  ;;  %s2283_s12 = sadd.s32 125, %s6183_s7  ;;  %s2261_s1 = int_to_ptr.hbm [resolvable:$true] %s2260_s1 }
 0x664   : > { %s5912_s18 = sshra.s32 %s2261_s1, 4  ;;  %s5913_s18 = int_to_ptr.hbm [resolvable:$true] %s5912_s18 }
 0x665   : > { %s5914_s25 = scalar_lea.hbm %s5913_s18, 1  ;;  %p5917_p1 = scmp.lt.s32.totalorder %s5913_s18, %s7892_s3 }
 0x666   : > { %p5915_p0 = scmp.ne.s32.totalorder %s5913_s18, %s5914_s25  ;;  %p5918_p2 = scmp.lt.s32.totalorder %s6212_s17, %s5914_s25 }
 0x668   : > { %p5919_p3 = por %p5918_p2, %p5917_p1 }
 0x66a   : > { %p5920_p4 = pnand %p5919_p3, %p5915_p0 }
 0x66c   : > { %5923 = shalt.err (!%p5920_p4)  }
 0x66d   : > { %2265 = dma.hbm_to_vmem [thread:$0]  %s2261_s1, 16, %s2263_s27, [#allocation2 + $0x1] }
 0x66e   : > { %s2284_s13 = sld [smem:[#allocation4 + %s2283_s12]]  ;;  %s2286_s30 = scalar_lea.vmem %s6186_s9, 125 [#allocation5] }
 0x66f   : > { %s2268_s8 = scalar_lea.hbm %s7892_s3, %s2267_s11  ;;  %s7701_s15 = sshll.u32 %s2286_s30, 4  ;;  %s2297_s15 = int_to_ptr.vmem [resolvable:$true] %s7701_s15 }
 0x670   : > { %s2277_s16 = sshll.u32 %s2268_s8, 4  ;;  %s2300_s18 = sadd.s32 126, %s6183_s7  ;;  %s2278_s16 = int_to_ptr.hbm [resolvable:$true] %s2277_s16 }
 0x671   : > { %s5936_s25 = sshra.s32 %s2278_s16, 4  ;;  %s5937_s25 = int_to_ptr.hbm [resolvable:$true] %s5936_s25 }
 0x672   : > { %s5938_s0 = scalar_lea.hbm %s5937_s25, 1  ;;  %p5941_p8 = scmp.lt.s32.totalorder %s5937_s25, %s7892_s3 }
 0x673   : > { %p5939_p7 = scmp.ne.s32.totalorder %s5937_s25, %s5938_s0  ;;  %p5942_p9 = scmp.lt.s32.totalorder %s6212_s17, %s5938_s0 }
 0x675   : > { %p5943_p10 = por %p5942_p9, %p5941_p8 }
 0x677   : > { %p5944_p11 = pnand %p5943_p10, %p5939_p7 }
 0x679   : > { %5947 = shalt.err (!%p5944_p11)  }
 0x67a   : > { %2282 = dma.hbm_to_vmem [thread:$0]  %s2278_s16, 16, %s2280_s26, [#allocation2 + $0x1] }
 0x67b   : > { %s2301_s11 = sld [smem:[#allocation4 + %s2300_s18]]  ;;  %s2303_s12 = scalar_lea.vmem %s6186_s9, 126 [#allocation5] }
 0x67c   : > { %s2285_s6 = scalar_lea.hbm %s7892_s3, %s2284_s13  ;;  %s7713_s8 = sshll.u32 %s2303_s12, 4  ;;  %s2314_s8 = int_to_ptr.vmem [resolvable:$true] %s7713_s8 }
 0x67d   : > { %s2294_s23 = sshll.u32 %s2285_s6, 4  ;;  %s2317_s25 = sadd.s32 127, %s6183_s7  ;;  %s2295_s23 = int_to_ptr.hbm [resolvable:$true] %s2294_s23 }
 0x67e   : > { %s5960_s0 = sshra.s32 %s2295_s23, 4  ;;  %s5961_s0 = int_to_ptr.hbm [resolvable:$true] %s5960_s0 }
 0x67f   : > { %s5962_s27 = scalar_lea.hbm %s5961_s0, 1  ;;  %p5965_p13 = scmp.lt.s32.totalorder %s5961_s0, %s7892_s3 }
 0x680   : > { %p5963_p12 = scmp.ne.s32.totalorder %s5961_s0, %s5962_s27  ;;  %p5966_p0 = scmp.lt.s32.totalorder %s6212_s17, %s5962_s27 }
 0x682   : > { %p5967_p1 = por %p5966_p0, %p5965_p13 }
 0x684   : > { %p5968_p2 = pnand %p5967_p1, %p5963_p12 }
 0x686   : > { %5971 = shalt.err (!%p5968_p2)  }
 0x687   : > { %2299 = dma.hbm_to_vmem [thread:$0]  %s2295_s23, 16, %s2297_s15, [#allocation2 + $0x1] }
 0x688   : > { %s2318_s13 = sld [smem:[#allocation4 + %s2317_s25]]  ;;  %s2320_s18 = scalar_lea.vmem %s6186_s9, 127 [#allocation5] }
 0x689   : > { %s2302_s5 = scalar_lea.hbm %s7892_s3, %s2301_s11  ;;  %s2330_s6 = sshll.u32 %s2320_s18, 4  ;;  %s2331_s6 = int_to_ptr.vmem [resolvable:$true] %s2330_s6 }
 0x68a   : > { %s2311_s30 = sshll.u32 %s2302_s5, 4  ;;  %s2312_s30 = int_to_ptr.hbm [resolvable:$true] %s2311_s30 }
 0x68b   : > { %s5984_s26 = sshra.s32 %s2312_s30, 4  ;;  %s5985_s26 = int_to_ptr.hbm [resolvable:$true] %s5984_s26 }
 0x68c   : > { %s5986_s0 = scalar_lea.hbm %s5985_s26, 1  ;;  %p5989_p4 = scmp.lt.s32.totalorder %s5985_s26, %s7892_s3 }
 0x68d   : > { %p5987_p3 = scmp.ne.s32.totalorder %s5985_s26, %s5986_s0  ;;  %p5990_p7 = scmp.lt.s32.totalorder %s6212_s17, %s5986_s0 }
 0x68f   : > { %p5991_p8 = por %p5990_p7, %p5989_p4 }
 0x691   : > { %p5992_p9 = pnand %p5991_p8, %p5987_p3 }
 0x693   : > { %5995 = shalt.err (!%p5992_p9)  }
 0x694   : > { %2316 = dma.hbm_to_vmem [thread:$0]  %s2312_s30, 16, %s2314_s8, [#allocation2 + $0x1] }
 0x695   : > { %s2319_s11 = scalar_lea.hbm %s7892_s3, %s2318_s13 }
 0x696   : > { %s2328_s25 = sshll.u32 %s2319_s11, 4  ;;  %s2329_s25 = int_to_ptr.hbm [resolvable:$true] %s2328_s25 }
 0x697   : > { %s6008_s18 = sshra.s32 %s2329_s25, 4  ;;  %s6009_s18 = int_to_ptr.hbm [resolvable:$true] %s6008_s18 }
 0x698   : > { %s6010_s1 = scalar_lea.hbm %s6009_s18, 1  ;;  %p6013_p11 = scmp.lt.s32.totalorder %s6009_s18, %s7892_s3 }
 0x699   : > { %p6011_p10 = scmp.ne.s32.totalorder %s6009_s18, %s6010_s1  ;;  %p6014_p12 = scmp.lt.s32.totalorder %s6212_s17, %s6010_s1 }
 0x69b   : > { %p6015_p13 = por %p6014_p12, %p6013_p11 }
 0x69d   : > { %p6016_p0 = pnand %p6015_p13, %p6011_p10 }
 0x69f   : > { %6019 = shalt.err (!%p6016_p0)  }
 0x6a0   : > { %2333 = dma.hbm_to_vmem [thread:$0]  %s2329_s25, 16, %s2331_s6, [#allocation2 + $0x1] }
 0x6a1   : > { %6078 = dma.done.wait [#allocation2], 1024 }
 0x6a2   : > { %6079 = vsyncadd [#allocation2], 4294966272  ;;  %v6103_v0 = vmov 0   ;;  %v2341_v1 = vld [vmem:[%s6194_s14 + $0x20] sm:$0xff]  ;;  %v2342_v2 = vld [vmem:[%s6194_s14 + $0x28] sm:$0xff]  ;;  %v6104_v7 = vmov 0.0  }
 0x6a3   : > { %2915 = vset.pattern.permute.xlu1 %v6103_v0  ;;  %2904 = vset.pattern.permute.xlu0 %v6103_v0  ;;  %v2337_v3 = vld [vmem:[%s6194_s14] sm:$0xff]  ;;  %vm2349_vm0 = vcmp.ne.s32.totalorder %v2341_v1, 0  ;;  %vm2350_vm1 = vcmp.ne.s32.totalorder %v2342_v2, 0  ;;  %v2338_v4 = vld [vmem:[%s6194_s14 + $0x8] sm:$0xff]  ;;  %v2343_v5 = vld [vmem:[%s6194_s14 + $0x30] sm:$0xff] }
 0x6a4   : > { %vm2345_vm2 = vcmp.ne.s32.totalorder %v2337_v3, 0  ;;  %v2344_v6 = vld [vmem:[%s6194_s14 + $0x38] sm:$0xff]  ;;  %v2813_v8 = vsel %vm2349_vm0, 1.0, %v6104_v7  ;;  %v2814_v9 = vsel %vm2350_vm1, 1.0, %v6104_v7  ;;  %vm2346_vm3 = vcmp.ne.s32.totalorder %v2338_v4, 0  ;;  %v2339_v11 = vld [vmem:[%s6194_s14 + $0x10] sm:$0xff] }
 0x6a5   : > { %v2809_v10 = vsel %vm2345_vm2, 1.0, %v6104_v7  ;;  %v2340_v12 = vld [vmem:[%s6194_s14 + $0x18] sm:$0xff]  ;;  %v2916_v13 = vpack.i.bf16 %v2814_v9, %v2813_v8  ;;  %v2810_v14 = vsel %vm2346_vm3, 1.0, %v6104_v7  ;;  %vm2351_vm4 = vcmp.ne.s32.totalorder %v2343_v5, 0  ;;  %v2373_v22 = vld [vmem:[%s6186_s9 + $0x20] sm:$0xff]  ;;  %v2374_v23 = vld [vmem:[%s6186_s9 + $0x28] sm:$0xff] }
 0x6a6   : > { %vm2352_vm5 = vcmp.ne.s32.totalorder %v2344_v6, 0  ;;  %v2905_v15 = vpack.i.bf16 %v2810_v14, %v2809_v10  ;;  %vm2347_vm6 = vcmp.ne.s32.totalorder %v2339_v11, 0  ;;  %vm2348_vm7 = vcmp.ne.s32.totalorder %v2340_v12, 0  ;;  %v2369_v24 = vld [vmem:[%s6186_s9] sm:$0xff]  ;;  %v2370_v25 = vld [vmem:[%s6186_s9 + $0x8] sm:$0xff]  ;;  %v2375_v39 = vld [vmem:[%s6186_s9 + $0x30] sm:$0xff] }
 0x6a7   : > { %2917 = vperm.xlu1 %2915, %v2916_v13   ;;  %v2815_v16 = vsel %vm2351_vm4, 1.0, %v6104_v7  ;;  %v2816_v17 = vsel %vm2352_vm5, 1.0, %v6104_v7  ;;  %v2811_v18 = vsel %vm2347_vm6, 1.0, %v6104_v7  ;;  %v2812_v19 = vsel %vm2348_vm7, 1.0, %v6104_v7  ;;  %v2389_v28 = vld [vmem:[%s7891_s2 + $0x20] sm:$0xff]  ;;  %v2390_v29 = vld [vmem:[%s7891_s2 + $0x28] sm:$0xff] }
 0x6a8   : > { %2906 = vperm.xlu0 %2904, %v2905_v15   ;;  %v2921_v20 = vpack.i.bf16 %v2816_v17, %v2815_v16  ;;  %v2910_v21 = vpack.i.bf16 %v2812_v19, %v2811_v18  ;;  %v2381_v26 = vmul.f32 11.313708, %v2373_v22  ;;  %v2382_v27 = vmul.f32 11.313708, %v2374_v23  ;;  %v2385_v32 = vld [vmem:[%s7891_s2] sm:$0xff]  ;;  %v2386_v33 = vld [vmem:[%s7891_s2 + $0x8] sm:$0xff] }
 0x6a9   : > { %v2377_v30 = vmul.f32 11.313708, %v2369_v24  ;;  %v2378_v31 = vmul.f32 11.313708, %v2370_v25  ;;  %v2376_v40 = vld [vmem:[%s6186_s9 + $0x38] sm:$0xff]  ;;  %v2371_v44 = vld [vmem:[%s6186_s9 + $0x10] sm:$0xff] }
 0x6aa   : > { %v2397_v34 = vadd.f32 %v2389_v28, %v2381_v26  ;;  %v2398_v35 = vadd.f32 %v2390_v29, %v2382_v27  ;;  %v2372_v45 = vld [vmem:[%s6186_s9 + $0x18] sm:$0xff]  ;;  %v2383_v50 = vmul.f32 11.313708, %v2375_v39  ;;  %v2384_v51 = vmul.f32 11.313708, %v2376_v40  ;;  %v2391_v54 = vld [vmem:[%s7891_s2 + $0x30] sm:$0xff] }
 0x6ab   : > { %v2393_v37 = vadd.f32 %v2385_v32, %v2377_v30  ;;  %v2394_v38 = vadd.f32 %v2386_v33, %v2378_v31  ;;  %v2392_v55 = vld [vmem:[%s7891_s2 + $0x38] sm:$0xff]  ;;  %v2379_v56 = vmul.f32 11.313708, %v2371_v44  ;;  %v2380_v57 = vmul.f32 11.313708, %v2372_v45  ;;  %v2387_v58 = vld [vmem:[%s7891_s2 + $0x10] sm:$0xff] }
 0x6ac   : > { %v2388_v59 = vld [vmem:[%s7891_s2 + $0x18] sm:$0xff]  ;;  %v2399_v60 = vadd.f32 %v2391_v54, %v2383_v50  ;;  %v2400_v61 = vadd.f32 %v2392_v55, %v2384_v51 }
 0x6ad   : > { %v2395_v63 = vadd.f32 %v2387_v58, %v2379_v56  ;;  %v2396_v1 = vadd.f32 %v2388_v59, %v2380_v57 }
 0x6af   : > { %2922 = vperm.xlu1 %2915, %v2921_v20  }
 0x6b0   : > { %2911 = vperm.xlu0 %2904, %v2910_v21  }
 0x719   : > { %v2918_v36 = vpop.permute.xlu1 %2917 }
 0x71a   : > { %v2920_v41 = vunpack.i.h.bf16 %v2918_v36  ;;  %v2919_v42 = vunpack.i.l.bf16 %v2918_v36  ;;  %v2907_v43 = vpop.permute.xlu0 %2906 }
 0x71b   : > { %v2909_v46 = vunpack.i.h.bf16 %v2907_v43  ;;  %v2908_v47 = vunpack.i.l.bf16 %v2907_v43 }
 0x71c   : > { %v2446_v48 = vmul.f32 %v2920_v41, %v2398_v35  ;;  %v2445_v49 = vmul.f32 %v2919_v42, %v2397_v34 }
 0x71d   : > { %v2442_v52 = vmul.f32 %v2909_v46, %v2394_v38  ;;  %v2441_v53 = vmul.f32 %v2908_v47, %v2393_v37 }
 0x71e   : > { %2454 = vst [vmem:[%s6186_s9 + $0x28] sm:$0xff] %v2446_v48 }
 0x71f   : > { %2453 = vst [vmem:[%s6186_s9 + $0x20] sm:$0xff] %v2445_v49 }
 0x720   : > { %2450 = vst [vmem:[%s6186_s9 + $0x8] sm:$0xff] %v2442_v52 }
 0x721   : > { %2449 = vst [vmem:[%s6186_s9] sm:$0xff] %v2441_v53  ;;  %v2923_v62 = vpop.permute.xlu1 %2922 }
 0x722   : > { %v2925_v2 = vunpack.i.h.bf16 %v2923_v62  ;;  %v2924_v3 = vunpack.i.l.bf16 %v2923_v62  ;;  %v2912_v4 = vpop.permute.xlu0 %2911 }
 0x723   : > { %v2914_v5 = vunpack.i.h.bf16 %v2912_v4  ;;  %v2913_v6 = vunpack.i.l.bf16 %v2912_v4 }
 0x724   : > { %v2448_v8 = vmul.f32 %v2925_v2, %v2400_v61  ;;  %v2447_v9 = vmul.f32 %v2924_v3, %v2399_v60 }
 0x725   : > { %v2444_v10 = vmul.f32 %v2914_v5, %v2396_v1  ;;  %v2443_v11 = vmul.f32 %v2913_v6, %v2395_v63 }
 0x726   : > { %2456 = vst [vmem:[%s6186_s9 + $0x38] sm:$0xff] %v2448_v8 }
 0x727   : > { %2455 = vst [vmem:[%s6186_s9 + $0x30] sm:$0xff] %v2447_v9 }
 0x728   : > { %2452 = vst [vmem:[%s6186_s9 + $0x18] sm:$0xff] %v2444_v10 }
 0x729   : > { %2451 = vst [vmem:[%s6186_s9 + $0x10] sm:$0xff] %v2443_v11 }
 0x72a   : > { %6080 = dma.done.wait [#allocation2 + $0x1], 1024 }
 0x72b   : > { %6081 = vsyncadd [#allocation2 + $0x1], 4294966272  ;;  %2937 = vset.pattern.permute.xlu1 %v6103_v0  ;;  %2926 = vset.pattern.permute.xlu0 %v6103_v0  ;;  %v2821_v12 = vld [vmem:[%s6194_s14 + $0x60] sm:$0xff]  ;;  %v2822_v13 = vld [vmem:[%s6194_s14 + $0x68] sm:$0xff]  ;;  %s6052_s26 = scalar_lea.hbm %s7893_s4, 256 }
 0x72c   : > { %v2817_v14 = vld [vmem:[%s6194_s14 + $0x40] sm:$0xff]  ;;  %vm2472_vm8 = vcmp.ne.s32.totalorder %v2821_v12, 0  ;;  %vm2473_vm9 = vcmp.ne.s32.totalorder %v2822_v13, 0  ;;  %v2818_v15 = vld [vmem:[%s6194_s14 + $0x48] sm:$0xff]  ;;  %v2823_v16 = vld [vmem:[%s6194_s14 + $0x70] sm:$0xff] }
 0x72d   : > { %vm2468_vm10 = vcmp.ne.s32.totalorder %v2817_v14, 0  ;;  %v2824_v17 = vld [vmem:[%s6194_s14 + $0x78] sm:$0xff]  ;;  %v2829_v18 = vsel %vm2472_vm8, 1.0, %v6104_v7  ;;  %v2830_v19 = vsel %vm2473_vm9, 1.0, %v6104_v7  ;;  %vm2469_vm11 = vcmp.ne.s32.totalorder %v2818_v15, 0  ;;  %v2819_v21 = vld [vmem:[%s6194_s14 + $0x50] sm:$0xff] }
 0x72e   : > { %v2825_v20 = vsel %vm2468_vm10, 1.0, %v6104_v7  ;;  %v2820_v22 = vld [vmem:[%s6194_s14 + $0x58] sm:$0xff]  ;;  %v2938_v23 = vpack.i.bf16 %v2830_v19, %v2829_v18  ;;  %v2826_v0 = vsel %vm2469_vm11, 1.0, %v6104_v7  ;;  %vm2474_vm12 = vcmp.ne.s32.totalorder %v2823_v16, 0  ;;  %v2837_v31 = vld [vmem:[%s6186_s9 + $0x60] sm:$0xff]  ;;  %v2838_v32 = vld [vmem:[%s6186_s9 + $0x68] sm:$0xff]  ;;  %s2593_s14 = scalar_lea.hbm %s7893_s4, %s6183_s7 }
 0x72f   : > { %vm2475_vm13 = vcmp.ne.s32.totalorder %v2824_v17, 0  ;;  %v2927_v24 = vpack.i.bf16 %v2826_v0, %v2825_v20  ;;  %vm2470_vm14 = vcmp.ne.s32.totalorder %v2819_v21, 0  ;;  %vm2471_vm15 = vcmp.ne.s32.totalorder %v2820_v22, 0  ;;  %v2833_v33 = vld [vmem:[%s6186_s9 + $0x40] sm:$0xff]  ;;  %v2834_v34 = vld [vmem:[%s6186_s9 + $0x48] sm:$0xff]  ;;  %v2839_v47 = vld [vmem:[%s6186_s9 + $0x70] sm:$0xff] }
 0x730   : > { %2939 = vperm.xlu1 %2937, %v2938_v23   ;;  %v2831_v25 = vsel %vm2474_vm12, 1.0, %v6104_v7  ;;  %v2832_v26 = vsel %vm2475_vm13, 1.0, %v6104_v7  ;;  %v2827_v27 = vsel %vm2470_vm14, 1.0, %v6104_v7  ;;  %v2828_v28 = vsel %vm2471_vm15, 1.0, %v6104_v7  ;;  %v2512_v37 = vld [vmem:[%s7891_s2 + $0x20] sm:$0xff]  ;;  %v2513_v7 = vld [vmem:[%s7891_s2 + $0x28] sm:$0xff] }
 0x731   : > { %2928 = vperm.xlu0 %2926, %v2927_v24   ;;  %v2943_v29 = vpack.i.bf16 %v2832_v26, %v2831_v25  ;;  %v2932_v30 = vpack.i.bf16 %v2828_v28, %v2827_v27  ;;  %v2504_v35 = vmul.f32 11.313708, %v2837_v31  ;;  %v2505_v36 = vmul.f32 11.313708, %v2838_v32  ;;  %v2508_v40 = vld [vmem:[%s7891_s2] sm:$0xff]  ;;  %v2509_v41 = vld [vmem:[%s7891_s2 + $0x8] sm:$0xff] }
 0x732   : > { %v2500_v38 = vmul.f32 11.313708, %v2833_v33  ;;  %v2501_v39 = vmul.f32 11.313708, %v2834_v34  ;;  %v2840_v48 = vld [vmem:[%s6186_s9 + $0x78] sm:$0xff]  ;;  %v2835_v52 = vld [vmem:[%s6186_s9 + $0x50] sm:$0xff] }
 0x733   : > { %v2520_v42 = vadd.f32 %v2512_v37, %v2504_v35  ;;  %v2521_v43 = vadd.f32 %v2513_v7, %v2505_v36  ;;  %v2836_v53 = vld [vmem:[%s6186_s9 + $0x58] sm:$0xff]  ;;  %v2506_v58 = vmul.f32 11.313708, %v2839_v47  ;;  %v2507_v59 = vmul.f32 11.313708, %v2840_v48  ;;  %v2514_v62 = vld [vmem:[%s7891_s2 + $0x30] sm:$0xff] }
 0x734   : > { %v2516_v45 = vadd.f32 %v2508_v40, %v2500_v38  ;;  %v2517_v46 = vadd.f32 %v2509_v41, %v2501_v39  ;;  %v2515_v63 = vld [vmem:[%s7891_s2 + $0x38] sm:$0xff]  ;;  %v2502_v1 = vmul.f32 11.313708, %v2835_v52  ;;  %v2503_v2 = vmul.f32 11.313708, %v2836_v53  ;;  %v2510_v3 = vld [vmem:[%s7891_s2 + $0x10] sm:$0xff] }
 0x735   : > { %v2511_v4 = vld [vmem:[%s7891_s2 + $0x18] sm:$0xff]  ;;  %v2522_v5 = vadd.f32 %v2514_v62, %v2506_v58  ;;  %v2523_v6 = vadd.f32 %v2515_v63, %v2507_v59  ;;  %s7852_s5 = sshll.u32 %s2593_s14, 4  ;;  %s7908_s7 = sand.u32 1, %s6092_s20   ;;  %s2597_s5 = int_to_ptr.hbm [resolvable:$true] %s7852_s5 }
 0x736   : > { %v2518_v9 = vadd.f32 %v2510_v3, %v2502_v1  ;;  %v2519_v10 = vadd.f32 %v2511_v4, %v2503_v2  ;;  %s2581_s17 = scalar_lea.sflag [#allocation6], %s7908_s7  ;;  %s6046_s8 = sshra.s32 %s2597_s5, 4  ;;  %s6047_s8 = int_to_ptr.hbm [resolvable:$true] %s6046_s8 }
 0x737   : > { %s6048_s13 = scalar_lea.hbm %s6047_s8, 128  ;;  %p6053_p4 = scmp.lt.s32.totalorder %s6047_s8, %s7893_s4 }
 0x738   : > { %2944 = vperm.xlu1 %2937, %v2943_v29   ;;  %p6049_p1 = scmp.ne.s32.totalorder %s6047_s8, %s6048_s13  ;;  %p6054_p7 = scmp.lt.s32.totalorder %s6052_s26, %s6048_s13 }
 0x739   : > { %2933 = vperm.xlu0 %2926, %v2932_v30  }
 0x73a   : > { %p6050_p2 = pnand %p6049_p1, %p6170_p5  ;;  %p6055_p8 = por %p6054_p7, %p6053_p4 }
 0x73c   : > { %p6051_p3 = pneg %p6050_p2 }
 0x73e   : > { %p6056_p9 = pnand %p6055_p8, %p6051_p3 }
 0x7a2   : > { %v2940_v44 = vpop.permute.xlu1 %2939 }
 0x7a3   : > { %v2942_v49 = vunpack.i.h.bf16 %v2940_v44  ;;  %v2941_v50 = vunpack.i.l.bf16 %v2940_v44  ;;  %v2929_v51 = vpop.permute.xlu0 %2928 }
 0x7a4   : > { %v2931_v54 = vunpack.i.h.bf16 %v2929_v51  ;;  %v2930_v55 = vunpack.i.l.bf16 %v2929_v51 }
 0x7a5   : > { %v2569_v56 = vmul.f32 %v2942_v49, %v2521_v43  ;;  %v2568_v57 = vmul.f32 %v2941_v50, %v2520_v42 }
 0x7a6   : > { %v2565_v60 = vmul.f32 %v2931_v54, %v2517_v46  ;;  %v2564_v61 = vmul.f32 %v2930_v55, %v2516_v45 }
 0x7a7   : > { %2846 = vst [vmem:[%s6186_s9 + $0x68] sm:$0xff] %v2569_v56 }
 0x7a8   : > { %2845 = vst [vmem:[%s6186_s9 + $0x60] sm:$0xff] %v2568_v57 }
 0x7a9   : > { %2842 = vst [vmem:[%s6186_s9 + $0x48] sm:$0xff] %v2565_v60 }
 0x7aa   : > { %2841 = vst [vmem:[%s6186_s9 + $0x40] sm:$0xff] %v2564_v61  ;;  %v2945_v8 = vpop.permute.xlu1 %2944 }
 0x7ab   : > { %v2947_v11 = vunpack.i.h.bf16 %v2945_v8  ;;  %v2946_v12 = vunpack.i.l.bf16 %v2945_v8  ;;  %v2934_v13 = vpop.permute.xlu0 %2933 }
 0x7ac   : > { %v2936_v14 = vunpack.i.h.bf16 %v2934_v13  ;;  %v2935_v15 = vunpack.i.l.bf16 %v2934_v13 }
 0x7ad   : > { %v2571_v16 = vmul.f32 %v2947_v11, %v2523_v6  ;;  %v2570_v17 = vmul.f32 %v2946_v12, %v2522_v5 }
 0x7ae   : > { %v2567_v18 = vmul.f32 %v2936_v14, %v2519_v10  ;;  %v2566_v19 = vmul.f32 %v2935_v15, %v2518_v9 }
 0x7af   : > { %2848 = vst [vmem:[%s6186_s9 + $0x78] sm:$0xff] %v2571_v16 }
 0x7b0   : > { %2847 = vst [vmem:[%s6186_s9 + $0x70] sm:$0xff] %v2570_v17 }
 0x7b1   : > { %2844 = vst [vmem:[%s6186_s9 + $0x58] sm:$0xff] %v2567_v18 }
 0x7b2   : > { %2843 = vst [vmem:[%s6186_s9 + $0x50] sm:$0xff] %v2566_v19 }
 0x7b3   : > { %6059 = shalt.err (!%p6056_p9)
}
 0x7b4   : > { %s6105_s9 = smov 128   ;;  %s6106_s16 = smov 8  }
 0x7b5   : > { %2860 = dma.vmem_to_hbm [thread:$0]  (%p6170_p5), %s6189_s10, 2048, %s2597_s5, %s2581_s17, %s6105_s9, %s6105_s9, %s6106_s16  }
 0x7b6 PF: > { %p2866_p10 = scmp.ge.s32.totalorder %s6100_s22, 2  ;;  %s2611_s15 = sand.u32 1, %s6088_s19  }
 0x7b7   : > { %s2612_s23 = scalar_lea.sflag [#allocation6], %s2611_s15 }
 0x7b8   : > { %p2863_p11 = pnand %p2866_p10, %p6174_p6 }
 0x7ba   : > { %p2864_p12 = pneg %p2863_p11 }
 0x7bc   : > { %6083 = dma.done.wait (%p2864_p12), %s2612_s23, 2048  }
 0x7bd   : > { %6085 = vsyncadd (%p2864_p12), %s2612_s23, 4294965248  ;;  %s7909_s11 = sld [smem:[#allocation269_spill]]  ;;  %p22_p13 = scmp.ge.s32.totalorder %s6158_s24, 4  }
 0x7be   : > { %s7910_s19 = smov %s6092_s20  ;;  %s7911_s20 = smov %s6096_s21 }
 0x7bf   : > { %s7913_s22 = smov %s6158_s24  ;;  %24 = sbr.rel (!%p22_p13) target bundleno = 9 (0x9), region = 833 }
 0x7c3   : > { %s7912_s21 = smov %s7909_s11 }
 0x7c4   :  { %2618 = vsyncpa [#allocation6], 1 }
 0x7c5   :  { %2620 = vsyncpa [#allocation6 + $0x1], 1 }
 0x7c6   :  { %2621 = vsyncmov [#allocation2] }
 0x7c9   :  { %s2622_s22 = vpop.sfrf %2621 }
 0x7ca   :  { %p2855_p5 = scmp.ne.s32.totalorder %s2622_s22, 0 }
 0x7cc   :  { %2626 = shalt.err (%p2855_p5)  }
 0x7cd   :  { %2628 = vsyncmov [#allocation2 + $0x1] }
 0x7d0   :  { %s2629_s28 = vpop.sfrf %2628 }
 0x7d1   :  { %p2856_p6 = scmp.ne.s32.totalorder %s2629_s28, 0 }
 0x7d3   :  { %2633 = shalt.err (%p2856_p6)  }

</bundles_post_ra>
